<compile_context>
chip_gen: v6e
topology: v6e:2x2x1
jax: 0.10.0
libtpu: 0.0.40
codegen_flags: <defaults>
</compile_context>

<pallas_src>
import jax
import jax.numpy as jnp
import numpy as np
from jax.experimental import pallas as pl
from jax.experimental.pallas import tpu as pltpu

B = 2
W0 = 100                 # input width
K = 9                    # conv kernel width
C1, C2 = 32, 64          # conv channels
W1_ = W0 - K + 1         # 92  (conv1 out width)
P1_ = (W1_ - 2) // 2 + 1 # 46  (pool1 out width)
W2_ = P1_ - K + 1        # 38  (conv2 out width)
P2_ = (W2_ - 2) // 2 + 1 # 19  (pool2 out width)
FLAT = C2 * P2_          # 1216
H1, H2, NUM_CLASSES = 1024, 512, 12

NPH = W0 // 4            # 25 4-phase rows per batch in the phase input layout
S1 = P1_ // 2            # 23 pooled conv1 positions per parity

TN = 512                 # fc1-column / fc2-row tile width (2 tiles total)
NT = H1 // TN            # 2


def fused_kernel(x_ref, w1_ref, b1_ref, w2_ref, b2_ref,
                 bf1_ref, bf2_ref, wf3_ref, bf3_ref,
                 wf1_hbm, wf2_hbm,
                 o_ref,
                 wf1_v, wf2_v, flat_ref, sem):
    # ---- kick off the big FC-weight DMAs first: contiguous bf16 tile copies
    #      HBM -> VMEM; the whole conv stage below runs in their shadow. ------
    copies = []
    for t in range(NT):
        c_w1 = pltpu.make_async_copy(wf1_hbm.at[t], wf1_v.at[t], sem.at[0, t])
        c_w2 = pltpu.make_async_copy(wf2_hbm.at[t], wf2_v.at[t], sem.at[1, t])
        c_w1.start()
        c_w2.start()
        copies.append((c_w1, c_w2))

    # ------------------------------ conv stage -------------------------------
    # Input layout: xp[t*B + b, r] = x[b, 4t + r]  (4-phase, batch-interleaved).
    xp = x_ref[...]                      # (NPH*B, 4)
    w1 = w1_ref[...]                     # (K, C1)
    w2 = w2_ref[...]                     # (K*C1, C2)
    b1 = b1_ref[...]                     # (1, C1)
    b2 = b2_ref[...]                     # (1, C2)

    # conv1 = 9 shifted outer-product MACs per output phase (VPU only).
    # A[j][s*B + b, c] = y1[b, 4s + j, c]  (pre-bias), s in [0, S1).
    A = []
    for j in range(4):
        acc = jnp.zeros((S1 * B, C1), jnp.float32)
        for k in range(K):
            r = (j + k) % 4
            d = (j + k) // 4
            acc = acc + xp[d * B:d * B + S1 * B, r:r + 1] * w1[k:k + 1, :]
        A.append(acc)

    # pool1 folded into the phase split (ReLU/bias commute with max).
    pe = jnp.maximum(jnp.maximum(A[0], A[1]) + b1, 0.0)   # pooled pos u = 2s
    po = jnp.maximum(jnp.maximum(A[2], A[3]) + b1, 0.0)   # pooled pos u = 2s+1

    # conv2 = sum_k (shifted contiguous slice) @ w2_k, split by output parity
    # so pool2 is an elementwise max.  Rows stay (position, batch)-interleaved,
    # so shifting a position by m is a shift of m*B rows.
    ye = jnp.zeros((P2_ * B, C2), jnp.float32)             # y2 at even positions
    yo = jnp.zeros((P2_ * B, C2), jnp.float32)             # y2 at odd positions
    for k in range(K):
        wk = w2[k * C1:(k + 1) * C1, :]                    # (C1, C2)
        m = k // 2
        if k % 2 == 0:
            ye = ye + jnp.dot(pe[m * B:m * B + P2_ * B, :], wk,
                              preferred_element_type=jnp.float32)
            yo = yo + jnp.dot(po[m * B:m * B + P2_ * B, :], wk,
                              preferred_element_type=jnp.float32)
        else:
            ye = ye + jnp.dot(po[m * B:m * B + P2_ * B, :], wk,
                              preferred_element_type=jnp.float32)
            yo = yo + jnp.dot(pe[(m + 1) * B:(m + 1) * B + P2_ * B, :], wk,
                              preferred_element_type=jnp.float32)
    p2 = jnp.maximum(jnp.maximum(ye, yo) + b2, 0.0)        # (P2_*B, C2), row p*B+b

    # flatten (w-major, matching the repacked wf1): 19 dense (B, 64) stores.
    for p_ in range(P2_):
        flat_ref[:, p_ * C2:(p_ + 1) * C2] = p2[p_ * B:(p_ + 1) * B, :]

    # ------------- FC stage: consume the streamed bf16 weight tiles ----------
    flat_bf = flat_ref[...].astype(jnp.bfloat16)           # (B, FLAT)
    h2 = jnp.zeros((B, H2), jnp.float32)
    for t in range(NT):
        c_w1, c_w2 = copies[t]
        c_w1.wait()
        h1_t = jnp.maximum(
            jnp.dot(flat_bf, wf1_v[t], preferred_element_type=jnp.float32)
            + bf1_ref[:, t * TN:(t + 1) * TN], 0.0)        # (B, TN)
        c_w2.wait()
        h2 = h2 + jnp.dot(h1_t.astype(jnp.bfloat16), wf2_v[t],
                          preferred_element_type=jnp.float32)   # (B, H2)
    h2 = jnp.maximum(h2 + bf2_ref[...], 0.0)
    o_ref[...] = (jnp.dot(h2.astype(jnp.bfloat16), wf3_ref[...],
                          preferred_element_type=jnp.float32)
                  + bf3_ref[...])                          # (B, 12)


@jax.jit
def har_cnn_forward(x_nchw, p):
    assert x_nchw.shape == (B, 1, 1, W0)
    # NCHW (B,1,1,100) -> 4-phase, batch-interleaved layout: pure layout plumbing.
    x_ph = (x_nchw.reshape(B, NPH, 4)
                  .transpose(1, 0, 2)
                  .reshape(NPH * B, 4))

    return pl.pallas_call(
        fused_kernel,
        out_shape=jax.ShapeDtypeStruct((B, NUM_CLASSES), jnp.float32),
        grid_spec=pltpu.PrefetchScalarGridSpec(
            num_scalar_prefetch=0,
            grid=(1,),
            in_specs=[
                pl.BlockSpec((NPH * B, 4), lambda i: (0, 0)),        # x (4-phase)
                pl.BlockSpec((K, C1), lambda i: (0, 0)),             # conv1 w
                pl.BlockSpec((1, C1), lambda i: (0, 0)),             # conv1 b
                pl.BlockSpec((K * C1, C2), lambda i: (0, 0)),        # conv2 w
                pl.BlockSpec((1, C2), lambda i: (0, 0)),             # conv2 b
                pl.BlockSpec((1, H1), lambda i: (0, 0)),             # fc1 b
                pl.BlockSpec((1, H2), lambda i: (0, 0)),             # fc2 b
                pl.BlockSpec((H2, NUM_CLASSES), lambda i: (0, 0)),   # fc3 w (bf16)
                pl.BlockSpec((1, NUM_CLASSES), lambda i: (0, 0)),    # fc3 b
                pl.BlockSpec(memory_space=pl.ANY),                   # fc1 w tiles (HBM, bf16)
                pl.BlockSpec(memory_space=pl.ANY),                   # fc2 w tiles (HBM, bf16)
            ],
            out_specs=pl.BlockSpec((B, NUM_CLASSES), lambda i: (0, 0)),
            scratch_shapes=[
                pltpu.VMEM((NT, FLAT, TN), jnp.bfloat16),    # streamed fc1 weight tiles
                pltpu.VMEM((NT, TN, H2), jnp.bfloat16),      # streamed fc2 weight tiles
                pltpu.VMEM((B, FLAT), jnp.float32),          # flattened features
                pltpu.SemaphoreType.DMA((2, NT)),            # per-tile DMA semaphores
            ],
        ),
        compiler_params=pltpu.CompilerParams(
            dimension_semantics=("arbitrary",),
        ),
    )(x_ph, p["w1"], p["b1"], p["w2"], p["b2"],
      p["bf1"], p["bf2"], p["wf3"], p["bf3"], p["wf1"], p["wf2"])


def init_params(key):
    ks = jax.random.split(key, 10)

    def nrm(k, shape, fan_in, scale=1.0, dtype=jnp.float32):
        w = scale * jax.random.normal(k, shape, jnp.float32) / np.sqrt(fan_in)
        return w.astype(dtype)

    # fc weights in bf16 (f32 accumulation in the kernel).
    wf1 = nrm(ks[4], (FLAT, H1), FLAT, dtype=jnp.bfloat16)   # rows in w-major flatten order
    wf2 = nrm(ks[6], (H1, H2), H1, dtype=jnp.bfloat16)

    return dict(
        w1=nrm(ks[0], (K, C1), K),                  # conv1.weight[oc,0,0,k] -> w1[k,oc]
        b1=nrm(ks[1], (1, C1), 1, 0.1),
        w2=nrm(ks[2], (K * C1, C2), K * C1),        # conv2.weight[oc,c,0,k] -> w2[k*32+c,oc]
        b2=nrm(ks[3], (1, C2), 1, 0.1),
        # fc1 weight stored tile-major (NT, FLAT, TN): each streamed tile is one
        # contiguous DMA (no strided descriptors).
        wf1=jnp.transpose(wf1.reshape(FLAT, NT, TN), (1, 0, 2)),
        bf1=nrm(ks[5], (1, H1), 1, 0.1),
        wf2=wf2.reshape(NT, TN, H2),                # row tiles are already contiguous
        bf2=nrm(ks[7], (1, H2), 1, 0.1),
        wf3=nrm(ks[8], (H2, NUM_CLASSES), H2, dtype=jnp.bfloat16),
        bf3=nrm(ks[9], (1, NUM_CLASSES), 1, 0.1),
    )


def ref_forward(x_nchw, p):
    """Pure-JAX reference with torch-equivalent semantics (f32 math)."""
    b = x_nchw.shape[0]
    x = x_nchw.reshape(b, W0)
    w1 = p["w1"].astype(jnp.float32)
    w2 = p["w2"].astype(jnp.float32)
    patches1 = jnp.stack([x[:, k:k + W1_] for k in range(K)], axis=-1)   # (B,92,9)
    y1 = jnp.maximum(jnp.einsum("bwk,kc->bwc", patches1, w1) + p["b1"], 0.0)
    p1 = jnp.max(y1.reshape(b, P1_, 2, C1), axis=2)                      # (B,46,32)
    patches2 = jnp.concatenate([p1[:, k:k + W2_, :] for k in range(K)],
                               axis=-1)                                  # (B,38,288)
    y2 = jnp.maximum(jnp.einsum("bwi,io->bwo", patches2, w2) + p["b2"], 0.0)
    p2 = jnp.max(y2.reshape(b, P2_, 2, C2), axis=2)                      # (B,19,64)
    # torch.flatten on NCHW (B,64,1,19) is channel-major: flat[b, c*19+p] = p2[b,p,c]
    flat = jnp.transpose(p2, (0, 2, 1)).reshape(b, FLAT)
    # undo the kernel-side repacks of the fc weights
    wf1_wmajor = jnp.transpose(p["wf1"].astype(jnp.float32),
                               (1, 0, 2)).reshape(FLAT, H1)
    wf1_cmajor = wf1_wmajor.reshape(P2_, C2, H1).transpose(1, 0, 2).reshape(FLAT, H1)
    wf2 = p["wf2"].astype(jnp.float32).reshape(H1, H2)
    wf3 = p["wf3"].astype(jnp.float32)
    h1 = jnp.maximum(flat @ wf1_cmajor + p["bf1"], 0.0)
    h2 = jnp.maximum(h1 @ wf2 + p["bf2"], 0.0)
    return h2 @ wf3 + p["bf3"]


if __name__ == "__main__":
    key = jax.random.PRNGKey(0)
    pkey, xkey = jax.random.split(key)
    params = init_params(pkey)
    x = jax.random.normal(xkey, (B, 1, 1, W0), jnp.float32)   # NCHW input

    out = jax.block_until_ready(har_cnn_forward(x, params))
    ref = jax.block_until_ready(ref_forward(x, params))

    assert out.shape == (B, NUM_CLASSES)
    np.testing.assert_allclose(np.asarray(out), np.asarray(ref),
                               rtol=1e-2, atol=1e-2)
    print("KERNEL_OK")
</pallas_src>

<mosaic_0001>
module attributes {stable_mosaic.version = 11 : i64} {
  func.func @fused_kernel(%arg0: i32, %arg1: memref<50x4xf32, #tpu.memory_space<vmem>>, %arg2: memref<9x32xf32, #tpu.memory_space<vmem>>, %arg3: memref<1x32xf32, #tpu.memory_space<vmem>>, %arg4: memref<288x64xf32, #tpu.memory_space<vmem>>, %arg5: memref<1x64xf32, #tpu.memory_space<vmem>>, %arg6: memref<1x1024xf32, #tpu.memory_space<vmem>>, %arg7: memref<1x512xf32, #tpu.memory_space<vmem>>, %arg8: memref<512x12xbf16, #tpu.memory_space<vmem>>, %arg9: memref<1x12xf32, #tpu.memory_space<vmem>>, %arg10: memref<2x1216x512xbf16, #tpu.memory_space<any>>, %arg11: memref<2x512x512xbf16, #tpu.memory_space<any>>, %arg12: memref<2x12xf32, #tpu.memory_space<vmem>>, %arg13: memref<2x1216x512xbf16, #tpu.memory_space<vmem>>, %arg14: memref<2x512x512xbf16, #tpu.memory_space<vmem>>, %arg15: memref<2x1216xf32, #tpu.memory_space<vmem>>, %arg16: memref<2x2x!tpu.dma_semaphore, #tpu.memory_space<semaphore_mem>>) attributes {dimension_semantics = [#tpu.dimension_semantics<arbitrary>], iteration_bounds = array<i64: 1>, scalar_prefetch = 0 : i64, scratch_operands = 4 : i64, tpu.core_type = #tpu.core_type<tc>, window_params = [{pipeline_mode = #tpu.pipeline_mode<synchronous>, transform_indices = @transform_0, window_bounds = array<i64: 50, 4>}, {pipeline_mode = #tpu.pipeline_mode<synchronous>, transform_indices = @transform_1, window_bounds = array<i64: 9, 32>}, {pipeline_mode = #tpu.pipeline_mode<synchronous>, transform_indices = @transform_2, window_bounds = array<i64: 1, 32>}, {pipeline_mode = #tpu.pipeline_mode<synchronous>, transform_indices = @transform_3, window_bounds = array<i64: 288, 64>}, {pipeline_mode = #tpu.pipeline_mode<synchronous>, transform_indices = @transform_4, window_bounds = array<i64: 1, 64>}, {pipeline_mode = #tpu.pipeline_mode<synchronous>, transform_indices = @transform_5, window_bounds = array<i64: 1, 1024>}, {pipeline_mode = #tpu.pipeline_mode<synchronous>, transform_indices = @transform_6, window_bounds = array<i64: 1, 512>}, {pipeline_mode = #tpu.pipeline_mode<synchronous>, transform_indices = @transform_7, window_bounds = array<i64: 512, 12>}, {pipeline_mode = #tpu.pipeline_mode<synchronous>, transform_indices = @transform_8, window_bounds = array<i64: 1, 12>}, {}, {}, {pipeline_mode = #tpu.pipeline_mode<synchronous>, transform_indices = @transform_11, window_bounds = array<i64: 2, 12>}]} {
    %c0_i32 = arith.constant 0 : i32
    %c0_i32_0 = arith.constant 0 : i32
    %c0_i32_1 = arith.constant 0 : i32
    %c0_i32_2 = arith.constant 0 : i32
    %c0_i32_3 = arith.constant 0 : i32
    %c0_i32_4 = arith.constant 0 : i32
    %0 = tpu.memref_slice %arg10[%c0_i32, %c0_i32_3, %c0_i32_4] : memref<2x1216x512xbf16, #tpu.memory_space<any>> -> memref<1x1216x512xbf16, #tpu.memory_space<any>>
    %1 = tpu.memref_squeeze %0 : memref<1x1216x512xbf16, #tpu.memory_space<any>> -> memref<1216x512xbf16, #tpu.memory_space<any>>
    %c0_i32_5 = arith.constant 0 : i32
    %c0_i32_6 = arith.constant 0 : i32
    %2 = tpu.memref_slice %arg13[%c0_i32_0, %c0_i32_5, %c0_i32_6] : memref<2x1216x512xbf16, #tpu.memory_space<vmem>> -> memref<1x1216x512xbf16, #tpu.memory_space<vmem>>
    %3 = tpu.memref_squeeze %2 : memref<1x1216x512xbf16, #tpu.memory_space<vmem>> -> memref<1216x512xbf16, #tpu.memory_space<vmem>>
    %4 = tpu.memref_slice %arg16[%c0_i32_1, %c0_i32_2] : memref<2x2x!tpu.dma_semaphore, #tpu.memory_space<semaphore_mem>> -> memref<1x1x!tpu.dma_semaphore, #tpu.memory_space<semaphore_mem>>
    %5 = tpu.memref_squeeze %4 : memref<1x1x!tpu.dma_semaphore, #tpu.memory_space<semaphore_mem>> -> memref<!tpu.dma_semaphore, #tpu.memory_space<semaphore_mem>>
    tpu.enqueue_dma source(%1 : memref<1216x512xbf16, #tpu.memory_space<any>>) target(%3 : memref<1216x512xbf16, #tpu.memory_space<vmem>>) target_semaphore(%5 : memref<!tpu.dma_semaphore, #tpu.memory_space<semaphore_mem>>)
    %c0_i32_7 = arith.constant 0 : i32
    %c0_i32_8 = arith.constant 0 : i32
    %c1_i32 = arith.constant 1 : i32
    %c0_i32_9 = arith.constant 0 : i32
    %c0_i32_10 = arith.constant 0 : i32
    %c0_i32_11 = arith.constant 0 : i32
    %6 = tpu.memref_slice %arg11[%c0_i32_7, %c0_i32_10, %c0_i32_11] : memref<2x512x512xbf16, #tpu.memory_space<any>> -> memref<1x512x512xbf16, #tpu.memory_space<any>>
    %7 = tpu.memref_squeeze %6 : memref<1x512x512xbf16, #tpu.memory_space<any>> -> memref<512x512xbf16, #tpu.memory_space<any>>
    %c0_i32_12 = arith.constant 0 : i32
    %c0_i32_13 = arith.constant 0 : i32
    %8 = tpu.memref_slice %arg14[%c0_i32_8, %c0_i32_12, %c0_i32_13] : memref<2x512x512xbf16, #tpu.memory_space<vmem>> -> memref<1x512x512xbf16, #tpu.memory_space<vmem>>
    %9 = tpu.memref_squeeze %8 : memref<1x512x512xbf16, #tpu.memory_space<vmem>> -> memref<512x512xbf16, #tpu.memory_space<vmem>>
    %10 = tpu.memref_slice %arg16[%c1_i32, %c0_i32_9] : memref<2x2x!tpu.dma_semaphore, #tpu.memory_space<semaphore_mem>> -> memref<1x1x!tpu.dma_semaphore, #tpu.memory_space<semaphore_mem>>
    %11 = tpu.memref_squeeze %10 : memref<1x1x!tpu.dma_semaphore, #tpu.memory_space<semaphore_mem>> -> memref<!tpu.dma_semaphore, #tpu.memory_space<semaphore_mem>>
    tpu.enqueue_dma source(%7 : memref<512x512xbf16, #tpu.memory_space<any>>) target(%9 : memref<512x512xbf16, #tpu.memory_space<vmem>>) target_semaphore(%11 : memref<!tpu.dma_semaphore, #tpu.memory_space<semaphore_mem>>)
    %c1_i32_14 = arith.constant 1 : i32
    %c1_i32_15 = arith.constant 1 : i32
    %c0_i32_16 = arith.constant 0 : i32
    %c1_i32_17 = arith.constant 1 : i32
    %c0_i32_18 = arith.constant 0 : i32
    %c0_i32_19 = arith.constant 0 : i32
    %12 = tpu.memref_slice %arg10[%c1_i32_14, %c0_i32_18, %c0_i32_19] : memref<2x1216x512xbf16, #tpu.memory_space<any>> -> memref<1x1216x512xbf16, #tpu.memory_space<any>>
    %13 = tpu.memref_squeeze %12 : memref<1x1216x512xbf16, #tpu.memory_space<any>> -> memref<1216x512xbf16, #tpu.memory_space<any>>
    %c0_i32_20 = arith.constant 0 : i32
    %c0_i32_21 = arith.constant 0 : i32
    %14 = tpu.memref_slice %arg13[%c1_i32_15, %c0_i32_20, %c0_i32_21] : memref<2x1216x512xbf16, #tpu.memory_space<vmem>> -> memref<1x1216x512xbf16, #tpu.memory_space<vmem>>
    %15 = tpu.memref_squeeze %14 : memref<1x1216x512xbf16, #tpu.memory_space<vmem>> -> memref<1216x512xbf16, #tpu.memory_space<vmem>>
    %16 = tpu.memref_slice %arg16[%c0_i32_16, %c1_i32_17] : memref<2x2x!tpu.dma_semaphore, #tpu.memory_space<semaphore_mem>> -> memref<1x1x!tpu.dma_semaphore, #tpu.memory_space<semaphore_mem>>
    %17 = tpu.memref_squeeze %16 : memref<1x1x!tpu.dma_semaphore, #tpu.memory_space<semaphore_mem>> -> memref<!tpu.dma_semaphore, #tpu.memory_space<semaphore_mem>>
    tpu.enqueue_dma source(%13 : memref<1216x512xbf16, #tpu.memory_space<any>>) target(%15 : memref<1216x512xbf16, #tpu.memory_space<vmem>>) target_semaphore(%17 : memref<!tpu.dma_semaphore, #tpu.memory_space<semaphore_mem>>)
    %c1_i32_22 = arith.constant 1 : i32
    %c1_i32_23 = arith.constant 1 : i32
    %c1_i32_24 = arith.constant 1 : i32
    %c1_i32_25 = arith.constant 1 : i32
    %c0_i32_26 = arith.constant 0 : i32
    %c0_i32_27 = arith.constant 0 : i32
    %18 = tpu.memref_slice %arg11[%c1_i32_22, %c0_i32_26, %c0_i32_27] : memref<2x512x512xbf16, #tpu.memory_space<any>> -> memref<1x512x512xbf16, #tpu.memory_space<any>>
    %19 = tpu.memref_squeeze %18 : memref<1x512x512xbf16, #tpu.memory_space<any>> -> memref<512x512xbf16, #tpu.memory_space<any>>
    %c0_i32_28 = arith.constant 0 : i32
    %c0_i32_29 = arith.constant 0 : i32
    %20 = tpu.memref_slice %arg14[%c1_i32_23, %c0_i32_28, %c0_i32_29] : memref<2x512x512xbf16, #tpu.memory_space<vmem>> -> memref<1x512x512xbf16, #tpu.memory_space<vmem>>
    %21 = tpu.memref_squeeze %20 : memref<1x512x512xbf16, #tpu.memory_space<vmem>> -> memref<512x512xbf16, #tpu.memory_space<vmem>>
    %22 = tpu.memref_slice %arg16[%c1_i32_24, %c1_i32_25] : memref<2x2x!tpu.dma_semaphore, #tpu.memory_space<semaphore_mem>> -> memref<1x1x!tpu.dma_semaphore, #tpu.memory_space<semaphore_mem>>
    %23 = tpu.memref_squeeze %22 : memref<1x1x!tpu.dma_semaphore, #tpu.memory_space<semaphore_mem>> -> memref<!tpu.dma_semaphore, #tpu.memory_space<semaphore_mem>>
    tpu.enqueue_dma source(%19 : memref<512x512xbf16, #tpu.memory_space<any>>) target(%21 : memref<512x512xbf16, #tpu.memory_space<vmem>>) target_semaphore(%23 : memref<!tpu.dma_semaphore, #tpu.memory_space<semaphore_mem>>)
    %c0 = arith.constant 0 : index
    %c0_30 = arith.constant 0 : index
    %24 = vector.load %arg1[%c0, %c0_30] : memref<50x4xf32, #tpu.memory_space<vmem>>, vector<50x4xf32>
    %c0_31 = arith.constant 0 : index
    %c0_32 = arith.constant 0 : index
    %25 = vector.load %arg2[%c0_31, %c0_32] : memref<9x32xf32, #tpu.memory_space<vmem>>, vector<9x32xf32>
    %c0_33 = arith.constant 0 : index
    %c0_34 = arith.constant 0 : index
    %26 = vector.load %arg4[%c0_33, %c0_34] : memref<288x64xf32, #tpu.memory_space<vmem>>, vector<288x64xf32>
    %c0_35 = arith.constant 0 : index
    %c0_36 = arith.constant 0 : index
    %27 = vector.load %arg3[%c0_35, %c0_36] : memref<1x32xf32, #tpu.memory_space<vmem>>, vector<1x32xf32>
    %c0_37 = arith.constant 0 : index
    %c0_38 = arith.constant 0 : index
    %28 = vector.load %arg5[%c0_37, %c0_38] : memref<1x64xf32, #tpu.memory_space<vmem>>, vector<1x64xf32>
    %cst = arith.constant 0.000000e+00 : f32
    %29 = vector.broadcast %cst : f32 to vector<46x32xf32>
    %30 = vector.extract_strided_slice %24 {offsets = [0, 0], sizes = [46, 1], strides = [1, 1]} : vector<50x4xf32> to vector<46x1xf32>
    %31 = vector.extract_strided_slice %25 {offsets = [0, 0], sizes = [1, 32], strides = [1, 1]} : vector<9x32xf32> to vector<1x32xf32>
    %32 = vector.broadcast %30 : vector<46x1xf32> to vector<46x32xf32>
    %33 = vector.broadcast %31 : vector<1x32xf32> to vector<46x32xf32>
    %34 = arith.mulf %32, %33 : vector<46x32xf32>
    %35 = arith.addf %29, %34 : vector<46x32xf32>
    %36 = vector.extract_strided_slice %24 {offsets = [0, 1], sizes = [46, 1], strides = [1, 1]} : vector<50x4xf32> to vector<46x1xf32>
    %37 = vector.extract_strided_slice %25 {offsets = [1, 0], sizes = [1, 32], strides = [1, 1]} : vector<9x32xf32> to vector<1x32xf32>
    %38 = vector.broadcast %36 : vector<46x1xf32> to vector<46x32xf32>
    %39 = vector.broadcast %37 : vector<1x32xf32> to vector<46x32xf32>
    %40 = arith.mulf %38, %39 : vector<46x32xf32>
    %41 = arith.addf %35, %40 : vector<46x32xf32>
    %42 = vector.extract_strided_slice %24 {offsets = [0, 2], sizes = [46, 1], strides = [1, 1]} : vector<50x4xf32> to vector<46x1xf32>
    %43 = vector.extract_strided_slice %25 {offsets = [2, 0], sizes = [1, 32], strides = [1, 1]} : vector<9x32xf32> to vector<1x32xf32>
    %44 = vector.broadcast %42 : vector<46x1xf32> to vector<46x32xf32>
    %45 = vector.broadcast %43 : vector<1x32xf32> to vector<46x32xf32>
    %46 = arith.mulf %44, %45 : vector<46x32xf32>
    %47 = arith.addf %41, %46 : vector<46x32xf32>
    %48 = vector.extract_strided_slice %24 {offsets = [0, 3], sizes = [46, 1], strides = [1, 1]} : vector<50x4xf32> to vector<46x1xf32>
    %49 = vector.extract_strided_slice %25 {offsets = [3, 0], sizes = [1, 32], strides = [1, 1]} : vector<9x32xf32> to vector<1x32xf32>
    %50 = vector.broadcast %48 : vector<46x1xf32> to vector<46x32xf32>
    %51 = vector.broadcast %49 : vector<1x32xf32> to vector<46x32xf32>
    %52 = arith.mulf %50, %51 : vector<46x32xf32>
    %53 = arith.addf %47, %52 : vector<46x32xf32>
    %54 = vector.extract_strided_slice %24 {offsets = [2, 0], sizes = [46, 1], strides = [1, 1]} : vector<50x4xf32> to vector<46x1xf32>
    %55 = vector.extract_strided_slice %25 {offsets = [4, 0], sizes = [1, 32], strides = [1, 1]} : vector<9x32xf32> to vector<1x32xf32>
    %56 = vector.broadcast %54 : vector<46x1xf32> to vector<46x32xf32>
    %57 = vector.broadcast %55 : vector<1x32xf32> to vector<46x32xf32>
    %58 = arith.mulf %56, %57 : vector<46x32xf32>
    %59 = arith.addf %53, %58 : vector<46x32xf32>
    %60 = vector.extract_strided_slice %24 {offsets = [2, 1], sizes = [46, 1], strides = [1, 1]} : vector<50x4xf32> to vector<46x1xf32>
    %61 = vector.extract_strided_slice %25 {offsets = [5, 0], sizes = [1, 32], strides = [1, 1]} : vector<9x32xf32> to vector<1x32xf32>
    %62 = vector.broadcast %60 : vector<46x1xf32> to vector<46x32xf32>
    %63 = vector.broadcast %61 : vector<1x32xf32> to vector<46x32xf32>
    %64 = arith.mulf %62, %63 : vector<46x32xf32>
    %65 = arith.addf %59, %64 : vector<46x32xf32>
    %66 = vector.extract_strided_slice %24 {offsets = [2, 2], sizes = [46, 1], strides = [1, 1]} : vector<50x4xf32> to vector<46x1xf32>
    %67 = vector.extract_strided_slice %25 {offsets = [6, 0], sizes = [1, 32], strides = [1, 1]} : vector<9x32xf32> to vector<1x32xf32>
    %68 = vector.broadcast %66 : vector<46x1xf32> to vector<46x32xf32>
    %69 = vector.broadcast %67 : vector<1x32xf32> to vector<46x32xf32>
    %70 = arith.mulf %68, %69 : vector<46x32xf32>
    %71 = arith.addf %65, %70 : vector<46x32xf32>
    %72 = vector.extract_strided_slice %24 {offsets = [2, 3], sizes = [46, 1], strides = [1, 1]} : vector<50x4xf32> to vector<46x1xf32>
    %73 = vector.extract_strided_slice %25 {offsets = [7, 0], sizes = [1, 32], strides = [1, 1]} : vector<9x32xf32> to vector<1x32xf32>
    %74 = vector.broadcast %72 : vector<46x1xf32> to vector<46x32xf32>
    %75 = vector.broadcast %73 : vector<1x32xf32> to vector<46x32xf32>
    %76 = arith.mulf %74, %75 : vector<46x32xf32>
    %77 = arith.addf %71, %76 : vector<46x32xf32>
    %78 = vector.extract_strided_slice %24 {offsets = [4, 0], sizes = [46, 1], strides = [1, 1]} : vector<50x4xf32> to vector<46x1xf32>
    %79 = vector.extract_strided_slice %25 {offsets = [8, 0], sizes = [1, 32], strides = [1, 1]} : vector<9x32xf32> to vector<1x32xf32>
    %80 = vector.broadcast %78 : vector<46x1xf32> to vector<46x32xf32>
    %81 = vector.broadcast %79 : vector<1x32xf32> to vector<46x32xf32>
    %82 = arith.mulf %80, %81 : vector<46x32xf32>
    %83 = arith.addf %77, %82 : vector<46x32xf32>
    %cst_39 = arith.constant 0.000000e+00 : f32
    %84 = vector.broadcast %cst_39 : f32 to vector<46x32xf32>
    %85 = vector.extract_strided_slice %24 {offsets = [0, 1], sizes = [46, 1], strides = [1, 1]} : vector<50x4xf32> to vector<46x1xf32>
    %86 = vector.extract_strided_slice %25 {offsets = [0, 0], sizes = [1, 32], strides = [1, 1]} : vector<9x32xf32> to vector<1x32xf32>
    %87 = vector.broadcast %85 : vector<46x1xf32> to vector<46x32xf32>
    %88 = vector.broadcast %86 : vector<1x32xf32> to vector<46x32xf32>
    %89 = arith.mulf %87, %88 : vector<46x32xf32>
    %90 = arith.addf %84, %89 : vector<46x32xf32>
    %91 = vector.extract_strided_slice %24 {offsets = [0, 2], sizes = [46, 1], strides = [1, 1]} : vector<50x4xf32> to vector<46x1xf32>
    %92 = vector.extract_strided_slice %25 {offsets = [1, 0], sizes = [1, 32], strides = [1, 1]} : vector<9x32xf32> to vector<1x32xf32>
    %93 = vector.broadcast %91 : vector<46x1xf32> to vector<46x32xf32>
    %94 = vector.broadcast %92 : vector<1x32xf32> to vector<46x32xf32>
    %95 = arith.mulf %93, %94 : vector<46x32xf32>
    %96 = arith.addf %90, %95 : vector<46x32xf32>
    %97 = vector.extract_strided_slice %24 {offsets = [0, 3], sizes = [46, 1], strides = [1, 1]} : vector<50x4xf32> to vector<46x1xf32>
    %98 = vector.extract_strided_slice %25 {offsets = [2, 0], sizes = [1, 32], strides = [1, 1]} : vector<9x32xf32> to vector<1x32xf32>
    %99 = vector.broadcast %97 : vector<46x1xf32> to vector<46x32xf32>
    %100 = vector.broadcast %98 : vector<1x32xf32> to vector<46x32xf32>
    %101 = arith.mulf %99, %100 : vector<46x32xf32>
    %102 = arith.addf %96, %101 : vector<46x32xf32>
    %103 = vector.extract_strided_slice %24 {offsets = [2, 0], sizes = [46, 1], strides = [1, 1]} : vector<50x4xf32> to vector<46x1xf32>
    %104 = vector.extract_strided_slice %25 {offsets = [3, 0], sizes = [1, 32], strides = [1, 1]} : vector<9x32xf32> to vector<1x32xf32>
    %105 = vector.broadcast %103 : vector<46x1xf32> to vector<46x32xf32>
    %106 = vector.broadcast %104 : vector<1x32xf32> to vector<46x32xf32>
    %107 = arith.mulf %105, %106 : vector<46x32xf32>
    %108 = arith.addf %102, %107 : vector<46x32xf32>
    %109 = vector.extract_strided_slice %24 {offsets = [2, 1], sizes = [46, 1], strides = [1, 1]} : vector<50x4xf32> to vector<46x1xf32>
    %110 = vector.extract_strided_slice %25 {offsets = [4, 0], sizes = [1, 32], strides = [1, 1]} : vector<9x32xf32> to vector<1x32xf32>
    %111 = vector.broadcast %109 : vector<46x1xf32> to vector<46x32xf32>
    %112 = vector.broadcast %110 : vector<1x32xf32> to vector<46x32xf32>
    %113 = arith.mulf %111, %112 : vector<46x32xf32>
    %114 = arith.addf %108, %113 : vector<46x32xf32>
    %115 = vector.extract_strided_slice %24 {offsets = [2, 2], sizes = [46, 1], strides = [1, 1]} : vector<50x4xf32> to vector<46x1xf32>
    %116 = vector.extract_strided_slice %25 {offsets = [5, 0], sizes = [1, 32], strides = [1, 1]} : vector<9x32xf32> to vector<1x32xf32>
    %117 = vector.broadcast %115 : vector<46x1xf32> to vector<46x32xf32>
    %118 = vector.broadcast %116 : vector<1x32xf32> to vector<46x32xf32>
    %119 = arith.mulf %117, %118 : vector<46x32xf32>
    %120 = arith.addf %114, %119 : vector<46x32xf32>
    %121 = vector.extract_strided_slice %24 {offsets = [2, 3], sizes = [46, 1], strides = [1, 1]} : vector<50x4xf32> to vector<46x1xf32>
    %122 = vector.extract_strided_slice %25 {offsets = [6, 0], sizes = [1, 32], strides = [1, 1]} : vector<9x32xf32> to vector<1x32xf32>
    %123 = vector.broadcast %121 : vector<46x1xf32> to vector<46x32xf32>
    %124 = vector.broadcast %122 : vector<1x32xf32> to vector<46x32xf32>
    %125 = arith.mulf %123, %124 : vector<46x32xf32>
    %126 = arith.addf %120, %125 : vector<46x32xf32>
    %127 = vector.extract_strided_slice %24 {offsets = [4, 0], sizes = [46, 1], strides = [1, 1]} : vector<50x4xf32> to vector<46x1xf32>
    %128 = vector.extract_strided_slice %25 {offsets = [7, 0], sizes = [1, 32], strides = [1, 1]} : vector<9x32xf32> to vector<1x32xf32>
    %129 = vector.broadcast %127 : vector<46x1xf32> to vector<46x32xf32>
    %130 = vector.broadcast %128 : vector<1x32xf32> to vector<46x32xf32>
    %131 = arith.mulf %129, %130 : vector<46x32xf32>
    %132 = arith.addf %126, %131 : vector<46x32xf32>
    %133 = vector.extract_strided_slice %24 {offsets = [4, 1], sizes = [46, 1], strides = [1, 1]} : vector<50x4xf32> to vector<46x1xf32>
    %134 = vector.extract_strided_slice %25 {offsets = [8, 0], sizes = [1, 32], strides = [1, 1]} : vector<9x32xf32> to vector<1x32xf32>
    %135 = vector.broadcast %133 : vector<46x1xf32> to vector<46x32xf32>
    %136 = vector.broadcast %134 : vector<1x32xf32> to vector<46x32xf32>
    %137 = arith.mulf %135, %136 : vector<46x32xf32>
    %138 = arith.addf %132, %137 : vector<46x32xf32>
    %cst_40 = arith.constant 0.000000e+00 : f32
    %139 = vector.broadcast %cst_40 : f32 to vector<46x32xf32>
    %140 = vector.extract_strided_slice %24 {offsets = [0, 2], sizes = [46, 1], strides = [1, 1]} : vector<50x4xf32> to vector<46x1xf32>
    %141 = vector.extract_strided_slice %25 {offsets = [0, 0], sizes = [1, 32], strides = [1, 1]} : vector<9x32xf32> to vector<1x32xf32>
    %142 = vector.broadcast %140 : vector<46x1xf32> to vector<46x32xf32>
    %143 = vector.broadcast %141 : vector<1x32xf32> to vector<46x32xf32>
    %144 = arith.mulf %142, %143 : vector<46x32xf32>
    %145 = arith.addf %139, %144 : vector<46x32xf32>
    %146 = vector.extract_strided_slice %24 {offsets = [0, 3], sizes = [46, 1], strides = [1, 1]} : vector<50x4xf32> to vector<46x1xf32>
    %147 = vector.extract_strided_slice %25 {offsets = [1, 0], sizes = [1, 32], strides = [1, 1]} : vector<9x32xf32> to vector<1x32xf32>
    %148 = vector.broadcast %146 : vector<46x1xf32> to vector<46x32xf32>
    %149 = vector.broadcast %147 : vector<1x32xf32> to vector<46x32xf32>
    %150 = arith.mulf %148, %149 : vector<46x32xf32>
    %151 = arith.addf %145, %150 : vector<46x32xf32>
    %152 = vector.extract_strided_slice %24 {offsets = [2, 0], sizes = [46, 1], strides = [1, 1]} : vector<50x4xf32> to vector<46x1xf32>
    %153 = vector.extract_strided_slice %25 {offsets = [2, 0], sizes = [1, 32], strides = [1, 1]} : vector<9x32xf32> to vector<1x32xf32>
    %154 = vector.broadcast %152 : vector<46x1xf32> to vector<46x32xf32>
    %155 = vector.broadcast %153 : vector<1x32xf32> to vector<46x32xf32>
    %156 = arith.mulf %154, %155 : vector<46x32xf32>
    %157 = arith.addf %151, %156 : vector<46x32xf32>
    %158 = vector.extract_strided_slice %24 {offsets = [2, 1], sizes = [46, 1], strides = [1, 1]} : vector<50x4xf32> to vector<46x1xf32>
    %159 = vector.extract_strided_slice %25 {offsets = [3, 0], sizes = [1, 32], strides = [1, 1]} : vector<9x32xf32> to vector<1x32xf32>
    %160 = vector.broadcast %158 : vector<46x1xf32> to vector<46x32xf32>
    %161 = vector.broadcast %159 : vector<1x32xf32> to vector<46x32xf32>
    %162 = arith.mulf %160, %161 : vector<46x32xf32>
    %163 = arith.addf %157, %162 : vector<46x32xf32>
    %164 = vector.extract_strided_slice %24 {offsets = [2, 2], sizes = [46, 1], strides = [1, 1]} : vector<50x4xf32> to vector<46x1xf32>
    %165 = vector.extract_strided_slice %25 {offsets = [4, 0], sizes = [1, 32], strides = [1, 1]} : vector<9x32xf32> to vector<1x32xf32>
    %166 = vector.broadcast %164 : vector<46x1xf32> to vector<46x32xf32>
    %167 = vector.broadcast %165 : vector<1x32xf32> to vector<46x32xf32>
    %168 = arith.mulf %166, %167 : vector<46x32xf32>
    %169 = arith.addf %163, %168 : vector<46x32xf32>
    %170 = vector.extract_strided_slice %24 {offsets = [2, 3], sizes = [46, 1], strides = [1, 1]} : vector<50x4xf32> to vector<46x1xf32>
    %171 = vector.extract_strided_slice %25 {offsets = [5, 0], sizes = [1, 32], strides = [1, 1]} : vector<9x32xf32> to vector<1x32xf32>
    %172 = vector.broadcast %170 : vector<46x1xf32> to vector<46x32xf32>
    %173 = vector.broadcast %171 : vector<1x32xf32> to vector<46x32xf32>
    %174 = arith.mulf %172, %173 : vector<46x32xf32>
    %175 = arith.addf %169, %174 : vector<46x32xf32>
    %176 = vector.extract_strided_slice %24 {offsets = [4, 0], sizes = [46, 1], strides = [1, 1]} : vector<50x4xf32> to vector<46x1xf32>
    %177 = vector.extract_strided_slice %25 {offsets = [6, 0], sizes = [1, 32], strides = [1, 1]} : vector<9x32xf32> to vector<1x32xf32>
    %178 = vector.broadcast %176 : vector<46x1xf32> to vector<46x32xf32>
    %179 = vector.broadcast %177 : vector<1x32xf32> to vector<46x32xf32>
    %180 = arith.mulf %178, %179 : vector<46x32xf32>
    %181 = arith.addf %175, %180 : vector<46x32xf32>
    %182 = vector.extract_strided_slice %24 {offsets = [4, 1], sizes = [46, 1], strides = [1, 1]} : vector<50x4xf32> to vector<46x1xf32>
    %183 = vector.extract_strided_slice %25 {offsets = [7, 0], sizes = [1, 32], strides = [1, 1]} : vector<9x32xf32> to vector<1x32xf32>
    %184 = vector.broadcast %182 : vector<46x1xf32> to vector<46x32xf32>
    %185 = vector.broadcast %183 : vector<1x32xf32> to vector<46x32xf32>
    %186 = arith.mulf %184, %185 : vector<46x32xf32>
    %187 = arith.addf %181, %186 : vector<46x32xf32>
    %188 = vector.extract_strided_slice %24 {offsets = [4, 2], sizes = [46, 1], strides = [1, 1]} : vector<50x4xf32> to vector<46x1xf32>
    %189 = vector.extract_strided_slice %25 {offsets = [8, 0], sizes = [1, 32], strides = [1, 1]} : vector<9x32xf32> to vector<1x32xf32>
    %190 = vector.broadcast %188 : vector<46x1xf32> to vector<46x32xf32>
    %191 = vector.broadcast %189 : vector<1x32xf32> to vector<46x32xf32>
    %192 = arith.mulf %190, %191 : vector<46x32xf32>
    %193 = arith.addf %187, %192 : vector<46x32xf32>
    %cst_41 = arith.constant 0.000000e+00 : f32
    %194 = vector.broadcast %cst_41 : f32 to vector<46x32xf32>
    %195 = vector.extract_strided_slice %24 {offsets = [0, 3], sizes = [46, 1], strides = [1, 1]} : vector<50x4xf32> to vector<46x1xf32>
    %196 = vector.extract_strided_slice %25 {offsets = [0, 0], sizes = [1, 32], strides = [1, 1]} : vector<9x32xf32> to vector<1x32xf32>
    %197 = vector.broadcast %195 : vector<46x1xf32> to vector<46x32xf32>
    %198 = vector.broadcast %196 : vector<1x32xf32> to vector<46x32xf32>
    %199 = arith.mulf %197, %198 : vector<46x32xf32>
    %200 = arith.addf %194, %199 : vector<46x32xf32>
    %201 = vector.extract_strided_slice %24 {offsets = [2, 0], sizes = [46, 1], strides = [1, 1]} : vector<50x4xf32> to vector<46x1xf32>
    %202 = vector.extract_strided_slice %25 {offsets = [1, 0], sizes = [1, 32], strides = [1, 1]} : vector<9x32xf32> to vector<1x32xf32>
    %203 = vector.broadcast %201 : vector<46x1xf32> to vector<46x32xf32>
    %204 = vector.broadcast %202 : vector<1x32xf32> to vector<46x32xf32>
    %205 = arith.mulf %203, %204 : vector<46x32xf32>
    %206 = arith.addf %200, %205 : vector<46x32xf32>
    %207 = vector.extract_strided_slice %24 {offsets = [2, 1], sizes = [46, 1], strides = [1, 1]} : vector<50x4xf32> to vector<46x1xf32>
    %208 = vector.extract_strided_slice %25 {offsets = [2, 0], sizes = [1, 32], strides = [1, 1]} : vector<9x32xf32> to vector<1x32xf32>
    %209 = vector.broadcast %207 : vector<46x1xf32> to vector<46x32xf32>
    %210 = vector.broadcast %208 : vector<1x32xf32> to vector<46x32xf32>
    %211 = arith.mulf %209, %210 : vector<46x32xf32>
    %212 = arith.addf %206, %211 : vector<46x32xf32>
    %213 = vector.extract_strided_slice %24 {offsets = [2, 2], sizes = [46, 1], strides = [1, 1]} : vector<50x4xf32> to vector<46x1xf32>
    %214 = vector.extract_strided_slice %25 {offsets = [3, 0], sizes = [1, 32], strides = [1, 1]} : vector<9x32xf32> to vector<1x32xf32>
    %215 = vector.broadcast %213 : vector<46x1xf32> to vector<46x32xf32>
    %216 = vector.broadcast %214 : vector<1x32xf32> to vector<46x32xf32>
    %217 = arith.mulf %215, %216 : vector<46x32xf32>
    %218 = arith.addf %212, %217 : vector<46x32xf32>
    %219 = vector.extract_strided_slice %24 {offsets = [2, 3], sizes = [46, 1], strides = [1, 1]} : vector<50x4xf32> to vector<46x1xf32>
    %220 = vector.extract_strided_slice %25 {offsets = [4, 0], sizes = [1, 32], strides = [1, 1]} : vector<9x32xf32> to vector<1x32xf32>
    %221 = vector.broadcast %219 : vector<46x1xf32> to vector<46x32xf32>
    %222 = vector.broadcast %220 : vector<1x32xf32> to vector<46x32xf32>
    %223 = arith.mulf %221, %222 : vector<46x32xf32>
    %224 = arith.addf %218, %223 : vector<46x32xf32>
    %225 = vector.extract_strided_slice %24 {offsets = [4, 0], sizes = [46, 1], strides = [1, 1]} : vector<50x4xf32> to vector<46x1xf32>
    %226 = vector.extract_strided_slice %25 {offsets = [5, 0], sizes = [1, 32], strides = [1, 1]} : vector<9x32xf32> to vector<1x32xf32>
    %227 = vector.broadcast %225 : vector<46x1xf32> to vector<46x32xf32>
    %228 = vector.broadcast %226 : vector<1x32xf32> to vector<46x32xf32>
    %229 = arith.mulf %227, %228 : vector<46x32xf32>
    %230 = arith.addf %224, %229 : vector<46x32xf32>
    %231 = vector.extract_strided_slice %24 {offsets = [4, 1], sizes = [46, 1], strides = [1, 1]} : vector<50x4xf32> to vector<46x1xf32>
    %232 = vector.extract_strided_slice %25 {offsets = [6, 0], sizes = [1, 32], strides = [1, 1]} : vector<9x32xf32> to vector<1x32xf32>
    %233 = vector.broadcast %231 : vector<46x1xf32> to vector<46x32xf32>
    %234 = vector.broadcast %232 : vector<1x32xf32> to vector<46x32xf32>
    %235 = arith.mulf %233, %234 : vector<46x32xf32>
    %236 = arith.addf %230, %235 : vector<46x32xf32>
    %237 = vector.extract_strided_slice %24 {offsets = [4, 2], sizes = [46, 1], strides = [1, 1]} : vector<50x4xf32> to vector<46x1xf32>
    %238 = vector.extract_strided_slice %25 {offsets = [7, 0], sizes = [1, 32], strides = [1, 1]} : vector<9x32xf32> to vector<1x32xf32>
    %239 = vector.broadcast %237 : vector<46x1xf32> to vector<46x32xf32>
    %240 = vector.broadcast %238 : vector<1x32xf32> to vector<46x32xf32>
    %241 = arith.mulf %239, %240 : vector<46x32xf32>
    %242 = arith.addf %236, %241 : vector<46x32xf32>
    %243 = vector.extract_strided_slice %24 {offsets = [4, 3], sizes = [46, 1], strides = [1, 1]} : vector<50x4xf32> to vector<46x1xf32>
    %244 = vector.extract_strided_slice %25 {offsets = [8, 0], sizes = [1, 32], strides = [1, 1]} : vector<9x32xf32> to vector<1x32xf32>
    %245 = vector.broadcast %243 : vector<46x1xf32> to vector<46x32xf32>
    %246 = vector.broadcast %244 : vector<1x32xf32> to vector<46x32xf32>
    %247 = arith.mulf %245, %246 : vector<46x32xf32>
    %248 = arith.addf %242, %247 : vector<46x32xf32>
    %249 = arith.maximumf %83, %138 : vector<46x32xf32>
    %250 = vector.broadcast %27 : vector<1x32xf32> to vector<46x32xf32>
    %251 = arith.addf %249, %250 : vector<46x32xf32>
    %cst_42 = arith.constant 0.000000e+00 : f32
    %252 = vector.broadcast %cst_42 : f32 to vector<46x32xf32>
    %253 = arith.maximumf %251, %252 : vector<46x32xf32>
    %254 = arith.maximumf %193, %248 : vector<46x32xf32>
    %255 = vector.broadcast %27 : vector<1x32xf32> to vector<46x32xf32>
    %256 = arith.addf %254, %255 : vector<46x32xf32>
    %cst_43 = arith.constant 0.000000e+00 : f32
    %257 = vector.broadcast %cst_43 : f32 to vector<46x32xf32>
    %258 = arith.maximumf %256, %257 : vector<46x32xf32>
    %cst_44 = arith.constant 0.000000e+00 : f32
    %259 = vector.broadcast %cst_44 : f32 to vector<38x64xf32>
    %cst_45 = arith.constant 0.000000e+00 : f32
    %260 = vector.broadcast %cst_45 : f32 to vector<38x64xf32>
    %261 = vector.extract_strided_slice %26 {offsets = [0, 0], sizes = [32, 64], strides = [1, 1]} : vector<288x64xf32> to vector<32x64xf32>
    %262 = vector.extract_strided_slice %253 {offsets = [0, 0], sizes = [38, 32], strides = [1, 1]} : vector<46x32xf32> to vector<38x32xf32>
    %cst_46 = arith.constant dense<0.000000e+00> : vector<38x64xf32>
    %263 = tpu.matmul %262, %261, %cst_46 {dimension_numbers = #tpu.dot_dimension_numbers<[1], [0], [0], [1], [0, 0, 1, 1], [], []>} : vector<38x32xf32>, vector<32x64xf32>, vector<38x64xf32> -> vector<38x64xf32>
    %264 = arith.addf %259, %263 : vector<38x64xf32>
    %265 = vector.extract_strided_slice %258 {offsets = [0, 0], sizes = [38, 32], strides = [1, 1]} : vector<46x32xf32> to vector<38x32xf32>
    %cst_47 = arith.constant dense<0.000000e+00> : vector<38x64xf32>
    %266 = tpu.matmul %265, %261, %cst_47 {dimension_numbers = #tpu.dot_dimension_numbers<[1], [0], [0], [1], [0, 0, 1, 1], [], []>} : vector<38x32xf32>, vector<32x64xf32>, vector<38x64xf32> -> vector<38x64xf32>
    %267 = arith.addf %260, %266 : vector<38x64xf32>
    %268 = vector.extract_strided_slice %26 {offsets = [32, 0], sizes = [32, 64], strides = [1, 1]} : vector<288x64xf32> to vector<32x64xf32>
    %269 = vector.extract_strided_slice %258 {offsets = [0, 0], sizes = [38, 32], strides = [1, 1]} : vector<46x32xf32> to vector<38x32xf32>
    %cst_48 = arith.constant dense<0.000000e+00> : vector<38x64xf32>
    %270 = tpu.matmul %269, %268, %cst_48 {dimension_numbers = #tpu.dot_dimension_numbers<[1], [0], [0], [1], [0, 0, 1, 1], [], []>} : vector<38x32xf32>, vector<32x64xf32>, vector<38x64xf32> -> vector<38x64xf32>
    %271 = arith.addf %264, %270 : vector<38x64xf32>
    %272 = vector.extract_strided_slice %253 {offsets = [2, 0], sizes = [38, 32], strides = [1, 1]} : vector<46x32xf32> to vector<38x32xf32>
    %cst_49 = arith.constant dense<0.000000e+00> : vector<38x64xf32>
    %273 = tpu.matmul %272, %268, %cst_49 {dimension_numbers = #tpu.dot_dimension_numbers<[1], [0], [0], [1], [0, 0, 1, 1], [], []>} : vector<38x32xf32>, vector<32x64xf32>, vector<38x64xf32> -> vector<38x64xf32>
    %274 = arith.addf %267, %273 : vector<38x64xf32>
    %275 = vector.extract_strided_slice %26 {offsets = [64, 0], sizes = [32, 64], strides = [1, 1]} : vector<288x64xf32> to vector<32x64xf32>
    %276 = vector.extract_strided_slice %253 {offsets = [2, 0], sizes = [38, 32], strides = [1, 1]} : vector<46x32xf32> to vector<38x32xf32>
    %cst_50 = arith.constant dense<0.000000e+00> : vector<38x64xf32>
    %277 = tpu.matmul %276, %275, %cst_50 {dimension_numbers = #tpu.dot_dimension_numbers<[1], [0], [0], [1], [0, 0, 1, 1], [], []>} : vector<38x32xf32>, vector<32x64xf32>, vector<38x64xf32> -> vector<38x64xf32>
    %278 = arith.addf %271, %277 : vector<38x64xf32>
    %279 = vector.extract_strided_slice %258 {offsets = [2, 0], sizes = [38, 32], strides = [1, 1]} : vector<46x32xf32> to vector<38x32xf32>
    %cst_51 = arith.constant dense<0.000000e+00> : vector<38x64xf32>
    %280 = tpu.matmul %279, %275, %cst_51 {dimension_numbers = #tpu.dot_dimension_numbers<[1], [0], [0], [1], [0, 0, 1, 1], [], []>} : vector<38x32xf32>, vector<32x64xf32>, vector<38x64xf32> -> vector<38x64xf32>
    %281 = arith.addf %274, %280 : vector<38x64xf32>
    %282 = vector.extract_strided_slice %26 {offsets = [96, 0], sizes = [32, 64], strides = [1, 1]} : vector<288x64xf32> to vector<32x64xf32>
    %283 = vector.extract_strided_slice %258 {offsets = [2, 0], sizes = [38, 32], strides = [1, 1]} : vector<46x32xf32> to vector<38x32xf32>
    %cst_52 = arith.constant dense<0.000000e+00> : vector<38x64xf32>
    %284 = tpu.matmul %283, %282, %cst_52 {dimension_numbers = #tpu.dot_dimension_numbers<[1], [0], [0], [1], [0, 0, 1, 1], [], []>} : vector<38x32xf32>, vector<32x64xf32>, vector<38x64xf32> -> vector<38x64xf32>
    %285 = arith.addf %278, %284 : vector<38x64xf32>
    %286 = vector.extract_strided_slice %253 {offsets = [4, 0], sizes = [38, 32], strides = [1, 1]} : vector<46x32xf32> to vector<38x32xf32>
    %cst_53 = arith.constant dense<0.000000e+00> : vector<38x64xf32>
    %287 = tpu.matmul %286, %282, %cst_53 {dimension_numbers = #tpu.dot_dimension_numbers<[1], [0], [0], [1], [0, 0, 1, 1], [], []>} : vector<38x32xf32>, vector<32x64xf32>, vector<38x64xf32> -> vector<38x64xf32>
    %288 = arith.addf %281, %287 : vector<38x64xf32>
    %289 = vector.extract_strided_slice %26 {offsets = [128, 0], sizes = [32, 64], strides = [1, 1]} : vector<288x64xf32> to vector<32x64xf32>
    %290 = vector.extract_strided_slice %253 {offsets = [4, 0], sizes = [38, 32], strides = [1, 1]} : vector<46x32xf32> to vector<38x32xf32>
    %cst_54 = arith.constant dense<0.000000e+00> : vector<38x64xf32>
    %291 = tpu.matmul %290, %289, %cst_54 {dimension_numbers = #tpu.dot_dimension_numbers<[1], [0], [0], [1], [0, 0, 1, 1], [], []>} : vector<38x32xf32>, vector<32x64xf32>, vector<38x64xf32> -> vector<38x64xf32>
    %292 = arith.addf %285, %291 : vector<38x64xf32>
    %293 = vector.extract_strided_slice %258 {offsets = [4, 0], sizes = [38, 32], strides = [1, 1]} : vector<46x32xf32> to vector<38x32xf32>
    %cst_55 = arith.constant dense<0.000000e+00> : vector<38x64xf32>
    %294 = tpu.matmul %293, %289, %cst_55 {dimension_numbers = #tpu.dot_dimension_numbers<[1], [0], [0], [1], [0, 0, 1, 1], [], []>} : vector<38x32xf32>, vector<32x64xf32>, vector<38x64xf32> -> vector<38x64xf32>
    %295 = arith.addf %288, %294 : vector<38x64xf32>
    %296 = vector.extract_strided_slice %26 {offsets = [160, 0], sizes = [32, 64], strides = [1, 1]} : vector<288x64xf32> to vector<32x64xf32>
    %297 = vector.extract_strided_slice %258 {offsets = [4, 0], sizes = [38, 32], strides = [1, 1]} : vector<46x32xf32> to vector<38x32xf32>
    %cst_56 = arith.constant dense<0.000000e+00> : vector<38x64xf32>
    %298 = tpu.matmul %297, %296, %cst_56 {dimension_numbers = #tpu.dot_dimension_numbers<[1], [0], [0], [1], [0, 0, 1, 1], [], []>} : vector<38x32xf32>, vector<32x64xf32>, vector<38x64xf32> -> vector<38x64xf32>
    %299 = arith.addf %292, %298 : vector<38x64xf32>
    %300 = vector.extract_strided_slice %253 {offsets = [6, 0], sizes = [38, 32], strides = [1, 1]} : vector<46x32xf32> to vector<38x32xf32>
    %cst_57 = arith.constant dense<0.000000e+00> : vector<38x64xf32>
    %301 = tpu.matmul %300, %296, %cst_57 {dimension_numbers = #tpu.dot_dimension_numbers<[1], [0], [0], [1], [0, 0, 1, 1], [], []>} : vector<38x32xf32>, vector<32x64xf32>, vector<38x64xf32> -> vector<38x64xf32>
    %302 = arith.addf %295, %301 : vector<38x64xf32>
    %303 = vector.extract_strided_slice %26 {offsets = [192, 0], sizes = [32, 64], strides = [1, 1]} : vector<288x64xf32> to vector<32x64xf32>
    %304 = vector.extract_strided_slice %253 {offsets = [6, 0], sizes = [38, 32], strides = [1, 1]} : vector<46x32xf32> to vector<38x32xf32>
    %cst_58 = arith.constant dense<0.000000e+00> : vector<38x64xf32>
    %305 = tpu.matmul %304, %303, %cst_58 {dimension_numbers = #tpu.dot_dimension_numbers<[1], [0], [0], [1], [0, 0, 1, 1], [], []>} : vector<38x32xf32>, vector<32x64xf32>, vector<38x64xf32> -> vector<38x64xf32>
    %306 = arith.addf %299, %305 : vector<38x64xf32>
    %307 = vector.extract_strided_slice %258 {offsets = [6, 0], sizes = [38, 32], strides = [1, 1]} : vector<46x32xf32> to vector<38x32xf32>
    %cst_59 = arith.constant dense<0.000000e+00> : vector<38x64xf32>
    %308 = tpu.matmul %307, %303, %cst_59 {dimension_numbers = #tpu.dot_dimension_numbers<[1], [0], [0], [1], [0, 0, 1, 1], [], []>} : vector<38x32xf32>, vector<32x64xf32>, vector<38x64xf32> -> vector<38x64xf32>
    %309 = arith.addf %302, %308 : vector<38x64xf32>
    %310 = vector.extract_strided_slice %26 {offsets = [224, 0], sizes = [32, 64], strides = [1, 1]} : vector<288x64xf32> to vector<32x64xf32>
    %311 = vector.extract_strided_slice %258 {offsets = [6, 0], sizes = [38, 32], strides = [1, 1]} : vector<46x32xf32> to vector<38x32xf32>
    %cst_60 = arith.constant dense<0.000000e+00> : vector<38x64xf32>
    %312 = tpu.matmul %311, %310, %cst_60 {dimension_numbers = #tpu.dot_dimension_numbers<[1], [0], [0], [1], [0, 0, 1, 1], [], []>} : vector<38x32xf32>, vector<32x64xf32>, vector<38x64xf32> -> vector<38x64xf32>
    %313 = arith.addf %306, %312 : vector<38x64xf32>
    %314 = vector.extract_strided_slice %253 {offsets = [8, 0], sizes = [38, 32], strides = [1, 1]} : vector<46x32xf32> to vector<38x32xf32>
    %cst_61 = arith.constant dense<0.000000e+00> : vector<38x64xf32>
    %315 = tpu.matmul %314, %310, %cst_61 {dimension_numbers = #tpu.dot_dimension_numbers<[1], [0], [0], [1], [0, 0, 1, 1], [], []>} : vector<38x32xf32>, vector<32x64xf32>, vector<38x64xf32> -> vector<38x64xf32>
    %316 = arith.addf %309, %315 : vector<38x64xf32>
    %317 = vector.extract_strided_slice %26 {offsets = [256, 0], sizes = [32, 64], strides = [1, 1]} : vector<288x64xf32> to vector<32x64xf32>
    %318 = vector.extract_strided_slice %253 {offsets = [8, 0], sizes = [38, 32], strides = [1, 1]} : vector<46x32xf32> to vector<38x32xf32>
    %cst_62 = arith.constant dense<0.000000e+00> : vector<38x64xf32>
    %319 = tpu.matmul %318, %317, %cst_62 {dimension_numbers = #tpu.dot_dimension_numbers<[1], [0], [0], [1], [0, 0, 1, 1], [], []>} : vector<38x32xf32>, vector<32x64xf32>, vector<38x64xf32> -> vector<38x64xf32>
    %320 = arith.addf %313, %319 : vector<38x64xf32>
    %321 = vector.extract_strided_slice %258 {offsets = [8, 0], sizes = [38, 32], strides = [1, 1]} : vector<46x32xf32> to vector<38x32xf32>
    %cst_63 = arith.constant dense<0.000000e+00> : vector<38x64xf32>
    %322 = tpu.matmul %321, %317, %cst_63 {dimension_numbers = #tpu.dot_dimension_numbers<[1], [0], [0], [1], [0, 0, 1, 1], [], []>} : vector<38x32xf32>, vector<32x64xf32>, vector<38x64xf32> -> vector<38x64xf32>
    %323 = arith.addf %316, %322 : vector<38x64xf32>
    %324 = arith.maximumf %320, %323 : vector<38x64xf32>
    %325 = vector.broadcast %28 : vector<1x64xf32> to vector<38x64xf32>
    %326 = arith.addf %324, %325 : vector<38x64xf32>
    %cst_64 = arith.constant 0.000000e+00 : f32
    %327 = vector.broadcast %cst_64 : f32 to vector<38x64xf32>
    %328 = arith.maximumf %326, %327 : vector<38x64xf32>
    %329 = vector.extract_strided_slice %328 {offsets = [0, 0], sizes = [2, 64], strides = [1, 1]} : vector<38x64xf32> to vector<2x64xf32>
    %c0_65 = arith.constant 0 : index
    %c0_66 = arith.constant 0 : index
    %330 = vector.load %arg15[%c0_65, %c0_66] : memref<2x1216xf32, #tpu.memory_space<vmem>>, vector<2x64xf32>
    tpu.vector_store %arg15[%c0_65, %c0_66], %329 {strides = array<i32>} : memref<2x1216xf32, #tpu.memory_space<vmem>>, vector<2x64xf32>,
    %331 = vector.extract_strided_slice %328 {offsets = [2, 0], sizes = [2, 64], strides = [1, 1]} : vector<38x64xf32> to vector<2x64xf32>
    %c0_67 = arith.constant 0 : index
    %c64 = arith.constant 64 : index
    %332 = vector.load %arg15[%c0_67, %c64] : memref<2x1216xf32, #tpu.memory_space<vmem>>, vector<2x64xf32>
    tpu.vector_store %arg15[%c0_67, %c64], %331 {strides = array<i32>} : memref<2x1216xf32, #tpu.memory_space<vmem>>, vector<2x64xf32>,
    %333 = vector.extract_strided_slice %328 {offsets = [4, 0], sizes = [2, 64], strides = [1, 1]} : vector<38x64xf32> to vector<2x64xf32>
    %c0_68 = arith.constant 0 : index
    %c128 = arith.constant 128 : index
    %334 = vector.load %arg15[%c0_68, %c128] : memref<2x1216xf32, #tpu.memory_space<vmem>>, vector<2x64xf32>
    tpu.vector_store %arg15[%c0_68, %c128], %333 {strides = array<i32>} : memref<2x1216xf32, #tpu.memory_space<vmem>>, vector<2x64xf32>,
    %335 = vector.extract_strided_slice %328 {offsets = [6, 0], sizes = [2, 64], strides = [1, 1]} : vector<38x64xf32> to vector<2x64xf32>
    %c0_69 = arith.constant 0 : index
    %c192 = arith.constant 192 : index
    %336 = vector.load %arg15[%c0_69, %c192] : memref<2x1216xf32, #tpu.memory_space<vmem>>, vector<2x64xf32>
    tpu.vector_store %arg15[%c0_69, %c192], %335 {strides = array<i32>} : memref<2x1216xf32, #tpu.memory_space<vmem>>, vector<2x64xf32>,
    %337 = vector.extract_strided_slice %328 {offsets = [8, 0], sizes = [2, 64], strides = [1, 1]} : vector<38x64xf32> to vector<2x64xf32>
    %c0_70 = arith.constant 0 : index
    %c256 = arith.constant 256 : index
    %338 = vector.load %arg15[%c0_70, %c256] : memref<2x1216xf32, #tpu.memory_space<vmem>>, vector<2x64xf32>
    tpu.vector_store %arg15[%c0_70, %c256], %337 {strides = array<i32>} : memref<2x1216xf32, #tpu.memory_space<vmem>>, vector<2x64xf32>,
    %339 = vector.extract_strided_slice %328 {offsets = [10, 0], sizes = [2, 64], strides = [1, 1]} : vector<38x64xf32> to vector<2x64xf32>
    %c0_71 = arith.constant 0 : index
    %c320 = arith.constant 320 : index
    %340 = vector.load %arg15[%c0_71, %c320] : memref<2x1216xf32, #tpu.memory_space<vmem>>, vector<2x64xf32>
    tpu.vector_store %arg15[%c0_71, %c320], %339 {strides = array<i32>} : memref<2x1216xf32, #tpu.memory_space<vmem>>, vector<2x64xf32>,
    %341 = vector.extract_strided_slice %328 {offsets = [12, 0], sizes = [2, 64], strides = [1, 1]} : vector<38x64xf32> to vector<2x64xf32>
    %c0_72 = arith.constant 0 : index
    %c384 = arith.constant 384 : index
    %342 = vector.load %arg15[%c0_72, %c384] : memref<2x1216xf32, #tpu.memory_space<vmem>>, vector<2x64xf32>
    tpu.vector_store %arg15[%c0_72, %c384], %341 {strides = array<i32>} : memref<2x1216xf32, #tpu.memory_space<vmem>>, vector<2x64xf32>,
    %343 = vector.extract_strided_slice %328 {offsets = [14, 0], sizes = [2, 64], strides = [1, 1]} : vector<38x64xf32> to vector<2x64xf32>
    %c0_73 = arith.constant 0 : index
    %c448 = arith.constant 448 : index
    %344 = vector.load %arg15[%c0_73, %c448] : memref<2x1216xf32, #tpu.memory_space<vmem>>, vector<2x64xf32>
    tpu.vector_store %arg15[%c0_73, %c448], %343 {strides = array<i32>} : memref<2x1216xf32, #tpu.memory_space<vmem>>, vector<2x64xf32>,
    %345 = vector.extract_strided_slice %328 {offsets = [16, 0], sizes = [2, 64], strides = [1, 1]} : vector<38x64xf32> to vector<2x64xf32>
    %c0_74 = arith.constant 0 : index
    %c512 = arith.constant 512 : index
    %346 = vector.load %arg15[%c0_74, %c512] : memref<2x1216xf32, #tpu.memory_space<vmem>>, vector<2x64xf32>
    tpu.vector_store %arg15[%c0_74, %c512], %345 {strides = array<i32>} : memref<2x1216xf32, #tpu.memory_space<vmem>>, vector<2x64xf32>,
    %347 = vector.extract_strided_slice %328 {offsets = [18, 0], sizes = [2, 64], strides = [1, 1]} : vector<38x64xf32> to vector<2x64xf32>
    %c0_75 = arith.constant 0 : index
    %c576 = arith.constant 576 : index
    %348 = vector.load %arg15[%c0_75, %c576] : memref<2x1216xf32, #tpu.memory_space<vmem>>, vector<2x64xf32>
    tpu.vector_store %arg15[%c0_75, %c576], %347 {strides = array<i32>} : memref<2x1216xf32, #tpu.memory_space<vmem>>, vector<2x64xf32>,
    %349 = vector.extract_strided_slice %328 {offsets = [20, 0], sizes = [2, 64], strides = [1, 1]} : vector<38x64xf32> to vector<2x64xf32>
    %c0_76 = arith.constant 0 : index
    %c640 = arith.constant 640 : index
    %350 = vector.load %arg15[%c0_76, %c640] : memref<2x1216xf32, #tpu.memory_space<vmem>>, vector<2x64xf32>
    tpu.vector_store %arg15[%c0_76, %c640], %349 {strides = array<i32>} : memref<2x1216xf32, #tpu.memory_space<vmem>>, vector<2x64xf32>,
    %351 = vector.extract_strided_slice %328 {offsets = [22, 0], sizes = [2, 64], strides = [1, 1]} : vector<38x64xf32> to vector<2x64xf32>
    %c0_77 = arith.constant 0 : index
    %c704 = arith.constant 704 : index
    %352 = vector.load %arg15[%c0_77, %c704] : memref<2x1216xf32, #tpu.memory_space<vmem>>, vector<2x64xf32>
    tpu.vector_store %arg15[%c0_77, %c704], %351 {strides = array<i32>} : memref<2x1216xf32, #tpu.memory_space<vmem>>, vector<2x64xf32>,
    %353 = vector.extract_strided_slice %328 {offsets = [24, 0], sizes = [2, 64], strides = [1, 1]} : vector<38x64xf32> to vector<2x64xf32>
    %c0_78 = arith.constant 0 : index
    %c768 = arith.constant 768 : index
    %354 = vector.load %arg15[%c0_78, %c768] : memref<2x1216xf32, #tpu.memory_space<vmem>>, vector<2x64xf32>
    tpu.vector_store %arg15[%c0_78, %c768], %353 {strides = array<i32>} : memref<2x1216xf32, #tpu.memory_space<vmem>>, vector<2x64xf32>,
    %355 = vector.extract_strided_slice %328 {offsets = [26, 0], sizes = [2, 64], strides = [1, 1]} : vector<38x64xf32> to vector<2x64xf32>
    %c0_79 = arith.constant 0 : index
    %c832 = arith.constant 832 : index
    %356 = vector.load %arg15[%c0_79, %c832] : memref<2x1216xf32, #tpu.memory_space<vmem>>, vector<2x64xf32>
    tpu.vector_store %arg15[%c0_79, %c832], %355 {strides = array<i32>} : memref<2x1216xf32, #tpu.memory_space<vmem>>, vector<2x64xf32>,
    %357 = vector.extract_strided_slice %328 {offsets = [28, 0], sizes = [2, 64], strides = [1, 1]} : vector<38x64xf32> to vector<2x64xf32>
    %c0_80 = arith.constant 0 : index
    %c896 = arith.constant 896 : index
    %358 = vector.load %arg15[%c0_80, %c896] : memref<2x1216xf32, #tpu.memory_space<vmem>>, vector<2x64xf32>
    tpu.vector_store %arg15[%c0_80, %c896], %357 {strides = array<i32>} : memref<2x1216xf32, #tpu.memory_space<vmem>>, vector<2x64xf32>,
    %359 = vector.extract_strided_slice %328 {offsets = [30, 0], sizes = [2, 64], strides = [1, 1]} : vector<38x64xf32> to vector<2x64xf32>
    %c0_81 = arith.constant 0 : index
    %c960 = arith.constant 960 : index
    %360 = vector.load %arg15[%c0_81, %c960] : memref<2x1216xf32, #tpu.memory_space<vmem>>, vector<2x64xf32>
    tpu.vector_store %arg15[%c0_81, %c960], %359 {strides = array<i32>} : memref<2x1216xf32, #tpu.memory_space<vmem>>, vector<2x64xf32>,
    %361 = vector.extract_strided_slice %328 {offsets = [32, 0], sizes = [2, 64], strides = [1, 1]} : vector<38x64xf32> to vector<2x64xf32>
    %c0_82 = arith.constant 0 : index
    %c1024 = arith.constant 1024 : index
    %362 = vector.load %arg15[%c0_82, %c1024] : memref<2x1216xf32, #tpu.memory_space<vmem>>, vector<2x64xf32>
    tpu.vector_store %arg15[%c0_82, %c1024], %361 {strides = array<i32>} : memref<2x1216xf32, #tpu.memory_space<vmem>>, vector<2x64xf32>,
    %363 = vector.extract_strided_slice %328 {offsets = [34, 0], sizes = [2, 64], strides = [1, 1]} : vector<38x64xf32> to vector<2x64xf32>
    %c0_83 = arith.constant 0 : index
    %c1088 = arith.constant 1088 : index
    %364 = vector.load %arg15[%c0_83, %c1088] : memref<2x1216xf32, #tpu.memory_space<vmem>>, vector<2x64xf32>
    tpu.vector_store %arg15[%c0_83, %c1088], %363 {strides = array<i32>} : memref<2x1216xf32, #tpu.memory_space<vmem>>, vector<2x64xf32>,
    %365 = vector.extract_strided_slice %328 {offsets = [36, 0], sizes = [2, 64], strides = [1, 1]} : vector<38x64xf32> to vector<2x64xf32>
    %c0_84 = arith.constant 0 : index
    %c1152 = arith.constant 1152 : index
    %366 = vector.load %arg15[%c0_84, %c1152] : memref<2x1216xf32, #tpu.memory_space<vmem>>, vector<2x64xf32>
    tpu.vector_store %arg15[%c0_84, %c1152], %365 {strides = array<i32>} : memref<2x1216xf32, #tpu.memory_space<vmem>>, vector<2x64xf32>,
    %c0_85 = arith.constant 0 : index
    %c0_86 = arith.constant 0 : index
    %367 = vector.load %arg15[%c0_85, %c0_86] : memref<2x1216xf32, #tpu.memory_space<vmem>>, vector<2x1216xf32>
    %368 = arith.truncf %367 : vector<2x1216xf32> to vector<2x1216xbf16>
    %cst_87 = arith.constant 0.000000e+00 : f32
    %369 = vector.broadcast %cst_87 : f32 to vector<2x512xf32>
    %c0_i32_88 = arith.constant 0 : i32
    %c0_i32_89 = arith.constant 0 : i32
    %c0_i32_90 = arith.constant 0 : i32
    %c0_i32_91 = arith.constant 0 : i32
    %c0_i32_92 = arith.constant 0 : i32
    %c0_i32_93 = arith.constant 0 : i32
    %370 = tpu.memref_slice %arg10[%c0_i32_88, %c0_i32_92, %c0_i32_93] : memref<2x1216x512xbf16, #tpu.memory_space<any>> -> memref<1x1216x512xbf16, #tpu.memory_space<any>>
    %371 = tpu.memref_squeeze %370 : memref<1x1216x512xbf16, #tpu.memory_space<any>> -> memref<1216x512xbf16, #tpu.memory_space<any>>
    %c0_i32_94 = arith.constant 0 : i32
    %c0_i32_95 = arith.constant 0 : i32
    %372 = tpu.memref_slice %arg13[%c0_i32_89, %c0_i32_94, %c0_i32_95] : memref<2x1216x512xbf16, #tpu.memory_space<vmem>> -> memref<1x1216x512xbf16, #tpu.memory_space<vmem>>
    %373 = tpu.memref_squeeze %372 : memref<1x1216x512xbf16, #tpu.memory_space<vmem>> -> memref<1216x512xbf16, #tpu.memory_space<vmem>>
    %374 = tpu.memref_slice %arg16[%c0_i32_90, %c0_i32_91] : memref<2x2x!tpu.dma_semaphore, #tpu.memory_space<semaphore_mem>> -> memref<1x1x!tpu.dma_semaphore, #tpu.memory_space<semaphore_mem>>
    %375 = tpu.memref_squeeze %374 : memref<1x1x!tpu.dma_semaphore, #tpu.memory_space<semaphore_mem>> -> memref<!tpu.dma_semaphore, #tpu.memory_space<semaphore_mem>>
    tpu.wait_dma2 semaphore(%375 : memref<!tpu.dma_semaphore, #tpu.memory_space<semaphore_mem>>) src(%371 : memref<1216x512xbf16, #tpu.memory_space<any>>) dst(%373 : memref<1216x512xbf16, #tpu.memory_space<vmem>>)
    %c0_96 = arith.constant 0 : index
    %c0_97 = arith.constant 0 : index
    %c0_98 = arith.constant 0 : index
    %376 = vector.load %arg13[%c0_96, %c0_97, %c0_98] : memref<2x1216x512xbf16, #tpu.memory_space<vmem>>, vector<1x1216x512xbf16>
    %377 = vector.shape_cast %376 : vector<1x1216x512xbf16> to vector<1216x512xbf16>
    %cst_99 = arith.constant dense<0.000000e+00> : vector<2x512xf32>
    %378 = tpu.matmul %368, %377, %cst_99 {dimension_numbers = #tpu.dot_dimension_numbers<[1], [0], [0], [1], [0, 0, 1, 1], [], []>} : vector<2x1216xbf16>, vector<1216x512xbf16>, vector<2x512xf32> -> vector<2x512xf32>
    %c0_100 = arith.constant 0 : index
    %c0_101 = arith.constant 0 : index
    %379 = vector.load %arg6[%c0_100, %c0_101] : memref<1x1024xf32, #tpu.memory_space<vmem>>, vector<1x512xf32>
    %380 = vector.broadcast %379 : vector<1x512xf32> to vector<2x512xf32>
    %381 = arith.addf %378, %380 : vector<2x512xf32>
    %cst_102 = arith.constant 0.000000e+00 : f32
    %382 = vector.broadcast %cst_102 : f32 to vector<2x512xf32>
    %383 = arith.maximumf %381, %382 : vector<2x512xf32>
    %c0_i32_103 = arith.constant 0 : i32
    %c0_i32_104 = arith.constant 0 : i32
    %c1_i32_105 = arith.constant 1 : i32
    %c0_i32_106 = arith.constant 0 : i32
    %c0_i32_107 = arith.constant 0 : i32
    %c0_i32_108 = arith.constant 0 : i32
    %384 = tpu.memref_slice %arg11[%c0_i32_103, %c0_i32_107, %c0_i32_108] : memref<2x512x512xbf16, #tpu.memory_space<any>> -> memref<1x512x512xbf16, #tpu.memory_space<any>>
    %385 = tpu.memref_squeeze %384 : memref<1x512x512xbf16, #tpu.memory_space<any>> -> memref<512x512xbf16, #tpu.memory_space<any>>
    %c0_i32_109 = arith.constant 0 : i32
    %c0_i32_110 = arith.constant 0 : i32
    %386 = tpu.memref_slice %arg14[%c0_i32_104, %c0_i32_109, %c0_i32_110] : memref<2x512x512xbf16, #tpu.memory_space<vmem>> -> memref<1x512x512xbf16, #tpu.memory_space<vmem>>
    %387 = tpu.memref_squeeze %386 : memref<1x512x512xbf16, #tpu.memory_space<vmem>> -> memref<512x512xbf16, #tpu.memory_space<vmem>>
    %388 = tpu.memref_slice %arg16[%c1_i32_105, %c0_i32_106] : memref<2x2x!tpu.dma_semaphore, #tpu.memory_space<semaphore_mem>> -> memref<1x1x!tpu.dma_semaphore, #tpu.memory_space<semaphore_mem>>
    %389 = tpu.memref_squeeze %388 : memref<1x1x!tpu.dma_semaphore, #tpu.memory_space<semaphore_mem>> -> memref<!tpu.dma_semaphore, #tpu.memory_space<semaphore_mem>>
    tpu.wait_dma2 semaphore(%389 : memref<!tpu.dma_semaphore, #tpu.memory_space<semaphore_mem>>) src(%385 : memref<512x512xbf16, #tpu.memory_space<any>>) dst(%387 : memref<512x512xbf16, #tpu.memory_space<vmem>>)
    %390 = arith.truncf %383 : vector<2x512xf32> to vector<2x512xbf16>
    %c0_111 = arith.constant 0 : index
    %c0_112 = arith.constant 0 : index
    %c0_113 = arith.constant 0 : index
    %391 = vector.load %arg14[%c0_111, %c0_112, %c0_113] : memref<2x512x512xbf16, #tpu.memory_space<vmem>>, vector<1x512x512xbf16>
    %392 = vector.shape_cast %391 : vector<1x512x512xbf16> to vector<512x512xbf16>
    %cst_114 = arith.constant dense<0.000000e+00> : vector<2x512xf32>
    %393 = tpu.matmul %390, %392, %cst_114 {dimension_numbers = #tpu.dot_dimension_numbers<[1], [0], [0], [1], [0, 0, 1, 1], [], []>} : vector<2x512xbf16>, vector<512x512xbf16>, vector<2x512xf32> -> vector<2x512xf32>
    %394 = arith.addf %369, %393 : vector<2x512xf32>
    %c1_i32_115 = arith.constant 1 : i32
    %c1_i32_116 = arith.constant 1 : i32
    %c0_i32_117 = arith.constant 0 : i32
    %c1_i32_118 = arith.constant 1 : i32
    %c0_i32_119 = arith.constant 0 : i32
    %c0_i32_120 = arith.constant 0 : i32
    %395 = tpu.memref_slice %arg10[%c1_i32_115, %c0_i32_119, %c0_i32_120] : memref<2x1216x512xbf16, #tpu.memory_space<any>> -> memref<1x1216x512xbf16, #tpu.memory_space<any>>
    %396 = tpu.memref_squeeze %395 : memref<1x1216x512xbf16, #tpu.memory_space<any>> -> memref<1216x512xbf16, #tpu.memory_space<any>>
    %c0_i32_121 = arith.constant 0 : i32
    %c0_i32_122 = arith.constant 0 : i32
    %397 = tpu.memref_slice %arg13[%c1_i32_116, %c0_i32_121, %c0_i32_122] : memref<2x1216x512xbf16, #tpu.memory_space<vmem>> -> memref<1x1216x512xbf16, #tpu.memory_space<vmem>>
    %398 = tpu.memref_squeeze %397 : memref<1x1216x512xbf16, #tpu.memory_space<vmem>> -> memref<1216x512xbf16, #tpu.memory_space<vmem>>
    %399 = tpu.memref_slice %arg16[%c0_i32_117, %c1_i32_118] : memref<2x2x!tpu.dma_semaphore, #tpu.memory_space<semaphore_mem>> -> memref<1x1x!tpu.dma_semaphore, #tpu.memory_space<semaphore_mem>>
    %400 = tpu.memref_squeeze %399 : memref<1x1x!tpu.dma_semaphore, #tpu.memory_space<semaphore_mem>> -> memref<!tpu.dma_semaphore, #tpu.memory_space<semaphore_mem>>
    tpu.wait_dma2 semaphore(%400 : memref<!tpu.dma_semaphore, #tpu.memory_space<semaphore_mem>>) src(%396 : memref<1216x512xbf16, #tpu.memory_space<any>>) dst(%398 : memref<1216x512xbf16, #tpu.memory_space<vmem>>)
    %c1 = arith.constant 1 : index
    %c0_123 = arith.constant 0 : index
    %c0_124 = arith.constant 0 : index
    %401 = vector.load %arg13[%c1, %c0_123, %c0_124] : memref<2x1216x512xbf16, #tpu.memory_space<vmem>>, vector<1x1216x512xbf16>
    %402 = vector.shape_cast %401 : vector<1x1216x512xbf16> to vector<1216x512xbf16>
    %cst_125 = arith.constant dense<0.000000e+00> : vector<2x512xf32>
    %403 = tpu.matmul %368, %402, %cst_125 {dimension_numbers = #tpu.dot_dimension_numbers<[1], [0], [0], [1], [0, 0, 1, 1], [], []>} : vector<2x1216xbf16>, vector<1216x512xbf16>, vector<2x512xf32> -> vector<2x512xf32>
    %c0_126 = arith.constant 0 : index
    %c512_127 = arith.constant 512 : index
    %404 = vector.load %arg6[%c0_126, %c512_127] : memref<1x1024xf32, #tpu.memory_space<vmem>>, vector<1x512xf32>
    %405 = vector.broadcast %404 : vector<1x512xf32> to vector<2x512xf32>
    %406 = arith.addf %403, %405 : vector<2x512xf32>
    %cst_128 = arith.constant 0.000000e+00 : f32
    %407 = vector.broadcast %cst_128 : f32 to vector<2x512xf32>
    %408 = arith.maximumf %406, %407 : vector<2x512xf32>
    %c1_i32_129 = arith.constant 1 : i32
    %c1_i32_130 = arith.constant 1 : i32
    %c1_i32_131 = arith.constant 1 : i32
    %c1_i32_132 = arith.constant 1 : i32
    %c0_i32_133 = arith.constant 0 : i32
    %c0_i32_134 = arith.constant 0 : i32
    %409 = tpu.memref_slice %arg11[%c1_i32_129, %c0_i32_133, %c0_i32_134] : memref<2x512x512xbf16, #tpu.memory_space<any>> -> memref<1x512x512xbf16, #tpu.memory_space<any>>
    %410 = tpu.memref_squeeze %409 : memref<1x512x512xbf16, #tpu.memory_space<any>> -> memref<512x512xbf16, #tpu.memory_space<any>>
    %c0_i32_135 = arith.constant 0 : i32
    %c0_i32_136 = arith.constant 0 : i32
    %411 = tpu.memref_slice %arg14[%c1_i32_130, %c0_i32_135, %c0_i32_136] : memref<2x512x512xbf16, #tpu.memory_space<vmem>> -> memref<1x512x512xbf16, #tpu.memory_space<vmem>>
    %412 = tpu.memref_squeeze %411 : memref<1x512x512xbf16, #tpu.memory_space<vmem>> -> memref<512x512xbf16, #tpu.memory_space<vmem>>
    %413 = tpu.memref_slice %arg16[%c1_i32_131, %c1_i32_132] : memref<2x2x!tpu.dma_semaphore, #tpu.memory_space<semaphore_mem>> -> memref<1x1x!tpu.dma_semaphore, #tpu.memory_space<semaphore_mem>>
    %414 = tpu.memref_squeeze %413 : memref<1x1x!tpu.dma_semaphore, #tpu.memory_space<semaphore_mem>> -> memref<!tpu.dma_semaphore, #tpu.memory_space<semaphore_mem>>
    tpu.wait_dma2 semaphore(%414 : memref<!tpu.dma_semaphore, #tpu.memory_space<semaphore_mem>>) src(%410 : memref<512x512xbf16, #tpu.memory_space<any>>) dst(%412 : memref<512x512xbf16, #tpu.memory_space<vmem>>)
    %415 = arith.truncf %408 : vector<2x512xf32> to vector<2x512xbf16>
    %c1_137 = arith.constant 1 : index
    %c0_138 = arith.constant 0 : index
    %c0_139 = arith.constant 0 : index
    %416 = vector.load %arg14[%c1_137, %c0_138, %c0_139] : memref<2x512x512xbf16, #tpu.memory_space<vmem>>, vector<1x512x512xbf16>
    %417 = vector.shape_cast %416 : vector<1x512x512xbf16> to vector<512x512xbf16>
    %cst_140 = arith.constant dense<0.000000e+00> : vector<2x512xf32>
    %418 = tpu.matmul %415, %417, %cst_140 {dimension_numbers = #tpu.dot_dimension_numbers<[1], [0], [0], [1], [0, 0, 1, 1], [], []>} : vector<2x512xbf16>, vector<512x512xbf16>, vector<2x512xf32> -> vector<2x512xf32>
    %419 = arith.addf %394, %418 : vector<2x512xf32>
    %c0_141 = arith.constant 0 : index
    %c0_142 = arith.constant 0 : index
    %420 = vector.load %arg7[%c0_141, %c0_142] : memref<1x512xf32, #tpu.memory_space<vmem>>, vector<1x512xf32>
    %421 = vector.broadcast %420 : vector<1x512xf32> to vector<2x512xf32>
    %422 = arith.addf %419, %421 : vector<2x512xf32>
    %cst_143 = arith.constant 0.000000e+00 : f32
    %423 = vector.broadcast %cst_143 : f32 to vector<2x512xf32>
    %424 = arith.maximumf %422, %423 : vector<2x512xf32>
    %425 = arith.truncf %424 : vector<2x512xf32> to vector<2x512xbf16>
    %c0_144 = arith.constant 0 : index
    %c0_145 = arith.constant 0 : index
    %426 = vector.load %arg8[%c0_144, %c0_145] : memref<512x12xbf16, #tpu.memory_space<vmem>>, vector<512x12xbf16>
    %cst_146 = arith.constant dense<0.000000e+00> : vector<2x12xf32>
    %427 = tpu.matmul %425, %426, %cst_146 {dimension_numbers = #tpu.dot_dimension_numbers<[1], [0], [0], [1], [0, 0, 1, 1], [], []>} : vector<2x512xbf16>, vector<512x12xbf16>, vector<2x12xf32> -> vector<2x12xf32>
    %c0_147 = arith.constant 0 : index
    %c0_148 = arith.constant 0 : index
    %428 = vector.load %arg9[%c0_147, %c0_148] : memref<1x12xf32, #tpu.memory_space<vmem>>, vector<1x12xf32>
    %429 = vector.broadcast %428 : vector<1x12xf32> to vector<2x12xf32>
    %430 = arith.addf %427, %429 : vector<2x12xf32>
    %c0_149 = arith.constant 0 : index
    %c0_150 = arith.constant 0 : index
    %431 = vector.load %arg12[%c0_149, %c0_150] : memref<2x12xf32, #tpu.memory_space<vmem>>, vector<2x12xf32>
    tpu.vector_store %arg12[%c0_149, %c0_150], %430 {strides = array<i32>} : memref<2x12xf32, #tpu.memory_space<vmem>>, vector<2x12xf32>,
    return
  }
  func.func @transform_0(%arg0: i32) -> (i32, i32) {
    %c0_i32 = arith.constant 0 : i32
    %c0_i32_0 = arith.constant 0 : i32
    %c0_i32_1 = arith.constant 0 : i32
    return %c0_i32, %c0_i32_0 : i32, i32
  }
  func.func @transform_1(%arg0: i32) -> (i32, i32) {
    %c0_i32 = arith.constant 0 : i32
    %c0_i32_0 = arith.constant 0 : i32
    %c0_i32_1 = arith.constant 0 : i32
    return %c0_i32, %c0_i32_0 : i32, i32
  }
  func.func @transform_2(%arg0: i32) -> (i32, i32) {
    %c0_i32 = arith.constant 0 : i32
    %c0_i32_0 = arith.constant 0 : i32
    %c0_i32_1 = arith.constant 0 : i32
    return %c0_i32, %c0_i32_0 : i32, i32
  }
  func.func @transform_3(%arg0: i32) -> (i32, i32) {
    %c0_i32 = arith.constant 0 : i32
    %c0_i32_0 = arith.constant 0 : i32
    %c0_i32_1 = arith.constant 0 : i32
    return %c0_i32, %c0_i32_0 : i32, i32
  }
  func.func @transform_4(%arg0: i32) -> (i32, i32) {
    %c0_i32 = arith.constant 0 : i32
    %c0_i32_0 = arith.constant 0 : i32
    %c0_i32_1 = arith.constant 0 : i32
    return %c0_i32, %c0_i32_0 : i32, i32
  }
  func.func @transform_5(%arg0: i32) -> (i32, i32) {
    %c0_i32 = arith.constant 0 : i32
    %c0_i32_0 = arith.constant 0 : i32
    %c0_i32_1 = arith.constant 0 : i32
    return %c0_i32, %c0_i32_0 : i32, i32
  }
  func.func @transform_6(%arg0: i32) -> (i32, i32) {
    %c0_i32 = arith.constant 0 : i32
    %c0_i32_0 = arith.constant 0 : i32
    %c0_i32_1 = arith.constant 0 : i32
    return %c0_i32, %c0_i32_0 : i32, i32
  }
  func.func @transform_7(%arg0: i32) -> (i32, i32) {
    %c0_i32 = arith.constant 0 : i32
    %c0_i32_0 = arith.constant 0 : i32
    %c0_i32_1 = arith.constant 0 : i32
    return %c0_i32, %c0_i32_0 : i32, i32
  }
  func.func @transform_8(%arg0: i32) -> (i32, i32) {
    %c0_i32 = arith.constant 0 : i32
    %c0_i32_0 = arith.constant 0 : i32
    %c0_i32_1 = arith.constant 0 : i32
    return %c0_i32, %c0_i32_0 : i32, i32
  }
  func.func @transform_11(%arg0: i32) -> (i32, i32) {
    %c0_i32 = arith.constant 0 : i32
    %c0_i32_0 = arith.constant 0 : i32
    %c0_i32_1 = arith.constant 0 : i32
    return %c0_i32, %c0_i32_0 : i32, i32
  }
}

</mosaic_0001>

<bundles_post_ra>
// kernel: har_cnn_forward.1
= control target key start
LH: loop header
LB: loop body
LE: loop exit
PB: predicated region body
PF: predicated region fallthrough
CT: control target
= control target key end

     0   :  { %16 = vsyncpa [#allocation7], 0  ;;  %s16895_s0 = inlined_call_operand.vmem [shape: f32[50,4], index: 0, kind: input, shape index: {}]   ;;  %s16896_s1 = inlined_call_operand.hbm [shape: f32[9,32], index: 1, kind: input, shape index: {}]   ;;  %s16897_s2 = inlined_call_operand.hbm [shape: f32[1,32], index: 2, kind: input, shape index: {}]   ;;  %s16898_s3 = inlined_call_operand.vmem [shape: f32[288,64], index: 3, kind: input, shape index: {}]   ;;  %s16899_s4 = inlined_call_operand.hbm [shape: f32[1,64], index: 4, kind: input, shape index: {}]   ;;  %s16900_s5 = inlined_call_operand.hbm [shape: f32[1,1024], index: 5, kind: input, shape index: {}]   ;;  %s16901_s6 = inlined_call_operand.hbm [shape: f32[1,512], index: 6, kind: input, shape index: {}]   ;;  %s16902_s7 = inlined_call_operand.vmem [shape: bf16[512,12], index: 7, kind: input, shape index: {}]   ;;  %s16903_s8 = inlined_call_operand.hbm [shape: f32[1,12], index: 8, kind: input, shape index: {}]   ;;  %s16904_s9 = inlined_call_operand.hbm [shape: bf16[2,1216,512], index: 9, kind: input, shape index: {}]   ;;  %s16905_s10 = inlined_call_operand.hbm [shape: bf16[2,512,512], index: 10, kind: input, shape index: {}]   ;;  %s16906_s11 = inlined_call_operand.hbm [shape: f32[2,12], index: 11, kind: output, shape index: {}]  }
   0x1   :  { %17 = vsyncpa [#allocation10], 0 }
   0x2   :  { %18 = vsyncpa [#allocation13], 0 }
   0x3   :  { %19 = vsyncpa [#allocation16], 0 }
   0x4   :  { %20 = vsyncpa [#allocation8], 0  ;;  %s13436_s17 = smov [#allocation9]   ;;  %s13437_s19 = smov [#allocation12]  }
   0x5   :  { %s41_s18 = sshll.u32 %s13436_s17, 4  ;;  %s63_s20 = sshll.u32 %s13437_s19, 4  ;;  %s42_s18 = int_to_ptr.vmem [resolvable:$true] %s41_s18  ;;  %s64_s20 = int_to_ptr.vmem [resolvable:$true] %s63_s20 }
   0x6   :  { %s13200_s21 = scalar_lea.vmem %s42_s18, 16  ;;  %s13204_s22 = scalar_lea.vmem %s42_s18, 32 }
   0x7   :  { %p13201_p0 = scmp.ne.s32.totalorder %s42_s18, %s13200_s21  ;;  %p13205_p1 = scmp.lt.s32.totalorder %s42_s18, %s42_s18 }
   0x8   :  { %p13206_p2 = scmp.lt.s32.totalorder %s13204_s22, %s13200_s21 }
   0xa   :  { %p13207_p3 = por %p13206_p2, %p13205_p1 }
   0xc   :  { %p13208_p4 = pnand %p13207_p3, %p13201_p0 }
   0xe   :  { %13211 = shalt.err (!%p13208_p4)
}
   0xf   :  { %44 = dma.hbm_to_vmem [thread:$0]  %s16897_s2, 16, %s42_s18, [#allocation10]  }
  0x10   :  { %s13220_s25 = scalar_lea.vmem %s64_s20, 128  ;;  %p13225_p6 = scmp.lt.s32.totalorder %s64_s20, %s64_s20 }
  0x11   :  { %p13221_p5 = scmp.ne.s32.totalorder %s64_s20, %s13220_s25  ;;  %p13226_p7 = scmp.lt.s32.totalorder %s13220_s25, %s13220_s25 }
  0x13   :  { %p13227_p8 = por %p13226_p7, %p13225_p6 }
  0x15   :  { %p13228_p9 = pnand %p13227_p8, %p13221_p5 }
  0x17   :  { %13231 = shalt.err (!%p13228_p9)
}
  0x18   :  { %66 = dma.hbm_to_vmem [thread:$0]  %s16900_s5, 128, %s64_s20, [#allocation13]  }
  0x19   :  { %s13438_s28 = smov [#allocation6]  }
  0x1a   :  { %s28_s29 = sshll.u32 %s13438_s28, 4  ;;  %s29_s29 = int_to_ptr.vmem [resolvable:$true] %s28_s29 }
  0x1b   :  { %s13240_s30 = scalar_lea.vmem %s29_s29, 256  ;;  %p13245_p11 = scmp.lt.s32.totalorder %s29_s29, %s29_s29 }
  0x1c   :  { %p13241_p10 = scmp.ne.s32.totalorder %s29_s29, %s13240_s30  ;;  %p13246_p12 = scmp.lt.s32.totalorder %s13240_s30, %s13240_s30 }
  0x1e   :  { %p13247_p13 = por %p13246_p12, %p13245_p11 }
  0x20   :  { %p13248_p0 = pnand %p13247_p13, %p13241_p10 }
  0x22   :  { %13251 = shalt.err (!%p13248_p0)
}
  0x23   :  { %s13439_s2 = smov 128   ;;  %s13440_s12 = smov 8  }
  0x24   :  { %34 = dma.hbm_to_vmem [thread:$0]  %s16896_s1, 256, %s29_s29, [#allocation7], %s13439_s2, %s13439_s2, %s13440_s12  }
  0x25   :  { %s13441_s15 = smov [#allocation11]   ;;  %s13442_s5 = smov [#allocation14]  }
  0x26   :  { %s53_s16 = sshll.u32 %s13441_s15, 4  ;;  %s73_s17 = sshll.u32 %s13442_s5, 4  ;;  %s54_s16 = int_to_ptr.vmem [resolvable:$true] %s53_s16  ;;  %s74_s17 = int_to_ptr.vmem [resolvable:$true] %s73_s17 }
  0x27   :  { %s13260_s18 = scalar_lea.vmem %s54_s16, 16  ;;  %s13264_s19 = scalar_lea.vmem %s54_s16, 32 }
  0x28   :  { %p13261_p1 = scmp.ne.s32.totalorder %s54_s16, %s13260_s18  ;;  %p13265_p2 = scmp.lt.s32.totalorder %s54_s16, %s54_s16 }
  0x29   :  { %p13266_p3 = scmp.lt.s32.totalorder %s13264_s19, %s13260_s18 }
  0x2b   :  { %p13267_p4 = por %p13266_p3, %p13265_p2 }
  0x2d   :  { %p13268_p5 = pnand %p13267_p4, %p13261_p1 }
  0x2f   :  { %13271 = shalt.err (!%p13268_p5)
}
  0x30   :  { %56 = dma.hbm_to_vmem [thread:$0]  %s16899_s4, 16, %s54_s16, [#allocation10]  }
  0x31   :  { %s13280_s22 = scalar_lea.vmem %s74_s17, 64  ;;  %p13285_p7 = scmp.lt.s32.totalorder %s74_s17, %s74_s17 }
  0x32   :  { %p13281_p6 = scmp.ne.s32.totalorder %s74_s17, %s13280_s22  ;;  %p13286_p8 = scmp.lt.s32.totalorder %s13280_s22, %s13280_s22 }
  0x34   :  { %p13287_p9 = por %p13286_p8, %p13285_p7 }
  0x36   :  { %p13288_p10 = pnand %p13287_p9, %p13281_p6 }
  0x38   :  { %13291 = shalt.err (!%p13288_p10)
}
  0x39   :  { %76 = dma.hbm_to_vmem [thread:$0]  %s16901_s6, 64, %s74_s17, [#allocation13]  }
  0x3a   :  { %s13443_s24 = smov [#allocation15]  }
  0x3b   :  { %s85_s25 = sshll.u32 %s13443_s24, 4  ;;  %s86_s25 = int_to_ptr.vmem [resolvable:$true] %s85_s25 }
  0x3c   :  { %s13300_s26 = scalar_lea.vmem %s86_s25, 16  ;;  %s13304_s27 = scalar_lea.vmem %s86_s25, 32 }
  0x3d   :  { %p13301_p11 = scmp.ne.s32.totalorder %s86_s25, %s13300_s26  ;;  %p13305_p12 = scmp.lt.s32.totalorder %s86_s25, %s86_s25 }
  0x3e   :  { %p13306_p13 = scmp.lt.s32.totalorder %s13304_s27, %s13300_s26 }
  0x40   :  { %p13307_p0 = por %p13306_p13, %p13305_p12 }
  0x42   :  { %p13308_p1 = pnand %p13307_p0, %p13301_p11 }
  0x44   :  { %13311 = shalt.err (!%p13308_p1)
}
  0x45   :  { %88 = dma.hbm_to_vmem [thread:$0]  %s16903_s8, 16, %s86_s25, [#allocation16]  }
  0x46   :  { %13418 = dma.done.wait [#allocation7], 256  }
  0x47   :  { %13419 = vsyncadd [#allocation7], 4294967040 }
  0x48   :  { %13420 = dma.done.wait [#allocation10], 32  }
  0x49   :  { %13421 = vsyncadd [#allocation10], 4294967264 }
  0x4a   :  { %13422 = dma.done.wait [#allocation13], 192  }
  0x4b   :  { %13423 = vsyncadd [#allocation13], 4294967104 }
  0x4c   :  { %13424 = dma.done.wait [#allocation16], 16  }
  0x4d   :  { %13425 = vsyncadd [#allocation16], 4294967280  ;;  %v13444_v0 = vmov 1   ;;  %v13445_v1 = vmov 0   ;;  %v159_v2 = vld [vmem:[%s16895_s0] sm:$0xff]  ;;  %v160_v3 = vld [vmem:[%s16895_s0 + $0x8] sm:$0xff]  ;;  %v236_v20 = vlaneseq }
  0x4e   :  { %12029 = vset.pattern.permute.xlu1 %v13444_v0  ;;  %12028 = vset.pattern.permute.xlu0 %v13445_v1  ;;  %v13446_v4 = vmov 3   ;;  %v161_v5 = vld [vmem:[%s16895_s0 + $0x10] sm:$0xff]  ;;  %v162_v6 = vld [vmem:[%s16895_s0 + $0x18] sm:$0xff]  ;;  %v13447_v7 = vmov 2   ;;  %v164_v8 = vld [vmem:[%s16895_s0 + $0x28] sm:$0xff]  ;;  %v16907_v12 = vmov 0.0  }
  0x4f   :  { %253 = vperm.xlu1 %12029, %v159_v2   ;;  %208 = vperm.xlu0 %12028, %v159_v2   ;;  %v163_v9 = vld [vmem:[%s16895_s0 + $0x20] sm:$0xff]  ;;  %v165_v10 = vld [vmem:[%s16895_s0 + $0x30] sm:$0x3]  ;;  %v13572_v11 = vld [vmem:[%s16898_s3 + $0x18] sm:$0xff]  ;;  %vm13449_vm0 = vmmov 0   ;;  %v13636_v21 = vshrl.u32 %v236_v20, 7 }
  0x50   :  { %17197 = vst [vmem:[#allocation37_spill] sm:$0xff] %v13572_v11  ;;  %11616 = vmatprep.subr.mxu1 %v16907_v12  ;;  %11593 = vmatprep.subr.mxu0 %v16907_v12  ;;  %v13579_v13 = vld [vmem:[%s16898_s3 + $0x10] sm:$0xff]  ;;  %v13587_v14 = vld [vmem:[%s16898_s3 + $0x38] sm:$0xff]  ;;  %v13592_v15 = vld [vmem:[%s16898_s3 + $0x8] sm:$0xff]  ;;  %vm388_vm1 = vcmask 1045504   ;;  %vm552_vm2 = vcmask 1043456  }
  0x51   :  { %17198 = vst [vmem:[#allocation38_spill] sm:$0xff] %v13579_v13  ;;  %11617 = vmatpush3.msra.mxu1 %v13572_v11  ;;  %17199 = vst [vmem:[#allocation39_spill] sm:$0xff] %v13587_v14  ;;  %v13597_v16 = vld [vmem:[%s16898_s3 + $0x30] sm:$0xff]  ;;  %11594 = vmatpush3.msra.mxu0 %v13587_v14  ;;  %v13608_v17 = vld [vmem:[%s16898_s3] sm:$0xff]  ;;  %v13639_v22 = vsub.s32 2, %v13636_v21  ;;  %v13642_v23 = vsub.s32 3, %v13636_v21 }
  0x52   :  { %11618 = vmatprep.subr.mxu1 %v16907_v12  ;;  %17200 = vst [vmem:[#allocation40_spill] sm:$0xff] %v13592_v15  ;;  %17201 = vst [vmem:[#allocation41_spill] sm:$0xff] %v13597_v16  ;;  %11595 = vmatprep.subr.mxu0 %v16907_v12  ;;  %v13615_v18 = vld [vmem:[%s16898_s3 + $0x28] sm:$0xff]  ;;  %v13632_v19 = vld [vmem:[%s16898_s3 + $0x20] sm:$0xff]  ;;  %v374_v24 = vsub.s32 4, %v13636_v21  ;;  %v453_v25 = vsub.s32 6, %v13636_v21 }
  0x53   :  { %257 = vperm.xlu1 %12029, %v160_v3   ;;  %213 = vperm.xlu0 %12028, %v160_v3   ;;  %17202 = vst [vmem:[#allocation42_spill] sm:$0xff] %v13608_v17  ;;  %17203 = vst [vmem:[#allocation43_spill] sm:$0xff] %v13615_v18  ;;  %v166_v27 = vld [vmem:[#allocation6] sm:$0xff]  ;;  %v13649_v28 = vsub.s32 0, %v13636_v21  ;;  %v13652_v29 = vsub.s32 1, %v13636_v21  ;;  %v414_v34 = vsub.s32 5, %v13636_v21 }
  0x54   :  { %11619 = vmatpush3.msra.mxu1 %v13579_v13  ;;  %11596 = vmatpush3.msra.mxu0 %v13597_v16  ;;  %17204 = vst [vmem:[#allocation44_spill] sm:$0xff] %v13632_v19  ;;  %17205 = vst [vmem:[#allocation45_spill] sm:$0xff] %v13636_v21  ;;  %v13655_v30 = vrot.slane %v166_v27, %v13639_v22  ;;  %v13658_v31 = vrot.slane %v166_v27, %v13642_v23  ;;  %v492_v39 = vsub.s32 7, %v13636_v21  ;;  %vm1475_vm3 = vcmask 261120   ;;  %s13452_s15 = smov [#allocation2]   ;;  %s13453_s5 = smov [#allocation3]  }
  0x55   :  { %11620 = vmatprep.subr.mxu1 %v16907_v12  ;;  %11597 = vmatprep.subr.mxu0 %v16907_v12  ;;  %17206 = vst [vmem:[#allocation46_spill] sm:$0xff] %v13639_v22  ;;  %17207 = vst [vmem:[#allocation47_spill] sm:$0xff] %v13642_v23  ;;  %v13660_v32 = vrot.slane %v166_v27, %v374_v24  ;;  %v13662_v33 = vrot.slane %v166_v27, %v453_v25  ;;  %vm2613_vm4 = vcmask 1041408   ;;  %vm3346_vm5 = vcmask 517120   ;;  %s115_s16 = sshll.u32 %s13452_s15, 4  ;;  %s127_s17 = sshll.u32 %s13453_s5, 4  ;;  %s16091_s16 = int_to_ptr.vmem [resolvable:$true] %s115_s16  ;;  %s16093_s17 = int_to_ptr.vmem [resolvable:$true] %s127_s17 }
  0x56   :  { %11621 = vmatpush3.msra.mxu1 %v13592_v15  ;;  %11624 = vmatprep.mubr.msk.f32.mxu1 %vm13449_vm0, %v16907_v12  ;;  %17208 = vst [vmem:[#allocation48_spill] sm:$0xff] %v13649_v28  ;;  %17209 = vst [vmem:[#allocation49_spill] sm:$0xff] %v13652_v29  ;;  %v13670_v37 = vrot.slane %v166_v27, %v13649_v28  ;;  %v13673_v38 = vrot.slane %v166_v27, %v13652_v29  ;;  %s13320_s18 = scalar_lea.vmem %s16091_s16, 38912  ;;  %s13324_s19 = scalar_lea.vmem %s16091_s16, 77824 }
  0x57   :  { %12030 = vset.pattern.permute.xlu1 %v13446_v4  ;;  %12033 = vset.pattern.permute.xlu0 %v13446_v4  ;;  %17210 = vst [vmem:[#allocation50_spill] sm:$0xff] %v13655_v30  ;;  %17211 = vst [vmem:[#allocation51_spill] sm:$0xff] %v13658_v31  ;;  %v13700_v46 = vrot.slane %v166_v27, %v414_v34  ;;  %v13718_v51 = vrot.slane %v166_v27, %v492_v39  ;;  %p13321_p2 = scmp.ne.s32.totalorder %s16091_s16, %s13320_s18  ;;  %p13325_p3 = scmp.lt.s32.totalorder %s16091_s16, %s16091_s16 }
  0x58   :  { %333 = vperm.xlu1 %12030, %v159_v2   ;;  %337 = vperm.xlu0 %12033, %v160_v3   ;;  %17213 = vst [vmem:[#allocation53_spill] sm:$0xff] %v13670_v37  ;;  %p13326_p4 = scmp.lt.s32.totalorder %s13324_s19, %s13320_s18 }
  0x59   :  { %11622 = vmatprep.subr.mxu1 %v16907_v12  ;;  %11598 = vmatpush3.msra.mxu0 %v13615_v18 }
  0x5a   :  { %11623 = vmatpush3.msra.mxu1 %v13608_v17  ;;  %11601 = vmatprep.mubr.msk.f32.mxu0 %vm13449_vm0, %v16907_v12  ;;  %p13327_p5 = por %p13326_p4, %p13325_p3 }
  0x5b   :  { %11599 = vmatprep.subr.mxu0 %v16907_v12  ;;  %11662 = vmatprep.subr.mxu1 %v16907_v12 }
  0x5c   :  { %12031 = vset.pattern.permute.xlu1 %v13445_v1  ;;  %12036 = vset.pattern.permute.xlu0 %v13444_v0  ;;  %p13328_p6 = pnand %p13327_p5, %p13321_p2 }
  0x5d   :  { %218 = vperm.xlu1 %12031, %v161_v5   ;;  %265 = vperm.xlu0 %12036, %v162_v6  }
  0x5e   :  { %11600 = vmatpush3.msra.mxu0 %v13632_v19 }
  0x5f   :  { %11639 = vmatprep.subr.mxu0 %v16907_v12 }
  0x61   :  { %12032 = vset.pattern.permute.xlu1 %v13444_v0  ;;  %12037 = vset.pattern.permute.xlu0 %v13447_v7 }
  0x62   :  { %261 = vperm.xlu1 %12032, %v161_v5   ;;  %293 = vperm.xlu0 %12037, %v159_v2  }
  0x66   :  { %12034 = vset.pattern.permute.xlu1 %v13445_v1  ;;  %297 = vperm.xlu0 %12037, %v160_v3  }
  0x67   :  { %223 = vperm.xlu1 %12034, %v162_v6  }
  0x6a   :  { %305 = vperm.xlu0 %12037, %v162_v6  }
  0x6b   :  { %12035 = vset.pattern.permute.xlu1 %v13447_v7 }
  0x6c   :  { %301 = vperm.xlu1 %12035, %v161_v5  }
  0x6e   :  { %12042 = vset.pattern.permute.xlu0 %v13445_v1 }
  0x6f   :  { %233 = vperm.xlu0 %12042, %v164_v8  }
  0x70   :  { %12038 = vset.pattern.permute.xlu1 %v13446_v4 }
  0x71   :  { %341 = vperm.xlu1 %12038, %v161_v5  }
  0x73   :  { %12045 = vset.pattern.permute.xlu0 %v13446_v4 }
  0x74   :  { %349 = vperm.xlu0 %12045, %v163_v9  }
  0x75   :  { %12039 = vset.pattern.permute.xlu1 %v13445_v1 }
  0x76   :  { %228 = vperm.xlu1 %12039, %v163_v9  }
  0x78   :  { %12048 = vset.pattern.permute.xlu0 %v13445_v1 }
  0x79   :  { %531 = vperm.xlu0 %12048, %v165_v10  }
  0x7a   :  { %12040 = vset.pattern.permute.xlu1 %v13444_v0 }
  0x7b   :  { %269 = vperm.xlu1 %12040, %v163_v9  }
  0x7d   :  { %12051 = vset.pattern.permute.xlu0 %v13446_v4 }
  0x7e   :  { %1391 = vperm.xlu0 %12051, %v165_v10  }
  0x7f   :  { %12041 = vset.pattern.permute.xlu1 %v13446_v4 }
  0x80   :  { %345 = vperm.xlu1 %12041, %v162_v6  }
  0x84   :  { %12043 = vset.pattern.permute.xlu1 %v13447_v7 }
  0x85   :  { %309 = vperm.xlu1 %12043, %v163_v9  }
  0x89   :  { %12044 = vset.pattern.permute.xlu1 %v13444_v0 }
  0x8a   :  { %273 = vperm.xlu1 %12044, %v164_v8  }
  0x8e   :  { %12046 = vset.pattern.permute.xlu1 %v13447_v7 }
  0x8f   :  { %313 = vperm.xlu1 %12046, %v164_v8  }
  0x93   :  { %12047 = vset.pattern.permute.xlu1 %v13446_v4 }
  0x94   :  { %353 = vperm.xlu1 %12047, %v164_v8  }
  0x98   :  { %12049 = vset.pattern.permute.xlu1 %v13444_v0 }
  0x99   :  { %794 = vperm.xlu1 %12049, %v165_v10  }
  0x9d   :  { %12050 = vset.pattern.permute.xlu1 %v13447_v7 }
  0x9e   :  { %1079 = vperm.xlu1 %12050, %v165_v10  }
  0xca   :  { %v13646_v26 = vpop.permute.xlu1 %253  ;;  %v13665_v35 = vpop.permute.xlu0 %208 }
  0xcb   :  { %17212 = vst [vmem:[#allocation52_spill] sm:$0xff] %v13665_v35  ;;  %v13678_v40 = vmul.f32 %v13660_v32, %v13646_v26  ;;  %v13682_v41 = vmul.f32 %v13658_v31, %v13646_v26  ;;  %v13686_v42 = vmul.f32 %v13655_v30, %v13646_v26  ;;  %v13690_v43 = vmul.f32 %v13662_v33, %v13646_v26 }
  0xcc   :  { %v13694_v44 = vmul.f32 %v13660_v32, %v13665_v35  ;;  %v13698_v45 = vmul.f32 %v13658_v31, %v13665_v35  ;;  %v13704_v47 = vmul.f32 %v13655_v30, %v13665_v35  ;;  %v13708_v48 = vmul.f32 %v13673_v38, %v13646_v26 }
  0xcd   :  { %17214 = vst [vmem:[#allocation54_spill] sm:$0xff] %v13678_v40  ;;  %17215 = vst [vmem:[#allocation55_spill] sm:$0xff] %v13682_v41  ;;  %v13712_v49 = vmul.f32 %v13646_v26, %v13670_v37  ;;  %v13716_v50 = vmul.f32 %v13670_v37, %v13665_v35  ;;  %v13732_v60 = vmul.f32 %v13662_v33, %v13665_v35 }
  0xce   :  { %v13667_v36 = vpop.permute.xlu1 %257  ;;  %17216 = vst [vmem:[#allocation56_spill] sm:$0xff] %v13686_v42  ;;  %17217 = vst [vmem:[#allocation57_spill] sm:$0xff] %v13690_v43  ;;  %v13724_v56 = vpop.permute.xlu0 %213  ;;  %v1133_v61 = vmul.f32 %v13673_v38, %v13665_v35  ;;  %v13739_v63 = vmul.f32 %v13700_v46, %v13665_v35 }
  0xcf   :  { %17218 = vst [vmem:[#allocation58_spill] sm:$0xff] %v13698_v45  ;;  %17219 = vst [vmem:[#allocation59_spill] sm:$0xff] %v13704_v47  ;;  %v13743_v0 = vmul.f32 %v13660_v32, %v13667_v36  ;;  %v13747_v1 = vmul.f32 %v13658_v31, %v13667_v36  ;;  %v281_v2 = vmul.f32 %v13673_v38, %v13667_v36 }
  0xd0   :  { %17220 = vst [vmem:[#allocation60_spill] sm:$0xff] %v13724_v56  ;;  %17221 = vst [vmem:[#allocation61_spill] sm:$0xff] %v13732_v60  ;;  %v13753_v3 = vmul.f32 %v13655_v30, %v13667_v36  ;;  %v13757_v4 = vmul.f32 %v13662_v33, %v13667_v36  ;;  %v13761_v5 = vmul.f32 %v13673_v38, %v13724_v56  ;;  %v1145_v20 = vrot.slane %v1133_v61, 2 }
  0xd1   :  { %17222 = vst [vmem:[#allocation62_spill] sm:$0xff] %v13739_v63  ;;  %17223 = vst [vmem:[#allocation63_spill] sm:$0xff] %v13747_v1  ;;  %v241_v6 = vmul.f32 %v13670_v37, %v13724_v56  ;;  %v13767_v7 = vmul.f32 %v13660_v32, %v13724_v56  ;;  %v13771_v8 = vmul.f32 %v13658_v31, %v13724_v56 }
  0xd2   :  { %17224 = vst [vmem:[#allocation64_spill] sm:$0xff] %v13753_v3  ;;  %17225 = vst [vmem:[#allocation65_spill] sm:$0xff] %v13757_v4  ;;  %v13775_v9 = vmul.f32 %v13655_v30, %v13724_v56  ;;  %v13780_v24 = vmul.f32 %v13667_v36, %v13670_v37  ;;  %v13784_v25 = vmul.f32 %v13662_v33, %v13724_v56  ;;  %v1146_v53 = vrot.slane %v13761_v5, 2 }
  0xd3   :  { %v13726_v57 = vpop.permute.xlu1 %333  ;;  %17226 = vst [vmem:[#allocation66_spill] sm:$0xff] %v13771_v8  ;;  %v13791_v12 = vmul.f32 %v13700_v46, %v13724_v56  ;;  %v13793_v55 = vpop.permute.xlu0 %337  ;;  %v13802_v62 = vadd.f32 %v281_v2, %v241_v6  ;;  %v13835_v2 = vld [vmem:[#allocation6 + $0x8] ss:$0 sm:$0xff] }
  0xd4   :  { %17227 = vst [vmem:[#allocation67_spill] sm:$0xff] %v13775_v9  ;;  %17228 = vst [vmem:[#allocation68_spill] sm:$0xff] %v13784_v25  ;;  %v13800_v27 = vmul.f32 %v13700_v46, %v13726_v57  ;;  %v13810_v10 = vmul.f32 %v13726_v57, %v13655_v30  ;;  %v13814_v5 = vmul.f32 %v13726_v57, %v13673_v38 }
  0xd5   :  { %17229 = vst [vmem:[#allocation69_spill] sm:$0xff] %v13791_v12  ;;  %v1121_v6 = vmul.f32 %v13726_v57, %v13670_v37  ;;  %v13824_v58 = vmul.f32 %v13660_v32, %v13726_v57  ;;  %v1147_v52 = vsel %vm388_vm1, %v1145_v20, %v1146_v53  ;;  %v13833_v23 = vmul.f32 %v13658_v31, %v13793_v55 }
  0xd6   :  { %17230 = vst [vmem:[#allocation70_spill] sm:$0xff] %v13800_v27  ;;  %17231 = vst [vmem:[#allocation71_spill] sm:$0xff] %v13810_v10  ;;  %v13842_v29 = vmul.f32 %v13700_v46, %v13793_v55  ;;  %v13846_v28 = vmul.f32 %v13660_v32, %v13793_v55  ;;  %v13856_v21 = vmul.f32 %v13793_v55, %v13655_v30 }
  0xd7   :  { %17232 = vst [vmem:[#allocation72_spill] sm:$0xff] %v13824_v58  ;;  %v13860_v19 = vmul.f32 %v13793_v55, %v13673_v38  ;;  %v1122_v17 = vmul.f32 %v13793_v55, %v13670_v37  ;;  %v13873_v43 = vadd.f32 %v1147_v52, %v1121_v6  ;;  %v17240_v6 = vrot.slane %v13767_v7, 2 }
  0xd8   :  { %v219_v61 = vpop.permute.xlu1 %218  ;;  %v266_v34 = vpop.permute.xlu0 %265  ;;  %17233 = vst [vmem:[#allocation73_spill] sm:$0xff] %v13842_v29 }
  0xd9   :  { %v13817_v54 = vmul.f32 %v13660_v32, %v219_v61  ;;  %v13827_v39 = vmul.f32 %v13673_v38, %v219_v61  ;;  %v13838_v22 = vmul.f32 %v13658_v31, %v219_v61  ;;  %v13849_v59 = vmul.f32 %v13835_v2, %v219_v61  ;;  %17237 = vst [vmem:[#allocation77_spill] sm:$0xff] %v13873_v43 }
  0xda   :  { %v13852_v20 = vmul.f32 %v13718_v51, %v219_v61  ;;  %v13864_v16 = vmul.f32 %v13655_v30, %v219_v61  ;;  %v13870_v15 = vmul.f32 %v13662_v33, %v219_v61  ;;  %v242_v4 = vmul.f32 %v13670_v37, %v219_v61 }
  0xdb   :  { %17234 = vst [vmem:[#allocation74_spill] sm:$0xff] %v13849_v59  ;;  %v13878_v63 = vmul.f32 %v13700_v46, %v219_v61  ;;  %v17239_v52 = vrot.slane %v13817_v54, 2  ;;  %v13895_v18 = vmul.f32 %v13700_v46, %v266_v34  ;;  %v13898_v14 = vmul.f32 %v13660_v32, %v266_v34 }
  0xdc   :  { %17235 = vst [vmem:[#allocation75_spill] sm:$0xff] %v13852_v20  ;;  %17236 = vst [vmem:[#allocation76_spill] sm:$0xff] %v13870_v15  ;;  %v17244_v60 = vrot.slane %v13827_v39, 2  ;;  %v13905_v20 = vmul.f32 %v13835_v2, %v266_v34  ;;  %v17248_v61 = vrot.slane %v13771_v8, 2  ;;  %v283_v58 = vmul.f32 %v13673_v38, %v266_v34 }
  0xdd   :  { %v262_v11 = vpop.permute.xlu1 %261  ;;  %17238 = vst [vmem:[#allocation78_spill] sm:$0xff] %v13878_v63  ;;  %v13884_v25 = vpop.permute.xlu0 %293  ;;  %v13891_v13 = vsel %vm388_vm1, %v17240_v6, %v17239_v52  ;;  %17242 = vst [vmem:[#allocation80_spill] sm:$0xff] %v13895_v18  ;;  %v13908_v52 = vmul.f32 %v13658_v31, %v266_v34  ;;  %v17247_v6 = vrot.slane %v13838_v22, 2  ;;  %v13920_v15 = vmul.f32 %v13718_v51, %v266_v34 }
  0xde   :  { %17241 = vst [vmem:[#allocation79_spill] sm:$0xff] %v13891_v13  ;;  %17243 = vst [vmem:[#allocation81_spill] sm:$0xff] %v13898_v14  ;;  %v1149_v12 = vsel %vm388_vm1, %v1146_v53, %v17244_v60  ;;  %v13923_v53 = vmul.f32 %v266_v34, %v13670_v37  ;;  %v13926_v60 = vmul.f32 %v13655_v30, %v266_v34 }
  0xdf   :  { %17245 = vst [vmem:[#allocation82_spill] sm:$0xff] %v13905_v20  ;;  %17246 = vst [vmem:[#allocation83_spill] sm:$0xff] %v13908_v52  ;;  %v13915_v59 = vsel %vm388_vm1, %v17248_v61, %v17247_v6  ;;  %v651_v43 = vmul.f32 %v13660_v32, %v262_v11  ;;  %v13930_v42 = vmul.f32 %v13655_v30, %v262_v11 }
  0xe0   :  { %17249 = vst [vmem:[#allocation84_spill] sm:$0xff] %v13920_v15  ;;  %17250 = vst [vmem:[#allocation85_spill] sm:$0xff] %v13926_v60  ;;  %v1163_v6 = vadd.f32 %v1149_v12, %v1122_v17  ;;  %v897_v27 = vmul.f32 %v13658_v31, %v262_v11  ;;  %v13940_v47 = vmul.f32 %v13662_v33, %v266_v34 }
  0xe1   :  { %v282_v40 = vmul.f32 %v13673_v38, %v262_v11  ;;  %v13943_v10 = vpop.permute.xlu0 %297  ;;  %v13947_v12 = vmul.f32 %v13700_v46, %v262_v11  ;;  %v13950_v17 = vmul.f32 %v13835_v2, %v262_v11  ;;  %v664_v41 = vrot.slane %v651_v43, 2 }
  0xe2   :  { %v13932_v61 = vpop.permute.xlu1 %223  ;;  %17251 = vst [vmem:[#allocation86_spill] sm:$0xff] %v13940_v47  ;;  %v13956_v34 = vmul.f32 %v13718_v51, %v262_v11  ;;  %v910_v20 = vrot.slane %v897_v27, 2  ;;  %v591_v56 = vmul.f32 %v13943_v10, %v13673_v38  ;;  %v837_v15 = vmul.f32 %v13943_v10, %v13670_v37 }
  0xe3   :  { %17252 = vst [vmem:[#allocation87_spill] sm:$0xff] %v13947_v12  ;;  %17253 = vst [vmem:[#allocation88_spill] sm:$0xff] %v13950_v17  ;;  %v243_v29 = vmul.f32 %v13670_v37, %v13932_v61  ;;  %v13966_v8 = vadd.f32 %v282_v40, %v242_v4  ;;  %v13969_v43 = vmul.f32 %v262_v11, %v13670_v37  ;;  %v17256_v40 = vrot.slane %v13743_v0, 2 }
  0xe4   :  { %17254 = vst [vmem:[#allocation89_spill] sm:$0xff] %v13956_v34  ;;  %v321_v13 = vmul.f32 %v13655_v30, %v13943_v10  ;;  %v13976_v35 = vmul.f32 %v13662_v33, %v262_v11  ;;  %v17258_v4 = vrot.slane %v13898_v14, 2  ;;  %v17260_v63 = vrot.slane %v13930_v42, 2 }
  0xe5   :  { %v13963_v18 = vadd.f32 %v283_v58, %v243_v29  ;;  %v13980_v29 = vmul.f32 %v13655_v30, %v13884_v25  ;;  %v13985_v58 = vsel %vm388_vm1, %v17256_v40, %v664_v41  ;;  %v17261_v11 = vrot.slane %v13753_v3, 2 }
  0xe6   :  { %17255 = vst [vmem:[#allocation90_spill] sm:$0xff] %v13976_v35  ;;  %17257 = vst [vmem:[#allocation91_spill] sm:$0xff] %v13985_v58  ;;  %v13990_v45 = vsel %vm388_vm1, %v664_v41, %v17258_v4  ;;  %v17262_v17 = vrot.slane %v13747_v1, 2  ;;  %v836_v40 = vmul.f32 %v13884_v25, %v13670_v37  ;;  %v597_v14 = vadd.f32 %v591_v56, %v13780_v24 }
  0xe7   :  { %17259 = vst [vmem:[#allocation92_spill] sm:$0xff] %v13990_v45  ;;  %v1184_v47 = vsel %vm388_vm1, %v17261_v11, %v17260_v63  ;;  %v855_v41 = vadd.f32 %v13860_v19, %v837_v15  ;;  %v17263_v4 = vrot.slane %v13908_v52, 2  ;;  %v14012_v45 = vmul.f32 %v13660_v32, %v13884_v25 }
  0xe8   :  { %v911_v12 = vsel %vm388_vm1, %v17262_v17, %v910_v20  ;;  %v14016_v63 = vmul.f32 %v13658_v31, %v13884_v25  ;;  %v327_v17 = vadd.f32 %v321_v13, %v13802_v62  ;;  %v14019_v11 = vadd.f32 %v1184_v47, %v1163_v6 }
  0xe9   :  { %v14008_v27 = vsel %vm388_vm1, %v910_v20, %v17263_v4  ;;  %17264 = vst [vmem:[#allocation93_spill] sm:$0xff] %v14012_v45  ;;  %v14024_v15 = vmul.f32 %v13884_v25, %v13673_v38  ;;  %v14028_v19 = vmul.f32 %v13660_v32, %v13943_v10  ;;  %v17266_v24 = vrot.slane %v13864_v16, 2 }
  0xea   :  { %17265 = vst [vmem:[#allocation94_spill] sm:$0xff] %v14016_v63  ;;  %v17267_v20 = vrot.slane %v13775_v9, 2  ;;  %v14037_v13 = vmul.f32 %v13658_v31, %v13943_v10  ;;  %v14041_v47 = vmul.f32 %v13660_v32, %v13932_v61  ;;  %v14045_v62 = vmul.f32 %v13835_v2, %v13932_v61 }
  0xeb   :  { %v14048_v6 = vadd.f32 %v13814_v5, %v836_v40  ;;  %v609_v56 = vadd.f32 %v13856_v21, %v597_v14  ;;  %v14058_v52 = vadd.f32 %v13833_v23, %v327_v17  ;;  %v14062_v58 = vmul.f32 %v13718_v51, %v13932_v61  ;;  %v306_v5 = vpop.permute.xlu0 %305 }
  0xec   :  { %v876_v4 = vsel %vm388_vm1, %v17267_v20, %v17266_v24  ;;  %17268 = vst [vmem:[#allocation95_spill] sm:$0xff] %v14045_v62  ;;  %v14053_v24 = vmul.f32 %v13658_v31, %v13932_v61  ;;  %v14067_v14 = vmul.f32 %v13655_v30, %v13932_v61  ;;  %v14071_v21 = vmul.f32 %v13662_v33, %v13932_v61  ;;  %v302_v20 = vpop.permute.xlu1 %301 }
  0xed   :  { %17269 = vst [vmem:[#allocation96_spill] sm:$0xff] %v14048_v6  ;;  %v890_v35 = vadd.f32 %v876_v4, %v855_v41  ;;  %17271 = vst [vmem:[#allocation98_spill] sm:$0xff] %v14058_v52  ;;  %v14075_v41 = vmul.f32 %v13673_v38, %v13932_v61  ;;  %v14082_v34 = vmul.f32 %v13700_v46, %v13932_v61  ;;  %v17291_v6 = vrot.slane %v13817_v54, 2 }
  0xee   :  { %17270 = vst [vmem:[#allocation97_spill] sm:$0xff] %v14053_v24  ;;  %17272 = vst [vmem:[#allocation99_spill] sm:$0xff] %v14062_v58  ;;  %v14085_v40 = vadd.f32 %v13915_v59, %v609_v56  ;;  %v323_v3 = vmul.f32 %v13655_v30, %v306_v5  ;;  %v14093_v17 = vmul.f32 %v13662_v33, %v306_v5 }
  0xef   :  { %17273 = vst [vmem:[#allocation100_spill] sm:$0xff] %v14071_v21  ;;  %17274 = vst [vmem:[#allocation101_spill] sm:$0xff] %v14082_v34  ;;  %v14087_v52 = vadd.f32 %v911_v12, %v890_v35  ;;  %v593_v4 = vmul.f32 %v306_v5, %v13673_v38  ;;  %v14097_v61 = vmul.f32 %v13700_v46, %v306_v5 }
  0xf0   :  { %17275 = vst [vmem:[#allocation102_spill] sm:$0xff] %v14085_v40  ;;  %17277 = vst [vmem:[#allocation104_spill] sm:$0xff] %v14093_v17  ;;  %v14103_v12 = vmul.f32 %v13660_v32, %v306_v5  ;;  %v14107_v23 = vmul.f32 %v13835_v2, %v306_v5  ;;  %v14110_v63 = vmul.f32 %v13658_v31, %v306_v5  ;;  %v342_v45 = vpop.permute.xlu1 %341 }
  0xf1   :  { %17276 = vst [vmem:[#allocation103_spill] sm:$0xff] %v14087_v52  ;;  %17278 = vst [vmem:[#allocation105_spill] sm:$0xff] %v14097_v61  ;;  %v14113_v58 = vmul.f32 %v13718_v51, %v306_v5  ;;  %v14116_v62 = vadd.f32 %v323_v3, %v13963_v18  ;;  %v14119_v59 = vmul.f32 %v306_v5, %v13670_v37 }
  0xf2   :  { %17279 = vst [vmem:[#allocation106_spill] sm:$0xff] %v14103_v12  ;;  %17280 = vst [vmem:[#allocation107_spill] sm:$0xff] %v14107_v23  ;;  %v322_v35 = vmul.f32 %v13655_v30, %v302_v20  ;;  %v1205_v21 = vmul.f32 %v13658_v31, %v302_v20  ;;  %v14125_v34 = vadd.f32 %v593_v4, %v13923_v53 }
  0xf3   :  { %17281 = vst [vmem:[#allocation108_spill] sm:$0xff] %v14110_v63  ;;  %17282 = vst [vmem:[#allocation109_spill] sm:$0xff] %v14113_v58  ;;  %v14129_v40 = vmul.f32 %v13662_v33, %v302_v20  ;;  %v592_v3 = vmul.f32 %v302_v20, %v13673_v38  ;;  %v14134_v5 = vmul.f32 %v13700_v46, %v302_v20 }
  0xf4   :  { %17283 = vst [vmem:[#allocation110_spill] sm:$0xff] %v14116_v62  ;;  %17284 = vst [vmem:[#allocation111_spill] sm:$0xff] %v14119_v59  ;;  %v932_v59 = vmul.f32 %v13660_v32, %v302_v20  ;;  %v14141_v52 = vmul.f32 %v13835_v2, %v302_v20  ;;  %v328_v61 = vadd.f32 %v322_v35, %v13966_v8  ;;  %v1218_v17 = vrot.slane %v1205_v21, 2 }
  0xf5   :  { %17285 = vst [vmem:[#allocation112_spill] sm:$0xff] %v14125_v34  ;;  %17286 = vst [vmem:[#allocation113_spill] sm:$0xff] %v14129_v40  ;;  %v14145_v18 = vmul.f32 %v13718_v51, %v302_v20  ;;  %v362_v34 = vmul.f32 %v13658_v31, %v342_v45  ;;  %v838_v1 = vmul.f32 %v302_v20, %v13670_v37  ;;  %v17290_v35 = vrot.slane %v14041_v47, 2 }
  0xf6   :  { %17287 = vst [vmem:[#allocation114_spill] sm:$0xff] %v14134_v5  ;;  %17288 = vst [vmem:[#allocation115_spill] sm:$0xff] %v14141_v52  ;;  %v604_v56 = vmul.f32 %v342_v45, %v13655_v30  ;;  %v850_v53 = vmul.f32 %v342_v45, %v13673_v38  ;;  %v598_v4 = vadd.f32 %v592_v3, %v13969_v43  ;;  %v945_v58 = vrot.slane %v932_v59, 2 }
  0xf7   :  { %17289 = vst [vmem:[#allocation116_spill] sm:$0xff] %v14145_v18  ;;  %v1123_v8 = vmul.f32 %v342_v45, %v13670_v37  ;;  %v395_v62 = vsel %vm388_vm1, %v17291_v6, %v17290_v35  ;;  %v17292_v20 = vrot.slane %v14053_v24, 2  ;;  %v17293_v40 = vrot.slane %v13838_v22, 2 }
  0xf8   :  { %v14167_v43 = vmul.f32 %v13718_v51, %v342_v45  ;;  %v17294_v59 = vrot.slane %v14037_v13, 2  ;;  %v368_v23 = vadd.f32 %v362_v34, %v328_v61  ;;  %v14174_v54 = vmul.f32 %v13662_v33, %v342_v45 }
  0xf9   :  { %v632_v9 = vsel %vm388_vm1, %v17293_v40, %v17292_v20  ;;  %v17295_v6 = vrot.slane %v14075_v41, 2  ;;  %v17296_v35 = vrot.slane %v13827_v39, 2  ;;  %v610_v40 = vadd.f32 %v604_v56, %v598_v4 }
  0xfa   :  { %v1219_v3 = vsel %vm388_vm1, %v17294_v59, %v1218_v17  ;;  %v856_v20 = vadd.f32 %v850_v53, %v838_v1  ;;  %v14182_v52 = vmul.f32 %v13700_v46, %v342_v45  ;;  %v17297_v24 = vrot.slane %v14028_v19, 2 }
  0xfb   :  { %v1151_v22 = vsel %vm388_vm1, %v17296_v35, %v17295_v6  ;;  %v17298_v34 = vrot.slane %v14067_v14, 2  ;;  %v17299_v61 = vrot.slane %v13864_v16, 2  ;;  %v14195_v39 = vmul.f32 %v13660_v32, %v342_v45  ;;  %v14209_v6 = vpop.permute.xlu1 %228  ;;  %v17321_v16 = vld [vmem:[#allocation66_spill] sm:$0xff] }
  0xfc   :  { %v14187_v59 = vsel %vm388_vm1, %v17297_v24, %v945_v58  ;;  %v1164_v18 = vadd.f32 %v1151_v22, %v1123_v8  ;;  %v17301_v1 = vrot.slane %v14103_v12, 2  ;;  %v17303_v53 = vrot.slane %v14110_v63, 2 }
  0xfd   :  { %v878_v21 = vsel %vm388_vm1, %v17299_v61, %v17298_v34  ;;  %17300 = vst [vmem:[#allocation117_spill] sm:$0xff] %v14195_v39  ;;  %v14206_v4 = vadd.f32 %v1219_v3, %v14019_v11  ;;  %v14211_v8 = vadd.f32 %v395_v62, %v368_v23  ;;  %v17305_v22 = vrot.slane %v13926_v60, 2  ;;  %v17361_v60 = vld [vmem:[#allocation68_spill] sm:$0xff] }
  0xfe   :  { %v14200_v56 = vsel %vm388_vm1, %v945_v58, %v17301_v1  ;;  %v1221_v24 = vsel %vm388_vm1, %v1218_v17, %v17303_v53  ;;  %v17306_v58 = vrot.slane %v13930_v42, 2  ;;  %v14220_v61 = vmul.f32 %v13835_v2, %v342_v45 }
  0xff   :  { %17302 = vst [vmem:[#allocation118_spill] sm:$0xff] %v14200_v56  ;;  %17304 = vst [vmem:[#allocation119_spill] sm:$0xff] %v14211_v8  ;;  %v14222_v17 = vadd.f32 %v632_v9, %v610_v40  ;;  %v891_v11 = vadd.f32 %v878_v21, %v856_v20  ;;  %v286_v62 = vadd.f32 %v13708_v48, %v13716_v50  ;;  %v17003_v1 = vrot.slane %v14195_v39, 2  ;;  %v17323_v56 = vld [vmem:[#allocation58_spill] sm:$0xff]  ;;  %v17336_v39 = vld [vmem:[#allocation59_spill] sm:$0xff] }
 0x100   :  { %v1186_v34 = vsel %vm388_vm1, %v17306_v58, %v17305_v22  ;;  %17307 = vst [vmem:[#allocation120_spill] sm:$0xff] %v14220_v61  ;;  %v14230_v53 = vmul.f32 %v13670_v37, %v14209_v6  ;;  %v360_v42 = vmul.f32 %v13658_v31, %v13726_v57  ;;  %v416_v9 = vmul.f32 %v13700_v46, %v13646_v26 }
 0x101   :  { %17308 = vst [vmem:[#allocation121_spill] sm:$0xff] %v14222_v17  ;;  %v1199_v23 = vadd.f32 %v1186_v34, %v1164_v18  ;;  %v326_v45 = vadd.f32 %v13980_v29, %v286_v62  ;;  %v14239_v21 = vmul.f32 %v13700_v46, %v13667_v36  ;;  %v455_v48 = vmul.f32 %v13662_v33, %v13884_v25 }
 0x102   :  { %v14246_v18 = vmul.f32 %v13660_v32, %v14209_v6  ;;  %v17310_v40 = vrot.slane %v13767_v7, 2  ;;  %v17311_v29 = vrot.slane %v13694_v44, 2  ;;  %v14255_v22 = vmul.f32 %v13662_v33, %v13943_v10 }
 0x103   :  { %v14259_v58 = vmul.f32 %v13835_v2, %v14209_v6  ;;  %v366_v34 = vadd.f32 %v360_v42, %v326_v45  ;;  %v17006_v62 = vrot.slane %v14239_v21, 2  ;;  %v494_v50 = vmul.f32 %v13718_v51, %v13726_v57 }
 0x104   :  { %17309 = vst [vmem:[#allocation122_spill] sm:$0xff] %v14246_v18  ;;  %v391_v20 = vsel %vm388_vm1, %v17311_v29, %v17310_v40  ;;  %v14265_v7 = vadd.f32 %v14008_v27, %v891_v11  ;;  %v17314_v44 = vrot.slane %v13846_v28, 2  ;;  %v14276_v29 = vmul.f32 %v13658_v31, %v14209_v6 }
 0x105   :  { %17312 = vst [vmem:[#allocation123_spill] sm:$0xff] %v14259_v58  ;;  %v428_v42 = vrot.slane %v416_v9, 2  ;;  %v406_v45 = vadd.f32 %v391_v20, %v366_v34  ;;  %v467_v3 = vrot.slane %v455_v48, 2  ;;  %v14281_v27 = vmul.f32 %v13718_v51, %v13793_v55  ;;  %v17320_v34 = vld [vmem:[#allocation52_spill] sm:$0xff] }
 0x106   :  { %17313 = vst [vmem:[#allocation124_spill] sm:$0xff] %v14265_v7  ;;  %v14272_v40 = vsel %vm388_vm1, %v17314_v44, %v17003_v1  ;;  %v14283_v11 = vadd.f32 %v1221_v24, %v1199_v23  ;;  %v14288_v44 = vmul.f32 %v13718_v51, %v14209_v6  ;;  %v14292_v1 = vmul.f32 %v13655_v30, %v14209_v6 }
 0x107   :  { %17315 = vst [vmem:[#allocation125_spill] sm:$0xff] %v14272_v40  ;;  %v14296_v9 = vmul.f32 %v13662_v33, %v14209_v6  ;;  %v430_v48 = vsel %vm388_vm1, %v428_v42, %v17006_v62  ;;  %v506_v24 = vrot.slane %v494_v50, 2  ;;  %v596_v23 = vadd.f32 %v14024_v15, %v13712_v49  ;;  %v17326_v49 = vld [vmem:[#allocation60_spill] sm:$0xff]  ;;  %v17329_v62 = vld [vmem:[#allocation54_spill] sm:$0xff]  ;;  %v17363_v40 = vld [vmem:[#allocation61_spill] sm:$0xff] }
 0x108   :  { %17316 = vst [vmem:[#allocation126_spill] sm:$0xff] %v14283_v11  ;;  %17317 = vst [vmem:[#allocation127_spill] sm:$0xff] %v14288_v44  ;;  %v445_v20 = vadd.f32 %v430_v48, %v406_v45  ;;  %v538_v35 = vmul.f32 %v13835_v2, %v17320_v34  ;;  %v17322_v11 = vrot.slane %v17321_v16, 2  ;;  %v17324_v7 = vrot.slane %v17323_v56, 2  ;;  %v17327_v45 = vld [vmem:[#allocation71_spill] sm:$0xff] }
 0x109   :  { %17318 = vst [vmem:[#allocation128_spill] sm:$0xff] %v14292_v1  ;;  %17319 = vst [vmem:[#allocation129_spill] sm:$0xff] %v14296_v9  ;;  %v684_v9 = vmul.f32 %v13700_v46, %v13884_v25  ;;  %v17325_v42 = vrot.slane %v14255_v22, 2  ;;  %v14318_v15 = vmul.f32 %v13835_v2, %v17326_v49  ;;  %v608_v48 = vadd.f32 %v17327_v45, %v596_v23  ;;  %v14342_v45 = vpop.permute.xlu0 %233 }
 0x10a   :  { %v628_v44 = vsel %vm388_vm1, %v17324_v7, %v17322_v11  ;;  %v14323_v56 = vmul.f32 %v13700_v46, %v13943_v10  ;;  %v719_v7 = vmul.f32 %v13662_v33, %v13726_v57  ;;  %v14329_v11 = vmul.f32 %v13662_v33, %v13793_v55  ;;  %17331 = vst [vmem:[#allocation52_spill] sm:$0xff] %v14342_v45 }
 0x10b   :  { %v469_v50 = vsel %vm388_vm1, %v467_v3, %v17325_v42  ;;  %v696_v16 = vrot.slane %v684_v9, 2  ;;  %v643_v3 = vadd.f32 %v628_v44, %v608_v48  ;;  %v17328_v42 = vrot.slane %v13743_v0, 2 }
 0x10c   :  { %v17330_v58 = vrot.slane %v17329_v62, 2  ;;  %v754_v23 = vmul.f32 %v13718_v51, %v17320_v34  ;;  %v14340_v9 = vmul.f32 %v13718_v51, %v17326_v49  ;;  %v484_v8 = vadd.f32 %v469_v50, %v445_v20 }
 0x10d   :  { %v17010_v63 = vrot.slane %v14323_v56, 2  ;;  %v731_v12 = vrot.slane %v719_v7, 2  ;;  %v17016_v44 = vrot.slane %v14329_v11, 2  ;;  %v553_v62 = vrot.slane %v538_v35, 4 }
 0x10e   :  { %v663_v17 = vsel %vm388_vm1, %v17330_v58, %v17328_v42  ;;  %v768_v58 = vrot.slane %v754_v23, 4  ;;  %v14349_v34 = vmul.f32 %v13673_v38, %v14209_v6  ;;  %v17015_v20 = vrot.slane %v14340_v9, 4 }
 0x10f   :  { %v678_v48 = vadd.f32 %v663_v17, %v643_v3  ;;  %v698_v49 = vsel %vm388_vm1, %v696_v16, %v17010_v63  ;;  %v797_v50 = vmul.f32 %v13835_v2, %v13646_v26  ;;  %v17333_v7 = vrot.slane %v14281_v27, 2  ;;  %v17334_v63 = vld [vmem:[#allocation67_spill] sm:$0xff] }
 0x110   :  { %17332 = vst [vmem:[#allocation66_spill] sm:$0xff] %v14349_v34  ;;  %v17017_v35 = vrot.slane %v14318_v15, 4  ;;  %v14363_v3 = vmul.f32 %v13835_v2, %v13667_v36  ;;  %v733_v16 = vsel %vm388_vm1, %v731_v12, %v17016_v44  ;;  %v770_v0 = vsel %vm552_vm2, %v768_v58, %v17015_v20  ;;  %v14385_v58 = vpop.permute.xlu0 %349 }
 0x111   :  { %v508_v42 = vsel %vm388_vm1, %v506_v24, %v17333_v7  ;;  %v713_v17 = vadd.f32 %v698_v49, %v678_v48  ;;  %v17335_v45 = vrot.slane %v17334_v63, 2  ;;  %v17337_v24 = vrot.slane %v17336_v39, 2  ;;  %17340 = vst [vmem:[#allocation60_spill] sm:$0xff] %v14385_v58  ;;  %v17341_v39 = vld [vmem:[#allocation63_spill] sm:$0xff] }
 0x112   :  { %v523_v23 = vadd.f32 %v508_v42, %v484_v8  ;;  %v555_v48 = vsel %vm552_vm2, %v553_v62, %v17017_v35  ;;  %v17018_v8 = vrot.slane %v14363_v3, 4  ;;  %v17338_v42 = vld [vmem:[#allocation96_spill] sm:$0xff]  ;;  %v14383_v12 = vmul.f32 %v13700_v46, %v14209_v6 }
 0x113   :  { %v874_v7 = vsel %vm388_vm1, %v17337_v24, %v17335_v45  ;;  %v748_v49 = vadd.f32 %v733_v16, %v713_v17  ;;  %v811_v63 = vrot.slane %v797_v50, 4  ;;  %v17342_v20 = vrot.slane %v17341_v39, 2  ;;  %v17343_v45 = vld [vmem:[#allocation55_spill] sm:$0xff]  ;;  %v17346_v17 = vld [vmem:[#allocation93_spill] sm:$0xff] }
 0x114   :  { %v889_v61 = vadd.f32 %v874_v7, %v17338_v42  ;;  %17339 = vst [vmem:[#allocation58_spill] sm:$0xff] %v14383_v12  ;;  %v17344_v24 = vrot.slane %v17343_v45, 2  ;;  %v17345_v62 = vrot.slane %v14028_v19, 2  ;;  %v17347_v16 = vrot.slane %v17346_v17, 2 }
 0x115   :  { %v14399_v6 = vmul.f32 %v13658_v31, %v14385_v58  ;;  %v787_v42 = vadd.f32 %v770_v0, %v748_v49  ;;  %v14403_v50 = vmul.f32 %v13718_v51, %v13667_v36  ;;  %v572_v45 = vadd.f32 %v555_v48, %v523_v23  ;;  %v17355_v49 = vld [vmem:[#allocation56_spill] sm:$0xff]  ;;  %v17358_v48 = vld [vmem:[#allocation94_spill] sm:$0xff] }
 0x116   :  { %v909_v44 = vsel %vm388_vm1, %v17344_v24, %v17342_v20  ;;  %v944_v7 = vsel %vm388_vm1, %v17347_v16, %v17345_v62  ;;  %v813_v19 = vsel %vm552_vm2, %v811_v63, %v17018_v8  ;;  %v17349_v20 = vld [vmem:[#allocation73_spill] sm:$0xff]  ;;  %v17351_v62 = vld [vmem:[#allocation70_spill] sm:$0xff]  ;;  %v17356_v36 = vrot.slane %v17355_v49, 2 }
 0x117   :  { %17348 = vst [vmem:[#allocation71_spill] sm:$0xff] %v14399_v6  ;;  %v924_v35 = vadd.f32 %v909_v44, %v889_v61  ;;  %v17350_v24 = vrot.slane %v17349_v20, 2  ;;  %v17352_v17 = vrot.slane %v17351_v62, 2  ;;  %v830_v12 = vadd.f32 %v813_v19, %v787_v42  ;;  %v17353_v61 = vld [vmem:[#allocation64_spill] sm:$0xff]  ;;  %v14424_v8 = vld [vmem:[#allocation9] ss:$0 sm:$0xff] }
 0x118   :  { %v17354_v44 = vrot.slane %v17353_v61, 2  ;;  %v17357_v23 = vrot.slane %v14037_v13, 2  ;;  %v17359_v39 = vrot.slane %v17358_v48, 2  ;;  %17360 = vst [vmem:[#allocation54_spill] sm:$0xff] %v14424_v8  ;;  %v17362_v62 = vrot.slane %v17361_v60, 4  ;;  %v17365_v19 = vld [vmem:[#allocation77_spill] sm:$0xff] }
 0x119   :  { %v979_v16 = vsel %vm388_vm1, %v17352_v17, %v17350_v24  ;;  %v959_v0 = vadd.f32 %v944_v7, %v924_v35  ;;  %v17364_v24 = vrot.slane %v17363_v40, 4  ;;  %v1039_v7 = vmul.f32 %v13718_v51, %v13646_v26 }
 0x11a   :  { %v1182_v6 = vsel %vm388_vm1, %v17356_v36, %v17354_v44  ;;  %v1217_v63 = vsel %vm388_vm1, %v17359_v39, %v17357_v23  ;;  %v1082_v42 = vmul.f32 %v13835_v2, %v13884_v25  ;;  %v1433_v17 = vmax.f32 %v572_v45, %v830_v12  ;;  %v17367_v36 = vld [vmem:[#allocation72_spill] sm:$0xff]  ;;  %v17369_v45 = vld [vmem:[#allocation69_spill] sm:$0xff] }
 0x11b   :  { %v1016_v35 = vsel %vm552_vm2, %v17364_v24, %v17362_v62  ;;  %v1197_v13 = vadd.f32 %v1182_v6, %v17365_v19  ;;  %v994_v61 = vadd.f32 %v979_v16, %v959_v0  ;;  %v17020_v39 = vrot.slane %v14403_v50, 4  ;;  %v17371_v0 = vld [vmem:[#allocation62_spill] sm:$0xff] }
 0x11c   :  { %v14439_v44 = vmul.f32 %v13835_v2, %v13943_v10  ;;  %v17366_v40 = vrot.slane %v13846_v28, 2  ;;  %v17368_v23 = vrot.slane %v17367_v36, 2  ;;  %v1351_v48 = vmul.f32 %v13718_v51, %v13884_v25 }
 0x11d   :  { %v1232_v49 = vadd.f32 %v1217_v63, %v1197_v13  ;;  %v14450_v12 = vmul.f32 %v13718_v51, %v13943_v10  ;;  %v1445_v6 = vadd.f32 %v14424_v8, %v1433_v17  ;;  %v17370_v16 = vrot.slane %v17369_v45, 4 }
 0x11e   :  { %v1252_v26 = vsel %vm388_vm1, %v17368_v23, %v17366_v40  ;;  %v17372_v62 = vrot.slane %v17371_v0, 4  ;;  %v1394_v28 = vmul.f32 %v13835_v2, %v13726_v57  ;;  %v14462_v24 = vmul.f32 %v13835_v2, %v13793_v55 }
 0x11f   :  { %v1033_v25 = vadd.f32 %v1016_v35, %v994_v61  ;;  %v1053_v19 = vrot.slane %v1039_v7, 4  ;;  %v1267_v13 = vadd.f32 %v1252_v26, %v1232_v49  ;;  %v1365_v10 = vrot.slane %v1351_v48, 4  ;;  %v17377_v61 = vld [vmem:[#allocation65_spill] sm:$0xff] }
 0x120   :  { %v1289_v63 = vsel %vm552_vm2, %v17372_v62, %v17370_v16  ;;  %v14466_v17 = vmul.f32 %v13718_v51, %v14385_v58  ;;  %v14468_v40 = vmax.f32 %v1445_v6, 0.0  ;;  %v1096_v36 = vrot.slane %v1082_v42, 4  ;;  %v14475_v16 = vpop.permute.xlu1 %269  ;;  %v17379_v49 = vld [vmem:[#allocation57_spill] sm:$0xff] }
 0x121   :  { %v17021_v23 = vrot.slane %v14450_v12, 4  ;;  %v14473_v57 = vmul.f32 %v14385_v58, %v13655_v30  ;;  %17376 = vst [vmem:[#allocation63_spill] sm:$0xff] %v14475_v16  ;;  %v1055_v55 = vsel %vm552_vm2, %v1053_v19, %v17020_v39  ;;  %v1306_v7 = vadd.f32 %v1289_v63, %v1267_v13 }
 0x122   :  { %17373 = vst [vmem:[#allocation67_spill] sm:$0xff] %v14466_v17  ;;  %17374 = vst [vmem:[#allocation59_spill] sm:$0xff] %v14468_v40  ;;  %11625 = vmatmul.mubr.msk.f32.vlgmr.msra.gmra.mxu1 %vm1475_vm3, %v14468_v40  ;;  %v17378_v42 = vrot.slane %v17377_v61, 4  ;;  %v17380_v26 = vrot.slane %v17379_v49, 4  ;;  %v1408_v0 = vrot.slane %v1394_v28, 4  ;;  %v17026_v62 = vrot.slane %v14462_v24, 4 }
 0x123   :  { %17375 = vst [vmem:[#allocation96_spill] sm:$0xff] %v14473_v57  ;;  %v1367_v6 = vsel %vm552_vm2, %v1365_v10, %v17021_v23  ;;  %v14495_v63 = vmul.f32 %v13662_v33, %v14385_v58  ;;  %v1072_v13 = vadd.f32 %v1055_v55, %v1033_v25  ;;  %v17382_v35 = vmov 0.0   ;;  %v17386_v55 = vld [vmem:[#allocation37_spill] sm:$0xff]  ;;  %v17397_v57 = vld [vmem:[#allocation40_spill] sm:$0xff] }
 0x124   :  { %v1328_v48 = vsel %vm552_vm2, %v17380_v26, %v17378_v42  ;;  %11627 = vmatprep.mubr.msk.f32.mxu1 %vm13449_vm0, %v17382_v35  ;;  %v14501_v42 = vmul.f32 %v14385_v58, %v13673_v38  ;;  %v14505_v28 = vmul.f32 %v13660_v32, %v14475_v16  ;;  %v14509_v10 = vmul.f32 %v13658_v31, %v14475_v16  ;;  %v17401_v17 = vld [vmem:[#allocation113_spill] sm:$0xff] }
 0x125   :  { %17381 = vst [vmem:[#allocation55_spill] sm:$0xff] %v14495_v63  ;;  %v1345_v39 = vadd.f32 %v1328_v48, %v1306_v7  ;;  %v17385_v49 = vrot.slane %v14439_v44, 4  ;;  %11663 = vmatpush3.msra.mxu1 %v17386_v55  ;;  %v14518_v26 = vmul.f32 %v13700_v46, %v14385_v58  ;;  %v14522_v48 = vmul.f32 %v14385_v58, %v13670_v37  ;;  %v17390_v7 = vld [vmem:[#allocation38_spill] sm:$0xff] }
 0x126   :  { %17383 = vst [vmem:[#allocation93_spill] sm:$0xff] %v14501_v42  ;;  %17384 = vst [vmem:[#allocation73_spill] sm:$0xff] %v14509_v10  ;;  %11664 = vmatprep.subr.mxu1 %v17382_v35  ;;  %v14527_v19 = vmul.f32 %v13660_v32, %v14385_v58  ;;  %v1410_v55 = vsel %vm552_vm2, %v1408_v0, %v17026_v62  ;;  %v17393_v0 = vrot.slane %v14134_v5, 2  ;;  %v17395_v63 = vld [vmem:[#allocation98_spill] sm:$0xff]  ;;  %v17396_v58 = vld [vmem:[#allocation79_spill] sm:$0xff]  ;;  %v17403_v5 = vrot.slane %v14255_v22, 2 }
 0x127   :  { %v1098_v25 = vsel %vm552_vm2, %v1096_v36, %v17385_v49  ;;  %17387 = vst [vmem:[#allocation70_spill] sm:$0xff] %v14518_v26  ;;  %17388 = vst [vmem:[#allocation64_spill] sm:$0xff] %v14522_v48  ;;  %v1384_v23 = vadd.f32 %v1367_v6, %v1345_v39  ;;  %v284_v36 = vmul.f32 %v13673_v38, %v14475_v16  ;;  %11665 = vmatpush3.msra.mxu1 %v17390_v7  ;;  %v14555_v26 = vpop.permute.xlu1 %345  ;;  %v17405_v42 = vld [vmem:[#allocation91_spill] sm:$0xff] }
 0x128   :  { %17389 = vst [vmem:[#allocation56_spill] sm:$0xff] %v14527_v19  ;;  %v14533_v49 = vmul.f32 %v13700_v46, %v14475_v16  ;;  %v14541_v39 = vmul.f32 %v14475_v16, %v13670_v37  ;;  %v14545_v6 = vmul.f32 %v13655_v30, %v14475_v16  ;;  %v1115_v40 = vadd.f32 %v1098_v25, %v1072_v13 }
 0x129   :  { %v1427_v19 = vadd.f32 %v1410_v55, %v1384_v23  ;;  %11666 = vmatprep.subr.mxu1 %v17382_v35  ;;  %v17394_v7 = vrot.slane %v14323_v56, 2  ;;  %v407_v16 = vadd.f32 %v17396_v58, %v17395_v63  ;;  %v17398_v23 = vld [vmem:[#allocation87_spill] sm:$0xff]  ;;  %v17400_v25 = vrot.slane %v14239_v21, 2 }
 0x12a   :  { %17391 = vst [vmem:[#allocation94_spill] sm:$0xff] %v14541_v39  ;;  %17392 = vst [vmem:[#allocation68_spill] sm:$0xff] %v14545_v6  ;;  %11667 = vmatpush3.msra.mxu1 %v17397_v57  ;;  %v17399_v13 = vrot.slane %v17398_v23, 2  ;;  %v17402_v48 = vrot.slane %v17401_v17, 2  ;;  %v14574_v58 = vadd.f32 %v284_v36, %v14230_v53  ;;  %v17406_v21 = vrot.slane %v14174_v54, 2  ;;  %v17412_v36 = vld [vmem:[#allocation81_spill] sm:$0xff] }
 0x12b   :  { %v700_v62 = vsel %vm388_vm1, %v17394_v7, %v17393_v0  ;;  %v1457_v0 = vmax.f32 %v1115_v40, %v1427_v19  ;;  %v17404_v7 = vld [vmem:[#allocation102_spill] sm:$0xff]  ;;  %11668 = vmatprep.subr.mxu1 %v17382_v35  ;;  %v17407_v63 = vrot.slane %v14329_v11, 2  ;;  %v17410_v40 = vrot.slane %v14281_v27, 2  ;;  %v17416_v27 = vld [vmem:[#allocation83_spill] sm:$0xff] }
 0x12c   :  { %v432_v55 = vsel %vm388_vm1, %v17400_v25, %v17399_v13  ;;  %v471_v56 = vsel %vm388_vm1, %v17403_v5, %v17402_v48  ;;  %v679_v39 = vadd.f32 %v17405_v42, %v17404_v7  ;;  %v17408_v25 = vld [vmem:[#allocation42_spill] sm:$0xff]  ;;  %v17409_v5 = vrot.slane %v14167_v43, 2 }
 0x12d   :  { %v735_v13 = vsel %vm388_vm1, %v17407_v63, %v17406_v21  ;;  %v446_v22 = vadd.f32 %v432_v55, %v407_v16  ;;  %11669 = vmatpush3.msra.mxu1 %v17408_v25  ;;  %v1463_v53 = vadd.f32 %v14424_v8, %v1457_v0  ;;  %v363_v42 = vmul.f32 %v13658_v31, %v14555_v26  ;;  %v17418_v0 = vld [vmem:[#allocation74_spill] sm:$0xff] }
 0x12e   :  { %v510_v19 = vsel %vm388_vm1, %v17410_v40, %v17409_v5  ;;  %v714_v48 = vadd.f32 %v700_v62, %v679_v39  ;;  %11708 = vmatprep.subr.mxu1 %v17382_v35  ;;  %v17411_v11 = vrot.slane %v14505_v28, 2  ;;  %v17413_v16 = vrot.slane %v17412_v36, 2  ;;  %v17421_v40 = vld [vmem:[#allocation75_spill] sm:$0xff] }
 0x12f   :  { %v17415_v7 = vrot.slane %v14509_v10, 2  ;;  %v17417_v21 = vrot.slane %v17416_v27, 2  ;;  %v17419_v25 = vrot.slane %v17418_v0, 4  ;;  %v17420_v62 = vrot.slane %v14318_v15, 4 }
 0x130   :  { %v14597_v55 = vsel %vm388_vm1, %v17413_v16, %v17411_v11  ;;  %v485_v5 = vadd.f32 %v471_v56, %v446_v22  ;;  %v17422_v57 = vrot.slane %v17421_v40, 4  ;;  %v17423_v36 = vrot.slane %v14340_v9, 4  ;;  %v17424_v16 = vld [vmem:[#allocation88_spill] sm:$0xff] }
 0x131   :  { %17414 = vst [vmem:[#allocation61_spill] sm:$0xff] %v14597_v55  ;;  %v14604_v63 = vsel %vm388_vm1, %v17417_v21, %v17415_v7  ;;  %v557_v39 = vsel %vm552_vm2, %v17420_v62, %v17419_v25  ;;  %v17425_v55 = vrot.slane %v17424_v16, 4  ;;  %v17426_v27 = vrot.slane %v14363_v3, 4 }
 0x132   :  { %v772_v11 = vsel %vm552_vm2, %v17423_v36, %v17422_v57  ;;  %v14621_v21 = vmax.f32 %v1463_v53, 0.0  ;;  %v749_v10 = vadd.f32 %v735_v13, %v714_v48  ;;  %v17428_v15 = vrot.slane %v14246_v18, 2  ;;  %v17432_v13 = vld [vmem:[#allocation97_spill] sm:$0xff] }
 0x133   :  { %v815_v7 = vsel %vm552_vm2, %v17426_v27, %v17425_v55  ;;  %v17429_v25 = vrot.slane %v14041_v47, 2  ;;  %v14630_v9 = vmul.f32 %v13718_v51, %v14555_v26  ;;  %v605_v57 = vmul.f32 %v14555_v26, %v13655_v30  ;;  %v17434_v47 = vld [vmem:[#allocation110_spill] sm:$0xff] }
 0x134   :  { %17427 = vst [vmem:[#allocation77_spill] sm:$0xff] %v14621_v21  ;;  %v524_v22 = vadd.f32 %v510_v19, %v485_v5  ;;  %11602 = vmatmul.mubr.msk.f32.vlgmr.msra.gmra.mxu0 %vm1475_vm3, %v14621_v21  ;;  %v17431_v3 = vrot.slane %v14276_v29, 2  ;;  %v17433_v53 = vrot.slane %v17432_v13, 2  ;;  %v369_v55 = vadd.f32 %v363_v42, %v17434_v47  ;;  %v17439_v42 = vld [vmem:[#allocation39_spill] sm:$0xff]  ;;  %v17443_v21 = vld [vmem:[#allocation112_spill] sm:$0xff] }
 0x135   :  { %v397_v56 = vsel %vm388_vm1, %v17429_v25, %v17428_v15  ;;  %17430 = vst [vmem:[#allocation72_spill] sm:$0xff] %v14630_v9  ;;  %v14644_v62 = vmul.f32 %v13662_v33, %v14555_v26  ;;  %v788_v36 = vadd.f32 %v772_v11, %v749_v10  ;;  %v17436_v19 = vrot.slane %v14292_v1, 2  ;;  %11604 = vmatprep.mubr.msk.f32.mxu0 %vm13449_vm0, %v17382_v35 }
 0x136   :  { %v634_v48 = vsel %vm388_vm1, %v17433_v53, %v17431_v3  ;;  %v17437_v5 = vrot.slane %v14067_v14, 2  ;;  %v851_v25 = vmul.f32 %v14555_v26, %v13673_v38  ;;  %v14656_v3 = vmul.f32 %v13700_v46, %v14555_v26  ;;  %11640 = vmatpush3.msra.mxu0 %v17439_v42  ;;  %v17440_v14 = vld [vmem:[#allocation103_spill] sm:$0xff] }
 0x137   :  { %17435 = vst [vmem:[#allocation69_spill] sm:$0xff] %v14644_v62  ;;  %v1124_v10 = vmul.f32 %v14555_v26, %v13670_v37  ;;  %v573_v11 = vadd.f32 %v557_v39, %v524_v22  ;;  %v831_v13 = vadd.f32 %v815_v7, %v788_v36  ;;  %v960_v53 = vadd.f32 %v14187_v59, %v17440_v14  ;;  %v17446_v22 = vld [vmem:[#allocation41_spill] sm:$0xff] }
 0x138   :  { %v880_v15 = vsel %vm388_vm1, %v17437_v5, %v17436_v19  ;;  %17438 = vst [vmem:[#allocation62_spill] sm:$0xff] %v14656_v3  ;;  %11641 = vmatprep.subr.mxu0 %v17382_v35  ;;  %v17441_v47 = vrot.slane %v14349_v34, 2  ;;  %v17442_v19 = vrot.slane %v14075_v41, 2  ;;  %v611_v42 = vadd.f32 %v605_v57, %v17443_v21  ;;  %v310_v41 = vpop.permute.xlu1 %309  ;;  %v17449_v57 = vld [vmem:[#allocation76_spill] sm:$0xff] }
 0x139   :  { %v17444_v18 = vrot.slane %v14182_v52, 2  ;;  %v17445_v39 = vrot.slane %v17349_v20, 2  ;;  %11642 = vmatpush3.msra.mxu0 %v17446_v22  ;;  %v14679_v59 = vadd.f32 %v397_v56, %v369_v55  ;;  %v1434_v14 = vmax.f32 %v573_v11, %v831_v13  ;;  %v17452_v56 = vld [vmem:[#allocation125_spill] sm:$0xff]  ;;  %v17476_v21 = vld [vmem:[#allocation120_spill] sm:$0xff] }
 0x13a   :  { %v1153_v5 = vsel %vm388_vm1, %v17442_v19, %v17441_v47  ;;  %11643 = vmatprep.subr.mxu0 %v17382_v35  ;;  %v17448_v47 = vld [vmem:[#allocation111_spill] sm:$0xff]  ;;  %v17450_v27 = vrot.slane %v17449_v57, 4  ;;  %v17451_v20 = vrot.slane %v17361_v60, 4  ;;  %v1268_v55 = vadd.f32 %v17452_v56, %v14206_v4  ;;  %v17463_v56 = vld [vmem:[#allocation89_spill] sm:$0xff] }
 0x13b   :  { %v981_v7 = vsel %vm388_vm1, %v17445_v39, %v17444_v18  ;;  %17447 = vst [vmem:[#allocation65_spill] sm:$0xff] %v14679_v59  ;;  %v857_v19 = vadd.f32 %v851_v25, %v17448_v47  ;;  %v17453_v39 = vld [vmem:[#allocation43_spill] sm:$0xff]  ;;  %v1165_v11 = vadd.f32 %v1153_v5, %v1124_v10  ;;  %v1446_v13 = vadd.f32 %v14424_v8, %v1434_v14  ;;  %v17458_v5 = vld [vmem:[#allocation44_spill] sm:$0xff]  ;;  %v17460_v14 = vld [vmem:[#allocation85_spill] sm:$0xff] }
 0x13c   :  { %v995_v34 = vadd.f32 %v981_v7, %v960_v53  ;;  %v1018_v18 = vsel %vm552_vm2, %v17451_v20, %v17450_v27  ;;  %11644 = vmatpush3.msra.mxu0 %v17453_v39  ;;  %v17454_v7 = vld [vmem:[#allocation78_spill] sm:$0xff]  ;;  %v17456_v25 = vrot.slane %v17369_v45, 4  ;;  %v14700_v60 = vadd.f32 %v634_v48, %v611_v42 }
 0x13d   :  { %v17455_v22 = vrot.slane %v17454_v7, 4  ;;  %11645 = vmatprep.subr.mxu0 %v17382_v35  ;;  %v14704_v27 = vmul.f32 %v13660_v32, %v14555_v26  ;;  %v324_v4 = vmul.f32 %v13655_v30, %v310_v41  ;;  %v17461_v20 = vrot.slane %v17460_v14, 2 }
 0x13e   :  { %v1034_v53 = vadd.f32 %v1018_v18, %v995_v34  ;;  %17457 = vst [vmem:[#allocation57_spill] sm:$0xff] %v14700_v60  ;;  %11646 = vmatpush3.msra.mxu0 %v17458_v5  ;;  %v17459_v34 = vrot.slane %v14545_v6, 2  ;;  %v14713_v18 = vmax.f32 %v1446_v13, 0.0  ;;  %v17464_v48 = vrot.slane %v17463_v56, 4 }
 0x13f   :  { %v1291_v47 = vsel %vm552_vm2, %v17456_v25, %v17455_v22  ;;  %v17465_v42 = vrot.slane %v14403_v50, 4  ;;  %v17466_v22 = vld [vmem:[#allocation90_spill] sm:$0xff]  ;;  %11685 = vmatprep.subr.mxu0 %v17382_v35  ;;  %v892_v5 = vadd.f32 %v880_v15, %v857_v19  ;;  %v594_v14 = vmul.f32 %v310_v41, %v13673_v38 }
 0x140   :  { %v1307_v10 = vadd.f32 %v1291_v47, %v1268_v55  ;;  %v1188_v45 = vsel %vm388_vm1, %v17461_v20, %v17459_v34  ;;  %17462 = vst [vmem:[#allocation37_spill] sm:$0xff] %v14713_v18  ;;  %v17467_v25 = vrot.slane %v17466_v22, 4  ;;  %v17468_v55 = vrot.slane %v17377_v61, 4  ;;  %11628 = vmatmul.mubr.msk.f32.gmra.mxu1 %vm1475_vm3, %v14713_v18 }
 0x141   :  { %v1057_v39 = vsel %vm552_vm2, %v17465_v42, %v17464_v48  ;;  %v14729_v20 = vmul.f32 %v13835_v2, %v14555_v26  ;;  %v14734_v50 = vmul.f32 %v13660_v32, %v310_v41  ;;  %v14737_v61 = vmul.f32 %v13658_v31, %v310_v41  ;;  %v17470_v48 = vld [vmem:[#allocation116_spill] sm:$0xff]  ;;  %11630 = vmatprep.mubr.msk.f32.mxu1 %vm13449_vm0, %v17382_v35 }
 0x142   :  { %v1330_v47 = vsel %vm552_vm2, %v17468_v55, %v17467_v25  ;;  %v1073_v34 = vadd.f32 %v1057_v39, %v1034_v53  ;;  %v17471_v42 = vrot.slane %v17470_v48, 4  ;;  %v17472_v15 = vrot.slane %v14450_v12, 4 }
 0x143   :  { %v1346_v13 = vadd.f32 %v1330_v47, %v1307_v10  ;;  %17469 = vst [vmem:[#allocation38_spill] sm:$0xff] %v14729_v20  ;;  %v330_v26 = vadd.f32 %v324_v4, %v14574_v58  ;;  %v14747_v10 = vmul.f32 %v13662_v33, %v310_v41  ;;  %v14752_v25 = vmul.f32 %v13700_v46, %v310_v41  ;;  %v17473_v47 = vld [vmem:[#allocation115_spill] sm:$0xff] }
 0x144   :  { %v1369_v19 = vsel %vm552_vm2, %v17472_v15, %v17471_v42  ;;  %v840_v55 = vmul.f32 %v310_v41, %v13670_v37  ;;  %v17474_v12 = vrot.slane %v17473_v47, 4  ;;  %v17475_v42 = vrot.slane %v14439_v44, 4 }
 0x145   :  { %v1385_v39 = vadd.f32 %v1369_v19, %v1346_v13  ;;  %v17477_v58 = vrot.slane %v17476_v21, 4  ;;  %v17478_v4 = vrot.slane %v14462_v24, 4  ;;  %v17479_v19 = vld [vmem:[#allocation94_spill] sm:$0xff]  ;;  %v14767_v53 = vmul.f32 %v13835_v2, %v310_v41  ;;  %v17483_v24 = vld [vmem:[#allocation117_spill] sm:$0xff] }
 0x146   :  { %v1100_v15 = vsel %vm552_vm2, %v17475_v42, %v17474_v12  ;;  %v600_v36 = vadd.f32 %v594_v14, %v17479_v19  ;;  %v14770_v59 = vadd.f32 %v14604_v63, %v892_v5  ;;  %v1200_v6 = vadd.f32 %v1188_v45, %v1165_v11  ;;  %v17487_v5 = vld [vmem:[#allocation93_spill] sm:$0xff]  ;;  %v17489_v19 = vld [vmem:[#allocation96_spill] sm:$0xff] }
 0x147   :  { %v1412_v13 = vsel %vm552_vm2, %v17478_v4, %v17477_v58  ;;  %17480 = vst [vmem:[#allocation98_spill] sm:$0xff] %v14767_v53  ;;  %v1116_v18 = vadd.f32 %v1100_v15, %v1073_v34  ;;  %v17042_v44 = vrot.slane %v14734_v50, 2  ;;  %v17045_v12 = vrot.slane %v14737_v61, 2 }
 0x148   :  { %v1428_v60 = vadd.f32 %v1412_v13, %v1385_v39  ;;  %17481 = vst [vmem:[#allocation79_spill] sm:$0xff] %v14770_v59  ;;  %v17482_v42 = vrot.slane %v14704_v27, 2  ;;  %v17484_v1 = vrot.slane %v17483_v24, 2  ;;  %v14781_v4 = vmul.f32 %v13718_v51, %v310_v41  ;;  %v17486_v39 = vld [vmem:[#allocation71_spill] sm:$0xff]  ;;  %v14791_v13 = vpop.permute.xlu1 %273 }
 0x149   :  { %v14784_v63 = vadd.f32 %v17486_v39, %v330_v26  ;;  %v14789_v15 = vadd.f32 %v17487_v5, %v840_v55  ;;  %17488 = vst [vmem:[#allocation87_spill] sm:$0xff] %v14791_v13  ;;  %v17492_v26 = vrot.slane %v17398_v23, 2  ;;  %v17493_v39 = vld [vmem:[#allocation106_spill] sm:$0xff]  ;;  %v17500_v23 = vld [vmem:[#allocation119_spill] sm:$0xff] }
 0x14a   :  { %v1256_v58 = vsel %vm388_vm1, %v17484_v1, %v17482_v42  ;;  %17485 = vst [vmem:[#allocation40_spill] sm:$0xff] %v14781_v4  ;;  %v1458_v34 = vmax.f32 %v1116_v18, %v1428_v60  ;;  %v14794_v1 = vadd.f32 %v17489_v19, %v600_v36  ;;  %v17490_v60 = vld [vmem:[#allocation80_spill] sm:$0xff]  ;;  %v17494_v55 = vrot.slane %v17493_v39, 2  ;;  %v17512_v4 = vld [vmem:[#allocation114_spill] sm:$0xff] }
 0x14b   :  { %v17491_v18 = vrot.slane %v17490_v60, 2  ;;  %v17496_v36 = vld [vmem:[#allocation108_spill] sm:$0xff] }
 0x14c   :  { %v1464_v41 = vadd.f32 %v14424_v8, %v1458_v34  ;;  %v14808_v5 = vsel %vm388_vm1, %v17494_v55, %v17042_v44  ;;  %v17497_v19 = vrot.slane %v17496_v36, 2  ;;  %v17498_v34 = vld [vmem:[#allocation52_spill] sm:$0xff]  ;;  %v17503_v55 = vld [vmem:[#allocation121_spill] sm:$0xff] }
 0x14d   :  { %v434_v24 = vsel %vm388_vm1, %v17492_v26, %v17491_v18  ;;  %17495 = vst [vmem:[#allocation113_spill] sm:$0xff] %v14808_v5  ;;  %v14817_v45 = vmul.f32 %v13835_v2, %v17498_v34  ;;  %v14825_v39 = vmul.f32 %v13718_v51, %v17498_v34  ;;  %v17504_v44 = vld [vmem:[#allocation92_spill] sm:$0xff]  ;;  %v17513_v5 = vrot.slane %v17512_v4, 2  ;;  %v17518_v4 = vld [vmem:[#allocation127_spill] sm:$0xff] }
 0x14e   :  { %v1223_v42 = vsel %vm388_vm1, %v17497_v19, %v17045_v12  ;;  %v447_v11 = vadd.f32 %v434_v24, %v17500_v23  ;;  %v14821_v26 = vmax.f32 %v1464_v41, 0.0  ;;  %v680_v14 = vadd.f32 %v17504_v44, %v17503_v55  ;;  %v17505_v36 = vld [vmem:[#allocation104_spill] sm:$0xff]  ;;  %v17510_v23 = vld [vmem:[#allocation105_spill] sm:$0xff] }
 0x14f   :  { %17499 = vst [vmem:[#allocation102_spill] sm:$0xff] %v14817_v45  ;;  %17502 = vst [vmem:[#allocation42_spill] sm:$0xff] %v14825_v39  ;;  %v17506_v53 = vrot.slane %v17505_v36, 2  ;;  %v17507_v19 = vrot.slane %v17401_v17, 2  ;;  %v17508_v12 = vrot.slane %v14630_v9, 2  ;;  %v17509_v24 = vrot.slane %v14167_v43, 2 }
 0x150   :  { %17501 = vst [vmem:[#allocation91_spill] sm:$0xff] %v14821_v26  ;;  %v17511_v18 = vrot.slane %v17510_v23, 2  ;;  %v17514_v44 = vrot.slane %v14644_v62, 2  ;;  %v17515_v55 = vrot.slane %v14174_v54, 2  ;;  %v14849_v36 = vadd.f32 %v1223_v42, %v1200_v6  ;;  %11605 = vmatmul.mubr.msk.f32.gmra.mxu0 %vm1475_vm3, %v14821_v26  ;;  %v17517_v43 = vld [vmem:[#allocation123_spill] sm:$0xff]  ;;  %v17521_v54 = vld [vmem:[#allocation124_spill] sm:$0xff] }
 0x151   :  { %v473_v2 = vsel %vm388_vm1, %v17507_v19, %v17506_v53  ;;  %v512_v41 = vsel %vm388_vm1, %v17509_v24, %v17508_v12  ;;  %11607 = vmatprep.mubr.msk.f32.mxu0 %vm13449_vm0, %v17382_v35  ;;  %v17522_v6 = vld [vmem:[#allocation118_spill] sm:$0xff]  ;;  %v1278_v26 = vmul.f32 %v13700_v46, %v17498_v34  ;;  %v17529_v62 = vld [vmem:[#allocation100_spill] sm:$0xff]  ;;  %v17533_v24 = vld [vmem:[#allocation95_spill] sm:$0xff] }
 0x152   :  { %v702_v59 = vsel %vm388_vm1, %v17513_v5, %v17511_v18  ;;  %v737_v17 = vsel %vm388_vm1, %v17515_v55, %v17514_v44  ;;  %17516 = vst [vmem:[#allocation81_spill] sm:$0xff] %v14849_v36  ;;  %v486_v12 = vadd.f32 %v473_v2, %v447_v11  ;;  %v14856_v5 = vpop.permute.xlu0 %531  ;;  %v14858_v18 = vpop.permute.xlu1 %313  ;;  %v961_v42 = vadd.f32 %v17522_v6, %v17521_v54  ;;  %v17525_v11 = vld [vmem:[#allocation129_spill] sm:$0xff]  ;;  %v17526_v36 = vld [vmem:[#allocation99_spill] sm:$0xff] }
 0x153   :  { %v715_v19 = vadd.f32 %v702_v59, %v680_v14  ;;  %17519 = vst [vmem:[#allocation83_spill] sm:$0xff] %v14856_v5  ;;  %17520 = vst [vmem:[#allocation74_spill] sm:$0xff] %v14858_v18  ;;  %v17523_v44 = vrot.slane %v14656_v3, 2  ;;  %v17524_v55 = vrot.slane %v14182_v52, 2  ;;  %v1005_v14 = vmul.f32 %v13662_v33, %v17498_v34 }
 0x154   :  { %v525_v9 = vadd.f32 %v512_v41, %v486_v12  ;;  %v17527_v54 = vrot.slane %v17526_v36, 4  ;;  %v17528_v6 = vrot.slane %v17421_v40, 4  ;;  %v17530_v2 = vrot.slane %v17529_v62, 4  ;;  %v17532_v12 = vld [vmem:[#allocation126_spill] sm:$0xff] }
 0x155   :  { %v983_v59 = vsel %vm388_vm1, %v17524_v55, %v17523_v44  ;;  %v750_v53 = vadd.f32 %v737_v17, %v715_v19  ;;  %v1006_v44 = vmul.f32 %v14856_v5, %v13662_v33  ;;  %v17531_v41 = vrot.slane %v17449_v57, 4 }
 0x156   :  { %v774_v52 = vsel %vm552_vm2, %v17528_v6, %v17527_v54  ;;  %v996_v3 = vadd.f32 %v983_v59, %v961_v42  ;;  %v1269_v19 = vadd.f32 %v1256_v58, %v17532_v12  ;;  %v17534_v23 = vrot.slane %v17533_v24, 4  ;;  %v17536_v54 = vld [vmem:[#allocation82_spill] sm:$0xff] }
 0x157   :  { %v789_v55 = vadd.f32 %v774_v52, %v750_v53  ;;  %v1020_v17 = vsel %vm552_vm2, %v17531_v41, %v17530_v2  ;;  %v17535_v36 = vrot.slane %v17418_v0, 4  ;;  %v17537_v42 = vrot.slane %v17536_v54, 4  ;;  %v17539_v52 = vld [vmem:[#allocation101_spill] sm:$0xff] }
 0x158   :  { %v17538_v59 = vrot.slane %v17424_v16, 4  ;;  %v1035_v6 = vadd.f32 %v1020_v17, %v996_v3  ;;  %v17540_v62 = vrot.slane %v17539_v52, 4  ;;  %v17541_v57 = vrot.slane %v17454_v7, 4  ;;  %v17545_v3 = vld [vmem:[#allocation58_spill] sm:$0xff]  ;;  %v17547_v7 = vld [vmem:[#allocation84_spill] sm:$0xff] }
 0x159   :  { %v559_v40 = vsel %vm552_vm2, %v17535_v36, %v17534_v23  ;;  %v1279_v58 = vmul.f32 %v14856_v5, %v13700_v46  ;;  %v17542_v36 = vrot.slane %v14817_v45, 4  ;;  %v17543_v23 = vrot.slane %v17517_v43, 4 }
 0x15a   :  { %v817_v53 = vsel %vm552_vm2, %v17538_v59, %v17537_v42  ;;  %v1293_v2 = vsel %vm552_vm2, %v17541_v57, %v17540_v62  ;;  %v574_v41 = vadd.f32 %v559_v40, %v525_v9  ;;  %v1294_v17 = vrot.slane %v17545_v3, 4  ;;  %v14913_v42 = vpop.permute.xlu1 %353  ;;  %v17550_v9 = vld [vmem:[#allocation86_spill] sm:$0xff] }
 0x15b   :  { %v832_v0 = vadd.f32 %v817_v53, %v789_v55  ;;  %v1308_v12 = vadd.f32 %v1293_v2, %v1269_v19  ;;  %v14910_v16 = vsel %vm552_vm2, %v17543_v23, %v17542_v36  ;;  %17546 = vst [vmem:[#allocation88_spill] sm:$0xff] %v14913_v42  ;;  %v17548_v59 = vrot.slane %v17547_v7, 4 }
 0x15c   :  { %17544 = vst [vmem:[#allocation75_spill] sm:$0xff] %v14910_v16  ;;  %v17549_v62 = vrot.slane %v17463_v56, 4  ;;  %v17551_v55 = vrot.slane %v17550_v9, 4  ;;  %v17552_v19 = vrot.slane %v17466_v22, 4  ;;  %v1023_v53 = vrot.slane %v1005_v14, 4 }
 0x15d   :  { %v1435_v2 = vmax.f32 %v574_v41, %v832_v0  ;;  %v17553_v3 = vrot.slane %v14825_v39, 4  ;;  %v17554_v45 = vrot.slane %v17518_v4, 4  ;;  %v1296_v56 = vrot.slane %v1278_v26, 4  ;;  %v1392_v0 = vpop.permute.xlu0 %1391 }
 0x15e   :  { %v1059_v57 = vsel %vm552_vm2, %v17549_v62, %v17548_v59  ;;  %v1332_v40 = vsel %vm552_vm2, %v17552_v19, %v17551_v55  ;;  %v1025_v16 = vrot.slane %v1006_v44, 4  ;;  %v17555_v59 = vld [vmem:[#allocation109_spill] sm:$0xff]  ;;  %v17557_v7 = vrot.slane %v17470_v48, 4  ;;  %v17562_v44 = vld [vmem:[#allocation107_spill] sm:$0xff] }
 0x15f   :  { %v1074_v36 = vadd.f32 %v1059_v57, %v1035_v6  ;;  %v1347_v23 = vadd.f32 %v1332_v40, %v1308_v12  ;;  %v14930_v5 = vsel %vm552_vm2, %v17554_v45, %v17553_v3  ;;  %v17556_v62 = vrot.slane %v17555_v59, 4  ;;  %v14938_v6 = vld [vmem:[#allocation6 + $0x8] ss:$0 sm:$0xff]  ;;  %v17560_v12 = vld [vmem:[#allocation60_spill] sm:$0xff] }
 0x160   :  { %v1298_v55 = vrot.slane %v1279_v58, 4  ;;  %v1447_v14 = vadd.f32 %v14424_v8, %v1435_v2  ;;  %17558 = vst [vmem:[#allocation97_spill] sm:$0xff] %v14938_v6  ;;  %v14942_v41 = vmul.f32 %v14938_v6, %v14913_v42  ;;  %v14946_v26 = vmul.f32 %v14938_v6, %v17560_v12 }
 0x161   :  { %v1371_v22 = vsel %vm552_vm2, %v17557_v7, %v17556_v62  ;;  %v17563_v57 = vrot.slane %v17562_v44, 4  ;;  %v17564_v48 = vrot.slane %v17473_v47, 4  ;;  %v17565_v7 = vrot.slane %v14729_v20, 4 }
 0x162   :  { %17559 = vst [vmem:[#allocation110_spill] sm:$0xff] %v14942_v41  ;;  %v1386_v45 = vadd.f32 %v1371_v22, %v1347_v23  ;;  %17561 = vst [vmem:[#allocation39_spill] sm:$0xff] %v14946_v26  ;;  %v17566_v19 = vrot.slane %v17476_v21, 4  ;;  %v14960_v2 = vmul.f32 %v13700_v46, %v14791_v13  ;;  %v14962_v23 = vmax.f32 %v1447_v14, 0.0 }
 0x163   :  { %v1102_v58 = vsel %vm552_vm2, %v17564_v48, %v17563_v57  ;;  %v14966_v22 = vmul.f32 %v13662_v33, %v14858_v18  ;;  %v17570_v47 = vrot.slane %v17525_v11, 4  ;;  %v17571_v21 = vrot.slane %v17539_v52, 4  ;;  %v17606_v11 = vld [vmem:[#allocation70_spill] sm:$0xff] }
 0x164   :  { %v1414_v40 = vsel %vm552_vm2, %v17566_v19, %v17565_v7  ;;  %17567 = vst [vmem:[#allocation103_spill] sm:$0xff] %v14960_v2  ;;  %17568 = vst [vmem:[#allocation112_spill] sm:$0xff] %v14962_v23  ;;  %v1117_v3 = vadd.f32 %v1102_v58, %v1074_v36  ;;  %v14979_v48 = vmul.f32 %v14938_v6, %v1392_v0  ;;  %11631 = vmatmul.mubr.msk.f32.gmra.mxu1 %vm1475_vm3, %v14962_v23 }
 0x165   :  { %v1429_v62 = vadd.f32 %v1414_v40, %v1386_v45  ;;  %17569 = vst [vmem:[#allocation41_spill] sm:$0xff] %v14966_v22  ;;  %v14971_v12 = vsel %vm552_vm2, %v17570_v47, %v1023_v53  ;;  %v14976_v57 = vsel %vm552_vm2, %v17571_v21, %v1294_v17  ;;  %v14983_v36 = vmul.f32 %v13660_v32, %v14791_v13  ;;  %v17578_v47 = vld [vmem:[#allocation63_spill] sm:$0xff] }
 0x166   :  { %17572 = vst [vmem:[#allocation111_spill] sm:$0xff] %v14976_v57  ;;  %17573 = vst [vmem:[#allocation76_spill] sm:$0xff] %v14979_v48  ;;  %v14986_v14 = vsel %vm552_vm2, %v1294_v17, %v1296_v56  ;;  %v17059_v45 = vrot.slane %v14942_v41, 4  ;;  %v14993_v52 = vmul.f32 %v13700_v46, %v14858_v18  ;;  %v14996_v0 = vsel %vm552_vm2, %v1023_v53, %v1025_v16 }
 0x167   :  { %17574 = vst [vmem:[#allocation125_spill] sm:$0xff] %v14983_v36  ;;  %v1459_v58 = vmax.f32 %v1117_v3, %v1429_v62  ;;  %v14999_v7 = vsel %vm552_vm2, %v1296_v56, %v1298_v55  ;;  %v17060_v19 = vrot.slane %v14946_v26, 4  ;;  %11633 = vmatprep.mubr.msk.f32.mxu1 %vm13449_vm0, %v17382_v35  ;;  %v15006_v17 = vmul.f32 %v14938_v6, %v14791_v13 }
 0x168   :  { %17575 = vst [vmem:[#allocation43_spill] sm:$0xff] %v14993_v52  ;;  %v15013_v16 = vmul.f32 %v13718_v51, %v14913_v42  ;;  %v15019_v55 = vmul.f32 %v13662_v33, %v14913_v42  ;;  %v15023_v21 = vmul.f32 %v14938_v6, %v17578_v47  ;;  %v853_v56 = vmul.f32 %v14913_v42, %v13673_v38 }
 0x169   :  { %17576 = vst [vmem:[#allocation78_spill] sm:$0xff] %v15006_v17  ;;  %v1465_v40 = vadd.f32 %v14424_v8, %v1459_v58  ;;  %v15030_v58 = vsel %vm552_vm2, %v17060_v19, %v17059_v45  ;;  %v900_v39 = vmul.f32 %v13658_v31, %v14791_v13  ;;  %v15042_v23 = vmul.f32 %v13660_v32, %v14858_v18 }
 0x16a   :  { %17577 = vst [vmem:[#allocation44_spill] sm:$0xff] %v15019_v55  ;;  %17579 = vst [vmem:[#allocation85_spill] sm:$0xff] %v15030_v58  ;;  %v15046_v45 = vmul.f32 %v13718_v51, %v14791_v13  ;;  %v17582_v19 = vrot.slane %v14533_v49, 2  ;;  %v17583_v53 = vrot.slane %v14966_v22, 2  ;;  %v17584_v58 = vrot.slane %v14747_v10, 2 }
 0x16b   :  { %v15032_v62 = vmax.f32 %v1465_v40, 0.0  ;;  %v17581_v40 = vrot.slane %v14960_v2, 2  ;;  %v841_v8 = vmul.f32 %v14858_v18, %v13670_v37  ;;  %v17586_v2 = vrot.slane %v14505_v28, 2 }
 0x16c   :  { %v15060_v41 = vsel %vm388_vm1, %v17584_v58, %v17583_v53  ;;  %v15074_v22 = vmul.f32 %v13718_v51, %v17578_v47  ;;  %v17588_v53 = vrot.slane %v14993_v52, 2  ;;  %v17589_v58 = vrot.slane %v14752_v25, 2 }
 0x16d   :  { %17580 = vst [vmem:[#allocation89_spill] sm:$0xff] %v15032_v62  ;;  %11608 = vmatmul.mubr.msk.f32.gmra.mxu0 %vm1475_vm3, %v15032_v62  ;;  %v438_v3 = vsel %vm388_vm1, %v17582_v19, %v17581_v40  ;;  %v17585_v62 = vrot.slane %v14983_v36, 2  ;;  %v17073_v40 = vrot.slane %v15023_v21, 4  ;;  %v859_v28 = vadd.f32 %v853_v56, %v841_v8 }
 0x16e   :  { %17587 = vst [vmem:[#allocation90_spill] sm:$0xff] %v15074_v22  ;;  %11610 = vmatprep.mubr.msk.f32.mxu0 %vm13449_vm0, %v17382_v35  ;;  %v706_v48 = vsel %vm388_vm1, %v17589_v58, %v17588_v53  ;;  %v17591_v19 = vrot.slane %v15006_v17, 4  ;;  %v916_v52 = vrot.slane %v900_v39, 2  ;;  %v951_v35 = vrot.slane %v15042_v23, 2  ;;  %v17593_v39 = vld [vmem:[#allocation73_spill] sm:$0xff] }
 0x16f   :  { %v671_v20 = vsel %vm388_vm1, %v17586_v2, %v17585_v62  ;;  %v970_v2 = vmul.f32 %v13700_v46, %v14913_v42  ;;  %v15087_v62 = vmul.f32 %v13660_v32, %v17498_v34  ;;  %v1173_v8 = vmul.f32 %v13655_v30, %v14791_v13 }
 0x170   :  { %v15094_v36 = vsel %vm552_vm2, %v17073_v40, %v17591_v19  ;;  %v15102_v46 = vmul.f32 %v13658_v31, %v14858_v18  ;;  %v15106_v56 = vmul.f32 %v13660_v32, %v14913_v42  ;;  %v15110_v19 = vmul.f32 %v13658_v31, %v17498_v34 }
 0x171   :  { %17590 = vst [vmem:[#allocation116_spill] sm:$0xff] %v15087_v62  ;;  %v15115_v23 = vmul.f32 %v13662_v33, %v17578_v47  ;;  %v15119_v58 = vmul.f32 %v13662_v33, %v14791_v13  ;;  %v865_v40 = vmul.f32 %v13655_v30, %v17498_v34  ;;  %v986_v53 = vrot.slane %v970_v2, 2 }
 0x172   :  { %17592 = vst [vmem:[#allocation115_spill] sm:$0xff] %v15110_v19  ;;  %v1126_v32 = vmul.f32 %v14913_v42, %v13670_v37  ;;  %v17594_v26 = vrot.slane %v17593_v39, 2  ;;  %v17595_v59 = vrot.slane %v14734_v50, 2  ;;  %v17596_v57 = vrot.slane %v15046_v45, 4  ;;  %v15142_v39 = vpop.permute.xlu1 %794 }
 0x173   :  { %v17597_v30 = vrot.slane %v15074_v22, 4  ;;  %v881_v42 = vrot.slane %v865_v40, 2  ;;  %v1189_v37 = vrot.slane %v1173_v8, 2  ;;  %v1224_v17 = vrot.slane %v15102_v46, 2  ;;  %v17605_v22 = vld [vmem:[#allocation55_spill] sm:$0xff] }
 0x174   :  { %v917_v47 = vsel %vm388_vm1, %v17594_v26, %v916_v52  ;;  %v952_v13 = vsel %vm388_vm1, %v17595_v59, %v951_v35  ;;  %v1259_v31 = vrot.slane %v15106_v56, 2  ;;  %v17598_v26 = vrot.slane %v15110_v19, 2  ;;  %v17603_v56 = vld [vmem:[#allocation122_spill] sm:$0xff] }
 0x175   :  { %v15138_v2 = vsel %vm552_vm2, %v17597_v30, %v17596_v57  ;;  %v17599_v50 = vrot.slane %v14276_v29, 2  ;;  %v1333_v6 = vrot.slane %v15115_v23, 4  ;;  %v1335_v18 = vrot.slane %v15119_v58, 4  ;;  %v17600_v57 = vld [vmem:[#allocation128_spill] sm:$0xff] }
 0x176   :  { %v17601_v40 = vrot.slane %v17600_v57, 2  ;;  %v17602_v46 = vrot.slane %v15087_v62, 2  ;;  %v17604_v44 = vrot.slane %v17603_v56, 2  ;;  %v17095_v29 = vrot.slane %v17605_v22, 2 }
 0x177   :  { %v636_v59 = vsel %vm388_vm1, %v17599_v50, %v17598_v26  ;;  %v894_v50 = vadd.f32 %v881_v42, %v859_v28  ;;  %v17096_v58 = vrot.slane %v17606_v11, 2 }
 0x178   :  { %v647_v30 = vadd.f32 %v636_v59, %v14794_v1  ;;  %v882_v8 = vsel %vm388_vm1, %v17601_v40, %v881_v42  ;;  %v399_v19 = vsel %vm388_vm1, %v17604_v44, %v17602_v46  ;;  %v1045_v1 = vmul.f32 %v15142_v39, %v13718_v51  ;;  %v17608_v42 = vld [vmem:[#allocation68_spill] sm:$0xff] }
 0x179   :  { %v893_v26 = vadd.f32 %v882_v8, %v14789_v15  ;;  %v1138_v59 = vmul.f32 %v13673_v38, %v17498_v34  ;;  %v410_v57 = vadd.f32 %v399_v19, %v14784_v63  ;;  %v17607_v40 = vrot.slane %v15019_v55, 2  ;;  %v17611_v19 = vld [vmem:[#allocation67_spill] sm:$0xff] }
 0x17a   :  { %v682_v23 = vadd.f32 %v671_v20, %v647_v30  ;;  %v929_v15 = vadd.f32 %v916_v52, %v894_v50  ;;  %v17609_v20 = vrot.slane %v17608_v42, 2  ;;  %v987_v8 = vsel %vm388_vm1, %v17096_v58, %v986_v53  ;;  %v17613_v50 = vld [vmem:[#allocation66_spill] sm:$0xff]  ;;  %v17615_v58 = vld [vmem:[#allocation64_spill] sm:$0xff] }
 0x17b   :  { %v741_v44 = vsel %vm388_vm1, %v17095_v29, %v17607_v40  ;;  %v928_v46 = vadd.f32 %v917_v47, %v893_v26  ;;  %v1154_v56 = vrot.slane %v1138_v59, 2  ;;  %v449_v62 = vadd.f32 %v438_v3, %v410_v57 }
 0x17c   :  { %v1190_v28 = vsel %vm388_vm1, %v17609_v20, %v1189_v37  ;;  %v717_v30 = vadd.f32 %v706_v48, %v682_v23  ;;  %v17610_v63 = vrot.slane %v15013_v16, 2  ;;  %v17612_v55 = vrot.slane %v17611_v19, 2 }
 0x17d   :  { %v963_v40 = vadd.f32 %v952_v13, %v928_v46  ;;  %v964_v47 = vadd.f32 %v951_v35, %v929_v15  ;;  %v1064_v26 = vrot.slane %v1045_v1, 4  ;;  %v17614_v42 = vrot.slane %v17613_v50, 2  ;;  %v17617_v1 = vld [vmem:[#allocation56_spill] sm:$0xff] }
 0x17e   :  { %v516_v34 = vsel %vm388_vm1, %v17612_v55, %v17610_v63  ;;  %v752_v52 = vadd.f32 %v741_v44, %v717_v30  ;;  %v1167_v23 = vadd.f32 %v1154_v56, %v1126_v32  ;;  %v1318_v3 = vmul.f32 %v15142_v39, %v13662_v33 }
 0x17f   :  { %v1155_v48 = vsel %vm388_vm1, %v17614_v42, %v1154_v56  ;;  %v998_v20 = vadd.f32 %v987_v8, %v963_v40  ;;  %v999_v29 = vadd.f32 %v986_v53, %v964_v47  ;;  %v17616_v57 = vrot.slane %v14737_v61, 2  ;;  %v17627_v42 = vld [vmem:[#allocation57_spill] sm:$0xff] }
 0x180   :  { %v1166_v59 = vadd.f32 %v1155_v48, %v17615_v58  ;;  %v1336_v35 = vsel %vm552_vm2, %v1333_v6, %v1335_v18  ;;  %v1202_v13 = vadd.f32 %v1189_v37, %v1167_v23  ;;  %v1257_v44 = vrot.slane %v17617_v1, 2  ;;  %v17628_v48 = vld [vmem:[#allocation61_spill] sm:$0xff] }
 0x181   :  { %v1225_v55 = vsel %vm388_vm1, %v17616_v57, %v1224_v17  ;;  %v488_v46 = vadd.f32 %v15060_v41, %v449_v62  ;;  %v791_v32 = vadd.f32 %v14930_v5, %v752_v52  ;;  %v1038_v53 = vadd.f32 %v14996_v0, %v999_v29 }
 0x182   :  { %v1201_v15 = vadd.f32 %v1190_v28, %v1166_v59  ;;  %v1037_v58 = vadd.f32 %v14971_v12, %v998_v20  ;;  %v17618_v33 = vrot.slane %v15046_v45, 4  ;;  %v1237_v30 = vadd.f32 %v1224_v17, %v1202_v13  ;;  %v17623_v17 = vld [vmem:[#allocation104_spill] sm:$0xff]  ;;  %v17630_v20 = vld [vmem:[#allocation105_spill] sm:$0xff] }
 0x183   :  { %v1260_v8 = vsel %vm388_vm1, %v1257_v44, %v1259_v31  ;;  %v527_v56 = vadd.f32 %v516_v34, %v488_v46  ;;  %v1337_v40 = vrot.slane %v1318_v3, 4  ;;  %v17619_v41 = vrot.slane %v14704_v27, 2 }
 0x184   :  { %v1065_v61 = vsel %vm552_vm2, %v17618_v33, %v1064_v26  ;;  %v1236_v63 = vadd.f32 %v1225_v55, %v1201_v15  ;;  %v1272_v62 = vadd.f32 %v1259_v31, %v1237_v30  ;;  %v17620_v0 = vrot.slane %v14533_v49, 2  ;;  %v17626_v31 = vld [vmem:[#allocation65_spill] sm:$0xff]  ;;  %v17633_v55 = vld [vmem:[#allocation72_spill] sm:$0xff] }
 0x185   :  { %v1077_v37 = vadd.f32 %v1065_v61, %v1038_v53  ;;  %v1258_v5 = vsel %vm388_vm1, %v17619_v41, %v1257_v44  ;;  %v17621_v12 = vrot.slane %v17490_v60, 2  ;;  %v17622_v29 = vrot.slane %v14747_v10, 2 }
 0x186   :  { %v17624_v28 = vrot.slane %v17623_v17, 2  ;;  %v834_v47 = vadd.f32 %v15094_v36, %v791_v32  ;;  %v1271_v52 = vadd.f32 %v1260_v8, %v1236_v63  ;;  %v17625_v27 = vrot.slane %v17550_v9, 4  ;;  %v17645_v8 = vld [vmem:[#allocation79_spill] sm:$0xff]  ;;  %v17646_v63 = vld [vmem:[#allocation113_spill] sm:$0xff]  ;;  %v17652_v17 = vld [vmem:[#allocation100_spill] sm:$0xff] }
 0x187   :  { %v436_v45 = vsel %vm388_vm1, %v17621_v12, %v17620_v0  ;;  %v1076_v49 = vadd.f32 %v15138_v2, %v1037_v58  ;;  %v1311_v60 = vadd.f32 %v14999_v7, %v1272_v62  ;;  %v681_v10 = vadd.f32 %v17628_v48, %v17627_v42  ;;  %v17641_v58 = vld [vmem:[#allocation99_spill] sm:$0xff]  ;;  %v17648_v0 = vld [vmem:[#allocation62_spill] sm:$0xff] }
 0x188   :  { %v475_v34 = vsel %vm388_vm1, %v17624_v28, %v17622_v29  ;;  %v1334_v26 = vsel %vm552_vm2, %v17625_v27, %v1333_v6  ;;  %v448_v50 = vadd.f32 %v436_v45, %v17626_v31  ;;  %v17629_v23 = vrot.slane %v14752_v25, 2  ;;  %v17650_v45 = vld [vmem:[#allocation129_spill] sm:$0xff]  ;;  %v17656_v31 = vld [vmem:[#allocation84_spill] sm:$0xff]  ;;  %v17660_v42 = vld [vmem:[#allocation107_spill] sm:$0xff] }
 0x189   :  { %v17631_v59 = vrot.slane %v17630_v20, 2  ;;  %v1310_v3 = vadd.f32 %v14986_v14, %v1271_v52  ;;  %v1338_v9 = vsel %vm552_vm2, %v1335_v18, %v1337_v40  ;;  %v17632_v57 = vrot.slane %v17611_v19, 2  ;;  %v17638_v14 = vld [vmem:[#allocation69_spill] sm:$0xff]  ;;  %v17654_v52 = vld [vmem:[#allocation90_spill] sm:$0xff] }
 0x18a   :  { %v487_v6 = vadd.f32 %v475_v34, %v448_v50  ;;  %v17634_v2 = vrot.slane %v17633_v55, 2  ;;  %v1350_v13 = vadd.f32 %v1338_v9, %v1311_v60  ;;  %v17635_v1 = vrot.slane %v17517_v43, 4  ;;  %v17658_v60 = vld [vmem:[#allocation98_spill] sm:$0xff]  ;;  %v17664_v9 = vld [vmem:[#allocation97_spill] sm:$0xff] }
 0x18b   :  { %v704_v36 = vsel %vm388_vm1, %v17631_v59, %v17629_v23  ;;  %v17636_v25 = vrot.slane %v17533_v24, 4  ;;  %v17637_v32 = vrot.slane %v17605_v22, 2  ;;  %v17639_v53 = vrot.slane %v17638_v14, 2  ;;  %v17662_v23 = vld [vmem:[#allocation81_spill] sm:$0xff] }
 0x18c   :  { %v514_v7 = vsel %vm388_vm1, %v17634_v2, %v17632_v57  ;;  %v716_v46 = vadd.f32 %v704_v36, %v681_v10  ;;  %v17640_v19 = vrot.slane %v17518_v4, 4  ;;  %v17642_v33 = vrot.slane %v17641_v58, 4  ;;  %v17665_v2 = vld [vmem:[#allocation111_spill] sm:$0xff] }
 0x18d   :  { %v561_v44 = vsel %vm552_vm2, %v17636_v25, %v17635_v1  ;;  %v739_v18 = vsel %vm388_vm1, %v17639_v53, %v17637_v32  ;;  %v526_v15 = vadd.f32 %v514_v7, %v487_v6  ;;  %v17643_v43 = vrot.slane %v15023_v21, 4  ;;  %v17666_v53 = vld [vmem:[#allocation75_spill] sm:$0xff] }
 0x18e   :  { %v776_v61 = vsel %vm552_vm2, %v17642_v33, %v17640_v19  ;;  %v17644_v24 = vrot.slane %v17536_v54, 4  ;;  %v962_v22 = vadd.f32 %v17646_v63, %v17645_v8  ;;  %v1349_v40 = vadd.f32 %v1336_v35, %v1310_v3  ;;  %v1080_v54 = vpop.permute.xlu1 %1079  ;;  %v17663_v3 = vld [vmem:[#allocation74_spill] sm:$0xff]  ;;  %v17667_v33 = vld [vmem:[#allocation40_spill] sm:$0xff]  ;;  %v17671_v63 = vld [vmem:[#allocation39_spill] sm:$0xff] }
 0x18f   :  { %v751_v41 = vadd.f32 %v739_v18, %v716_v46  ;;  %v17647_v62 = vrot.slane %v17606_v11, 2  ;;  %v17649_v12 = vrot.slane %v17648_v0, 2  ;;  %v17651_v29 = vrot.slane %v17650_v45, 4 }
 0x190   :  { %v819_v30 = vsel %vm552_vm2, %v17644_v24, %v17643_v43  ;;  %v17653_v28 = vrot.slane %v17652_v17, 4  ;;  %v17655_v27 = vrot.slane %v17654_v52, 4  ;;  %v17657_v50 = vrot.slane %v17656_v31, 4  ;;  %v17669_v43 = vld [vmem:[#allocation109_spill] sm:$0xff]  ;;  %v17677_v17 = vld [vmem:[#allocation54_spill] sm:$0xff] }
 0x191   :  { %v985_v4 = vsel %vm388_vm1, %v17649_v12, %v17647_v62  ;;  %v17659_v11 = vrot.slane %v17658_v60, 4  ;;  %v17661_v48 = vrot.slane %v17660_v42, 4  ;;  %v1270_v20 = vadd.f32 %v1258_v5, %v17662_v23  ;;  %v17680_v60 = vld [vmem:[#allocation110_spill] sm:$0xff] }
 0x192   :  { %v1022_v21 = vsel %vm552_vm2, %v17653_v28, %v17651_v29  ;;  %v997_v34 = vadd.f32 %v985_v4, %v962_v22  ;;  %v1061_v35 = vsel %vm552_vm2, %v17657_v50, %v17655_v27  ;;  %v575_v59 = vadd.f32 %v561_v44, %v526_v15  ;;  %v17678_v50 = vld [vmem:[#allocation76_spill] sm:$0xff] }
 0x193   :  { %v1104_v10 = vsel %vm552_vm2, %v17661_v48, %v17659_v11  ;;  %v790_v36 = vadd.f32 %v776_v61, %v751_v41  ;;  %v1087_v6 = vmul.f32 %v17664_v9, %v17663_v3  ;;  %v1356_v57 = vmul.f32 %v13718_v51, %v17663_v3  ;;  %v17673_v41 = vld [vmem:[#allocation38_spill] sm:$0xff] }
 0x194   :  { %v1036_v55 = vadd.f32 %v1022_v21, %v997_v34  ;;  %v1309_v7 = vadd.f32 %v17665_v2, %v1270_v20  ;;  %v1088_v1 = vmul.f32 %v17664_v9, %v1080_v54  ;;  %v1357_v25 = vmul.f32 %v1080_v54, %v13718_v51  ;;  %v17682_v20 = vld [vmem:[#allocation85_spill] sm:$0xff] }
 0x195   :  { %v833_v46 = vadd.f32 %v819_v30, %v790_v36  ;;  %v1105_v32 = vrot.slane %v1087_v6, 4  ;;  %v1374_v14 = vrot.slane %v1356_v57, 4  ;;  %v576_v5 = vadd.f32 %v17666_v53, %v527_v56 }
 0x196   :  { %v1075_v44 = vadd.f32 %v1061_v35, %v1036_v55  ;;  %v1348_v18 = vadd.f32 %v1334_v26, %v1309_v7  ;;  %v1107_v15 = vrot.slane %v1088_v1, 4  ;;  %v1376_v19 = vrot.slane %v1357_v25, 4  ;;  %v179_v7 = vld [vmem:[%s16898_s3 + $0x58] sm:$0xff] }
 0x197   :  { %v1436_v58 = vmax.f32 %v575_v59, %v833_v46  ;;  %v17668_v61 = vrot.slane %v17667_v33, 4  ;;  %v17670_v24 = vrot.slane %v17669_v43, 4  ;;  %v17672_v22 = vrot.slane %v17671_v63, 4  ;;  %v17684_v1 = vld [vmem:[#allocation77_spill] sm:$0xff]  ;;  %v17690_v33 = vld [vmem:[#allocation87_spill] sm:$0xff]  ;;  %v17691_v43 = vld [vmem:[#allocation50_spill] sm:$0xff] }
 0x198   :  { %v17674_v62 = vrot.slane %v17673_v41, 4  ;;  %v1437_v0 = vmax.f32 %v576_v5, %v834_v47  ;;  %v17675_v56 = vmov %v17659_v11  ;;  %v1108_v29 = vsel %vm552_vm2, %v1105_v32, %v1107_v15  ;;  %v17685_v25 = vld [vmem:[#allocation37_spill] sm:$0xff]  ;;  %v17687_v5 = vld [vmem:[#allocation91_spill] sm:$0xff]  ;;  %v178_v15 = vld [vmem:[%s16898_s3 + $0x50] sm:$0xff] }
 0x199   :  { %v1373_v8 = vsel %vm552_vm2, %v17670_v24, %v17668_v61  ;;  %v1106_v26 = vsel %vm552_vm2, %v17675_v56, %v1105_v32  ;;  %v17676_v4 = vmov %v17668_v61  ;;  %v1448_v28 = vadd.f32 %v17677_v17, %v1436_v58  ;;  %v17686_v32 = vld [vmem:[#allocation59_spill] sm:$0xff]  ;;  %v17689_v58 = vld [vmem:[#allocation53_spill] sm:$0xff]  ;;  %v17692_v24 = vld [vmem:[#allocation88_spill] sm:$0xff] }
 0x19a   :  { %v1416_v30 = vsel %vm552_vm2, %v17674_v62, %v17672_v22  ;;  %v1387_v12 = vadd.f32 %v1373_v8, %v1348_v18  ;;  %v1375_v45 = vsel %vm552_vm2, %v17676_v4, %v1374_v14  ;;  %v15306_v21 = vadd.f32 %v1108_v29, %v1077_v37  ;;  %v17693_v22 = vld [vmem:[#allocation89_spill] sm:$0xff]  ;;  %v17694_v62 = vld [vmem:[#allocation52_spill] sm:$0xff]  ;;  %v177_v56 = vld [vmem:[%s16898_s3 + $0x48] sm:$0xff] }
 0x19b   :  { %v1377_v54 = vsel %vm552_vm2, %v1374_v14, %v1376_v19  ;;  %v1388_v34 = vadd.f32 %v1375_v45, %v1349_v40  ;;  %v1118_v52 = vadd.f32 %v1104_v10, %v1075_v44  ;;  %v1449_v31 = vadd.f32 %v17677_v17, %v1437_v0  ;;  %v17688_v44 = vld [vmem:[#allocation112_spill] sm:$0xff] }
 0x19c   :  { %v1430_v47 = vadd.f32 %v1416_v30, %v1387_v12  ;;  %v1389_v27 = vadd.f32 %v1377_v54, %v1350_v13  ;;  %v17679_v35 = vrot.slane %v17678_v50, 4  ;;  %v17681_v11 = vrot.slane %v17680_v60, 4  ;;  %v17698_v60 = vld [vmem:[#allocation125_spill] sm:$0xff] }
 0x19d   :  { %v15315_v48 = vmax.f32 %v1448_v28, 0.0  ;;  %v1119_v23 = vadd.f32 %v1106_v26, %v1076_v49  ;;  %v1431_v37 = vadd.f32 %v17682_v20, %v1388_v34  ;;  %v15322_v40 = vmax.f32 %v1449_v31, 0.0  ;;  %v17696_v34 = vld [vmem:[#allocation115_spill] sm:$0xff] }
 0x19e   :  { %v1420_v42 = vsel %vm552_vm2, %v17681_v11, %v17679_v35  ;;  %v1460_v59 = vmax.f32 %v1118_v52, %v1430_v47  ;;  %v17683_v57 = vmov 0.0   ;;  %v1687_v46 = vrot.slane %v17685_v25, 2 }
 0x19f   :  { %v15318_v36 = vadd.f32 %v1420_v42, %v1389_v27  ;;  %11634 = vmatmul.mubr.msk.f32.gmra.mxu1 %vm1475_vm3, %v15315_v48  ;;  %v1461_v13 = vmax.f32 %v1119_v23, %v1431_v37  ;;  %v1686_v14 = vrot.slane %v17686_v32, 2  ;;  %v1689_v18 = vrot.slane %v17688_v44, 2  ;;  %v183_v37 = vld [vmem:[%s16898_s3 + $0x78] sm:$0xff] }
 0x1a0   :  { %v1466_v10 = vadd.f32 %v17677_v17, %v1460_v59  ;;  %11636 = vmatprep.mubr.msk.f32.mxu1 %vm13449_vm0, %v17683_v57  ;;  %v595_v19 = vmul.f32 %v17663_v3, %v13673_v38  ;;  %v583_v61 = vmul.f32 %v17690_v33, %v17689_v58  ;;  %v607_v8 = vmul.f32 %v17692_v24, %v17691_v43  ;;  %v17700_v59 = vld [vmem:[#allocation116_spill] sm:$0xff] }
 0x1a1   :  { %v1462_v6 = vmax.f32 %v15306_v21, %v15318_v36  ;;  %v1467_v49 = vadd.f32 %v17677_v17, %v1461_v13  ;;  %v15357_v53 = vsel %vm388_vm1, %v1686_v14, %v1687_v46  ;;  %v15379_v63 = vsel %vm388_vm1, %v1687_v46, %v1689_v18  ;;  %v17695_v17 = vld [vmem:[#allocation51_spill] sm:$0xff] }
 0x1a2   :  { %v15330_v55 = vmax.f32 %v1466_v10, 0.0  ;;  %v1691_v41 = vrot.slane %v15315_v48, 2  ;;  %v245_v30 = vmul.f32 %v17689_v58, %v17694_v62  ;;  %v285_v0 = vmul.f32 %v13673_v38, %v17690_v33  ;;  %v17703_v46 = vld [vmem:[#allocation43_spill] sm:$0xff] }
 0x1a3   :  { %11637 = vmatmul.mubr.msk.f32.gmra.mxu1 %vm1475_vm3, %v15322_v40  ;;  %v15338_v2 = vmax.f32 %v1467_v49, 0.0  ;;  %v601_v12 = vadd.f32 %v595_v19, %v583_v61  ;;  %v325_v26 = vmul.f32 %v17691_v43, %v17663_v3  ;;  %v15407_v45 = vrot.slane %v15322_v40, 2  ;;  %v176_v3 = vld [vmem:[%s16898_s3 + $0x40] sm:$0xff]  ;;  %v17702_v49 = vld [vmem:[#allocation83_spill] sm:$0xff] }
 0x1a4   :  { %11611 = vmatmul.mubr.msk.f32.gmra.mxu0 %vm1475_vm3, %v15330_v55  ;;  %11670 = vmatprep.mubr.msk.f32.mxu1 %vm13449_vm0, %v17683_v57  ;;  %v15402_v4 = vsel %vm388_vm1, %v1689_v18, %v1691_v41  ;;  %v291_v29 = vadd.f32 %v285_v0, %v245_v30  ;;  %v365_v28 = vmul.f32 %v17695_v17, %v17692_v24  ;;  %v17697_v52 = vrot.slane %v17696_v34, 2  ;;  %v17705_v58 = vld [vmem:[#allocation103_spill] sm:$0xff] }
 0x1a5   :  { %11613 = vmatprep.mubr.msk.f32.mxu0 %vm13449_vm0, %v17683_v57  ;;  %v613_v38 = vadd.f32 %v607_v8, %v601_v12  ;;  %v1981_v27 = vrot.slane %v17687_v5, 2  ;;  %v15427_v31 = vsel %vm388_vm1, %v1691_v41, %v15407_v45  ;;  %v1980_v35 = vrot.slane %v17684_v1, 2  ;;  %v17707_v8 = vld [vmem:[#allocation44_spill] sm:$0xff] }
 0x1a6   :  { %v331_v54 = vadd.f32 %v325_v26, %v291_v29  ;;  %v17699_v11 = vrot.slane %v17698_v60, 2  ;;  %v1983_v20 = vrot.slane %v17693_v22, 2  ;;  %v17701_v13 = vrot.slane %v17700_v59, 2  ;;  %v17711_v26 = vld [vmem:[#allocation42_spill] sm:$0xff] }
 0x1a7   :  { %11671 = vmatmul.mubr.msk.f32.vlgmr.msra.gmra.mxu1 %vm1475_vm3, %v17684_v1  ;;  %v648_v47 = vadd.f32 %v17697_v52, %v613_v38  ;;  %v15442_v23 = vsel %vm388_vm1, %v1980_v35, %v1981_v27  ;;  %v17704_v14 = vrot.slane %v17703_v46, 2  ;;  %v1985_v19 = vrot.slane %v15330_v55, 2  ;;  %v17714_v52 = vld [vmem:[#allocation78_spill] sm:$0xff] }
 0x1a8   :  { %11614 = vmatmul.mubr.msk.f32.gmra.mxu0 %vm1475_vm3, %v15338_v2  ;;  %11673 = vmatprep.mubr.msk.f32.mxu1 %vm13449_vm0, %v17683_v57  ;;  %v371_v50 = vadd.f32 %v365_v28, %v331_v54  ;;  %v17706_v33 = vrot.slane %v17705_v58, 2  ;;  %v803_v24 = vmul.f32 %v17664_v9, %v15142_v39  ;;  %v17708_v41 = vrot.slane %v17707_v8, 2  ;;  %v17709_v39 = vld [vmem:[#allocation41_spill] sm:$0xff]  ;;  %v17716_v35 = vld [vmem:[#allocation102_spill] sm:$0xff] }
 0x1a9   :  { %11647 = vmatprep.mubr.msk.f32.mxu0 %vm13449_vm0, %v17683_v57  ;;  %11709 = vmatpush3.msra.mxu1 %v179_v7  ;;  %v683_v42 = vadd.f32 %v17699_v11, %v648_v47  ;;  %v15486_v30 = vsel %vm388_vm1, %v1983_v20, %v1985_v19  ;;  %v544_v0 = vmul.f32 %v17664_v9, %v17702_v49  ;;  %v17710_v12 = vrot.slane %v17709_v39, 2  ;;  %v181_v9 = vld [vmem:[%s16898_s3 + $0x68] sm:$0xff]  ;;  %v184_v58 = vld [vmem:[%s16898_s3 + $0x80] sm:$0xff] }
 0x1aa   :  { %11710 = vmatprep.subr.mxu1 %v17683_v57  ;;  %v411_v10 = vadd.f32 %v17701_v13, %v371_v50  ;;  %v17712_v38 = vrot.slane %v17711_v26, 4  ;;  %v822_v17 = vrot.slane %v803_v24, 4  ;;  %v17713_v54 = vrot.slane %v15013_v16, 2  ;;  %v180_v50 = vld [vmem:[%s16898_s3 + $0x60] sm:$0xff]  ;;  %v189_v39 = vld [vmem:[%s16898_s3 + $0xa8] sm:$0xff] }
 0x1ab   :  { %11674 = vmatmul.mubr.msk.f32.gmra.mxu1 %vm1475_vm3, %v17687_v5  ;;  %v718_v18 = vadd.f32 %v17704_v14, %v683_v42  ;;  %v17715_v47 = vrot.slane %v17714_v52, 4  ;;  %v17717_v60 = vrot.slane %v17716_v35, 4  ;;  %v2193_v13 = vrot.slane %v17688_v44, 4  ;;  %v188_v26 = vld [vmem:[%s16898_s3 + $0xa0] sm:$0xff] }
 0x1ac   :  { %11648 = vmatmul.mubr.msk.f32.vlgmr.msra.gmra.mxu0 %vm1475_vm3, %v15357_v53  ;;  %11676 = vmatprep.mubr.msk.f32.mxu1 %vm13449_vm0, %v17683_v57  ;;  %v450_v61 = vadd.f32 %v17706_v33, %v411_v10  ;;  %v12055_v10 = vld [vmem:[#allocation9] ss:$0 sm:$0xff]  ;;  %v2195_v46 = vrot.slane %v15315_v48, 4  ;;  %v2405_v8 = vrot.slane %v17693_v22, 4  ;;  %v2621_v52 = vrot.slane %v15322_v40, 6 }
 0x1ad   :  { %11686 = vmatpush3.msra.mxu0 %v179_v7  ;;  %11650 = vmatprep.mubr.msk.f32.mxu0 %vm13449_vm0, %v17683_v57  ;;  %v760_v7 = vmul.f32 %v17702_v49, %v13718_v51  ;;  %v182_v51 = vld [vmem:[%s16898_s3 + $0x70] sm:$0xff]  ;;  %v753_v62 = vadd.f32 %v17708_v41, %v718_v18  ;;  %v191_v41 = vld [vmem:[%s16898_s3 + $0xb8] sm:$0xff]  ;;  %v192_v35 = vld [vmem:[%s16898_s3 + $0xc0] sm:$0xff] }
 0x1ae   :  { %11687 = vmatprep.subr.mxu0 %v17683_v57  ;;  %11711 = vmatpush3.msra.mxu1 %v178_v15  ;;  %v15583_v18 = vsel %vm552_vm2, %v2193_v13, %v2195_v46 }
 0x1af   :  { %11677 = vmatmul.mubr.msk.f32.gmra.mxu1 %vm1475_vm3, %v17693_v22  ;;  %11688 = vmatpush3.msra.mxu0 %v178_v15  ;;  %v15464_v15 = vsel %vm388_vm1, %v1981_v27, %v1983_v20  ;;  %v779_v43 = vrot.slane %v760_v7, 4  ;;  %v823_v27 = vsel %vm552_vm2, %v17715_v47, %v822_v17  ;;  %v2190_v20 = vrot.slane %v17686_v32, 4  ;;  %v193_v47 = vld [vmem:[%s16898_s3 + $0xc8] sm:$0xff] }
 0x1b0   :  { %11651 = vmatmul.mubr.msk.f32.gmra.mxu0 %vm1475_vm3, %v15379_v63  ;;  %11679 = vmatprep.mubr.msk.f32.mxu1 %vm13449_vm0, %v17683_v57  ;;  %v2614_v17 = vrot.slane %v17686_v32, 6 }
 0x1b1   :  { %11653 = vmatprep.mubr.msk.f32.mxu0 %vm13449_vm0, %v17683_v57  ;;  %11689 = vmatprep.subr.mxu0 %v17683_v57  ;;  %v780_v29 = vsel %vm552_vm2, %v17712_v38, %v779_v43  ;;  %v2402_v43 = vrot.slane %v17684_v1, 4 }
 0x1b2   :  { %11712 = vmatprep.subr.mxu1 %v17683_v57  ;;  %11690 = vmatpush3.msra.mxu0 %v177_v56  ;;  %v792_v28 = vadd.f32 %v780_v29, %v753_v62  ;;  %v1468_v62 = vadd.f32 %v12055_v10, %v1462_v6  ;;  %v2409_v6 = vrot.slane %v15338_v2, 4  ;;  %v2615_v29 = vrot.slane %v17685_v25, 6 }
 0x1b3   :  { %11680 = vmatmul.mubr.msk.f32.gmra.mxu1 %vm1475_vm3, %v15330_v55  ;;  %11691 = vmatprep.subr.mxu0 %v17683_v57 }
 0x1b4   :  { %11654 = vmatmul.mubr.msk.f32.gmra.mxu0 %vm1475_vm3, %v15402_v4  ;;  %11713 = vmatpush3.msra.mxu1 %v177_v56  ;;  %v489_v56 = vadd.f32 %v17710_v12, %v450_v61  ;;  %v835_v16 = vadd.f32 %v823_v27, %v792_v28  ;;  %v2403_v61 = vrot.slane %v17687_v5, 4  ;;  %v15666_v21 = vmax.f32 %v1468_v62, 0.0  ;;  %v201_v62 = vld [vmem:[%s16898_s3 + $0x108] sm:$0xff] }
 0x1b5   :  { %11656 = vmatprep.mubr.msk.f32.mxu0 %vm13449_vm0, %v17683_v57  ;;  %11682 = vmatprep.mubr.msk.f32.mxu1 %vm13449_vm0, %v17683_v57  ;;  %v2617_v28 = vrot.slane %v17688_v44, 6 }
 0x1b6   :  { %11714 = vmatprep.subr.mxu1 %v17683_v57  ;;  %11692 = vmatpush3.msra.mxu0 %v176_v3  ;;  %v528_v34 = vadd.f32 %v17713_v54, %v489_v56  ;;  %v15632_v24 = vsel %vm552_vm2, %v2402_v43, %v2403_v61  ;;  %v2411_v56 = vrot.slane %v15666_v21, 4  ;;  %v194_v54 = vld [vmem:[%s16898_s3 + $0xd0] sm:$0xff] }
 0x1b7   :  { %11683 = vmatmul.mubr.msk.f32.gmra.mxu1 %vm1475_vm3, %v15338_v2  ;;  %11731 = vmatprep.subr.mxu0 %v17683_v57  ;;  %v15734_v32 = vsel %vm2613_vm4, %v2615_v29, %v2617_v28  ;;  %v202_v43 = vld [vmem:[%s16898_s3 + $0x110] sm:$0xff] }
 0x1b8   :  { %11657 = vmatmul.mubr.msk.f32.gmra.mxu0 %vm1475_vm3, %v15427_v31  ;;  %11715 = vmatpush3.msra.mxu1 %v176_v3  ;;  %v564_v3 = vrot.slane %v544_v0, 4  ;;  %v2407_v0 = vrot.slane %v15330_v55, 4  ;;  %v15703_v38 = vsel %vm552_vm2, %v2409_v6, %v2411_v56 }
 0x1b9   :  { %11659 = vmatprep.mubr.msk.f32.mxu0 %vm13449_vm0, %v17683_v57  ;;  %11716 = vmatprep.mubr.msk.f32.mxu1 %vm13449_vm0, %v17683_v57 }
 0x1ba   :  { %11754 = vmatprep.subr.mxu1 %v17683_v57  ;;  %v565_v11 = vsel %vm552_vm2, %v17717_v60, %v564_v3  ;;  %v15669_v36 = vsel %vm552_vm2, %v2405_v8, %v2407_v0  ;;  %v15686_v12 = vsel %vm552_vm2, %v2407_v0, %v2409_v6  ;;  %v2619_v3 = vrot.slane %v15315_v48, 6 }
 0x1bb   :  { %11717 = vmatmul.mubr.msk.f32.vlgmr.msra.gmra.mxu1 %vm1475_vm3, %v15442_v23  ;;  %v577_v42 = vadd.f32 %v565_v11, %v528_v34  ;;  %v2826_v11 = vrot.slane %v17687_v5, 6 }
 0x1bc   :  { %11660 = vmatmul.mubr.msk.f32.gmra.mxu0 %vm1475_vm3, %v15407_v45  ;;  %11719 = vmatprep.mubr.msk.f32.mxu1 %vm13449_vm0, %v17683_v57  ;;  %v15750_v34 = vsel %vm2613_vm4, %v2617_v28, %v2619_v3  ;;  %v15767_v27 = vsel %vm2613_vm4, %v2619_v3, %v2621_v52 }
 0x1bd   :  { %11693 = vmatprep.mubr.msk.f32.mxu0 %vm13449_vm0, %v17683_v57  ;;  %11755 = vmatpush3.msra.mxu1 %v183_v37 }
 0x1be   :  { %11756 = vmatprep.subr.mxu1 %v17683_v57 }
 0x1bf   :  { %11720 = vmatmul.mubr.msk.f32.gmra.mxu1 %vm1475_vm3, %v15464_v15 }
 0x1c0   :  { %11694 = vmatmul.mubr.msk.f32.vlgmr.msra.gmra.mxu0 %vm1475_vm3, %v15357_v53  ;;  %11722 = vmatprep.mubr.msk.f32.mxu1 %vm13449_vm0, %v17683_v57  ;;  %v15490_v53 = vrot.slane %v15338_v2, 2 }
 0x1c1   :  { %11732 = vmatpush3.msra.mxu0 %v183_v37  ;;  %11696 = vmatprep.mubr.msk.f32.mxu0 %vm13449_vm0, %v17683_v57  ;;  %v1438_v37 = vmax.f32 %v577_v42, %v835_v16  ;;  %v2825_v42 = vrot.slane %v17684_v1, 6 }
 0x1c2   :  { %11733 = vmatprep.subr.mxu0 %v17683_v57  ;;  %11757 = vmatpush3.msra.mxu1 %v182_v51 }
 0x1c3   :  { %11723 = vmatmul.mubr.msk.f32.gmra.mxu1 %vm1475_vm3, %v15486_v30  ;;  %11734 = vmatpush3.msra.mxu0 %v182_v51  ;;  %v1450_v49 = vadd.f32 %v12055_v10, %v1438_v37  ;;  %v2828_v37 = vrot.slane %v17693_v22, 6 }
 0x1c4   :  { %11697 = vmatmul.mubr.msk.f32.gmra.mxu0 %vm1475_vm3, %v15379_v63  ;;  %11725 = vmatprep.mubr.msk.f32.mxu1 %vm13449_vm0, %v17683_v57  ;;  %v15513_v63 = vsel %vm388_vm1, %v1985_v19, %v15490_v53  ;;  %v2197_v19 = vrot.slane %v15322_v40, 4 }
 0x1c5   :  { %11699 = vmatprep.mubr.msk.f32.mxu0 %vm13449_vm0, %v17683_v57  ;;  %11735 = vmatprep.subr.mxu0 %v17683_v57  ;;  %v15580_v14 = vmax.f32 %v1450_v49, 0.0  ;;  %v15815_v1 = vsel %vm2613_vm4, %v2826_v11, %v2828_v37 }
 0x1c6   :  { %11758 = vmatprep.subr.mxu1 %v17683_v57  ;;  %11736 = vmatpush3.msra.mxu0 %v181_v9  ;;  %v15600_v51 = vsel %vm552_vm2, %v2195_v46, %v2197_v19 }
 0x1c7   :  { %11726 = vmatmul.mubr.msk.f32.gmra.mxu1 %vm1475_vm3, %v15513_v63  ;;  %11737 = vmatprep.subr.mxu0 %v17683_v57 }
 0x1c8   :  { %11700 = vmatmul.mubr.msk.f32.gmra.mxu0 %vm1475_vm3, %v15402_v4  ;;  %11759 = vmatpush3.msra.mxu1 %v181_v9  ;;  %v2191_v4 = vrot.slane %v17685_v25, 4  ;;  %v15718_v9 = vsel %vm2613_vm4, %v2614_v17, %v2615_v29 }
 0x1c9   :  { %11702 = vmatprep.mubr.msk.f32.mxu0 %vm13449_vm0, %v17683_v57  ;;  %11728 = vmatprep.mubr.msk.f32.mxu1 %vm13449_vm0, %v17683_v57 }
 0x1ca   :  { %11760 = vmatprep.subr.mxu1 %v17683_v57  ;;  %11738 = vmatpush3.msra.mxu0 %v180_v50  ;;  %v15549_v59 = vsel %vm552_vm2, %v2190_v20, %v2191_v4  ;;  %v15565_v7 = vsel %vm552_vm2, %v2191_v4, %v2193_v13  ;;  %v15799_v20 = vsel %vm2613_vm4, %v2825_v42, %v2826_v11  ;;  %v2830_v13 = vrot.slane %v15330_v55, 6 }
 0x1cb   :  { %11729 = vmatmul.mubr.msk.f32.gmra.mxu1 %vm1475_vm3, %v15490_v53  ;;  %11777 = vmatprep.subr.mxu0 %v17683_v57 }
 0x1cc   :  { %11703 = vmatmul.mubr.msk.f32.gmra.mxu0 %vm1475_vm3, %v15427_v31  ;;  %11761 = vmatpush3.msra.mxu1 %v180_v50  ;;  %v187_v31 = vld [vmem:[%s16898_s3 + $0x98] sm:$0xff]  ;;  %v2623_v50 = vrot.slane %v15580_v14, 6  ;;  %v15833_v46 = vsel %vm2613_vm4, %v2828_v37, %v2830_v13 }
 0x1cd   :  { %11705 = vmatprep.mubr.msk.f32.mxu0 %vm13449_vm0, %v17683_v57  ;;  %11762 = vmatprep.mubr.msk.f32.mxu1 %vm13449_vm0, %v17683_v57 }
 0x1ce   :  { %11800 = vmatprep.subr.mxu1 %v17683_v57  ;;  %v15784_v60 = vsel %vm2613_vm4, %v2621_v52, %v2623_v50 }
 0x1cf   :  { %11763 = vmatmul.mubr.msk.f32.vlgmr.msra.gmra.mxu1 %vm1475_vm3, %v15549_v59 }
 0x1d0   :  { %11706 = vmatmul.mubr.msk.f32.gmra.mxu0 %vm1475_vm3, %v15407_v45  ;;  %11765 = vmatprep.mubr.msk.f32.mxu1 %vm13449_vm0, %v17683_v57  ;;  %v186_v45 = vld [vmem:[%s16898_s3 + $0x90] sm:$0xff] }
 0x1d1   :  { %11739 = vmatprep.mubr.msk.f32.mxu0 %vm13449_vm0, %v17683_v57  ;;  %11801 = vmatpush3.msra.mxu1 %v187_v31 }
 0x1d2   :  { %11802 = vmatprep.subr.mxu1 %v17683_v57 }
 0x1d3   :  { %11766 = vmatmul.mubr.msk.f32.gmra.mxu1 %vm1475_vm3, %v15565_v7 }
 0x1d4   :  { %11740 = vmatmul.mubr.msk.f32.vlgmr.msra.gmra.mxu0 %vm1475_vm3, %v15442_v23  ;;  %11768 = vmatprep.mubr.msk.f32.mxu1 %vm13449_vm0, %v17683_v57  ;;  %v185_v23 = vld [vmem:[%s16898_s3 + $0x88] sm:$0xff] }
 0x1d5   :  { %11778 = vmatpush3.msra.mxu0 %v187_v31  ;;  %11742 = vmatprep.mubr.msk.f32.mxu0 %vm13449_vm0, %v17683_v57  ;;  %v198_v31 = vld [vmem:[%s16898_s3 + $0xf0] sm:$0xff] }
 0x1d6   :  { %11779 = vmatprep.subr.mxu0 %v17683_v57  ;;  %11803 = vmatpush3.msra.mxu1 %v186_v45 }
 0x1d7   :  { %11769 = vmatmul.mubr.msk.f32.gmra.mxu1 %vm1475_vm3, %v15583_v18  ;;  %11780 = vmatpush3.msra.mxu0 %v186_v45  ;;  %v2832_v45 = vrot.slane %v15338_v2, 6 }
 0x1d8   :  { %11743 = vmatmul.mubr.msk.f32.gmra.mxu0 %vm1475_vm3, %v15464_v15  ;;  %11771 = vmatprep.mubr.msk.f32.mxu1 %vm13449_vm0, %v17683_v57  ;;  %v2199_v15 = vrot.slane %v15580_v14, 4 }
 0x1d9   :  { %11745 = vmatprep.mubr.msk.f32.mxu0 %vm13449_vm0, %v17683_v57  ;;  %11781 = vmatprep.subr.mxu0 %v17683_v57 }
 0x1da   :  { %11804 = vmatprep.subr.mxu1 %v17683_v57  ;;  %11782 = vmatpush3.msra.mxu0 %v185_v23  ;;  %v15617_v33 = vsel %vm552_vm2, %v2197_v19, %v2199_v15  ;;  %v2833_v19 = vsel %vm2613_vm4, %v2830_v13, %v2832_v45 }
 0x1db   :  { %11772 = vmatmul.mubr.msk.f32.gmra.mxu1 %vm1475_vm3, %v15600_v51  ;;  %11783 = vmatprep.subr.mxu0 %v17683_v57 }
 0x1dc   :  { %11746 = vmatmul.mubr.msk.f32.gmra.mxu0 %vm1475_vm3, %v15486_v30  ;;  %11805 = vmatpush3.msra.mxu1 %v185_v23  ;;  %v15651_v30 = vsel %vm552_vm2, %v2403_v61, %v2405_v8  ;;  %v2834_v23 = vrot.slane %v15666_v21, 6  ;;  %v203_v61 = vld [vmem:[%s16898_s3 + $0x118] sm:$0xff] }
 0x1dd   :  { %11748 = vmatprep.mubr.msk.f32.mxu0 %vm13449_vm0, %v17683_v57  ;;  %11774 = vmatprep.mubr.msk.f32.mxu1 %vm13449_vm0, %v17683_v57 }
 0x1de   :  { %11806 = vmatprep.subr.mxu1 %v17683_v57  ;;  %11784 = vmatpush3.msra.mxu0 %v184_v58 }
 0x1df   :  { %11775 = vmatmul.mubr.msk.f32.gmra.mxu1 %vm1475_vm3, %v15617_v33  ;;  %11823 = vmatprep.subr.mxu0 %v17683_v57 }
 0x1e0   :  { %11749 = vmatmul.mubr.msk.f32.gmra.mxu0 %vm1475_vm3, %v15513_v63  ;;  %11807 = vmatpush3.msra.mxu1 %v184_v58  ;;  %v195_v63 = vld [vmem:[%s16898_s3 + $0xd8] sm:$0xff]  ;;  %v2835_v58 = vsel %vm2613_vm4, %v2832_v45, %v2834_v23 }
 0x1e1   :  { %11751 = vmatprep.mubr.msk.f32.mxu0 %vm13449_vm0, %v17683_v57  ;;  %11808 = vmatprep.mubr.msk.f32.mxu1 %vm13449_vm0, %v17683_v57 }
 0x1e2   :  { %11846 = vmatprep.subr.mxu1 %v17683_v57  ;;  %v1662_v16 = vpop.f32.mrf.mxu1 }
 0x1e3   :  { %11809 = vmatmul.mubr.msk.f32.vlgmr.msra.gmra.mxu1 %vm1475_vm3, %v15632_v24 }
 0x1e4   :  { %11752 = vmatmul.mubr.msk.f32.gmra.mxu0 %vm1475_vm3, %v15490_v53  ;;  %11811 = vmatprep.mubr.msk.f32.mxu1 %vm13449_vm0, %v17683_v57  ;;  %v190_v53 = vld [vmem:[%s16898_s3 + $0xb0] sm:$0xff]  ;;  %v11626_v4 = vpop.f32.mrf.mxu1 }
 0x1e5   :  { %11785 = vmatprep.mubr.msk.f32.mxu0 %vm13449_vm0, %v17683_v57  ;;  %11847 = vmatpush3.msra.mxu1 %v191_v41 }
 0x1e6   :  { %11848 = vmatprep.subr.mxu1 %v17683_v57 }
 0x1e7   :  { %11812 = vmatmul.mubr.msk.f32.gmra.mxu1 %vm1475_vm3, %v15651_v30 }
 0x1e8   :  { %11786 = vmatmul.mubr.msk.f32.vlgmr.msra.gmra.mxu0 %vm1475_vm3, %v15549_v59  ;;  %11814 = vmatprep.mubr.msk.f32.mxu1 %vm13449_vm0, %v17683_v57  ;;  %v199_v59 = vld [vmem:[%s16898_s3 + $0xf8] sm:$0xff] }
 0x1e9   :  { %11824 = vmatpush3.msra.mxu0 %v191_v41  ;;  %11788 = vmatprep.mubr.msk.f32.mxu0 %vm13449_vm0, %v17683_v57 }
 0x1ea   :  { %11825 = vmatprep.subr.mxu0 %v17683_v57  ;;  %11849 = vmatpush3.msra.mxu1 %v190_v53 }
 0x1eb   :  { %11815 = vmatmul.mubr.msk.f32.gmra.mxu1 %vm1475_vm3, %v15669_v36  ;;  %11826 = vmatpush3.msra.mxu0 %v190_v53 }
 0x1ec   :  { %11789 = vmatmul.mubr.msk.f32.gmra.mxu0 %vm1475_vm3, %v15565_v7  ;;  %11817 = vmatprep.mubr.msk.f32.mxu1 %vm13449_vm0, %v17683_v57 }
 0x1ed   :  { %11791 = vmatprep.mubr.msk.f32.mxu0 %vm13449_vm0, %v17683_v57  ;;  %11827 = vmatprep.subr.mxu0 %v17683_v57 }
 0x1ee   :  { %11850 = vmatprep.subr.mxu1 %v17683_v57  ;;  %11828 = vmatpush3.msra.mxu0 %v189_v39 }
 0x1ef   :  { %11818 = vmatmul.mubr.msk.f32.gmra.mxu1 %vm1475_vm3, %v15686_v12  ;;  %11829 = vmatprep.subr.mxu0 %v17683_v57 }
 0x1f0   :  { %11792 = vmatmul.mubr.msk.f32.gmra.mxu0 %vm1475_vm3, %v15583_v18  ;;  %11851 = vmatpush3.msra.mxu1 %v189_v39  ;;  %v197_v18 = vld [vmem:[%s16898_s3 + $0xe8] sm:$0xff] }
 0x1f1   :  { %11794 = vmatprep.mubr.msk.f32.mxu0 %vm13449_vm0, %v17683_v57  ;;  %11820 = vmatprep.mubr.msk.f32.mxu1 %vm13449_vm0, %v17683_v57 }
 0x1f2   :  { %11852 = vmatprep.subr.mxu1 %v17683_v57  ;;  %11830 = vmatpush3.msra.mxu0 %v188_v26 }
 0x1f3   :  { %11821 = vmatmul.mubr.msk.f32.gmra.mxu1 %vm1475_vm3, %v15703_v38  ;;  %11869 = vmatprep.subr.mxu0 %v17683_v57 }
 0x1f4   :  { %11795 = vmatmul.mubr.msk.f32.gmra.mxu0 %vm1475_vm3, %v15600_v51  ;;  %11853 = vmatpush3.msra.mxu1 %v188_v26  ;;  %v1557_v10 = vpop.f32.mrf.mxu0  ;;  %v196_v51 = vld [vmem:[%s16898_s3 + $0xe0] sm:$0xff] }
 0x1f5   :  { %11797 = vmatprep.mubr.msk.f32.mxu0 %vm13449_vm0, %v17683_v57  ;;  %11854 = vmatprep.mubr.msk.f32.mxu1 %vm13449_vm0, %v17683_v57  ;;  %v15828_v49 = vadd.f32 %v1662_v16, %v1557_v10 }
 0x1f6   :  { %11892 = vmatprep.subr.mxu1 %v17683_v57  ;;  %v11603_v7 = vpop.f32.mrf.mxu0 }
 0x1f7   :  { %11855 = vmatmul.mubr.msk.f32.vlgmr.msra.gmra.mxu1 %vm1475_vm3, %v15718_v9 }
 0x1f8   :  { %11798 = vmatmul.mubr.msk.f32.gmra.mxu0 %vm1475_vm3, %v15617_v33  ;;  %11857 = vmatprep.mubr.msk.f32.mxu1 %vm13449_vm0, %v17683_v57 }
 0x1f9   :  { %11831 = vmatprep.mubr.msk.f32.mxu0 %vm13449_vm0, %v17683_v57  ;;  %11893 = vmatpush3.msra.mxu1 %v195_v63 }
 0x1fa   :  { %11894 = vmatprep.subr.mxu1 %v17683_v57 }
 0x1fb   :  { %11858 = vmatmul.mubr.msk.f32.gmra.mxu1 %vm1475_vm3, %v15734_v32 }
 0x1fc   :  { %11832 = vmatmul.mubr.msk.f32.vlgmr.msra.gmra.mxu0 %vm1475_vm3, %v15632_v24  ;;  %11860 = vmatprep.mubr.msk.f32.mxu1 %vm13449_vm0, %v17683_v57 }
 0x1fd   :  { %11870 = vmatpush3.msra.mxu0 %v195_v63  ;;  %11834 = vmatprep.mubr.msk.f32.mxu0 %vm13449_vm0, %v17683_v57 }
 0x1fe   :  { %11871 = vmatprep.subr.mxu0 %v17683_v57  ;;  %11895 = vmatpush3.msra.mxu1 %v194_v54 }
 0x1ff   :  { %11861 = vmatmul.mubr.msk.f32.gmra.mxu1 %vm1475_vm3, %v15750_v34  ;;  %11872 = vmatpush3.msra.mxu0 %v194_v54 }
 0x200   :  { %11835 = vmatmul.mubr.msk.f32.gmra.mxu0 %vm1475_vm3, %v15651_v30  ;;  %11863 = vmatprep.mubr.msk.f32.mxu1 %vm13449_vm0, %v17683_v57  ;;  %v1667_v15 = vpop.f32.mrf.mxu1  ;;  %v200_v30 = vld [vmem:[%s16898_s3 + $0x100] sm:$0xff]  ;;  %s13451_s3 = smov 64  }
 0x201   :  { %11837 = vmatprep.mubr.msk.f32.mxu0 %vm13449_vm0, %v17683_v57  ;;  %11873 = vmatprep.subr.mxu0 %v17683_v57 }
 0x202   :  { %11896 = vmatprep.subr.mxu1 %v17683_v57  ;;  %11874 = vmatpush3.msra.mxu0 %v193_v47  ;;  %v11629_v33 = vpop.f32.mrf.mxu1 }
 0x203   :  { %11864 = vmatmul.mubr.msk.f32.gmra.mxu1 %vm1475_vm3, %v15767_v27  ;;  %11875 = vmatprep.subr.mxu0 %v17683_v57 }
 0x204   :  { %11838 = vmatmul.mubr.msk.f32.gmra.mxu0 %vm1475_vm3, %v15669_v36  ;;  %11897 = vmatpush3.msra.mxu1 %v193_v47 }
 0x205   :  { %11840 = vmatprep.mubr.msk.f32.mxu0 %vm13449_vm0, %v17683_v57  ;;  %11866 = vmatprep.mubr.msk.f32.mxu1 %vm13449_vm0, %v17683_v57 }
 0x206   :  { %11898 = vmatprep.subr.mxu1 %v17683_v57  ;;  %11876 = vmatpush3.msra.mxu0 %v192_v35 }
 0x207   :  { %11867 = vmatmul.mubr.msk.f32.gmra.mxu1 %vm1475_vm3, %v15784_v60  ;;  %11915 = vmatprep.subr.mxu0 %v17683_v57 }
 0x208   :  { %11841 = vmatmul.mubr.msk.f32.gmra.mxu0 %vm1475_vm3, %v15686_v12  ;;  %11899 = vmatpush3.msra.mxu1 %v192_v35 }
 0x209   :  { %11843 = vmatprep.mubr.msk.f32.mxu0 %vm13449_vm0, %v17683_v57  ;;  %11900 = vmatprep.mubr.msk.f32.mxu1 %vm13449_vm0, %v17683_v57 }
 0x20a   :  { %11938 = vmatprep.subr.mxu1 %v17683_v57 }
 0x20b   :  { %11901 = vmatmul.mubr.msk.f32.vlgmr.msra.gmra.mxu1 %vm1475_vm3, %v15799_v20 }
 0x20c   :  { %11844 = vmatmul.mubr.msk.f32.gmra.mxu0 %vm1475_vm3, %v15703_v38  ;;  %11903 = vmatprep.mubr.msk.f32.mxu1 %vm13449_vm0, %v17683_v57 }
 0x20d   :  { %11877 = vmatprep.mubr.msk.f32.mxu0 %vm13449_vm0, %v17683_v57  ;;  %11939 = vmatpush3.msra.mxu1 %v199_v59 }
 0x20e   :  { %11940 = vmatprep.subr.mxu1 %v17683_v57 }
 0x20f   :  { %11904 = vmatmul.mubr.msk.f32.gmra.mxu1 %vm1475_vm3, %v15815_v1 }
 0x210   :  { %11878 = vmatmul.mubr.msk.f32.vlgmr.msra.gmra.mxu0 %vm1475_vm3, %v15718_v9  ;;  %11906 = vmatprep.mubr.msk.f32.mxu1 %vm13449_vm0, %v17683_v57  ;;  %v1562_v24 = vpop.f32.mrf.mxu0 }
 0x211   :  { %11916 = vmatpush3.msra.mxu0 %v199_v59  ;;  %11880 = vmatprep.mubr.msk.f32.mxu0 %vm13449_vm0, %v17683_v57  ;;  %v15897_v8 = vadd.f32 %v1667_v15, %v1562_v24 }
 0x212   :  { %11917 = vmatprep.subr.mxu0 %v17683_v57  ;;  %11941 = vmatpush3.msra.mxu1 %v198_v31  ;;  %v11606_v41 = vpop.f32.mrf.mxu0 }
 0x213   :  { %11907 = vmatmul.mubr.msk.f32.gmra.mxu1 %vm1475_vm3, %v15833_v46  ;;  %11918 = vmatpush3.msra.mxu0 %v198_v31 }
 0x214   :  { %11881 = vmatmul.mubr.msk.f32.gmra.mxu0 %vm1475_vm3, %v15734_v32  ;;  %11909 = vmatprep.mubr.msk.f32.mxu1 %vm13449_vm0, %v17683_v57 }
 0x215   :  { %11883 = vmatprep.mubr.msk.f32.mxu0 %vm13449_vm0, %v17683_v57  ;;  %11919 = vmatprep.subr.mxu0 %v17683_v57 }
 0x216   :  { %11942 = vmatprep.subr.mxu1 %v17683_v57  ;;  %11920 = vmatpush3.msra.mxu0 %v197_v18 }
 0x217   :  { %11910 = vmatmul.mubr.msk.f32.gmra.mxu1 %vm1475_vm3, %v2833_v19  ;;  %11921 = vmatprep.subr.mxu0 %v17683_v57 }
 0x218   :  { %11884 = vmatmul.mubr.msk.f32.gmra.mxu0 %vm1475_vm3, %v15750_v34  ;;  %11943 = vmatpush3.msra.mxu1 %v197_v18 }
 0x219   :  { %11886 = vmatprep.mubr.msk.f32.mxu0 %vm13449_vm0, %v17683_v57  ;;  %11912 = vmatprep.mubr.msk.f32.mxu1 %vm13449_vm0, %v17683_v57 }
 0x21a   :  { %11944 = vmatprep.subr.mxu1 %v17683_v57  ;;  %11922 = vmatpush3.msra.mxu0 %v196_v51 }
 0x21b   :  { %11913 = vmatmul.mubr.msk.f32.gmra.mxu1 %vm1475_vm3, %v2835_v58  ;;  %11961 = vmatprep.subr.mxu0 %v17683_v57 }
 0x21c   :  { %11887 = vmatmul.mubr.msk.f32.gmra.mxu0 %vm1475_vm3, %v15767_v27  ;;  %11945 = vmatpush3.msra.mxu1 %v196_v51 }
 0x21d   :  { %11889 = vmatprep.mubr.msk.f32.mxu0 %vm13449_vm0, %v17683_v57  ;;  %11946 = vmatprep.mubr.msk.f32.mxu1 %vm13449_vm0, %v17683_v57 }
 0x21e   :  { %11984 = vmatprep.subr.mxu1 %v17683_v57 }
 0x21f   :  { %11947 = vmatmul.mubr.msk.f32.vlgmr.msra.gmra.mxu1 %vm1475_vm3, %v17685_v25 }
 0x220   :  { %11890 = vmatmul.mubr.msk.f32.gmra.mxu0 %vm1475_vm3, %v15784_v60  ;;  %11949 = vmatprep.mubr.msk.f32.mxu1 %vm13449_vm0, %v17683_v57 }
 0x221   :  { %11923 = vmatprep.mubr.msk.f32.mxu0 %vm13449_vm0, %v17683_v57  ;;  %11985 = vmatpush3.msra.mxu1 %v203_v61 }
 0x222   :  { %11986 = vmatprep.subr.mxu1 %v17683_v57 }
 0x223   :  { %11950 = vmatmul.mubr.msk.f32.gmra.mxu1 %vm1475_vm3, %v17688_v44 }
 0x224   :  { %11924 = vmatmul.mubr.msk.f32.vlgmr.msra.gmra.mxu0 %vm1475_vm3, %v15799_v20  ;;  %11952 = vmatprep.mubr.msk.f32.mxu1 %vm13449_vm0, %v17683_v57  ;;  %v1672_v0 = vpop.f32.mrf.mxu1 }
 0x225   :  { %11962 = vmatpush3.msra.mxu0 %v203_v61  ;;  %11926 = vmatprep.mubr.msk.f32.mxu0 %vm13449_vm0, %v17683_v57 }
 0x226   :  { %11963 = vmatprep.subr.mxu0 %v17683_v57  ;;  %11987 = vmatpush3.msra.mxu1 %v202_v43  ;;  %v11632_v53 = vpop.f32.mrf.mxu1 }
 0x227   :  { %11953 = vmatmul.mubr.msk.f32.gmra.mxu1 %vm1475_vm3, %v15315_v48  ;;  %11964 = vmatpush3.msra.mxu0 %v202_v43 }
 0x228   :  { %11927 = vmatmul.mubr.msk.f32.gmra.mxu0 %vm1475_vm3, %v15815_v1  ;;  %11955 = vmatprep.mubr.msk.f32.mxu1 %vm13449_vm0, %v17683_v57 }
 0x229   :  { %11929 = vmatprep.mubr.msk.f32.mxu0 %vm13449_vm0, %v17683_v57  ;;  %11965 = vmatprep.subr.mxu0 %v17683_v57 }
 0x22a   :  { %11988 = vmatprep.subr.mxu1 %v17683_v57  ;;  %11966 = vmatpush3.msra.mxu0 %v201_v62 }
 0x22b   :  { %11956 = vmatmul.mubr.msk.f32.gmra.mxu1 %vm1475_vm3, %v15322_v40  ;;  %11967 = vmatprep.subr.mxu0 %v17683_v57 }
 0x22c   :  { %11930 = vmatmul.mubr.msk.f32.gmra.mxu0 %vm1475_vm3, %v15833_v46  ;;  %11989 = vmatpush3.msra.mxu1 %v201_v62 }
 0x22d   :  { %11932 = vmatprep.mubr.msk.f32.mxu0 %vm13449_vm0, %v17683_v57  ;;  %11958 = vmatprep.mubr.msk.f32.mxu1 %vm13449_vm0, %v17683_v57  ;;  %v1567_v36 = vpop.f32.mrf.mxu0 }
 0x22e   :  { %11990 = vmatprep.subr.mxu1 %v17683_v57  ;;  %11968 = vmatpush3.msra.mxu0 %v200_v30 }
 0x22f   :  { %11959 = vmatmul.mubr.msk.f32.gmra.mxu1 %vm1475_vm3, %v15580_v14  ;;  %v11609_v6 = vpop.f32.mrf.mxu0 }
 0x230   :  { %11933 = vmatmul.mubr.msk.f32.gmra.mxu0 %vm1475_vm3, %v2833_v19  ;;  %11991 = vmatpush3.msra.mxu1 %v200_v30 }
 0x231   :  { %11935 = vmatprep.mubr.msk.f32.mxu0 %vm13449_vm0, %v17683_v57  ;;  %11992 = vmatprep.mubr.msk.f32.mxu1 %vm13449_vm0, %v17683_v57 }
 0x233   :  { %11993 = vmatmul.mubr.msk.f32.vlgmr.msra.gmra.mxu1 %vm1475_vm3, %v17687_v5  ;;  %v15948_v5 = vadd.f32 %v1672_v0, %v1567_v36 }
 0x234   :  { %11936 = vmatmul.mubr.msk.f32.gmra.mxu0 %vm1475_vm3, %v2835_v58  ;;  %11995 = vmatprep.mubr.msk.f32.mxu1 %vm13449_vm0, %v17683_v57 }
 0x235   :  { %11969 = vmatprep.mubr.msk.f32.mxu0 %vm13449_vm0, %v17683_v57 }
 0x237   :  { %11996 = vmatmul.mubr.msk.f32.gmra.mxu1 %vm1475_vm3, %v17693_v22 }
 0x238   :  { %11970 = vmatmul.mubr.msk.f32.vlgmr.msra.gmra.mxu0 %vm1475_vm3, %v17685_v25  ;;  %11998 = vmatprep.mubr.msk.f32.mxu1 %vm13449_vm0, %v17683_v57 }
 0x239   :  { %11972 = vmatprep.mubr.msk.f32.mxu0 %vm13449_vm0, %v17683_v57 }
 0x23b   :  { %11999 = vmatmul.mubr.msk.f32.gmra.mxu1 %vm1475_vm3, %v15330_v55 }
 0x23c   :  { %11973 = vmatmul.mubr.msk.f32.gmra.mxu0 %vm1475_vm3, %v17688_v44  ;;  %12001 = vmatprep.mubr.msk.f32.mxu1 %vm13449_vm0, %v17683_v57 }
 0x23d   :  { %11975 = vmatprep.mubr.msk.f32.mxu0 %vm13449_vm0, %v17683_v57 }
 0x23f   :  { %12002 = vmatmul.mubr.msk.f32.gmra.mxu1 %vm1475_vm3, %v15338_v2 }
 0x240   :  { %11976 = vmatmul.mubr.msk.f32.gmra.mxu0 %vm1475_vm3, %v15315_v48  ;;  %12004 = vmatprep.mubr.msk.f32.mxu1 %vm13449_vm0, %v17683_v57 }
 0x241   :  { %11978 = vmatprep.mubr.msk.f32.mxu0 %vm13449_vm0, %v17683_v57 }
 0x243   :  { %12005 = vmatmul.mubr.msk.f32.gmra.mxu1 %vm1475_vm3, %v15666_v21 }
 0x244   :  { %11979 = vmatmul.mubr.msk.f32.gmra.mxu0 %vm1475_vm3, %v15322_v40 }
 0x245   :  { %11981 = vmatprep.mubr.msk.f32.mxu0 %vm13449_vm0, %v17683_v57 }
 0x248   :  { %11982 = vmatmul.mubr.msk.f32.gmra.mxu0 %vm1475_vm3, %v15580_v14 }
 0x25f   :  { %v1677_v55 = vpop.f32.mrf.mxu1 }
 0x261   :  { %v11635_v48 = vpop.f32.mrf.mxu1 }
 0x263   :  { %v1682_v2 = vpop.f32.mrf.mxu1 }
 0x264   :  { %v1572_v25 = vpop.f32.mrf.mxu0 }
 0x265   :  { %v1678_v44 = vadd.f32 %v1677_v55, %v1572_v25  ;;  %v11638_v22 = vpop.f32.mrf.mxu1 }
 0x266   :  { %v11612_v39 = vpop.f32.mrf.mxu0 }
 0x267   :  { %v1861_v12 = vpop.f32.mrf.mxu1 }
 0x268   :  { %v1577_v56 = vpop.f32.mrf.mxu0 }
 0x269   :  { %v1683_v26 = vadd.f32 %v1682_v2, %v1577_v56  ;;  %v11672_v21 = vpop.f32.mrf.mxu1 }
 0x26a   :  { %v11615_v38 = vpop.f32.mrf.mxu0 }
 0x26b   :  { %v1866_v29 = vpop.f32.mrf.mxu1 }
 0x26c   :  { %v1771_v40 = vpop.f32.mrf.mxu0 }
 0x26d   :  { %v1862_v17 = vadd.f32 %v1861_v12, %v1771_v40  ;;  %v11675_v9 = vpop.f32.mrf.mxu1 }
 0x26e   :  { %v11649_v57 = vpop.f32.mrf.mxu0 }
 0x26f   :  { %v1871_v28 = vpop.f32.mrf.mxu1 }
 0x270   :  { %v1776_v63 = vpop.f32.mrf.mxu0 }
 0x271   :  { %v1867_v14 = vadd.f32 %v1866_v29, %v1776_v63  ;;  %v11678_v32 = vpop.f32.mrf.mxu1 }
 0x272   :  { %v11652_v3 = vpop.f32.mrf.mxu0 }
 0x273   :  { %v1876_v54 = vpop.f32.mrf.mxu1 }
 0x274   :  { %v1781_v34 = vpop.f32.mrf.mxu0 }
 0x275   :  { %v1872_v52 = vadd.f32 %v1871_v28, %v1781_v34  ;;  %v11681_v47 = vpop.f32.mrf.mxu1 }
 0x276   :  { %v11655_v27 = vpop.f32.mrf.mxu0 }
 0x277   :  { %v1881_v50 = vpop.f32.mrf.mxu1 }
 0x278   :  { %v1786_v16 = vpop.f32.mrf.mxu0 }
 0x279   :  { %v1877_v4 = vadd.f32 %v1876_v54, %v1786_v16  ;;  %v11684_v35 = vpop.f32.mrf.mxu1 }
 0x27a   :  { %v11658_v60 = vpop.f32.mrf.mxu0 }
 0x27b   :  { %v2065_v11 = vpop.f32.mrf.mxu1 }
 0x27c   :  { %v1791_v42 = vpop.f32.mrf.mxu0  ;;  %v2089_v20 = vadd.f32 %v2065_v11, %v1862_v17 }
 0x27d   :  { %v1882_v37 = vadd.f32 %v1881_v50, %v1791_v42  ;;  %v11718_v59 = vpop.f32.mrf.mxu1 }
 0x27e   :  { %v11661_v1 = vpop.f32.mrf.mxu0 }
 0x27f   :  { %v2070_v13 = vpop.f32.mrf.mxu1 }
 0x280   :  { %v1951_v31 = vpop.f32.mrf.mxu0  ;;  %v2090_v10 = vadd.f32 %v2070_v13, %v1867_v14 }
 0x281   :  { %v1975_v7 = vadd.f32 %v1951_v31, %v15828_v49  ;;  %v11721_v46 = vpop.f32.mrf.mxu1 }
 0x282   :  { %v11695_v45 = vpop.f32.mrf.mxu0 }
 0x283   :  { %v2075_v18 = vpop.f32.mrf.mxu1 }
 0x284   :  { %v1956_v19 = vpop.f32.mrf.mxu0  ;;  %v2091_v23 = vadd.f32 %v2075_v18, %v1872_v52 }
 0x285   :  { %v1976_v51 = vadd.f32 %v1956_v19, %v15897_v8  ;;  %v11724_v15 = vpop.f32.mrf.mxu1 }
 0x286   :  { %v11698_v58 = vpop.f32.mrf.mxu0 }
 0x287   :  { %v2080_v33 = vpop.f32.mrf.mxu1 }
 0x288   :  { %v1961_v61 = vpop.f32.mrf.mxu0  ;;  %v2092_v43 = vadd.f32 %v2080_v33, %v1877_v4 }
 0x289   :  { %v1977_v24 = vadd.f32 %v1961_v61, %v15948_v5  ;;  %v11727_v41 = vpop.f32.mrf.mxu1 }
 0x28a   :  { %v11701_v62 = vpop.f32.mrf.mxu0 }
 0x28b   :  { %v2085_v30 = vpop.f32.mrf.mxu1 }
 0x28c   :  { %v1966_v0 = vpop.f32.mrf.mxu0  ;;  %v2093_v53 = vadd.f32 %v2085_v30, %v1882_v37 }
 0x28d   :  { %v1978_v49 = vadd.f32 %v1966_v0, %v1678_v44  ;;  %v11730_v36 = vpop.f32.mrf.mxu1 }
 0x28e   :  { %v11704_v6 = vpop.f32.mrf.mxu0 }
 0x28f   :  { %v2277_v55 = vpop.f32.mrf.mxu1 }
 0x290   :  { %v1971_v48 = vpop.f32.mrf.mxu0  ;;  %v2301_v2 = vadd.f32 %v2277_v55, %v2089_v20 }
 0x291   :  { %v1979_v25 = vadd.f32 %v1971_v48, %v1683_v26  ;;  %v11764_v8 = vpop.f32.mrf.mxu1 }
 0x292   :  { %v11707_v22 = vpop.f32.mrf.mxu0 }
 0x293   :  { %v2282_v39 = vpop.f32.mrf.mxu1 }
 0x294   :  { %v2160_v12 = vpop.f32.mrf.mxu0  ;;  %v2302_v56 = vadd.f32 %v2282_v39, %v2090_v10 }
 0x295   :  { %v2184_v21 = vadd.f32 %v2160_v12, %v1975_v7  ;;  %v11767_v38 = vpop.f32.mrf.mxu1 }
 0x296   :  { %v11741_v5 = vpop.f32.mrf.mxu0 }
 0x297   :  { %v2287_v29 = vpop.f32.mrf.mxu1 }
 0x298   :  { %v2165_v40 = vpop.f32.mrf.mxu0  ;;  %v2303_v17 = vadd.f32 %v2287_v29, %v2091_v23 }
 0x299   :  { %v2185_v9 = vadd.f32 %v2165_v40, %v1976_v51  ;;  %v11770_v57 = vpop.f32.mrf.mxu1 }
 0x29a   :  { %v11744_v44 = vpop.f32.mrf.mxu0 }
 0x29b   :  { %v2292_v28 = vpop.f32.mrf.mxu1 }
 0x29c   :  { %v2170_v63 = vpop.f32.mrf.mxu0  ;;  %v2304_v14 = vadd.f32 %v2292_v28, %v2092_v43 }
 0x29d   :  { %v2186_v32 = vadd.f32 %v2170_v63, %v1977_v24  ;;  %v11773_v3 = vpop.f32.mrf.mxu1 }
 0x29e   :  { %v11747_v26 = vpop.f32.mrf.mxu0 }
 0x29f   :  { %v2297_v54 = vpop.f32.mrf.mxu1 }
 0x2a0   :  { %v2175_v34 = vpop.f32.mrf.mxu0  ;;  %v2305_v52 = vadd.f32 %v2297_v54, %v2093_v53 }
 0x2a1   :  { %v2187_v47 = vadd.f32 %v2175_v34, %v1978_v49  ;;  %v11776_v27 = vpop.f32.mrf.mxu1 }
 0x2a2   :  { %v11750_v50 = vpop.f32.mrf.mxu0 }
 0x2a3   :  { %v2489_v16 = vpop.f32.mrf.mxu1 }
 0x2a4   :  { %v2180_v4 = vpop.f32.mrf.mxu0  ;;  %v15977_v35 = vadd.f32 %v2489_v16, %v2301_v2 }
 0x2a5   :  { %v2188_v60 = vadd.f32 %v2180_v4, %v1979_v25  ;;  %v11810_v11 = vpop.f32.mrf.mxu1 }
 0x2a6   :  { %v11753_v42 = vpop.f32.mrf.mxu0 }
 0x2a7   :  { %v2494_v20 = vpop.f32.mrf.mxu1 }
 0x2a8   :  { %v2372_v37 = vpop.f32.mrf.mxu0  ;;  %v15979_v59 = vadd.f32 %v2494_v20, %v2302_v56 }
 0x2a9   :  { %v15981_v1 = vadd.f32 %v2372_v37, %v2184_v21  ;;  %v11813_v13 = vpop.f32.mrf.mxu1 }
 0x2aa   :  { %v11787_v31 = vpop.f32.mrf.mxu0 }
 0x2ab   :  { %v2499_v10 = vpop.f32.mrf.mxu1 }
 0x2ac   :  { %v2377_v7 = vpop.f32.mrf.mxu0  ;;  %v15983_v46 = vadd.f32 %v2499_v10, %v2303_v17 }
 0x2ad   :  { %v15985_v45 = vadd.f32 %v2377_v7, %v2185_v9  ;;  %v11816_v18 = vpop.f32.mrf.mxu1 }
 0x2ae   :  { %v11790_v19 = vpop.f32.mrf.mxu0 }
 0x2af   :  { %v2504_v23 = vpop.f32.mrf.mxu1 }
 0x2b0   :  { %v2382_v51 = vpop.f32.mrf.mxu0  ;;  %v15987_v15 = vadd.f32 %v2504_v23, %v2304_v14 }
 0x2b1   :  { %v15989_v58 = vadd.f32 %v2382_v51, %v2186_v32  ;;  %v11819_v33 = vpop.f32.mrf.mxu1 }
 0x2b2   :  { %v11793_v61 = vpop.f32.mrf.mxu0 }
 0x2b3   :  { %v2509_v43 = vpop.f32.mrf.mxu1 }
 0x2b4   :  { %v2387_v24 = vpop.f32.mrf.mxu0  ;;  %v15991_v41 = vadd.f32 %v2509_v43, %v2305_v52 }
 0x2b5   :  { %v15993_v62 = vadd.f32 %v2387_v24, %v2187_v47  ;;  %v11822_v30 = vpop.f32.mrf.mxu1 }
 0x2b6   :  { %v11796_v0 = vpop.f32.mrf.mxu0 }
 0x2b7   :  { %v2701_v53 = vpop.f32.mrf.mxu1 }
 0x2b8   :  { %v2392_v49 = vpop.f32.mrf.mxu0 }
 0x2b9   :  { %v15995_v36 = vadd.f32 %v2392_v49, %v2188_v60  ;;  %v11856_v6 = vpop.f32.mrf.mxu1 }
 0x2ba   :  { %v11799_v55 = vpop.f32.mrf.mxu0 }
 0x2bb   :  { %v15997_v48 = vpop.f32.mrf.mxu1 }
 0x2bc   :  { %v2584_v2 = vpop.f32.mrf.mxu0 }
 0x2bd   :  { %v11859_v25 = vpop.f32.mrf.mxu1 }
 0x2be   :  { %v11833_v8 = vpop.f32.mrf.mxu0 }
 0x2bf   :  { %v15999_v22 = vpop.f32.mrf.mxu1 }
 0x2c0   :  { %v2589_v39 = vpop.f32.mrf.mxu0 }
 0x2c1   :  { %v11862_v12 = vpop.f32.mrf.mxu1 }
 0x2c2   :  { %v11836_v56 = vpop.f32.mrf.mxu0 }
 0x2c3   :  { %v16001_v21 = vpop.f32.mrf.mxu1  ;;  %v2725_v56 = vadd.f32 %v2701_v53, %v15977_v35 }
 0x2c4   :  { %v16003_v38 = vpop.f32.mrf.mxu0 }
 0x2c5   :  { %v11865_v5 = vpop.f32.mrf.mxu1 }
 0x2c6   :  { %v11839_v29 = vpop.f32.mrf.mxu0  ;;  %v2608_v5 = vadd.f32 %v2584_v2, %v15981_v1 }
 0x2c7   :  { %v16005_v40 = vpop.f32.mrf.mxu1 }
 0x2c8   :  { %v16007_v17 = vpop.f32.mrf.mxu0 }
 0x2c9   :  { %v11868_v9 = vpop.f32.mrf.mxu1 }
 0x2ca   :  { %v11842_v57 = vpop.f32.mrf.mxu0 }
 0x2cb   :  { %v2912_v44 = vpop.f32.mrf.mxu1  ;;  %v13450_v57 = vmov 1983009808  }
 0x2cc   :  { %v16009_v28 = vpop.f32.mrf.mxu0 }
 0x2cd   :  { %v11902_v63 = vpop.f32.mrf.mxu1 }
 0x2ce   :  { %v11845_v14 = vpop.f32.mrf.mxu0  ;;  %v3350_v63 = vunpack.c.l.s4 %v13450_v57 }
 0x2cf   :  { %v2917_v32 = vpop.f32.mrf.mxu1  ;;  %v2936_v14 = vadd.f32 %v2912_v44, %v2725_v56  ;;  %v2727_v44 = vadd.f32 %v15999_v22, %v15983_v46 }
 0x2d0   :  { %v2796_v3 = vpop.f32.mrf.mxu0  ;;  %v3351_v53 = vunpack.c.0.s8 %v3350_v63 }
 0x2d1   :  { %v11905_v26 = vpop.f32.mrf.mxu1 }
 0x2d2   :  { %v11879_v54 = vpop.f32.mrf.mxu0  ;;  %v2820_v26 = vadd.f32 %v2796_v3, %v2608_v5  ;;  %v16034_v3 = vld [vmem:[#allocation11] ss:$0 sm:$0xff] }
 0x2d3   :  { %v2922_v34 = vpop.f32.mrf.mxu1 }
 0x2d4   :  { %v2801_v52 = vpop.f32.mrf.mxu0 }
 0x2d5   :  { %v11908_v47 = vpop.f32.mrf.mxu1 }
 0x2d6   :  { %v11882_v27 = vpop.f32.mrf.mxu0 }
 0x2d7   :  { %v16011_v50 = vpop.f32.mrf.mxu1  ;;  %v2726_v27 = vadd.f32 %v15997_v48, %v15979_v59  ;;  %v2610_v59 = vadd.f32 %v16003_v38, %v15989_v58  ;;  %v2611_v58 = vadd.f32 %v16007_v17, %v15993_v62  ;;  %v2729_v17 = vadd.f32 %v16005_v40, %v15991_v41 }
 0x2d8   :  { %v2806_v16 = vpop.f32.mrf.mxu0 }
 0x2d9   :  { %v11911_v4 = vpop.f32.mrf.mxu1  ;;  %v2937_v1 = vadd.f32 %v2917_v32, %v2726_v27  ;;  %v17718_v32 = vld [vmem:[#allocation45_spill] sm:$0xff] }
 0x2da   :  { %v11885_v60 = vpop.f32.mrf.mxu0  ;;  %v2609_v4 = vadd.f32 %v2589_v39, %v15985_v45 }
 0x2db   :  { %v16013_v11 = vpop.f32.mrf.mxu1 }
 0x2dc   :  { %v16015_v42 = vpop.f32.mrf.mxu0  ;;  %v2821_v2 = vadd.f32 %v2801_v52, %v2609_v4  ;;  %v16039_v52 = vsub.s32 %v3351_v53, %v17718_v32 }
 0x2dd   :  { %v11914_v20 = vpop.f32.mrf.mxu1  ;;  %v2823_v5 = vadd.f32 %v16015_v42, %v2611_v58 }
 0x2de   :  { %v11888_v37 = vpop.f32.mrf.mxu0 }
 0x2df   :  { %v3104_v13 = vpop.f32.mrf.mxu1 }
 0x2e0   :  { %v16017_v31 = vpop.f32.mrf.mxu0  ;;  %v3128_v60 = vadd.f32 %v3104_v13, %v2936_v14 }
 0x2e1   :  { %v11948_v10 = vpop.f32.mrf.mxu1 }
 0x2e2   :  { %v11891_v7 = vpop.f32.mrf.mxu0 }
 0x2e3   :  { %v3109_v18 = vpop.f32.mrf.mxu1 }
 0x2e4   :  { %v3007_v19 = vpop.f32.mrf.mxu0  ;;  %v3129_v45 = vadd.f32 %v3109_v18, %v2937_v1 }
 0x2e5   :  { %v11951_v23 = vpop.f32.mrf.mxu1  ;;  %v3031_v20 = vadd.f32 %v3007_v19, %v2820_v26  ;;  %v2938_v19 = vadd.f32 %v2922_v34, %v2727_v44 }
 0x2e6   :  { %v11925_v51 = vpop.f32.mrf.mxu0 }
 0x2e7   :  { %v3114_v33 = vpop.f32.mrf.mxu1 }
 0x2e8   :  { %v3012_v61 = vpop.f32.mrf.mxu0  ;;  %v3130_v38 = vadd.f32 %v3114_v33, %v2938_v19  ;;  %v2612_v33 = vadd.f32 %v16009_v28, %v15995_v36 }
 0x2e9   :  { %v11954_v43 = vpop.f32.mrf.mxu1  ;;  %v3032_v48 = vadd.f32 %v3012_v61, %v2821_v2 }
 0x2ea   :  { %v11928_v24 = vpop.f32.mrf.mxu0 }
 0x2eb   :  { %v16019_v30 = vpop.f32.mrf.mxu1  ;;  %v2822_v24 = vadd.f32 %v2806_v16, %v2610_v59 }
 0x2ec   :  { %v3017_v0 = vpop.f32.mrf.mxu0 }
 0x2ed   :  { %v11957_v49 = vpop.f32.mrf.mxu1  ;;  %v3033_v34 = vadd.f32 %v3017_v0, %v2822_v24 }
 0x2ee   :  { %v11931_v6 = vpop.f32.mrf.mxu0 }
 0x2ef   :  { %v16021_v55 = vpop.f32.mrf.mxu1 }
 0x2f0   :  { %v16023_v25 = vpop.f32.mrf.mxu0 }
 0x2f1   :  { %v11960_v8 = vpop.f32.mrf.mxu1  ;;  %v3034_v42 = vadd.f32 %v16023_v25, %v2823_v5 }
 0x2f2   :  { %v11934_v12 = vpop.f32.mrf.mxu0  ;;  %v2728_v8 = vadd.f32 %v16001_v21, %v15987_v15 }
 0x2f3   :  { %v3296_v29 = vpop.f32.mrf.mxu1 }
 0x2f4   :  { %v16027_v9 = vpop.f32.mrf.mxu0  ;;  %v3320_v10 = vadd.f32 %v3296_v29, %v3128_v60  ;;  %v2939_v16 = vadd.f32 %v16011_v50, %v2728_v8  ;;  %v2940_v60 = vadd.f32 %v16013_v11, %v2729_v17 }
 0x2f5   :  { %v11994_v54 = vpop.f32.mrf.mxu1 }
 0x2f6   :  { %v11937_v47 = vpop.f32.mrf.mxu0  ;;  %v3131_v50 = vadd.f32 %v16019_v30, %v2939_v16  ;;  %v3132_v25 = vadd.f32 %v16021_v55, %v2940_v60 }
 0x2f7   :  { %v3301_v37 = vpop.f32.mrf.mxu1 }
 0x2f8   :  { %v3199_v35 = vpop.f32.mrf.mxu0  ;;  %v3321_v6 = vadd.f32 %v3301_v37, %v3129_v45 }
 0x2f9   :  { %v3223_v7 = vadd.f32 %v3199_v35, %v3031_v20  ;;  %v11997_v23 = vpop.f32.mrf.mxu1  ;;  %v2824_v20 = vadd.f32 %v16017_v31, %v2612_v33 }
 0x2fa   :  { %v11971_v51 = vpop.f32.mrf.mxu0 }
 0x2fb   :  { %v3325_v39 = vmax.f32 %v3223_v7, %v3320_v10  ;;  %v3306_v13 = vpop.f32.mrf.mxu1  ;;  %v3035_v11 = vadd.f32 %v16027_v9, %v2824_v20 }
 0x2fc   :  { %v3204_v43 = vpop.f32.mrf.mxu0  ;;  %v3322_v29 = vadd.f32 %v3306_v13, %v3130_v38 }
 0x2fd   :  { %v3336_v49 = vadd.f32 %v16034_v3, %v3325_v39  ;;  %v3224_v46 = vadd.f32 %v3204_v43, %v3032_v48  ;;  %v12000_v22 = vpop.f32.mrf.mxu1 }
 0x2fe   :  { %v11974_v18 = vpop.f32.mrf.mxu0 }
 0x2ff   :  { %v3341_v61 = vmax.f32 %v3336_v49, 0.0  ;;  %v3326_v12 = vmax.f32 %v3224_v46, %v3321_v6  ;;  %v3311_v56 = vpop.f32.mrf.mxu1 }
 0x300   :  { %v3209_v57 = vpop.f32.mrf.mxu0  ;;  %v3323_v40 = vadd.f32 %v3311_v56, %v3131_v50 }
 0x301   :  { %v3337_v63 = vadd.f32 %v16034_v3, %v3326_v12  ;;  %v3225_v14 = vadd.f32 %v3209_v57, %v3033_v34  ;;  %v12003_v15 = vpop.f32.mrf.mxu1  ;;  %v3355_v21 = vrot.slane %v3341_v61, %v16039_v52  ;;  %3347 = vst.msk [vmem:[#allocation4] sm:$0x3] %vm3346_vm5, %v3341_v61  ;;  %v3362_v62 = vcombine.high %v3341_v61, %v3341_v61 }
 0x302   :  { %v11977_v0 = vpop.f32.mrf.mxu0 }
 0x303   :  { %v3342_v26 = vmax.f32 %v3337_v63, 0.0  ;;  %v3327_v54 = vmax.f32 %v3225_v14, %v3322_v29  ;;  %v3316_v47 = vpop.f32.mrf.mxu1  ;;  %v3356_v27 = vcombine.high %v3355_v21, %v3355_v21  ;;  %v3369_v4 = vrot.slane %v3362_v62, %v16039_v52 }
 0x304   :  { %v3214_v37 = vpop.f32.mrf.mxu0  ;;  %v3324_v7 = vadd.f32 %v3316_v47, %v3132_v25 }
 0x305   :  { %v3338_v41 = vadd.f32 %v16034_v3, %v3327_v54  ;;  %v3226_v36 = vadd.f32 %v3214_v37, %v3034_v42  ;;  %3357 = vrot.lane.b32.xlu1 %v3356_v27, %s13451_s3  ;;  %v12006_v28 = vpop.f32.mrf.mxu1  ;;  %3377 = vst.msk [vmem:[#allocation4 + $0x4] sm:$0x3] %vm3346_vm5, %v3342_v26  ;;  %3371 = vst.msk [vmem:[#allocation4 + $0x2] sm:$0x3] %vm3346_vm5, %v3369_v4  ;;  %v3385_v30 = vrot.slane %v3342_v26, %v16039_v52 }
 0x306   :  { %v11980_v31 = vpop.f32.mrf.mxu0  ;;  %v3391_v35 = vcombine.high %v3342_v26, %v3342_v26  ;;  %v3372_v2 = vcombine.high %v3369_v4, %v3369_v4 }
 0x307   :  { %v3343_v53 = vmax.f32 %v3338_v41, 0.0  ;;  %v3328_v1 = vmax.f32 %v3226_v36, %v3323_v40  ;;  %v3386_v10 = vcombine.high %v3385_v30, %v3385_v30 }
 0x308   :  { %v3219_v23 = vpop.f32.mrf.mxu0  ;;  %v3398_v44 = vrot.slane %v3391_v35, %v16039_v52 }
 0x309   :  { %v3339_v51 = vadd.f32 %v16034_v3, %v3328_v1  ;;  %v3227_v59 = vadd.f32 %v3219_v23, %v3035_v11  ;;  %3406 = vst.msk [vmem:[#allocation4 + $0x8] sm:$0x3] %vm3346_vm5, %v3343_v53  ;;  %3373 = vrot.lane.b32.xlu1 %v3372_v2, %s13451_s3  ;;  %3387 = vrot.lane.b32.xlu0 %v3386_v10, %s13451_s3 }
 0x30a   :  { %v3414_v55 = vrot.slane %v3343_v53, %v16039_v52  ;;  %v11983_v9 = vpop.f32.mrf.mxu0  ;;  %3400 = vst.msk [vmem:[#allocation4 + $0x6] sm:$0x3] %vm3346_vm5, %v3398_v44  ;;  %v3420_v45 = vcombine.high %v3343_v53, %v3343_v53  ;;  %v3401_v13 = vcombine.high %v3398_v44, %v3398_v44 }
 0x30b   :  { %v3344_v48 = vmax.f32 %v3339_v51, 0.0  ;;  %v3329_v39 = vmax.f32 %v3227_v59, %v3324_v7 }
 0x30c   :  { %v3415_v19 = vcombine.high %v3414_v55, %v3414_v55  ;;  %v3427_v43 = vrot.slane %v3420_v45, %v16039_v52 }
 0x30d   :  { %v3340_v32 = vadd.f32 %v16034_v3, %v3329_v39  ;;  %3435 = vst.msk [vmem:[#allocation4 + $0xc] sm:$0x3] %vm3346_vm5, %v3344_v48  ;;  %3402 = vrot.lane.b32.xlu1 %v3401_v13, %s13451_s3  ;;  %v3443_v24 = vrot.slane %v3344_v48, %v16039_v52  ;;  %v3449_v49 = vcombine.high %v3344_v48, %v3344_v48 }
 0x30e   :  { %3416 = vrot.lane.b32.xlu0 %v3415_v19, %s13451_s3  ;;  %3429 = vst.msk [vmem:[#allocation4 + $0xa] sm:$0x3] %vm3346_vm5, %v3427_v43  ;;  %v3430_v46 = vcombine.high %v3427_v43, %v3427_v43 }
 0x30f   :  { %v3345_v6 = vmax.f32 %v3340_v32, 0.0  ;;  %v3444_v22 = vcombine.high %v3443_v24, %v3443_v24  ;;  %v3456_v8 = vrot.slane %v3449_v49, %v16039_v52 }
 0x311   :  { %v3478_v58 = vcombine.high %v3345_v6, %v3345_v6  ;;  %3464 = vst.msk [vmem:[#allocation4 + $0x10] sm:$0x3] %vm3346_vm5, %v3345_v6  ;;  %3431 = vrot.lane.b32.xlu1 %v3430_v46, %s13451_s3  ;;  %3458 = vst.msk [vmem:[#allocation4 + $0xe] sm:$0x3] %vm3346_vm5, %v3456_v8  ;;  %v3472_v3 = vrot.slane %v3345_v6, %v16039_v52  ;;  %v3459_v18 = vcombine.high %v3456_v8, %v3456_v8 }
 0x312   :  { %3445 = vrot.lane.b32.xlu0 %v3444_v22, %s13451_s3 }
 0x313   :  { %v3485_v38 = vrot.slane %v3478_v58, %v16039_v52  ;;  %v3473_v34 = vcombine.high %v3472_v3, %v3472_v3 }
 0x315   :  { %3487 = vst.msk [vmem:[#allocation4 + $0x12] sm:$0x3] %vm3346_vm5, %v3485_v38  ;;  %3460 = vrot.lane.b32.xlu1 %v3459_v18, %s13451_s3 }
 0x316   :  { %3474 = vrot.lane.b32.xlu0 %v3473_v34, %s13451_s3 }
 0x317   :  { %13331 = shalt.err (!%p13328_p6)  }
 0x318   :  { %118 = dma.hbm_to_vmem [thread:$0]  %s16904_s9, 38912, %s16091_s16, [#allocation5] }
 0x319   :  { %s13340_s0 = scalar_lea.vmem %s16093_s17, 16384  ;;  %s13344_s22 = scalar_lea.vmem %s16093_s17, 32768 }
 0x31a   :  { %p13341_p7 = scmp.ne.s32.totalorder %s16093_s17, %s13340_s0  ;;  %p13345_p8 = scmp.lt.s32.totalorder %s16093_s17, %s16093_s17 }
 0x31b   :  { %p13346_p9 = scmp.lt.s32.totalorder %s13344_s22, %s13340_s0 }
 0x31d   :  { %p13347_p10 = por %p13346_p9, %p13345_p8 }
 0x31f   :  { %p13348_p11 = pnand %p13347_p10, %p13341_p7 }
 0x321   :  { %13351 = shalt.err (!%p13348_p11)  }
 0x322   :  { %130 = dma.hbm_to_vmem [thread:$0]  %s16905_s10, 16384, %s16093_s17, [#allocation5 + $0x2] }
 0x323   :  { %s131_s26 = scalar_lea.hbm %s16904_s9, 38912  ;;  %s13454_s27 = smov [#allocation2 + $0x980]  }
 0x324   :  { %s141_s4 = sshll.u32 %s13454_s27, 4  ;;  %s145_s29 = scalar_lea.hbm %s16905_s10, 16384  ;;  %s142_s4 = int_to_ptr.vmem [resolvable:$true] %s141_s4 }
 0x325   :  { %s13362_s8 = scalar_lea.vmem %s142_s4, 38912  ;;  %p13367_p13 = scmp.lt.s32.totalorder %s142_s4, %s16091_s16 }
 0x326   :  { %p13363_p12 = scmp.ne.s32.totalorder %s142_s4, %s13362_s8  ;;  %p13368_p0 = scmp.lt.s32.totalorder %s13324_s19, %s13362_s8 }
 0x328   :  { %p13369_p1 = por %p13368_p0, %p13367_p13 }
 0x32a   :  { %p13370_p2 = pnand %p13369_p1, %p13363_p12 }
 0x32c   :  { %13373 = shalt.err (!%p13370_p2)  }
 0x32d   :  { %144 = dma.hbm_to_vmem [thread:$0]  %s131_s26, 38912, %s142_s4, [#allocation5 + $0x1] }
 0x32e   :  { %s13455_s30 = smov [#allocation3 + $0x400]  }
 0x32f   :  { %s155_s2 = sshll.u32 %s13455_s30, 4  ;;  %s156_s2 = int_to_ptr.vmem [resolvable:$true] %s155_s2 }
 0x330   :  { %s13385_s9 = scalar_lea.vmem %s156_s2, 16384  ;;  %p13390_p4 = scmp.lt.s32.totalorder %s156_s2, %s16093_s17 }
 0x331   :  { %p13386_p3 = scmp.ne.s32.totalorder %s156_s2, %s13385_s9  ;;  %p13391_p5 = scmp.lt.s32.totalorder %s13344_s22, %s13385_s9 }
 0x333   :  { %p13392_p6 = por %p13391_p5, %p13390_p4 }
 0x335   :  { %p13393_p7 = pnand %p13392_p6, %p13386_p3 }
 0x337   :  { %13396 = shalt.err (!%p13393_p7)  }
 0x338   :  { %158 = dma.hbm_to_vmem [thread:$0]  %s145_s29, 16384, %s156_s2, [#allocation5 + $0x3]  ;;  %vm3360_vm6 = vcmask 1041920  }
 0x377   :  { %v3358_v61 = vpop.permute.xlu1 %3357 }
 0x378   :  { %3361 = vst.msk [vmem:[#allocation4] sm:$0x3] %vm3360_vm6, %v3358_v61 }
 0x37b   :  { %v3374_v12 = vpop.permute.xlu1 %3373  ;;  %v3388_v56 = vpop.permute.xlu0 %3387 }
 0x37c   :  { %3376 = vst.msk [vmem:[#allocation4 + $0x2] sm:$0x3] %vm3360_vm6, %v3374_v12  ;;  %3390 = vst.msk [vmem:[#allocation4 + $0x4] sm:$0x3] %vm3360_vm6, %v3388_v56 }
 0x37f   :  { %v3403_v16 = vpop.permute.xlu1 %3402 }
 0x380   :  { %v3417_v5 = vpop.permute.xlu0 %3416  ;;  %3405 = vst.msk [vmem:[#allocation4 + $0x6] sm:$0x3] %vm3360_vm6, %v3403_v16 }
 0x381   :  { %3419 = vst.msk [vmem:[#allocation4 + $0x8] sm:$0x3] %vm3360_vm6, %v3417_v5 }
 0x383   :  { %v3432_v29 = vpop.permute.xlu1 %3431 }
 0x384   :  { %v3446_v57 = vpop.permute.xlu0 %3445  ;;  %3434 = vst.msk [vmem:[#allocation4 + $0xa] sm:$0x3] %vm3360_vm6, %v3432_v29 }
 0x385   :  { %3448 = vst.msk [vmem:[#allocation4 + $0xc] sm:$0x3] %vm3360_vm6, %v3446_v57 }
 0x387   :  { %v3488_v63 = vld [vmem:[#allocation4] sm:$0xff]  ;;  %v3461_v14 = vpop.permute.xlu1 %3460 }
 0x388   :  { %v3475_v15 = vpop.permute.xlu0 %3474  ;;  %v3494_v21 = vcombine.high %v3488_v63, %v3488_v63  ;;  %v3501_v62 = vrot.slane %v3488_v63, %v16039_v52  ;;  %3463 = vst.msk [vmem:[#allocation4 + $0xe] sm:$0x3] %vm3360_vm6, %v3461_v14 }
 0x389   :  { %3477 = vst.msk [vmem:[#allocation4 + $0x10] sm:$0x3] %vm3360_vm6, %v3475_v15 }
 0x38a   :  { %v3508_v17 = vrot.slane %v3494_v21, %v16039_v52  ;;  %v3509_v33 = vcombine.high %v3501_v62, %v3501_v62  ;;  %v16132_v50 = vpack.c.bf16 %v3501_v62, %v3501_v62 }
 0x38c   :  { %v3510_v42 = vcombine.high %v3508_v17, %v3508_v17  ;;  %v16134_v0 = vpack.c.bf16 %v3509_v33, %v3509_v33  ;;  %v16136_v26 = vpack.c.bf16 %v3508_v17, %v3508_v17 }
 0x38e   :  { %v16138_v54 = vpack.c.bf16 %v3510_v42, %v3510_v42 }
 0x38f   :  { %v3489_v47 = vld [vmem:[#allocation4 + $0x8] sm:$0xff] }
 0x390   :  { %v10481_v27 = vld.sshfl [vmem:[#allocation4 + $0x10] sm:$0x33 pattern:$0x76325410]  ;;  %v3511_v4 = vcombine.high %v3489_v47, %v3489_v47  ;;  %v3518_v60 = vrot.slane %v3489_v47, %v16039_v52 }
 0x391   :  { %v3535_v20 = vcombine.high %v10481_v27, %v10481_v27  ;;  %v16141_v37 = vpack.c.bf16 %v10481_v27, %v10481_v27 }
 0x392   :  { %v3525_v41 = vrot.slane %v3511_v4, %v16039_v52  ;;  %v3526_v40 = vcombine.high %v3518_v60, %v3518_v60  ;;  %v16144_v36 = vpack.c.bf16 %v3518_v60, %v3518_v60 }
 0x393   :  { %v16146_v28 = vpack.c.bf16 %v3535_v20, %v3535_v20 }
 0x394   :  { %v3527_v30 = vcombine.high %v3525_v41, %v3525_v41  ;;  %v16148_v25 = vpack.c.bf16 %v3526_v40, %v3526_v40  ;;  %v16150_v11 = vpack.c.bf16 %v3525_v41, %v3525_v41 }
 0x396   :  { %v16152_v31 = vpack.c.bf16 %v3527_v30, %v3527_v30 }
 0x397   :  { %13426 = dma.done.wait [#allocation5], 38912 }
 0x398   :  { %13427 = vsyncadd [#allocation5], 4294928384  ;;  %5442 = vmatprep.mubr.bf16.mxu0 %v16134_v0  ;;  %5483 = vmatprep.mubr.bf16.mxu1 %v16138_v54  ;;  %v12056_v35 = vld [vmem:[#allocation2 + $0xe4] ss:$16 sps:$4 sm:$0xff]   ;;  %v12060_v53 = vld [vmem:[#allocation2 + $0xe0] ss:$16 sps:$4 sm:$0xff]  }
 0x399   :  { %v12058_v52 = vld [vmem:[#allocation2 + $0x2e4] ss:$16 sps:$4 sm:$0xff]   ;;  %5410 = vmatprep.subr.bf16.mxu0 %v12056_v35  ;;  %v12061_v1 = vld [vmem:[#allocation2 + $0x2e0] ss:$16 sps:$4 sm:$0xff]   ;;  %vm5406_vm7 = vcmask 523264  }
 0x39a   :  { %5451 = vmatprep.subr.bf16.mxu1 %v12058_v52  ;;  %v12062_v2 = vld [vmem:[#allocation2 + $0xc4] ss:$16 sps:$4 sm:$0xff]   ;;  %5411 = vmatpush1.bf16.msra.mxu0 %v12060_v53  ;;  %v12066_v7 = vld [vmem:[#allocation2 + $0xc0] ss:$16 sps:$4 sm:$0xff]  }
 0x39b   :  { %5452 = vmatpush1.bf16.msra.mxu1 %v12061_v1  ;;  %v12064_v10 = vld [vmem:[#allocation2 + $0x2c4] ss:$16 sps:$4 sm:$0xff]   ;;  %5412 = vmatprep.subr.bf16.mxu0 %v12062_v2  ;;  %v12067_v23 = vld [vmem:[#allocation2 + $0x2c0] ss:$16 sps:$4 sm:$0xff]  }
 0x39c   :  { %5453 = vmatprep.subr.bf16.mxu1 %v12064_v10  ;;  %v12068_v44 = vld [vmem:[#allocation2 + $0xa4] ss:$16 sps:$4 sm:$0xff]   ;;  %v12072_v59 = vld [vmem:[#allocation2 + $0xa0] ss:$16 sps:$4 sm:$0xff]  }
 0x39d   :  { %v12070_v51 = vld [vmem:[#allocation2 + $0x2a4] ss:$16 sps:$4 sm:$0xff]   ;;  %v12073_v55 = vld [vmem:[#allocation2 + $0x2a0] ss:$16 sps:$4 sm:$0xff]  }
 0x39e   :  { %5413 = vmatpush1.bf16.msra.mxu0 %v12066_v7  ;;  %v12074_v9 = vld [vmem:[#allocation2 + $0x84] ss:$16 sps:$4 sm:$0xff]   ;;  %v12078_v48 = vld [vmem:[#allocation2 + $0x80] ss:$16 sps:$4 sm:$0xff]  }
 0x39f   :  { %5454 = vmatpush1.bf16.msra.mxu1 %v12067_v23  ;;  %5414 = vmatprep.subr.bf16.mxu0 %v12068_v44  ;;  %v12076_v45 = vld [vmem:[#allocation2 + $0x284] ss:$16 sps:$4 sm:$0xff]   ;;  %v12079_v39 = vld [vmem:[#allocation2 + $0x280] ss:$16 sps:$4 sm:$0xff]  }
 0x3a0   :  { %5455 = vmatprep.subr.bf16.mxu1 %v12070_v51  ;;  %v12080_v13 = vld [vmem:[#allocation2 + $0x64] ss:$16 sps:$4 sm:$0xff]   ;;  %v12084_v43 = vld [vmem:[#allocation2 + $0x60] ss:$16 sps:$4 sm:$0xff]  }
 0x3a1   :  { %v12082_v19 = vld [vmem:[#allocation2 + $0x264] ss:$16 sps:$4 sm:$0xff]   ;;  %v12085_v32 = vld [vmem:[#allocation2 + $0x260] ss:$16 sps:$4 sm:$0xff]  }
 0x3a2   :  { %5415 = vmatpush1.bf16.msra.mxu0 %v12072_v59  ;;  %v12086_v24 = vld [vmem:[#allocation2 + $0x44] ss:$16 sps:$4 sm:$0xff]   ;;  %v12090_v6 = vld [vmem:[#allocation2 + $0x40] ss:$16 sps:$4 sm:$0xff]  }
 0x3a3   :  { %5456 = vmatpush1.bf16.msra.mxu1 %v12073_v55  ;;  %5416 = vmatprep.subr.bf16.mxu0 %v12074_v9  ;;  %v12088_v49 = vld [vmem:[#allocation2 + $0x244] ss:$16 sps:$4 sm:$0xff]   ;;  %v12091_v46 = vld [vmem:[#allocation2 + $0x240] ss:$16 sps:$4 sm:$0xff]  }
 0x3a4   :  { %5457 = vmatprep.subr.bf16.mxu1 %v12076_v45  ;;  %v12092_v22 = vld [vmem:[#allocation2 + $0x24] ss:$16 sps:$4 sm:$0xff]   ;;  %v12096_v58 = vld [vmem:[#allocation2 + $0x20] ss:$16 sps:$4 sm:$0xff]  }
 0x3a5   :  { %v12094_v8 = vld [vmem:[#allocation2 + $0x224] ss:$16 sps:$4 sm:$0xff]   ;;  %v12097_v3 = vld [vmem:[#allocation2 + $0x220] ss:$16 sps:$4 sm:$0xff]  }
 0x3a6   :  { %5417 = vmatpush1.bf16.msra.mxu0 %v12078_v48  ;;  %v12098_v38 = vld [vmem:[#allocation2 + $0x4] ss:$16 sps:$4 sm:$0xff]   ;;  %v12102_v34 = vld [vmem:[#allocation2] ss:$16 sps:$4 sm:$0xff]  }
 0x3a7   :  { %5458 = vmatpush1.bf16.msra.mxu1 %v12079_v39  ;;  %5418 = vmatprep.subr.bf16.mxu0 %v12080_v13  ;;  %v12100_v18 = vld [vmem:[#allocation2 + $0x204] ss:$16 sps:$4 sm:$0xff]   ;;  %v12103_v61 = vld [vmem:[#allocation2 + $0x200] ss:$16 sps:$4 sm:$0xff]  }
 0x3a8   :  { %5459 = vmatprep.subr.bf16.mxu1 %v12082_v19  ;;  %v12104_v12 = vld [vmem:[#allocation2 + $0x1e4] ss:$16 sps:$4 sm:$0xff]   ;;  %v12108_v16 = vld [vmem:[#allocation2 + $0x1e0] ss:$16 sps:$4 sm:$0xff]  }
 0x3a9   :  { %v12106_v56 = vld [vmem:[#allocation2 + $0x3e4] ss:$16 sps:$4 sm:$0xff]   ;;  %v12109_v5 = vld [vmem:[#allocation2 + $0x3e0] ss:$16 sps:$4 sm:$0xff]  }
 0x3aa   :  { %5419 = vmatpush1.bf16.msra.mxu0 %v12084_v43  ;;  %v12110_v29 = vld [vmem:[#allocation2 + $0x1c4] ss:$16 sps:$4 sm:$0xff]   ;;  %v12114_v63 = vld [vmem:[#allocation2 + $0x1c0] ss:$16 sps:$4 sm:$0xff]  }
 0x3ab   :  { %5460 = vmatpush1.bf16.msra.mxu1 %v12085_v32  ;;  %5420 = vmatprep.subr.bf16.mxu0 %v12086_v24  ;;  %v12112_v57 = vld [vmem:[#allocation2 + $0x3c4] ss:$16 sps:$4 sm:$0xff]   ;;  %v12115_v14 = vld [vmem:[#allocation2 + $0x3c0] ss:$16 sps:$4 sm:$0xff]  }
 0x3ac   :  { %5461 = vmatprep.subr.bf16.mxu1 %v12088_v49  ;;  %v12116_v15 = vld [vmem:[#allocation2 + $0x1a4] ss:$16 sps:$4 sm:$0xff]   ;;  %v12120_v62 = vld [vmem:[#allocation2 + $0x1a0] ss:$16 sps:$4 sm:$0xff]  }
 0x3ad   :  { %v12118_v21 = vld [vmem:[#allocation2 + $0x3a4] ss:$16 sps:$4 sm:$0xff]   ;;  %v12121_v17 = vld [vmem:[#allocation2 + $0x3a0] ss:$16 sps:$4 sm:$0xff]  }
 0x3ae   :  { %5421 = vmatpush1.bf16.msra.mxu0 %v12090_v6  ;;  %v12122_v33 = vld [vmem:[#allocation2 + $0x184] ss:$16 sps:$4 sm:$0xff]   ;;  %v12126_v47 = vld [vmem:[#allocation2 + $0x180] ss:$16 sps:$4 sm:$0xff]  }
 0x3af   :  { %5462 = vmatpush1.bf16.msra.mxu1 %v12091_v46  ;;  %5422 = vmatprep.subr.bf16.mxu0 %v12092_v22  ;;  %v12124_v42 = vld [vmem:[#allocation2 + $0x384] ss:$16 sps:$4 sm:$0xff]   ;;  %v12127_v27 = vld [vmem:[#allocation2 + $0x380] ss:$16 sps:$4 sm:$0xff]  }
 0x3b0   :  { %5463 = vmatprep.subr.bf16.mxu1 %v12094_v8  ;;  %v12128_v4 = vld [vmem:[#allocation2 + $0x164] ss:$16 sps:$4 sm:$0xff]   ;;  %v12132_v20 = vld [vmem:[#allocation2 + $0x160] ss:$16 sps:$4 sm:$0xff]  }
 0x3b1   :  { %v12130_v60 = vld [vmem:[#allocation2 + $0x364] ss:$16 sps:$4 sm:$0xff]   ;;  %v12133_v41 = vld [vmem:[#allocation2 + $0x360] ss:$16 sps:$4 sm:$0xff]  }
 0x3b2   :  { %5423 = vmatpush1.bf16.msra.mxu0 %v12096_v58  ;;  %v12134_v40 = vld [vmem:[#allocation2 + $0x144] ss:$16 sps:$4 sm:$0xff]   ;;  %v12138_v35 = vld [vmem:[#allocation2 + $0x140] ss:$16 sps:$4 sm:$0xff]  }
 0x3b3   :  { %5464 = vmatpush1.bf16.msra.mxu1 %v12097_v3  ;;  %5424 = vmatprep.subr.bf16.mxu0 %v12098_v38  ;;  %v12136_v30 = vld [vmem:[#allocation2 + $0x344] ss:$16 sps:$4 sm:$0xff]   ;;  %v12139_v52 = vld [vmem:[#allocation2 + $0x340] ss:$16 sps:$4 sm:$0xff]  }
 0x3b4   :  { %5465 = vmatprep.subr.bf16.mxu1 %v12100_v18  ;;  %v12140_v53 = vld [vmem:[#allocation2 + $0x124] ss:$16 sps:$4 sm:$0xff]   ;;  %v12144_v2 = vld [vmem:[#allocation2 + $0x120] ss:$16 sps:$4 sm:$0xff]  }
 0x3b5   :  { %v12142_v1 = vld [vmem:[#allocation2 + $0x324] ss:$16 sps:$4 sm:$0xff]   ;;  %v12145_v10 = vld [vmem:[#allocation2 + $0x320] ss:$16 sps:$4 sm:$0xff]  }
 0x3b6   :  { %5425 = vmatpush1.bf16.msra.mxu0 %v12102_v34  ;;  %v12146_v7 = vld [vmem:[#allocation2 + $0x104] ss:$16 sps:$4 sm:$0xff]   ;;  %v12150_v44 = vld [vmem:[#allocation2 + $0x100] ss:$16 sps:$4 sm:$0xff]  }
 0x3b7   :  { %5466 = vmatpush1.bf16.msra.mxu1 %v12103_v61  ;;  %5426 = vmatprep.subr.bf16.mxu0 %v12104_v12  ;;  %v12148_v23 = vld [vmem:[#allocation2 + $0x304] ss:$16 sps:$4 sm:$0xff]   ;;  %v12151_v51 = vld [vmem:[#allocation2 + $0x300] ss:$16 sps:$4 sm:$0xff]  }
 0x3b8   :  { %5467 = vmatprep.subr.bf16.mxu1 %v12106_v56  ;;  %v12154_v59 = vld [vmem:[#allocation2 + $0x4e4] ss:$16 sps:$4 sm:$0xff]   ;;  %v12152_v9 = vld [vmem:[#allocation2 + $0x4e0] ss:$16 sps:$4 sm:$0xff]  }
 0x3b9   :  { %v12157_v55 = vld [vmem:[#allocation2 + $0x6e4] ss:$16 sps:$4 sm:$0xff]   ;;  %v12155_v45 = vld [vmem:[#allocation2 + $0x6e0] ss:$16 sps:$4 sm:$0xff]  }
 0x3ba   :  { %5427 = vmatpush2.bf16.msra.mxu0 %v12108_v16  ;;  %v12160_v48 = vld [vmem:[#allocation2 + $0x4c4] ss:$16 sps:$4 sm:$0xff]   ;;  %v12158_v13 = vld [vmem:[#allocation2 + $0x4c0] ss:$16 sps:$4 sm:$0xff]  }
 0x3bb   :  { %5468 = vmatpush2.bf16.msra.mxu1 %v12109_v5  ;;  %5428 = vmatprep.subr.bf16.mxu0 %v12110_v29  ;;  %v12163_v39 = vld [vmem:[#allocation2 + $0x6c4] ss:$16 sps:$4 sm:$0xff]   ;;  %v12161_v19 = vld [vmem:[#allocation2 + $0x6c0] ss:$16 sps:$4 sm:$0xff]  }
 0x3bc   :  { %5469 = vmatprep.subr.bf16.mxu1 %v12112_v57  ;;  %v12166_v43 = vld [vmem:[#allocation2 + $0x4a4] ss:$16 sps:$4 sm:$0xff]   ;;  %v12164_v24 = vld [vmem:[#allocation2 + $0x4a0] ss:$16 sps:$4 sm:$0xff]  }
 0x3bd   :  { %v12169_v32 = vld [vmem:[#allocation2 + $0x6a4] ss:$16 sps:$4 sm:$0xff]   ;;  %v12167_v49 = vld [vmem:[#allocation2 + $0x6a0] ss:$16 sps:$4 sm:$0xff]  }
 0x3be   :  { %5429 = vmatpush2.bf16.msra.mxu0 %v12114_v63  ;;  %v12172_v6 = vld [vmem:[#allocation2 + $0x484] ss:$16 sps:$4 sm:$0xff]   ;;  %v12170_v22 = vld [vmem:[#allocation2 + $0x480] ss:$16 sps:$4 sm:$0xff]  }
 0x3bf   :  { %5470 = vmatpush2.bf16.msra.mxu1 %v12115_v14  ;;  %5430 = vmatprep.subr.bf16.mxu0 %v12116_v15  ;;  %v12175_v46 = vld [vmem:[#allocation2 + $0x684] ss:$16 sps:$4 sm:$0xff]   ;;  %v12173_v8 = vld [vmem:[#allocation2 + $0x680] ss:$16 sps:$4 sm:$0xff]  }
 0x3c0   :  { %5471 = vmatprep.subr.bf16.mxu1 %v12118_v21  ;;  %v12178_v58 = vld [vmem:[#allocation2 + $0x464] ss:$16 sps:$4 sm:$0xff]   ;;  %v12176_v38 = vld [vmem:[#allocation2 + $0x460] ss:$16 sps:$4 sm:$0xff]  }
 0x3c1   :  { %v12181_v3 = vld [vmem:[#allocation2 + $0x664] ss:$16 sps:$4 sm:$0xff]   ;;  %v12179_v18 = vld [vmem:[#allocation2 + $0x660] ss:$16 sps:$4 sm:$0xff]  }
 0x3c2   :  { %5431 = vmatpush2.bf16.msra.mxu0 %v12120_v62  ;;  %v12184_v34 = vld [vmem:[#allocation2 + $0x444] ss:$16 sps:$4 sm:$0xff]   ;;  %v12182_v12 = vld [vmem:[#allocation2 + $0x440] ss:$16 sps:$4 sm:$0xff]  }
 0x3c3   :  { %5472 = vmatpush2.bf16.msra.mxu1 %v12121_v17  ;;  %5432 = vmatprep.subr.bf16.mxu0 %v12122_v33  ;;  %v12187_v61 = vld [vmem:[#allocation2 + $0x644] ss:$16 sps:$4 sm:$0xff]   ;;  %v12185_v56 = vld [vmem:[#allocation2 + $0x640] ss:$16 sps:$4 sm:$0xff]  }
 0x3c4   :  { %5473 = vmatprep.subr.bf16.mxu1 %v12124_v42  ;;  %v12190_v16 = vld [vmem:[#allocation2 + $0x424] ss:$16 sps:$4 sm:$0xff]   ;;  %v12188_v29 = vld [vmem:[#allocation2 + $0x420] ss:$16 sps:$4 sm:$0xff]  }
 0x3c5   :  { %v12193_v5 = vld [vmem:[#allocation2 + $0x624] ss:$16 sps:$4 sm:$0xff]   ;;  %v12191_v57 = vld [vmem:[#allocation2 + $0x620] ss:$16 sps:$4 sm:$0xff]  }
 0x3c6   :  { %5433 = vmatpush2.bf16.msra.mxu0 %v12126_v47  ;;  %v12196_v63 = vld [vmem:[#allocation2 + $0x404] ss:$16 sps:$4 sm:$0xff]   ;;  %v12194_v15 = vld [vmem:[#allocation2 + $0x400] ss:$16 sps:$4 sm:$0xff]  }
 0x3c7   :  { %5474 = vmatpush2.bf16.msra.mxu1 %v12127_v27  ;;  %5434 = vmatprep.subr.bf16.mxu0 %v12128_v4  ;;  %v12199_v14 = vld [vmem:[#allocation2 + $0x604] ss:$16 sps:$4 sm:$0xff]   ;;  %v12197_v21 = vld [vmem:[#allocation2 + $0x600] ss:$16 sps:$4 sm:$0xff]  }
 0x3c8   :  { %5475 = vmatprep.subr.bf16.mxu1 %v12130_v60  ;;  %v12202_v62 = vld [vmem:[#allocation2 + $0x5e4] ss:$16 sps:$4 sm:$0xff]   ;;  %v12200_v33 = vld [vmem:[#allocation2 + $0x5e0] ss:$16 sps:$4 sm:$0xff]  }
 0x3c9   :  { %v12205_v17 = vld [vmem:[#allocation2 + $0x7e4] ss:$16 sps:$4 sm:$0xff]   ;;  %v12203_v42 = vld [vmem:[#allocation2 + $0x7e0] ss:$16 sps:$4 sm:$0xff]  }
 0x3ca   :  { %5435 = vmatpush2.bf16.msra.mxu0 %v12132_v20  ;;  %v12208_v47 = vld [vmem:[#allocation2 + $0x5c4] ss:$16 sps:$4 sm:$0xff]   ;;  %v12206_v4 = vld [vmem:[#allocation2 + $0x5c0] ss:$16 sps:$4 sm:$0xff]  }
 0x3cb   :  { %5476 = vmatpush2.bf16.msra.mxu1 %v12133_v41  ;;  %5436 = vmatprep.subr.bf16.mxu0 %v12134_v40  ;;  %v12211_v27 = vld [vmem:[#allocation2 + $0x7c4] ss:$16 sps:$4 sm:$0xff]   ;;  %v12209_v60 = vld [vmem:[#allocation2 + $0x7c0] ss:$16 sps:$4 sm:$0xff]  }
 0x3cc   :  { %5477 = vmatprep.subr.bf16.mxu1 %v12136_v30  ;;  %v12214_v20 = vld [vmem:[#allocation2 + $0x5a4] ss:$16 sps:$4 sm:$0xff]   ;;  %v12212_v40 = vld [vmem:[#allocation2 + $0x5a0] ss:$16 sps:$4 sm:$0xff]  }
 0x3cd   :  { %v12217_v41 = vld [vmem:[#allocation2 + $0x7a4] ss:$16 sps:$4 sm:$0xff]   ;;  %v12215_v30 = vld [vmem:[#allocation2 + $0x7a0] ss:$16 sps:$4 sm:$0xff]  }
 0x3ce   :  { %5437 = vmatpush2.bf16.msra.mxu0 %v12138_v35  ;;  %v12220_v35 = vld [vmem:[#allocation2 + $0x584] ss:$16 sps:$4 sm:$0xff]  }
 0x3cf   :  { %5478 = vmatpush2.bf16.msra.mxu1 %v12139_v52  ;;  %5438 = vmatprep.subr.bf16.mxu0 %v12140_v53  ;;  %v12223_v52 = vld [vmem:[#allocation2 + $0x784] ss:$16 sps:$4 sm:$0xff]   ;;  %v12218_v53 = vld [vmem:[#allocation2 + $0x580] ss:$16 sps:$4 sm:$0xff]  }
 0x3d0   :  { %5479 = vmatprep.subr.bf16.mxu1 %v12142_v1  ;;  %v12221_v1 = vld [vmem:[#allocation2 + $0x780] ss:$16 sps:$4 sm:$0xff]  }
 0x3d2   :  { %5439 = vmatpush2.bf16.msra.mxu0 %v12144_v2  ;;  %v12226_v2 = vld [vmem:[#allocation2 + $0x564] ss:$16 sps:$4 sm:$0xff]  }
 0x3d3   :  { %5480 = vmatpush2.bf16.msra.mxu1 %v12145_v10  ;;  %5440 = vmatprep.subr.bf16.mxu0 %v12146_v7  ;;  %v12229_v10 = vld [vmem:[#allocation2 + $0x764] ss:$16 sps:$4 sm:$0xff]   ;;  %v12224_v7 = vld [vmem:[#allocation2 + $0x560] ss:$16 sps:$4 sm:$0xff]  }
 0x3d4   :  { %5481 = vmatprep.subr.bf16.mxu1 %v12148_v23  ;;  %v12227_v23 = vld [vmem:[#allocation2 + $0x760] ss:$16 sps:$4 sm:$0xff]  }
 0x3d6   :  { %5441 = vmatpush2.bf16.msra.mxu0 %v12150_v44  ;;  %v12232_v44 = vld [vmem:[#allocation2 + $0x544] ss:$16 sps:$4 sm:$0xff]  }
 0x3d7   :  { %5482 = vmatpush2.bf16.msra.mxu1 %v12151_v51  ;;  %5492 = vmatprep.subr.bf16.mxu0 %v12154_v59  ;;  %v12235_v51 = vld [vmem:[#allocation2 + $0x744] ss:$16 sps:$4 sm:$0xff]   ;;  %v12230_v59 = vld [vmem:[#allocation2 + $0x540] ss:$16 sps:$4 sm:$0xff]  }
 0x3d8   :  { %5533 = vmatprep.subr.bf16.mxu1 %v12157_v55  ;;  %v12233_v55 = vld [vmem:[#allocation2 + $0x740] ss:$16 sps:$4 sm:$0xff]  }
 0x3d9   :  { %5443 = vmatmul.mubr.bf16.vlgmr.msra.gmra.mxu0 %v16132_v50 }
 0x3da   :  { %5484 = vmatmul.mubr.bf16.vlgmr.msra.gmra.mxu1 %v16136_v26  ;;  %5493 = vmatpush1.bf16.msra.mxu0 %v12152_v9  ;;  %v12238_v9 = vld [vmem:[#allocation2 + $0x524] ss:$16 sps:$4 sm:$0xff]  }
 0x3db   :  { %5534 = vmatpush1.bf16.msra.mxu1 %v12155_v45  ;;  %5494 = vmatprep.subr.bf16.mxu0 %v12160_v48  ;;  %v12241_v45 = vld [vmem:[#allocation2 + $0x724] ss:$16 sps:$4 sm:$0xff]   ;;  %v12236_v48 = vld [vmem:[#allocation2 + $0x520] ss:$16 sps:$4 sm:$0xff]  }
 0x3dc   :  { %5535 = vmatprep.subr.bf16.mxu1 %v12163_v39  ;;  %5524 = vmatprep.mubr.bf16.mxu0 %v16148_v25  ;;  %v12239_v39 = vld [vmem:[#allocation2 + $0x720] ss:$16 sps:$4 sm:$0xff]  }
 0x3dd   :  { %5565 = vmatprep.mubr.bf16.mxu1 %v16152_v31 }
 0x3de   :  { %5495 = vmatpush1.bf16.msra.mxu0 %v12158_v13  ;;  %v12244_v13 = vld [vmem:[#allocation2 + $0x504] ss:$16 sps:$4 sm:$0xff]  }
 0x3df   :  { %5536 = vmatpush1.bf16.msra.mxu1 %v12161_v19  ;;  %5496 = vmatprep.subr.bf16.mxu0 %v12166_v43  ;;  %v12247_v19 = vld [vmem:[#allocation2 + $0x704] ss:$16 sps:$4 sm:$0xff]   ;;  %v12242_v43 = vld [vmem:[#allocation2 + $0x500] ss:$16 sps:$4 sm:$0xff]  }
 0x3e0   :  { %5537 = vmatprep.subr.bf16.mxu1 %v12169_v32  ;;  %v12245_v32 = vld [vmem:[#allocation2 + $0x700] ss:$16 sps:$4 sm:$0xff]  }
 0x3e2   :  { %5497 = vmatpush1.bf16.msra.mxu0 %v12164_v24  ;;  %v12250_v24 = vld [vmem:[#allocation2 + $0x8e4] ss:$16 sps:$4 sm:$0xff]  }
 0x3e3   :  { %5538 = vmatpush1.bf16.msra.mxu1 %v12167_v49  ;;  %5498 = vmatprep.subr.bf16.mxu0 %v12172_v6  ;;  %v12253_v49 = vld [vmem:[#allocation2 + $0xec] ss:$16 sps:$4 sm:$0xff]   ;;  %v12248_v6 = vld [vmem:[#allocation2 + $0x8e0] ss:$16 sps:$4 sm:$0xff]  }
 0x3e4   :  { %5539 = vmatprep.subr.bf16.mxu1 %v12175_v46  ;;  %v12251_v46 = vld [vmem:[#allocation2 + $0xe8] ss:$16 sps:$4 sm:$0xff]  }
 0x3e6   :  { %5499 = vmatpush1.bf16.msra.mxu0 %v12170_v22  ;;  %v12256_v22 = vld [vmem:[#allocation2 + $0x8c4] ss:$16 sps:$4 sm:$0xff]  }
 0x3e7   :  { %5540 = vmatpush1.bf16.msra.mxu1 %v12173_v8  ;;  %5500 = vmatprep.subr.bf16.mxu0 %v12178_v58  ;;  %v12259_v8 = vld [vmem:[#allocation2 + $0xcc] ss:$16 sps:$4 sm:$0xff]   ;;  %v12254_v58 = vld [vmem:[#allocation2 + $0x8c0] ss:$16 sps:$4 sm:$0xff]  }
 0x3e8   :  { %5541 = vmatprep.subr.bf16.mxu1 %v12181_v3  ;;  %v12257_v3 = vld [vmem:[#allocation2 + $0xc8] ss:$16 sps:$4 sm:$0xff]  }
 0x3ea   :  { %5501 = vmatpush1.bf16.msra.mxu0 %v12176_v38  ;;  %v12262_v38 = vld [vmem:[#allocation2 + $0x8a4] ss:$16 sps:$4 sm:$0xff]  }
 0x3eb   :  { %5542 = vmatpush1.bf16.msra.mxu1 %v12179_v18  ;;  %5502 = vmatprep.subr.bf16.mxu0 %v12184_v34  ;;  %v12265_v18 = vld [vmem:[#allocation2 + $0xac] ss:$16 sps:$4 sm:$0xff]   ;;  %v12260_v34 = vld [vmem:[#allocation2 + $0x8a0] ss:$16 sps:$4 sm:$0xff]  }
 0x3ec   :  { %5543 = vmatprep.subr.bf16.mxu1 %v12187_v61  ;;  %v12263_v61 = vld [vmem:[#allocation2 + $0xa8] ss:$16 sps:$4 sm:$0xff]  }
 0x3ee   :  { %5503 = vmatpush1.bf16.msra.mxu0 %v12182_v12  ;;  %v12268_v12 = vld [vmem:[#allocation2 + $0x884] ss:$16 sps:$4 sm:$0xff]  }
 0x3ef   :  { %5544 = vmatpush1.bf16.msra.mxu1 %v12185_v56  ;;  %5504 = vmatprep.subr.bf16.mxu0 %v12190_v16  ;;  %v12271_v56 = vld [vmem:[#allocation2 + $0x8c] ss:$16 sps:$4 sm:$0xff]   ;;  %v12266_v16 = vld [vmem:[#allocation2 + $0x880] ss:$16 sps:$4 sm:$0xff]  }
 0x3f0   :  { %5545 = vmatprep.subr.bf16.mxu1 %v12193_v5  ;;  %v12269_v5 = vld [vmem:[#allocation2 + $0x88] ss:$16 sps:$4 sm:$0xff]  }
 0x3f2   :  { %5505 = vmatpush1.bf16.msra.mxu0 %v12188_v29  ;;  %v12274_v29 = vld [vmem:[#allocation2 + $0x864] ss:$16 sps:$4 sm:$0xff]  }
 0x3f3   :  { %5546 = vmatpush1.bf16.msra.mxu1 %v12191_v57  ;;  %5506 = vmatprep.subr.bf16.mxu0 %v12196_v63  ;;  %v12277_v57 = vld [vmem:[#allocation2 + $0x6c] ss:$16 sps:$4 sm:$0xff]   ;;  %v12272_v63 = vld [vmem:[#allocation2 + $0x860] ss:$16 sps:$4 sm:$0xff]  }
 0x3f4   :  { %5547 = vmatprep.subr.bf16.mxu1 %v12199_v14  ;;  %v12275_v14 = vld [vmem:[#allocation2 + $0x68] ss:$16 sps:$4 sm:$0xff]  }
 0x3f6   :  { %5507 = vmatpush1.bf16.msra.mxu0 %v12194_v15  ;;  %v12280_v15 = vld [vmem:[#allocation2 + $0x844] ss:$16 sps:$4 sm:$0xff]  }
 0x3f7   :  { %5548 = vmatpush1.bf16.msra.mxu1 %v12197_v21  ;;  %5508 = vmatprep.subr.bf16.mxu0 %v12202_v62  ;;  %v12283_v21 = vld [vmem:[#allocation2 + $0x4c] ss:$16 sps:$4 sm:$0xff]   ;;  %v12278_v62 = vld [vmem:[#allocation2 + $0x840] ss:$16 sps:$4 sm:$0xff]  }
 0x3f8   :  { %5549 = vmatprep.subr.bf16.mxu1 %v12205_v17  ;;  %v12281_v17 = vld [vmem:[#allocation2 + $0x48] ss:$16 sps:$4 sm:$0xff]  }
 0x3fa   :  { %5509 = vmatpush2.bf16.msra.mxu0 %v12200_v33  ;;  %v12286_v33 = vld [vmem:[#allocation2 + $0x824] ss:$16 sps:$4 sm:$0xff]  }
 0x3fb   :  { %5550 = vmatpush2.bf16.msra.mxu1 %v12203_v42  ;;  %5510 = vmatprep.subr.bf16.mxu0 %v12208_v47  ;;  %v12289_v42 = vld [vmem:[#allocation2 + $0x2c] ss:$16 sps:$4 sm:$0xff]   ;;  %v12284_v47 = vld [vmem:[#allocation2 + $0x820] ss:$16 sps:$4 sm:$0xff]  }
 0x3fc   :  { %5551 = vmatprep.subr.bf16.mxu1 %v12211_v27  ;;  %v12287_v27 = vld [vmem:[#allocation2 + $0x28] ss:$16 sps:$4 sm:$0xff]  }
 0x3fe   :  { %5511 = vmatpush2.bf16.msra.mxu0 %v12206_v4  ;;  %v12292_v4 = vld [vmem:[#allocation2 + $0x804] ss:$16 sps:$4 sm:$0xff]  }
 0x3ff   :  { %5552 = vmatpush2.bf16.msra.mxu1 %v12209_v60  ;;  %5512 = vmatprep.subr.bf16.mxu0 %v12214_v20  ;;  %v12295_v60 = vld [vmem:[#allocation2 + $0xc] ss:$16 sps:$4 sm:$0xff]   ;;  %v12290_v20 = vld [vmem:[#allocation2 + $0x800] ss:$16 sps:$4 sm:$0xff]  }
 0x400   :  { %5553 = vmatprep.subr.bf16.mxu1 %v12217_v41  ;;  %v12293_v41 = vld [vmem:[#allocation2 + $0x8] ss:$16 sps:$4 sm:$0xff]  }
 0x402   :  { %5513 = vmatpush2.bf16.msra.mxu0 %v12212_v40  ;;  %v12298_v40 = vld [vmem:[#allocation2 + $0x964] ss:$16 sps:$4 sm:$0xff]  }
 0x403   :  { %5554 = vmatpush2.bf16.msra.mxu1 %v12215_v30  ;;  %5514 = vmatprep.subr.bf16.mxu0 %v12220_v35  ;;  %v12301_v30 = vld [vmem:[#allocation2 + $0x1ec] ss:$16 sps:$4 sm:$0xff]   ;;  %v12296_v35 = vld [vmem:[#allocation2 + $0x960] ss:$16 sps:$4 sm:$0xff]  }
 0x404   :  { %5555 = vmatprep.subr.bf16.mxu1 %v12223_v52  ;;  %v12299_v52 = vld [vmem:[#allocation2 + $0x1e8] ss:$16 sps:$4 sm:$0xff]  }
 0x406   :  { %5515 = vmatpush2.bf16.msra.mxu0 %v12218_v53  ;;  %v12304_v53 = vld [vmem:[#allocation2 + $0x944] ss:$16 sps:$4 sm:$0xff]  }
 0x407   :  { %5556 = vmatpush2.bf16.msra.mxu1 %v12221_v1  ;;  %5516 = vmatprep.subr.bf16.mxu0 %v12226_v2  ;;  %v12307_v1 = vld [vmem:[#allocation2 + $0x1cc] ss:$16 sps:$4 sm:$0xff]   ;;  %v12302_v2 = vld [vmem:[#allocation2 + $0x940] ss:$16 sps:$4 sm:$0xff]  }
 0x408   :  { %5557 = vmatprep.subr.bf16.mxu1 %v12229_v10  ;;  %v12305_v10 = vld [vmem:[#allocation2 + $0x1c8] ss:$16 sps:$4 sm:$0xff]  }
 0x40a   :  { %5517 = vmatpush2.bf16.msra.mxu0 %v12224_v7  ;;  %v12310_v7 = vld [vmem:[#allocation2 + $0x924] ss:$16 sps:$4 sm:$0xff]  }
 0x40b   :  { %5558 = vmatpush2.bf16.msra.mxu1 %v12227_v23  ;;  %5518 = vmatprep.subr.bf16.mxu0 %v12232_v44  ;;  %v12313_v23 = vld [vmem:[#allocation2 + $0x1ac] ss:$16 sps:$4 sm:$0xff]   ;;  %v12308_v44 = vld [vmem:[#allocation2 + $0x920] ss:$16 sps:$4 sm:$0xff]  }
 0x40c   :  { %5559 = vmatprep.subr.bf16.mxu1 %v12235_v51  ;;  %v12311_v51 = vld [vmem:[#allocation2 + $0x1a8] ss:$16 sps:$4 sm:$0xff]  }
 0x40e   :  { %5519 = vmatpush2.bf16.msra.mxu0 %v12230_v59  ;;  %v12316_v59 = vld [vmem:[#allocation2 + $0x904] ss:$16 sps:$4 sm:$0xff]  }
 0x40f   :  { %5560 = vmatpush2.bf16.msra.mxu1 %v12233_v55  ;;  %5520 = vmatprep.subr.bf16.mxu0 %v12238_v9  ;;  %v12319_v55 = vld [vmem:[#allocation2 + $0x18c] ss:$16 sps:$4 sm:$0xff]   ;;  %v12314_v9 = vld [vmem:[#allocation2 + $0x900] ss:$16 sps:$4 sm:$0xff]  }
 0x410   :  { %5561 = vmatprep.subr.bf16.mxu1 %v12241_v45  ;;  %v12317_v45 = vld [vmem:[#allocation2 + $0x188] ss:$16 sps:$4 sm:$0xff]  }
 0x412   :  { %5521 = vmatpush2.bf16.msra.mxu0 %v12236_v48  ;;  %v12322_v48 = vld [vmem:[#allocation2 + $0x16c] ss:$16 sps:$4 sm:$0xff]  }
 0x413   :  { %5562 = vmatpush2.bf16.msra.mxu1 %v12239_v39  ;;  %5522 = vmatprep.subr.bf16.mxu0 %v12244_v13  ;;  %v12325_v39 = vld [vmem:[#allocation2 + $0x2ec] ss:$16 sps:$4 sm:$0xff]   ;;  %v12320_v13 = vld [vmem:[#allocation2 + $0x168] ss:$16 sps:$4 sm:$0xff]  }
 0x414   :  { %5563 = vmatprep.subr.bf16.mxu1 %v12247_v19  ;;  %v12323_v19 = vld [vmem:[#allocation2 + $0x2e8] ss:$16 sps:$4 sm:$0xff]  }
 0x416   :  { %5523 = vmatpush2.bf16.msra.mxu0 %v12242_v43  ;;  %v12328_v43 = vld [vmem:[#allocation2 + $0x14c] ss:$16 sps:$4 sm:$0xff]  }
 0x417   :  { %5564 = vmatpush2.bf16.msra.mxu1 %v12245_v32  ;;  %5574 = vmatprep.subr.bf16.mxu0 %v12250_v24  ;;  %v12331_v32 = vld [vmem:[#allocation2 + $0x2cc] ss:$16 sps:$4 sm:$0xff]   ;;  %v12326_v24 = vld [vmem:[#allocation2 + $0x148] ss:$16 sps:$4 sm:$0xff]  }
 0x418   :  { %5615 = vmatprep.subr.bf16.mxu1 %v12253_v49  ;;  %v12329_v49 = vld [vmem:[#allocation2 + $0x2c8] ss:$16 sps:$4 sm:$0xff]  }
 0x419   :  { %5525 = vmatmul.mubr.bf16.vlgmr.msra.gmra.mxu0 %v16144_v36 }
 0x41a   :  { %5566 = vmatmul.mubr.bf16.vlgmr.msra.gmra.mxu1 %v16150_v11  ;;  %5575 = vmatpush1.bf16.msra.mxu0 %v12248_v6  ;;  %v12334_v6 = vld [vmem:[#allocation2 + $0x12c] ss:$16 sps:$4 sm:$0xff]  }
 0x41b   :  { %5616 = vmatpush1.bf16.msra.mxu1 %v12251_v46  ;;  %5576 = vmatprep.subr.bf16.mxu0 %v12256_v22  ;;  %v12337_v46 = vld [vmem:[#allocation2 + $0x2ac] ss:$16 sps:$4 sm:$0xff]   ;;  %v12332_v22 = vld [vmem:[#allocation2 + $0x128] ss:$16 sps:$4 sm:$0xff]  }
 0x41c   :  { %5617 = vmatprep.subr.bf16.mxu1 %v12259_v8  ;;  %10786 = vmatprep.mubr.msk.bf16.mxu0 %vm5406_vm7, %v16146_v28  ;;  %v12335_v8 = vld [vmem:[#allocation2 + $0x2a8] ss:$16 sps:$4 sm:$0xff]  }
 0x41d   :  { %5647 = vmatprep.mubr.bf16.mxu1 %v16134_v0 }
 0x41e   :  { %5577 = vmatpush1.bf16.msra.mxu0 %v12254_v58  ;;  %v12340_v58 = vld [vmem:[#allocation2 + $0x10c] ss:$16 sps:$4 sm:$0xff]  }
 0x41f   :  { %5618 = vmatpush1.bf16.msra.mxu1 %v12257_v3  ;;  %5578 = vmatprep.subr.bf16.mxu0 %v12262_v38  ;;  %v12343_v3 = vld [vmem:[#allocation2 + $0x28c] ss:$16 sps:$4 sm:$0xff]   ;;  %v12338_v38 = vld [vmem:[#allocation2 + $0x108] ss:$16 sps:$4 sm:$0xff]  }
 0x420   :  { %5619 = vmatprep.subr.bf16.mxu1 %v12265_v18  ;;  %v12341_v18 = vld [vmem:[#allocation2 + $0x288] ss:$16 sps:$4 sm:$0xff]  }
 0x422   :  { %5579 = vmatpush1.bf16.msra.mxu0 %v12260_v34  ;;  %v12346_v34 = vld [vmem:[#allocation2 + $0x26c] ss:$16 sps:$4 sm:$0xff]  }
 0x423   :  { %5620 = vmatpush1.bf16.msra.mxu1 %v12263_v61  ;;  %5580 = vmatprep.subr.bf16.mxu0 %v12268_v12  ;;  %v12349_v61 = vld [vmem:[#allocation2 + $0x4ec] ss:$16 sps:$4 sm:$0xff]   ;;  %v12344_v12 = vld [vmem:[#allocation2 + $0x268] ss:$16 sps:$4 sm:$0xff]  }
 0x424   :  { %5621 = vmatprep.subr.bf16.mxu1 %v12271_v56  ;;  %v12347_v56 = vld [vmem:[#allocation2 + $0x4e8] ss:$16 sps:$4 sm:$0xff]  }
 0x426   :  { %5581 = vmatpush1.bf16.msra.mxu0 %v12266_v16  ;;  %v12352_v16 = vld [vmem:[#allocation2 + $0x24c] ss:$16 sps:$4 sm:$0xff]  }
 0x427   :  { %5622 = vmatpush1.bf16.msra.mxu1 %v12269_v5  ;;  %5582 = vmatprep.subr.bf16.mxu0 %v12274_v29  ;;  %v12355_v5 = vld [vmem:[#allocation2 + $0x4cc] ss:$16 sps:$4 sm:$0xff]   ;;  %v12350_v29 = vld [vmem:[#allocation2 + $0x248] ss:$16 sps:$4 sm:$0xff]  }
 0x428   :  { %5623 = vmatprep.subr.bf16.mxu1 %v12277_v57  ;;  %v12353_v57 = vld [vmem:[#allocation2 + $0x4c8] ss:$16 sps:$4 sm:$0xff]  }
 0x42a   :  { %5583 = vmatpush1.bf16.msra.mxu0 %v12272_v63  ;;  %v12358_v63 = vld [vmem:[#allocation2 + $0x22c] ss:$16 sps:$4 sm:$0xff]  }
 0x42b   :  { %5624 = vmatpush1.bf16.msra.mxu1 %v12275_v14  ;;  %5584 = vmatprep.subr.bf16.mxu0 %v12280_v15  ;;  %v12361_v14 = vld [vmem:[#allocation2 + $0x4ac] ss:$16 sps:$4 sm:$0xff]   ;;  %v12356_v15 = vld [vmem:[#allocation2 + $0x228] ss:$16 sps:$4 sm:$0xff]  }
 0x42c   :  { %5625 = vmatprep.subr.bf16.mxu1 %v12283_v21  ;;  %v12359_v21 = vld [vmem:[#allocation2 + $0x4a8] ss:$16 sps:$4 sm:$0xff]  }
 0x42e   :  { %5585 = vmatpush1.bf16.msra.mxu0 %v12278_v62  ;;  %v12364_v62 = vld [vmem:[#allocation2 + $0x20c] ss:$16 sps:$4 sm:$0xff]  }
 0x42f   :  { %5626 = vmatpush1.bf16.msra.mxu1 %v12281_v17  ;;  %5586 = vmatprep.subr.bf16.mxu0 %v12286_v33  ;;  %v12367_v17 = vld [vmem:[#allocation2 + $0x48c] ss:$16 sps:$4 sm:$0xff]   ;;  %v12362_v33 = vld [vmem:[#allocation2 + $0x208] ss:$16 sps:$4 sm:$0xff]  }
 0x430   :  { %5627 = vmatprep.subr.bf16.mxu1 %v12289_v42  ;;  %v12365_v42 = vld [vmem:[#allocation2 + $0x488] ss:$16 sps:$4 sm:$0xff]  }
 0x432   :  { %5587 = vmatpush1.bf16.msra.mxu0 %v12284_v47  ;;  %v12370_v47 = vld [vmem:[#allocation2 + $0x3ec] ss:$16 sps:$4 sm:$0xff]  }
 0x433   :  { %5628 = vmatpush1.bf16.msra.mxu1 %v12287_v27  ;;  %5588 = vmatprep.subr.bf16.mxu0 %v12292_v4  ;;  %v12373_v27 = vld [vmem:[#allocation2 + $0x46c] ss:$16 sps:$4 sm:$0xff]   ;;  %v12368_v4 = vld [vmem:[#allocation2 + $0x3e8] ss:$16 sps:$4 sm:$0xff]  }
 0x434   :  { %5629 = vmatprep.subr.bf16.mxu1 %v12295_v60  ;;  %v12371_v60 = vld [vmem:[#allocation2 + $0x468] ss:$16 sps:$4 sm:$0xff]  }
 0x436   :  { %5589 = vmatpush1.bf16.msra.mxu0 %v12290_v20  ;;  %v12376_v20 = vld [vmem:[#allocation2 + $0x3cc] ss:$16 sps:$4 sm:$0xff]  }
 0x437   :  { %5630 = vmatpush1.bf16.msra.mxu1 %v12293_v41  ;;  %5598 = vmatprep.subr.bf16.mxu0 %v12298_v40  ;;  %v12379_v41 = vld [vmem:[#allocation2 + $0x44c] ss:$16 sps:$4 sm:$0xff]   ;;  %v12374_v40 = vld [vmem:[#allocation2 + $0x3c8] ss:$16 sps:$4 sm:$0xff]  }
 0x438   :  { %5631 = vmatprep.subr.bf16.mxu1 %v12301_v30  ;;  %v12377_v30 = vld [vmem:[#allocation2 + $0x448] ss:$16 sps:$4 sm:$0xff]  }
 0x43a   :  { %5599 = vmatpush2.bf16.msra.mxu0 %v12296_v35  ;;  %v12382_v35 = vld [vmem:[#allocation2 + $0x3ac] ss:$16 sps:$4 sm:$0xff]  }
 0x43b   :  { %5632 = vmatpush2.bf16.msra.mxu1 %v12299_v52  ;;  %5600 = vmatprep.subr.bf16.mxu0 %v12304_v53  ;;  %v12385_v52 = vld [vmem:[#allocation2 + $0x42c] ss:$16 sps:$4 sm:$0xff]   ;;  %v12380_v53 = vld [vmem:[#allocation2 + $0x3a8] ss:$16 sps:$4 sm:$0xff]  }
 0x43c   :  { %5633 = vmatprep.subr.bf16.mxu1 %v12307_v1  ;;  %v12383_v1 = vld [vmem:[#allocation2 + $0x428] ss:$16 sps:$4 sm:$0xff]  }
 0x43e   :  { %5601 = vmatpush2.bf16.msra.mxu0 %v12302_v2  ;;  %v12388_v2 = vld [vmem:[#allocation2 + $0x38c] ss:$16 sps:$4 sm:$0xff]  }
 0x43f   :  { %5634 = vmatpush2.bf16.msra.mxu1 %v12305_v10  ;;  %5602 = vmatprep.subr.bf16.mxu0 %v12310_v7  ;;  %v12391_v10 = vld [vmem:[#allocation2 + $0x40c] ss:$16 sps:$4 sm:$0xff]   ;;  %v12386_v7 = vld [vmem:[#allocation2 + $0x388] ss:$16 sps:$4 sm:$0xff]  }
 0x440   :  { %5635 = vmatprep.subr.bf16.mxu1 %v12313_v23  ;;  %v12389_v23 = vld [vmem:[#allocation2 + $0x408] ss:$16 sps:$4 sm:$0xff]  }
 0x442   :  { %5603 = vmatpush2.bf16.msra.mxu0 %v12308_v44  ;;  %v12394_v44 = vld [vmem:[#allocation2 + $0x36c] ss:$16 sps:$4 sm:$0xff]  }
 0x443   :  { %5636 = vmatpush2.bf16.msra.mxu1 %v12311_v51  ;;  %5604 = vmatprep.subr.bf16.mxu0 %v12316_v59  ;;  %v12397_v51 = vld [vmem:[#allocation2 + $0x5ec] ss:$16 sps:$4 sm:$0xff]   ;;  %v12392_v59 = vld [vmem:[#allocation2 + $0x368] ss:$16 sps:$4 sm:$0xff]  }
 0x444   :  { %5637 = vmatprep.subr.bf16.mxu1 %v12319_v55  ;;  %v12395_v55 = vld [vmem:[#allocation2 + $0x5e8] ss:$16 sps:$4 sm:$0xff]  }
 0x446   :  { %5605 = vmatpush2.bf16.msra.mxu0 %v12314_v9  ;;  %v12400_v9 = vld [vmem:[#allocation2 + $0x34c] ss:$16 sps:$4 sm:$0xff]  }
 0x447   :  { %5638 = vmatpush2.bf16.msra.mxu1 %v12317_v45  ;;  %5656 = vmatprep.subr.bf16.mxu0 %v12325_v39  ;;  %v12403_v45 = vld [vmem:[#allocation2 + $0x5cc] ss:$16 sps:$4 sm:$0xff]   ;;  %v12401_v39 = vld [vmem:[#allocation2 + $0x5c8] ss:$16 sps:$4 sm:$0xff]  }
 0x448   :  { %5639 = vmatprep.subr.bf16.mxu1 %v12322_v48  ;;  %v12398_v48 = vld [vmem:[#allocation2 + $0x348] ss:$16 sps:$4 sm:$0xff]  }
 0x449   :  { %5607 = vmatmul.mubr.bf16.vlgmr.msra.gmra.mxu0 %v16141_v37 }
 0x44a   :  { %5657 = vmatpush1.bf16.msra.mxu0 %v12323_v19  ;;  %5688 = vmatprep.mubr.bf16.mxu0 %v16138_v54  ;;  %v12409_v19 = vld [vmem:[#allocation2 + $0x5ac] ss:$16 sps:$4 sm:$0xff]  }
 0x44b   :  { %5640 = vmatpush2.bf16.msra.mxu1 %v12320_v13  ;;  %5658 = vmatprep.subr.bf16.mxu0 %v12331_v32  ;;  %v12406_v13 = vld [vmem:[#allocation2 + $0x32c] ss:$16 sps:$4 sm:$0xff]   ;;  %v12407_v32 = vld [vmem:[#allocation2 + $0x5a8] ss:$16 sps:$4 sm:$0xff]  }
 0x44c   :  { %5641 = vmatprep.subr.bf16.mxu1 %v12328_v43  ;;  %v12404_v43 = vld [vmem:[#allocation2 + $0x328] ss:$16 sps:$4 sm:$0xff]  }
 0x44e   :  { %5659 = vmatpush1.bf16.msra.mxu0 %v12329_v49  ;;  %v12415_v49 = vld [vmem:[#allocation2 + $0x58c] ss:$16 sps:$4 sm:$0xff]  }
 0x44f   :  { %5642 = vmatpush2.bf16.msra.mxu1 %v12326_v24  ;;  %5660 = vmatprep.subr.bf16.mxu0 %v12337_v46  ;;  %v12412_v24 = vld [vmem:[#allocation2 + $0x30c] ss:$16 sps:$4 sm:$0xff]   ;;  %v12413_v46 = vld [vmem:[#allocation2 + $0x588] ss:$16 sps:$4 sm:$0xff]  }
 0x450   :  { %5643 = vmatprep.subr.bf16.mxu1 %v12334_v6  ;;  %v12410_v6 = vld [vmem:[#allocation2 + $0x308] ss:$16 sps:$4 sm:$0xff]  }
 0x452   :  { %5661 = vmatpush1.bf16.msra.mxu0 %v12335_v8  ;;  %v12421_v8 = vld [vmem:[#allocation2 + $0x6ec] ss:$16 sps:$4 sm:$0xff]  }
 0x453   :  { %5644 = vmatpush2.bf16.msra.mxu1 %v12332_v22  ;;  %5662 = vmatprep.subr.bf16.mxu0 %v12343_v3  ;;  %v12418_v22 = vld [vmem:[#allocation2 + $0x56c] ss:$16 sps:$4 sm:$0xff]   ;;  %v12419_v3 = vld [vmem:[#allocation2 + $0x6e8] ss:$16 sps:$4 sm:$0xff]  }
 0x454   :  { %5645 = vmatprep.subr.bf16.mxu1 %v12340_v58  ;;  %v12416_v58 = vld [vmem:[#allocation2 + $0x568] ss:$16 sps:$4 sm:$0xff]  }
 0x456   :  { %5663 = vmatpush1.bf16.msra.mxu0 %v12341_v18  ;;  %v12427_v18 = vld [vmem:[#allocation2 + $0x6cc] ss:$16 sps:$4 sm:$0xff]  }
 0x457   :  { %5646 = vmatpush2.bf16.msra.mxu1 %v12338_v38  ;;  %5664 = vmatprep.subr.bf16.mxu0 %v12346_v34  ;;  %v12424_v38 = vld [vmem:[#allocation2 + $0x54c] ss:$16 sps:$4 sm:$0xff]   ;;  %v12422_v34 = vld [vmem:[#allocation2 + $0x548] ss:$16 sps:$4 sm:$0xff]  }
 0x458   :  { %5697 = vmatprep.subr.bf16.mxu1 %v12349_v61  ;;  %v12425_v61 = vld [vmem:[#allocation2 + $0x6c8] ss:$16 sps:$4 sm:$0xff]  }
 0x45a   :  { %5648 = vmatmul.mubr.bf16.vlgmr.msra.gmra.mxu1 %v16132_v50  ;;  %5665 = vmatpush1.bf16.msra.mxu0 %v12344_v12  ;;  %v12430_v12 = vld [vmem:[#allocation2 + $0x52c] ss:$16 sps:$4 sm:$0xff]  }
 0x45b   :  { %5698 = vmatpush1.bf16.msra.mxu1 %v12347_v56  ;;  %5666 = vmatprep.subr.bf16.mxu0 %v12352_v16  ;;  %v12433_v56 = vld [vmem:[#allocation2 + $0x6ac] ss:$16 sps:$4 sm:$0xff]   ;;  %v12428_v16 = vld [vmem:[#allocation2 + $0x528] ss:$16 sps:$4 sm:$0xff]  }
 0x45c   :  { %5699 = vmatprep.subr.bf16.mxu1 %v12355_v5  ;;  %5729 = vmatprep.mubr.bf16.mxu1 %v16148_v25  ;;  %v12431_v5 = vld [vmem:[#allocation2 + $0x6a8] ss:$16 sps:$4 sm:$0xff]  }
 0x45e   :  { %5667 = vmatpush1.bf16.msra.mxu0 %v12350_v29  ;;  %v12436_v29 = vld [vmem:[#allocation2 + $0x50c] ss:$16 sps:$4 sm:$0xff]  }
 0x45f   :  { %5700 = vmatpush1.bf16.msra.mxu1 %v12353_v57  ;;  %5668 = vmatprep.subr.bf16.mxu0 %v12358_v63  ;;  %v12439_v57 = vld [vmem:[#allocation2 + $0x68c] ss:$16 sps:$4 sm:$0xff]   ;;  %v12434_v63 = vld [vmem:[#allocation2 + $0x508] ss:$16 sps:$4 sm:$0xff]  }
 0x460   :  { %5701 = vmatprep.subr.bf16.mxu1 %v12361_v14  ;;  %v12437_v14 = vld [vmem:[#allocation2 + $0x688] ss:$16 sps:$4 sm:$0xff]  }
 0x462   :  { %5669 = vmatpush1.bf16.msra.mxu0 %v12356_v15  ;;  %v16171_v15 = vld [vmem:[#allocation12] sm:$0xf] }
 0x463   :  { %5702 = vmatpush1.bf16.msra.mxu1 %v12359_v21  ;;  %5670 = vmatprep.subr.bf16.mxu0 %v12364_v62  ;;  %v12442_v21 = vld [vmem:[#allocation2 + $0x66c] ss:$16 sps:$4 sm:$0xff]  }
 0x464   :  { %5703 = vmatprep.subr.bf16.mxu1 %v12367_v17  ;;  %v12445_v62 = vld [vmem:[#allocation2 + $0x8ec] ss:$16 sps:$4 sm:$0xff]   ;;  %v17719_v17 = vld [vmem:[#allocation48_spill] sm:$0xff] }
 0x466   :  { %5671 = vmatpush1.bf16.msra.mxu0 %v12362_v33  ;;  %v3869_v33 = vrot.slane %v16171_v15, %v17719_v17 }
 0x467   :  { %5704 = vmatpush1.bf16.msra.mxu1 %v12365_v42  ;;  %5672 = vmatprep.subr.bf16.mxu0 %v12370_v47  ;;  %v12440_v42 = vld [vmem:[#allocation2 + $0x668] ss:$16 sps:$4 sm:$0xff]  }
 0x468   :  { %5705 = vmatprep.subr.bf16.mxu1 %v12373_v27  ;;  %v12443_v47 = vld [vmem:[#allocation2 + $0x8e8] ss:$16 sps:$4 sm:$0xff]   ;;  %v12448_v27 = vld [vmem:[#allocation2 + $0x64c] ss:$16 sps:$4 sm:$0xff]  }
 0x46a   :  { %5673 = vmatpush2.bf16.msra.mxu0 %v12368_v4  ;;  %v12451_v4 = vld [vmem:[#allocation2 + $0x8cc] ss:$16 sps:$4 sm:$0xff]  }
 0x46b   :  { %5706 = vmatpush1.bf16.msra.mxu1 %v12371_v60  ;;  %5674 = vmatprep.subr.bf16.mxu0 %v12376_v20  ;;  %v17720_v60 = vld [vmem:[#allocation49_spill] sm:$0xff] }
 0x46c   :  { %5707 = vmatprep.subr.bf16.mxu1 %v12379_v41  ;;  %v3873_v20 = vrot.slane %v16171_v15, %v17720_v60 }
 0x46e   :  { %5675 = vmatpush2.bf16.msra.mxu0 %v12374_v40 }
 0x46f   :  { %5708 = vmatpush1.bf16.msra.mxu1 %v12377_v30  ;;  %5676 = vmatprep.subr.bf16.mxu0 %v12382_v35  ;;  %v12446_v35 = vld [vmem:[#allocation2 + $0x648] ss:$16 sps:$4 sm:$0xff]  }
 0x470   :  { %5709 = vmatprep.subr.bf16.mxu1 %v12385_v52  ;;  %v12449_v52 = vld [vmem:[#allocation2 + $0x8c8] ss:$16 sps:$4 sm:$0xff]  }
 0x472   :  { %5677 = vmatpush2.bf16.msra.mxu0 %v12380_v53 }
 0x473   :  { %5710 = vmatpush1.bf16.msra.mxu1 %v12383_v1  ;;  %5678 = vmatprep.subr.bf16.mxu0 %v12388_v2  ;;  %v12454_v2 = vld [vmem:[#allocation2 + $0x62c] ss:$16 sps:$4 sm:$0xff]  }
 0x474   :  { %5711 = vmatprep.subr.bf16.mxu1 %v12391_v10  ;;  %v12457_v10 = vld [vmem:[#allocation2 + $0x8ac] ss:$16 sps:$4 sm:$0xff]  }
 0x476   :  { %5679 = vmatpush2.bf16.msra.mxu0 %v12386_v7 }
 0x477   :  { %5712 = vmatpush1.bf16.msra.mxu1 %v12389_v23  ;;  %5680 = vmatprep.subr.bf16.mxu0 %v12394_v44 }
 0x478   :  { %5713 = vmatprep.subr.bf16.mxu1 %v12397_v51 }
 0x47a   :  { %5681 = vmatpush2.bf16.msra.mxu0 %v12392_v59 }
 0x47b   :  { %5714 = vmatpush2.bf16.msra.mxu1 %v12395_v55  ;;  %5682 = vmatprep.subr.bf16.mxu0 %v12400_v9  ;;  %v12452_v55 = vld [vmem:[#allocation2 + $0x628] ss:$16 sps:$4 sm:$0xff]  }
 0x47c   :  { %5715 = vmatprep.subr.bf16.mxu1 %v12403_v45  ;;  %v12455_v9 = vld [vmem:[#allocation2 + $0x8a8] ss:$16 sps:$4 sm:$0xff]  }
 0x47e   :  { %5683 = vmatpush2.bf16.msra.mxu0 %v12398_v48 }
 0x47f   :  { %5716 = vmatpush2.bf16.msra.mxu1 %v12401_v39  ;;  %5684 = vmatprep.subr.bf16.mxu0 %v12406_v13  ;;  %v12460_v39 = vld [vmem:[#allocation2 + $0x60c] ss:$16 sps:$4 sm:$0xff]  }
 0x480   :  { %5717 = vmatprep.subr.bf16.mxu1 %v12409_v19  ;;  %v12463_v13 = vld [vmem:[#allocation2 + $0x88c] ss:$16 sps:$4 sm:$0xff]   ;;  %v12458_v19 = vld [vmem:[#allocation2 + $0x608] ss:$16 sps:$4 sm:$0xff]  }
 0x482   :  { %5685 = vmatpush2.bf16.msra.mxu0 %v12404_v43  ;;  %v12461_v43 = vld [vmem:[#allocation2 + $0x888] ss:$16 sps:$4 sm:$0xff]  }
 0x483   :  { %5718 = vmatpush2.bf16.msra.mxu1 %v12407_v32  ;;  %5686 = vmatprep.subr.bf16.mxu0 %v12412_v24  ;;  %v12466_v32 = vld [vmem:[#allocation2 + $0x7ec] ss:$16 sps:$4 sm:$0xff]  }
 0x484   :  { %5719 = vmatprep.subr.bf16.mxu1 %v12415_v49  ;;  %v12469_v24 = vld [vmem:[#allocation2 + $0x86c] ss:$16 sps:$4 sm:$0xff]   ;;  %v12464_v49 = vld [vmem:[#allocation2 + $0x7e8] ss:$16 sps:$4 sm:$0xff]  }
 0x486   :  { %5687 = vmatpush2.bf16.msra.mxu0 %v12410_v6  ;;  %v12467_v6 = vld [vmem:[#allocation2 + $0x868] ss:$16 sps:$4 sm:$0xff]  }
 0x487   :  { %5720 = vmatpush2.bf16.msra.mxu1 %v12413_v46  ;;  %5738 = vmatprep.subr.bf16.mxu0 %v12421_v8  ;;  %v12472_v46 = vld [vmem:[#allocation2 + $0x7cc] ss:$16 sps:$4 sm:$0xff]   ;;  %v12470_v8 = vld [vmem:[#allocation2 + $0x7c8] ss:$16 sps:$4 sm:$0xff]  }
 0x488   :  { %5721 = vmatprep.subr.bf16.mxu1 %v12418_v22  ;;  %v12475_v22 = vld [vmem:[#allocation2 + $0x84c] ss:$16 sps:$4 sm:$0xff]  }
 0x489   :  { %5689 = vmatmul.mubr.bf16.vlgmr.msra.gmra.mxu0 %v16136_v26 }
 0x48a   :  { %5739 = vmatpush1.bf16.msra.mxu0 %v12419_v3  ;;  %5770 = vmatprep.mubr.bf16.mxu0 %v16152_v31  ;;  %v12478_v3 = vld [vmem:[#allocation2 + $0x7ac] ss:$16 sps:$4 sm:$0xff]  }
 0x48b   :  { %5722 = vmatpush2.bf16.msra.mxu1 %v12416_v58  ;;  %5740 = vmatprep.subr.bf16.mxu0 %v12427_v18  ;;  %v12473_v58 = vld [vmem:[#allocation2 + $0x848] ss:$16 sps:$4 sm:$0xff]  }
 0x48c   :  { %5723 = vmatprep.subr.bf16.mxu1 %v12424_v38  ;;  %v12481_v38 = vld [vmem:[#allocation2 + $0x82c] ss:$16 sps:$4 sm:$0xff]   ;;  %v12476_v18 = vld [vmem:[#allocation2 + $0x7a8] ss:$16 sps:$4 sm:$0xff]  }
 0x48e   :  { %5741 = vmatpush1.bf16.msra.mxu0 %v12425_v61  ;;  %v12484_v61 = vld [vmem:[#allocation2 + $0x78c] ss:$16 sps:$4 sm:$0xff]  }
 0x48f   :  { %5724 = vmatpush2.bf16.msra.mxu1 %v12422_v34  ;;  %5742 = vmatprep.subr.bf16.mxu0 %v12433_v56  ;;  %v12479_v34 = vld [vmem:[#allocation2 + $0x828] ss:$16 sps:$4 sm:$0xff]  }
 0x490   :  { %5725 = vmatprep.subr.bf16.mxu1 %v12430_v12  ;;  %v12487_v12 = vld [vmem:[#allocation2 + $0x80c] ss:$16 sps:$4 sm:$0xff]   ;;  %v12482_v56 = vld [vmem:[#allocation2 + $0x788] ss:$16 sps:$4 sm:$0xff]  }
 0x492   :  { %5743 = vmatpush1.bf16.msra.mxu0 %v12431_v5  ;;  %v12490_v5 = vld [vmem:[#allocation2 + $0x76c] ss:$16 sps:$4 sm:$0xff]  }
 0x493   :  { %5726 = vmatpush2.bf16.msra.mxu1 %v12428_v16  ;;  %5744 = vmatprep.subr.bf16.mxu0 %v12439_v57  ;;  %v12485_v16 = vld [vmem:[#allocation2 + $0x808] ss:$16 sps:$4 sm:$0xff]  }
 0x494   :  { %5727 = vmatprep.subr.bf16.mxu1 %v12436_v29  ;;  %v12493_v29 = vld [vmem:[#allocation2 + $0x96c] ss:$16 sps:$4 sm:$0xff]   ;;  %v12488_v57 = vld [vmem:[#allocation2 + $0x768] ss:$16 sps:$4 sm:$0xff]  }
 0x496   :  { %5745 = vmatpush1.bf16.msra.mxu0 %v12437_v14  ;;  %v12496_v14 = vld [vmem:[#allocation2 + $0x74c] ss:$16 sps:$4 sm:$0xff]  }
 0x497   :  { %5728 = vmatpush2.bf16.msra.mxu1 %v12434_v63  ;;  %5746 = vmatprep.subr.bf16.mxu0 %v12442_v21  ;;  %v12491_v63 = vld [vmem:[#allocation2 + $0x968] ss:$16 sps:$4 sm:$0xff]   ;;  %v12499_v21 = vld [vmem:[#allocation2 + $0x94c] ss:$16 sps:$4 sm:$0xff]  }
 0x498   :  { %5779 = vmatprep.subr.bf16.mxu1 %v12445_v62  ;;  %v12494_v62 = vld [vmem:[#allocation2 + $0x748] ss:$16 sps:$4 sm:$0xff]  }
 0x499   :  { %v5444_v41 = vpop.f32.mrf.mxu0 }
 0x49a   :  { %v5485_v40 = vpop.f32.mrf.mxu1  ;;  %5730 = vmatmul.mubr.bf16.vlgmr.msra.gmra.mxu1 %v16144_v36  ;;  %v5445_v30 = vadd.f32 %v5444_v41, %v3869_v33  ;;  %5747 = vmatpush1.bf16.msra.mxu0 %v12440_v42  ;;  %v12497_v33 = vld [vmem:[#allocation2 + $0x948] ss:$16 sps:$4 sm:$0xff]   ;;  %v12502_v42 = vld [vmem:[#allocation2 + $0x72c] ss:$16 sps:$4 sm:$0xff]  }
 0x49b   :  { %5780 = vmatpush1.bf16.msra.mxu1 %v12443_v47  ;;  %v5446_v53 = vpop.f32.mrf.mxu0  ;;  %5748 = vmatprep.subr.bf16.mxu0 %v12448_v27  ;;  %v12505_v47 = vld [vmem:[#allocation2 + $0x92c] ss:$16 sps:$4 sm:$0xff]   ;;  %v12500_v27 = vld [vmem:[#allocation2 + $0x728] ss:$16 sps:$4 sm:$0xff]  }
 0x49c   :  { %v5487_v1 = vpop.f32.mrf.mxu1  ;;  %5781 = vmatprep.subr.bf16.mxu1 %v12451_v4  ;;  %v16178_v7 = vadd.f32 %v5485_v40, %v5445_v30  ;;  %v5447_v23 = vadd.f32 %v5446_v53, %v3873_v20  ;;  %10787 = vmatprep.mubr.msk.bf16.mxu1 %vm5406_vm7, %v16146_v28  ;;  %v12503_v4 = vld [vmem:[#allocation2 + $0x928] ss:$16 sps:$4 sm:$0xff]   ;;  %v12508_v20 = vld [vmem:[#allocation2 + $0x70c] ss:$16 sps:$4 sm:$0xff]  }
 0x49d   :  { %v5448_v44 = vpop.f32.mrf.mxu0  ;;  %v12511_v41 = vld [vmem:[#allocation2 + $0x90c] ss:$16 sps:$4 sm:$0xff]   ;;  %v12506_v40 = vld [vmem:[#allocation2 + $0x708] ss:$16 sps:$4 sm:$0xff]  }
 0x49e   :  { %v5489_v51 = vpop.f32.mrf.mxu1  ;;  %v16182_v59 = vadd.f32 %v5487_v1, %v5447_v23  ;;  %5749 = vmatpush1.bf16.msra.mxu0 %v12446_v35  ;;  %v12509_v30 = vld [vmem:[#allocation2 + $0x908] ss:$16 sps:$4 sm:$0xff]  }
 0x49f   :  { %5782 = vmatpush1.bf16.msra.mxu1 %v12449_v52  ;;  %v5449_v45 = vpop.f32.mrf.mxu0  ;;  %5750 = vmatprep.subr.bf16.mxu0 %v12454_v2 }
 0x4a0   :  { %v5490_v48 = vpop.f32.mrf.mxu1  ;;  %5783 = vmatprep.subr.bf16.mxu1 %v12457_v10 }
 0x4a2   :  { %5751 = vmatpush1.bf16.msra.mxu0 %v12452_v55 }
 0x4a3   :  { %5784 = vmatpush1.bf16.msra.mxu1 %v12455_v9  ;;  %5752 = vmatprep.subr.bf16.mxu0 %v12460_v39 }
 0x4a4   :  { %5785 = vmatprep.subr.bf16.mxu1 %v12463_v13 }
 0x4a6   :  { %5753 = vmatpush1.bf16.msra.mxu0 %v12458_v19 }
 0x4a7   :  { %5786 = vmatpush1.bf16.msra.mxu1 %v12461_v43  ;;  %5754 = vmatprep.subr.bf16.mxu0 %v12466_v32 }
 0x4a8   :  { %5787 = vmatprep.subr.bf16.mxu1 %v12469_v24 }
 0x4aa   :  { %5755 = vmatpush2.bf16.msra.mxu0 %v12464_v49 }
 0x4ab   :  { %5788 = vmatpush1.bf16.msra.mxu1 %v12467_v6  ;;  %5756 = vmatprep.subr.bf16.mxu0 %v12472_v46 }
 0x4ac   :  { %5789 = vmatprep.subr.bf16.mxu1 %v12475_v22 }
 0x4ae   :  { %5757 = vmatpush2.bf16.msra.mxu0 %v12470_v8 }
 0x4af   :  { %5790 = vmatpush1.bf16.msra.mxu1 %v12473_v58  ;;  %5758 = vmatprep.subr.bf16.mxu0 %v12478_v3 }
 0x4b0   :  { %5791 = vmatprep.subr.bf16.mxu1 %v12481_v38 }
 0x4b2   :  { %5759 = vmatpush2.bf16.msra.mxu0 %v12476_v18 }
 0x4b3   :  { %5792 = vmatpush1.bf16.msra.mxu1 %v12479_v34  ;;  %5760 = vmatprep.subr.bf16.mxu0 %v12484_v61 }
 0x4b4   :  { %5793 = vmatprep.subr.bf16.mxu1 %v12487_v12  ;;  %v17721_v12 = vld [vmem:[#allocation46_spill] sm:$0xff] }
 0x4b6   :  { %5761 = vmatpush2.bf16.msra.mxu0 %v12482_v56  ;;  %v3877_v56 = vrot.slane %v16171_v15, %v17721_v12 }
 0x4b7   :  { %5794 = vmatpush1.bf16.msra.mxu1 %v12485_v16  ;;  %5762 = vmatprep.subr.bf16.mxu0 %v12490_v5  ;;  %v17722_v16 = vld [vmem:[#allocation47_spill] sm:$0xff] }
 0x4b8   :  { %5803 = vmatprep.subr.bf16.mxu1 %v12493_v29  ;;  %v3881_v5 = vrot.slane %v16171_v15, %v17722_v16 }
 0x4ba   :  { %5763 = vmatpush2.bf16.msra.mxu0 %v12488_v57 }
 0x4bb   :  { %5804 = vmatpush2.bf16.msra.mxu1 %v12491_v63  ;;  %5764 = vmatprep.subr.bf16.mxu0 %v12496_v14 }
 0x4bc   :  { %5805 = vmatprep.subr.bf16.mxu1 %v12499_v21 }
 0x4be   :  { %5765 = vmatpush2.bf16.msra.mxu0 %v12494_v62 }
 0x4bf   :  { %5806 = vmatpush2.bf16.msra.mxu1 %v12497_v33  ;;  %5766 = vmatprep.subr.bf16.mxu0 %v12502_v42 }
 0x4c0   :  { %5807 = vmatprep.subr.bf16.mxu1 %v12505_v47 }
 0x4c2   :  { %5767 = vmatpush2.bf16.msra.mxu0 %v12500_v27 }
 0x4c3   :  { %5808 = vmatpush2.bf16.msra.mxu1 %v12503_v4  ;;  %5768 = vmatprep.subr.bf16.mxu0 %v12508_v20 }
 0x4c4   :  { %5809 = vmatprep.subr.bf16.mxu1 %v12511_v41 }
 0x4c6   :  { %5769 = vmatpush2.bf16.msra.mxu0 %v12506_v40 }
 0x4c7   :  { %5810 = vmatpush2.bf16.msra.mxu1 %v12509_v30 }
 0x4c9   :  { %5771 = vmatmul.mubr.bf16.vlgmr.msra.gmra.mxu0 %v16150_v11 }
 0x4ca   :  { %5812 = vmatmul.mubr.bf16.vlgmr.msra.gmra.mxu1 %v16141_v37 }
 0x4d9   :  { %v5526_v35 = vpop.f32.mrf.mxu0 }
 0x4da   :  { %v5567_v52 = vpop.f32.mrf.mxu1  ;;  %v5527_v53 = vadd.f32 %v5526_v35, %v16178_v7 }
 0x4db   :  { %v5528_v1 = vpop.f32.mrf.mxu0 }
 0x4dc   :  { %v5569_v2 = vpop.f32.mrf.mxu1  ;;  %v5568_v10 = vadd.f32 %v5567_v52, %v5527_v53  ;;  %v5529_v23 = vadd.f32 %v5528_v1, %v16182_v59 }
 0x4dd   :  { %v5530_v44 = vpop.f32.mrf.mxu0 }
 0x4de   :  { %v5571_v51 = vpop.f32.mrf.mxu1  ;;  %v5570_v55 = vadd.f32 %v5569_v2, %v5529_v23 }
 0x4df   :  { %v5531_v9 = vpop.f32.mrf.mxu0 }
 0x4e0   :  { %v5572_v45 = vpop.f32.mrf.mxu1 }
 0x509   :  { %v5608_v48 = vpop.f32.mrf.mxu0 }
 0x50a   :  { %v5609_v39 = vadd.f32 %v5608_v48, %v5568_v10 }
 0x50b   :  { %v5610_v13 = vpop.f32.mrf.mxu0 }
 0x50c   :  { %v5820_v19 = vmax.f32 %v5609_v39, 0.0  ;;  %v5611_v43 = vadd.f32 %v5610_v13, %v5570_v55 }
 0x50d   :  { %v5612_v32 = vpop.f32.mrf.mxu0 }
 0x50e   :  { %v5821_v24 = vmax.f32 %v5611_v43, 0.0 }
 0x50f   :  { %v5613_v49 = vpop.f32.mrf.mxu0 }
 0x51a   :  { %v5649_v6 = vpop.f32.mrf.mxu1 }
 0x51b   :  { %v5650_v29 = vadd.f32 %v5649_v6, %v3877_v56 }
 0x51c   :  { %v5651_v7 = vpop.f32.mrf.mxu1 }
 0x51d   :  { %v5652_v57 = vadd.f32 %v5651_v7, %v3881_v5 }
 0x51e   :  { %v5653_v46 = vpop.f32.mrf.mxu1 }
 0x520   :  { %v5654_v22 = vpop.f32.mrf.mxu1 }
 0x549   :  { %v5690_v8 = vpop.f32.mrf.mxu0 }
 0x54a   :  { %v5691_v63 = vadd.f32 %v5690_v8, %v5650_v29 }
 0x54b   :  { %v5692_v58 = vpop.f32.mrf.mxu0 }
 0x54c   :  { %v5693_v14 = vadd.f32 %v5692_v58, %v5652_v57 }
 0x54d   :  { %v5694_v59 = vpop.f32.mrf.mxu0 }
 0x54f   :  { %v5695_v3 = vpop.f32.mrf.mxu0 }
 0x55a   :  { %v5731_v38 = vpop.f32.mrf.mxu1 }
 0x55b   :  { %v5732_v21 = vadd.f32 %v5731_v38, %v5691_v63 }
 0x55c   :  { %v5733_v18 = vpop.f32.mrf.mxu1 }
 0x55d   :  { %v5734_v42 = vadd.f32 %v5733_v18, %v5693_v14 }
 0x55e   :  { %v5735_v34 = vpop.f32.mrf.mxu1 }
 0x560   :  { %v5736_v61 = vpop.f32.mrf.mxu1 }
 0x589   :  { %v5772_v62 = vpop.f32.mrf.mxu0 }
 0x58a   :  { %v5813_v33 = vpop.f32.mrf.mxu1  ;;  %v5773_v47 = vadd.f32 %v5772_v62, %v5732_v21 }
 0x58b   :  { %v5774_v27 = vpop.f32.mrf.mxu0 }
 0x58c   :  { %v5815_v4 = vpop.f32.mrf.mxu1  ;;  %v5814_v20 = vadd.f32 %v5813_v33, %v5773_v47  ;;  %v5775_v41 = vadd.f32 %v5774_v27, %v5734_v42 }
 0x58d   :  { %v5776_v40 = vpop.f32.mrf.mxu0 }
 0x58e   :  { %v5817_v30 = vpop.f32.mrf.mxu1  ;;  %v5822_v35 = vmax.f32 %v5814_v20, 0.0  ;;  %v5816_v52 = vadd.f32 %v5815_v4, %v5775_v41 }
 0x58f   :  { %v5777_v53 = vpop.f32.mrf.mxu0 }
 0x590   :  { %v5818_v1 = vpop.f32.mrf.mxu1  ;;  %v5823_v15 = vmax.f32 %v5816_v52, 0.0 }
 0x591   :  { %13428 = dma.done.wait [#allocation5 + $0x2], 16384 }
 0x592   :  { %13429 = vsyncadd [#allocation5 + $0x2], 4294950912  ;;  %v16192_v2 = vpack.c.bf16 %v5820_v19, %v5820_v19  ;;  %v16194_v10 = vpack.c.bf16 %v5821_v24, %v5821_v24  ;;  %v16196_v23 = vpack.c.bf16 %v5822_v35, %v5822_v35  ;;  %v16198_v44 = vpack.c.bf16 %v5823_v15, %v5823_v15  ;;  %v16200_v51 = vld [vmem:[#allocation3] sm:$0xff]  ;;  %v16202_v55 = vld [vmem:[#allocation3 + $0x8] sm:$0xff] }
 0x593   :  { %17725 = vst [vmem:[#allocation117_spill] sm:$0xff] %v16202_v55  ;;  %v16204_v9 = vld [vmem:[#allocation3 + $0x10] sm:$0xff]  ;;  %v16206_v45 = vld [vmem:[#allocation3 + $0x18] sm:$0xff]  ;;  %v16208_v48 = vld [vmem:[#allocation3 + $0x20] sm:$0xff] }
 0x594   :  { %17723 = vst [vmem:[#allocation120_spill] sm:$0xff] %v16192_v2  ;;  %17724 = vst [vmem:[#allocation94_spill] sm:$0xff] %v16196_v23  ;;  %v16210_v39 = vld [vmem:[#allocation3 + $0x28] sm:$0xff]  ;;  %v16212_v13 = vld [vmem:[#allocation3 + $0x30] sm:$0xff] }
 0x595   :  { %17726 = vst [vmem:[#allocation71_spill] sm:$0xff] %v16206_v45  ;;  %17727 = vst [vmem:[#allocation93_spill] sm:$0xff] %v16210_v39  ;;  %v16214_v19 = vld [vmem:[#allocation3 + $0x38] sm:$0xff]  ;;  %v16216_v43 = vld [vmem:[#allocation3 + $0x40] sm:$0xff] }
 0x596   :  { %17728 = vst [vmem:[#allocation96_spill] sm:$0xff] %v16214_v19  ;;  %v16218_v32 = vld [vmem:[#allocation3 + $0x48] sm:$0xff]  ;;  %v16220_v24 = vld [vmem:[#allocation3 + $0x50] sm:$0xff]  ;;  %v16222_v49 = vld [vmem:[#allocation3 + $0x58] sm:$0xff] }
 0x597   :  { %17729 = vst [vmem:[#allocation80_spill] sm:$0xff] %v16218_v32  ;;  %17730 = vst [vmem:[#allocation106_spill] sm:$0xff] %v16222_v49  ;;  %v16224_v6 = vld [vmem:[#allocation3 + $0x60] sm:$0xff]  ;;  %v16226_v7 = vld [vmem:[#allocation3 + $0x68] sm:$0xff] }
 0x598   :  { %17731 = vst [vmem:[#allocation108_spill] sm:$0xff] %v16226_v7  ;;  %v16228_v46 = vld [vmem:[#allocation3 + $0x70] sm:$0xff]  ;;  %v16230_v22 = vld [vmem:[#allocation3 + $0x78] sm:$0xff]  ;;  %v16232_v8 = vld [vmem:[#allocation3 + $0x80] sm:$0xff] }
 0x599   :  { %17732 = vst [vmem:[#allocation119_spill] sm:$0xff] %v16230_v22  ;;  %v16234_v58 = vld [vmem:[#allocation3 + $0x88] sm:$0xff]  ;;  %v16236_v59 = vld [vmem:[#allocation3 + $0x90] sm:$0xff]  ;;  %v16238_v3 = vld [vmem:[#allocation3 + $0x98] sm:$0xff] }
 0x59a   :  { %17733 = vst [vmem:[#allocation121_spill] sm:$0xff] %v16234_v58  ;;  %17734 = vst [vmem:[#allocation92_spill] sm:$0xff] %v16238_v3  ;;  %v16240_v38 = vld [vmem:[#allocation3 + $0xa0] sm:$0xff]  ;;  %v16242_v18 = vld [vmem:[#allocation3 + $0xa8] sm:$0xff] }
 0x59b   :  { %17735 = vst [vmem:[#allocation114_spill] sm:$0xff] %v16242_v18  ;;  %v16244_v34 = vld [vmem:[#allocation3 + $0xb0] sm:$0xff]  ;;  %v16246_v61 = vld [vmem:[#allocation3 + $0xb8] sm:$0xff]  ;;  %v16248_v56 = vld [vmem:[#allocation3 + $0xc0] sm:$0xff] }
 0x59c   :  { %17736 = vst [vmem:[#allocation123_spill] sm:$0xff] %v16246_v61  ;;  %v16250_v5 = vld [vmem:[#allocation3 + $0xc8] sm:$0xff]  ;;  %v16252_v29 = vld [vmem:[#allocation3 + $0xd0] sm:$0xff]  ;;  %v16254_v57 = vld [vmem:[#allocation3 + $0xd8] sm:$0xff] }
 0x59d   :  { %17737 = vst [vmem:[#allocation127_spill] sm:$0xff] %v16250_v5  ;;  %17738 = vst [vmem:[#allocation124_spill] sm:$0xff] %v16254_v57  ;;  %v16256_v63 = vld [vmem:[#allocation3 + $0xe0] sm:$0xff]  ;;  %v16258_v14 = vld [vmem:[#allocation3 + $0xe8] sm:$0xff] }
 0x59e   :  { %17739 = vst [vmem:[#allocation118_spill] sm:$0xff] %v16258_v14  ;;  %v16260_v21 = vld [vmem:[#allocation3 + $0xf0] sm:$0xff]  ;;  %v16262_v62 = vld [vmem:[#allocation3 + $0xf8] sm:$0xff]  ;;  %v16264_v33 = vld [vmem:[#allocation3 + $0x100] sm:$0xff] }
 0x59f   :  { %17740 = vst [vmem:[#allocation126_spill] sm:$0xff] %v16262_v62  ;;  %17741 = vst [vmem:[#allocation95_spill] sm:$0xff] %v16264_v33  ;;  %v16266_v42 = vld [vmem:[#allocation3 + $0x108] sm:$0xff]  ;;  %v16268_v47 = vld [vmem:[#allocation3 + $0x110] sm:$0xff] }
 0x5a0   :  { %17742 = vst [vmem:[#allocation82_spill] sm:$0xff] %v16266_v42  ;;  %17743 = vst [vmem:[#allocation101_spill] sm:$0xff] %v16268_v47  ;;  %v16270_v27 = vld [vmem:[#allocation3 + $0x118] sm:$0xff]  ;;  %v16272_v4 = vld [vmem:[#allocation3 + $0x120] sm:$0xff] }
 0x5a1   :  { %17744 = vst [vmem:[#allocation58_spill] sm:$0xff] %v16270_v27  ;;  %17745 = vst [vmem:[#allocation86_spill] sm:$0xff] %v16272_v4  ;;  %v16274_v20 = vld [vmem:[#allocation3 + $0x128] sm:$0xff]  ;;  %v16276_v41 = vld [vmem:[#allocation3 + $0x130] sm:$0xff] }
 0x5a2   :  { %17746 = vst [vmem:[#allocation60_spill] sm:$0xff] %v16274_v20  ;;  %17747 = vst [vmem:[#allocation63_spill] sm:$0xff] %v16276_v41  ;;  %v16278_v40 = vld [vmem:[#allocation3 + $0x138] sm:$0xff]  ;;  %v16280_v30 = vld [vmem:[#allocation3 + $0x140] sm:$0xff] }
 0x5a3   :  { %17748 = vst [vmem:[#allocation73_spill] sm:$0xff] %v16278_v40  ;;  %17749 = vst [vmem:[#allocation128_spill] sm:$0xff] %v16280_v30  ;;  %v16282_v35 = vld [vmem:[#allocation3 + $0x148] sm:$0xff]  ;;  %v16284_v52 = vld [vmem:[#allocation3 + $0x150] sm:$0xff] }
 0x5a4   :  { %17750 = vst [vmem:[#allocation122_spill] sm:$0xff] %v16282_v35  ;;  %17751 = vst [vmem:[#allocation55_spill] sm:$0xff] %v16284_v52  ;;  %v16286_v53 = vld [vmem:[#allocation3 + $0x158] sm:$0xff]  ;;  %v16288_v1 = vld [vmem:[#allocation3 + $0x160] sm:$0xff] }
 0x5a5   :  { %17752 = vst [vmem:[#allocation70_spill] sm:$0xff] %v16286_v53  ;;  %17753 = vst [vmem:[#allocation68_spill] sm:$0xff] %v16288_v1  ;;  %v16290_v15 = vld [vmem:[#allocation3 + $0x168] sm:$0xff]  ;;  %v16292_v42 = vld [vmem:[#allocation3 + $0x170] sm:$0xff] }
 0x5a6   :  { %17754 = vst [vmem:[#allocation67_spill] sm:$0xff] %v16290_v15  ;;  %17755 = vst [vmem:[#allocation66_spill] sm:$0xff] %v16292_v42  ;;  %v16294_v27 = vld [vmem:[#allocation3 + $0x178] sm:$0xff]  ;;  %v16296_v20 = vld [vmem:[#allocation3 + $0x180] sm:$0xff] }
 0x5a7   :  { %17756 = vst [vmem:[#allocation64_spill] sm:$0xff] %v16294_v27  ;;  %17757 = vst [vmem:[#allocation56_spill] sm:$0xff] %v16296_v20  ;;  %v16298_v55 = vld [vmem:[#allocation3 + $0x188] sm:$0xff]  ;;  %v16300_v40 = vld [vmem:[#allocation3 + $0x190] sm:$0xff] }
 0x5a8   :  { %17758 = vst [vmem:[#allocation104_spill] sm:$0xff] %v16298_v55  ;;  %17759 = vst [vmem:[#allocation65_spill] sm:$0xff] %v16300_v40  ;;  %v16302_v45 = vld [vmem:[#allocation3 + $0x198] sm:$0xff]  ;;  %v16304_v35 = vld [vmem:[#allocation3 + $0x1a0] sm:$0xff] }
 0x5a9   :  { %17760 = vst [vmem:[#allocation57_spill] sm:$0xff] %v16302_v45  ;;  %17761 = vst [vmem:[#allocation61_spill] sm:$0xff] %v16304_v35  ;;  %v16306_v39 = vld [vmem:[#allocation3 + $0x1a8] sm:$0xff]  ;;  %v16308_v53 = vld [vmem:[#allocation3 + $0x1b0] sm:$0xff] }
 0x5aa   :  { %17762 = vst [vmem:[#allocation105_spill] sm:$0xff] %v16306_v39  ;;  %17763 = vst [vmem:[#allocation72_spill] sm:$0xff] %v16308_v53  ;;  %v16310_v19 = vld [vmem:[#allocation3 + $0x1b8] sm:$0xff]  ;;  %v16312_v15 = vld [vmem:[#allocation3 + $0x1c0] sm:$0xff] }
 0x5ab   :  { %17764 = vst [vmem:[#allocation69_spill] sm:$0xff] %v16310_v19  ;;  %17765 = vst [vmem:[#allocation99_spill] sm:$0xff] %v16312_v15  ;;  %v16314_v32 = vld [vmem:[#allocation3 + $0x1c8] sm:$0xff]  ;;  %v16316_v27 = vld [vmem:[#allocation3 + $0x1d0] sm:$0xff] }
 0x5ac   :  { %17766 = vst [vmem:[#allocation79_spill] sm:$0xff] %v16314_v32  ;;  %17767 = vst [vmem:[#allocation113_spill] sm:$0xff] %v16316_v27  ;;  %v16318_v49 = vld [vmem:[#allocation3 + $0x1d8] sm:$0xff]  ;;  %v16320_v55 = vld [vmem:[#allocation3 + $0x1e0] sm:$0xff] }
 0x5ad   :  { %17768 = vst [vmem:[#allocation62_spill] sm:$0xff] %v16318_v49  ;;  %17769 = vst [vmem:[#allocation129_spill] sm:$0xff] %v16320_v55  ;;  %v16322_v7 = vld [vmem:[#allocation3 + $0x1e8] sm:$0xff]  ;;  %v16324_v45 = vld [vmem:[#allocation3 + $0x1f0] sm:$0xff] }
 0x5ae   :  { %17770 = vst [vmem:[#allocation100_spill] sm:$0xff] %v16322_v7  ;;  %v16326_v22 = vld [vmem:[#allocation3 + $0x1f8] sm:$0xff]  ;;  %v16328_v39 = vld [vmem:[#allocation3 + $0x200] sm:$0xff]  ;;  %v16330_v58 = vld [vmem:[#allocation3 + $0x208] sm:$0xff] }
 0x5af   :  { %17771 = vst [vmem:[#allocation90_spill] sm:$0xff] %v16326_v22  ;;  %17772 = vst [vmem:[#allocation84_spill] sm:$0xff] %v16330_v58  ;;  %v16332_v19 = vld [vmem:[#allocation3 + $0x210] sm:$0xff]  ;;  %v16334_v3 = vld [vmem:[#allocation3 + $0x218] sm:$0xff] }
 0x5b0   :  { %17773 = vst [vmem:[#allocation98_spill] sm:$0xff] %v16334_v3  ;;  %v16336_v32 = vld [vmem:[#allocation3 + $0x220] sm:$0xff]  ;;  %v16338_v18 = vld [vmem:[#allocation3 + $0x228] sm:$0xff]  ;;  %v16340_v49 = vld [vmem:[#allocation3 + $0x230] sm:$0xff] }
 0x5b1   :  { %17774 = vst [vmem:[#allocation107_spill] sm:$0xff] %v16338_v18  ;;  %v16342_v61 = vld [vmem:[#allocation3 + $0x238] sm:$0xff]  ;;  %v16344_v7 = vld [vmem:[#allocation3 + $0x240] sm:$0xff]  ;;  %v16346_v23 = vld [vmem:[#allocation3 + $0x248] sm:$0xff] }
 0x5b2   :  { %17775 = vst [vmem:[#allocation81_spill] sm:$0xff] %v16342_v61  ;;  %17776 = vst [vmem:[#allocation74_spill] sm:$0xff] %v16346_v23  ;;  %v16348_v22 = vld [vmem:[#allocation3 + $0x250] sm:$0xff]  ;;  %v16350_v2 = vld [vmem:[#allocation3 + $0x258] sm:$0xff] }
 0x5b3   :  { %17777 = vst [vmem:[#allocation97_spill] sm:$0xff] %v16350_v2  ;;  %v16352_v58 = vld [vmem:[#allocation3 + $0x260] sm:$0xff]  ;;  %v16354_v5 = vld [vmem:[#allocation3 + $0x268] sm:$0xff]  ;;  %v16356_v3 = vld [vmem:[#allocation3 + $0x270] sm:$0xff] }
 0x5b4   :  { %17778 = vst [vmem:[#allocation111_spill] sm:$0xff] %v16354_v5  ;;  %v16358_v57 = vld [vmem:[#allocation3 + $0x278] sm:$0xff]  ;;  %v16360_v18 = vld [vmem:[#allocation3 + $0x280] sm:$0xff]  ;;  %v16362_v14 = vld [vmem:[#allocation3 + $0x288] sm:$0xff] }
 0x5b5   :  { %17779 = vst [vmem:[#allocation75_spill] sm:$0xff] %v16358_v57  ;;  %17780 = vst [vmem:[#allocation40_spill] sm:$0xff] %v16362_v14  ;;  %v16364_v61 = vld [vmem:[#allocation3 + $0x290] sm:$0xff]  ;;  %v16366_v62 = vld [vmem:[#allocation3 + $0x298] sm:$0xff] }
 0x5b6   :  { %17781 = vst [vmem:[#allocation109_spill] sm:$0xff] %v16366_v62  ;;  %v16368_v23 = vld [vmem:[#allocation3 + $0x2a0] sm:$0xff]  ;;  %v16370_v33 = vld [vmem:[#allocation3 + $0x2a8] sm:$0xff]  ;;  %v16372_v2 = vld [vmem:[#allocation3 + $0x2b0] sm:$0xff] }
 0x5b7   :  { %17782 = vst [vmem:[#allocation39_spill] sm:$0xff] %v16370_v33  ;;  %v16374_v47 = vld [vmem:[#allocation3 + $0x2b8] sm:$0xff]  ;;  %v16376_v5 = vld [vmem:[#allocation3 + $0x2c0] sm:$0xff]  ;;  %v16378_v4 = vld [vmem:[#allocation3 + $0x2c8] sm:$0xff] }
 0x5b8   :  { %17783 = vst [vmem:[#allocation38_spill] sm:$0xff] %v16374_v47  ;;  %17784 = vst [vmem:[#allocation54_spill] sm:$0xff] %v16378_v4  ;;  %v16380_v57 = vld [vmem:[#allocation3 + $0x2d0] sm:$0xff]  ;;  %v16382_v41 = vld [vmem:[#allocation3 + $0x2d8] sm:$0xff] }
 0x5b9   :  { %17785 = vst [vmem:[#allocation76_spill] sm:$0xff] %v16382_v41  ;;  %v16384_v14 = vld [vmem:[#allocation3 + $0x2e0] sm:$0xff]  ;;  %v16386_v30 = vld [vmem:[#allocation3 + $0x2e8] sm:$0xff]  ;;  %v16388_v62 = vld [vmem:[#allocation3 + $0x2f0] sm:$0xff] }
 0x5ba   :  { %17786 = vst [vmem:[#allocation110_spill] sm:$0xff] %v16386_v30  ;;  %v16390_v52 = vld [vmem:[#allocation3 + $0x2f8] sm:$0xff]  ;;  %v16392_v33 = vld [vmem:[#allocation3 + $0x300] sm:$0xff]  ;;  %v16394_v1 = vld [vmem:[#allocation3 + $0x308] sm:$0xff] }
 0x5bb   :  { %17787 = vst [vmem:[#allocation85_spill] sm:$0xff] %v16390_v52  ;;  %17788 = vst [vmem:[#allocation77_spill] sm:$0xff] %v16392_v33  ;;  %v16396_v47 = vld [vmem:[#allocation3 + $0x310] sm:$0xff]  ;;  %v16398_v42 = vld [vmem:[#allocation3 + $0x318] sm:$0xff] }
 0x5bc   :  { %17789 = vst [vmem:[#allocation37_spill] sm:$0xff] %v16394_v1  ;;  %17790 = vst [vmem:[#allocation59_spill] sm:$0xff] %v16396_v47  ;;  %v16400_v4 = vld [vmem:[#allocation3 + $0x320] sm:$0xff]  ;;  %v16402_v20 = vld [vmem:[#allocation3 + $0x328] sm:$0xff] }
 0x5bd   :  { %17791 = vst [vmem:[#allocation91_spill] sm:$0xff] %v16398_v42  ;;  %17792 = vst [vmem:[#allocation112_spill] sm:$0xff] %v16400_v4  ;;  %v16404_v41 = vld [vmem:[#allocation3 + $0x330] sm:$0xff]  ;;  %v16406_v40 = vld [vmem:[#allocation3 + $0x338] sm:$0xff] }
 0x5be   :  { %17793 = vst [vmem:[#allocation53_spill] sm:$0xff] %v16402_v20  ;;  %17794 = vst [vmem:[#allocation87_spill] sm:$0xff] %v16404_v41  ;;  %v16408_v30 = vld [vmem:[#allocation3 + $0x340] sm:$0xff]  ;;  %v16410_v35 = vld [vmem:[#allocation3 + $0x348] sm:$0xff] }
 0x5bf   :  { %17795 = vst [vmem:[#allocation50_spill] sm:$0xff] %v16406_v40  ;;  %17796 = vst [vmem:[#allocation88_spill] sm:$0xff] %v16408_v30  ;;  %v16412_v52 = vld [vmem:[#allocation3 + $0x350] sm:$0xff]  ;;  %v16414_v33 = vld [vmem:[#allocation3 + $0x358] sm:$0xff] }
 0x5c0   :  { %17797 = vst [vmem:[#allocation89_spill] sm:$0xff] %v16410_v35  ;;  %17798 = vst [vmem:[#allocation52_spill] sm:$0xff] %v16412_v52  ;;  %v16416_v1 = vld [vmem:[#allocation3 + $0x360] sm:$0xff]  ;;  %v16418_v47 = vld [vmem:[#allocation3 + $0x368] sm:$0xff] }
 0x5c1   :  { %17799 = vst [vmem:[#allocation51_spill] sm:$0xff] %v16414_v33  ;;  %17800 = vst [vmem:[#allocation115_spill] sm:$0xff] %v16416_v1  ;;  %v16420_v42 = vld [vmem:[#allocation3 + $0x370] sm:$0xff]  ;;  %v16422_v4 = vld [vmem:[#allocation3 + $0x378] sm:$0xff] }
 0x5c2   :  { %17801 = vst [vmem:[#allocation125_spill] sm:$0xff] %v16418_v47  ;;  %17802 = vst [vmem:[#allocation116_spill] sm:$0xff] %v16420_v42  ;;  %v16424_v20 = vld [vmem:[#allocation3 + $0x380] sm:$0xff]  ;;  %v16426_v41 = vld [vmem:[#allocation3 + $0x388] sm:$0xff] }
 0x5c3   :  { %17803 = vst [vmem:[#allocation83_spill] sm:$0xff] %v16422_v4  ;;  %17804 = vst [vmem:[#allocation43_spill] sm:$0xff] %v16424_v20  ;;  %v16428_v40 = vld [vmem:[#allocation3 + $0x390] sm:$0xff]  ;;  %v16430_v30 = vld [vmem:[#allocation3 + $0x398] sm:$0xff] }
 0x5c4   :  { %17805 = vst [vmem:[#allocation103_spill] sm:$0xff] %v16426_v41  ;;  %17806 = vst [vmem:[#allocation44_spill] sm:$0xff] %v16428_v40  ;;  %v16432_v35 = vld [vmem:[#allocation3 + $0x3a0] sm:$0xff]  ;;  %v16434_v52 = vld [vmem:[#allocation3 + $0x3a8] sm:$0xff] }
 0x5c5   :  { %17807 = vst [vmem:[#allocation41_spill] sm:$0xff] %v16430_v30  ;;  %17808 = vst [vmem:[#allocation42_spill] sm:$0xff] %v16432_v35  ;;  %v16436_v33 = vld [vmem:[#allocation3 + $0x3b0] sm:$0xff]  ;;  %v16438_v1 = vld [vmem:[#allocation3 + $0x3b8] sm:$0xff] }
 0x5c6   :  { %17809 = vst [vmem:[#allocation78_spill] sm:$0xff] %v16434_v52  ;;  %17810 = vst [vmem:[#allocation102_spill] sm:$0xff] %v16436_v33  ;;  %v16440_v47 = vld [vmem:[#allocation3 + $0x3c0] sm:$0xff]  ;;  %v16442_v42 = vld [vmem:[#allocation3 + $0x3c8] sm:$0xff] }
 0x5c7   :  { %17811 = vst [vmem:[#allocation45_spill] sm:$0xff] %v16438_v1  ;;  %17812 = vst [vmem:[#allocation47_spill] sm:$0xff] %v16440_v47  ;;  %v16444_v4 = vld [vmem:[#allocation3 + $0x3d0] sm:$0xff]  ;;  %v16446_v20 = vld [vmem:[#allocation3 + $0x3d8] sm:$0xff] }
 0x5c8   :  { %17813 = vst [vmem:[#allocation130_spill] sm:$0xff] %v16442_v42  ;;  %17814 = vst [vmem:[#allocation131_spill] sm:$0xff] %v16444_v4  ;;  %v16448_v41 = vld [vmem:[#allocation3 + $0x3e0] sm:$0xff]  ;;  %v16450_v40 = vld [vmem:[#allocation3 + $0x3e8] sm:$0xff] }
 0x5c9   :  { %17815 = vst [vmem:[#allocation132_spill] sm:$0xff] %v16446_v20  ;;  %17816 = vst [vmem:[#allocation133_spill] sm:$0xff] %v16448_v41  ;;  %v16452_v30 = vld [vmem:[#allocation3 + $0x3f0] sm:$0xff]  ;;  %v16454_v35 = vld [vmem:[#allocation3 + $0x3f8] sm:$0xff] }
 0x5ca   :  { %17817 = vst [vmem:[#allocation134_spill] sm:$0xff] %v16450_v40  ;;  %17818 = vst [vmem:[#allocation135_spill] sm:$0xff] %v16452_v30 }
 0x5cb   :  { %17819 = vst [vmem:[#allocation136_spill] sm:$0xff] %v16454_v35 }
 0x5cc   :  { %13430 = dma.done.wait [#allocation5 + $0x1], 38912 }
 0x5cd   :  { %13431 = vsyncadd [#allocation5 + $0x1], 4294928384  ;;  %7840 = vmatprep.mubr.bf16.mxu0 %v16134_v0  ;;  %7881 = vmatprep.mubr.bf16.mxu1 %v16138_v54  ;;  %v12512_v52 = vld [vmem:[#allocation2 + $0xa64] ss:$16 sps:$4 sm:$0xff]   ;;  %v12516_v42 = vld [vmem:[#allocation2 + $0xa60] ss:$16 sps:$4 sm:$0xff]  }
 0x5ce   :  { %v12514_v1 = vld [vmem:[#allocation2 + $0xc64] ss:$16 sps:$4 sm:$0xff]   ;;  %7808 = vmatprep.subr.bf16.mxu0 %v12512_v52  ;;  %v12517_v33 = vld [vmem:[#allocation2 + $0xc60] ss:$16 sps:$4 sm:$0xff]  }
 0x5cf   :  { %7849 = vmatprep.subr.bf16.mxu1 %v12514_v1  ;;  %v12518_v20 = vld [vmem:[#allocation2 + $0xa44] ss:$16 sps:$4 sm:$0xff]   ;;  %7809 = vmatpush1.bf16.msra.mxu0 %v12516_v42  ;;  %v12522_v53 = vld [vmem:[#allocation2 + $0xa40] ss:$16 sps:$4 sm:$0xff]  }
 0x5d0   :  { %7850 = vmatpush1.bf16.msra.mxu1 %v12517_v33  ;;  %v12520_v40 = vld [vmem:[#allocation2 + $0xc44] ss:$16 sps:$4 sm:$0xff]   ;;  %7810 = vmatprep.subr.bf16.mxu0 %v12518_v20  ;;  %v12523_v47 = vld [vmem:[#allocation2 + $0xc40] ss:$16 sps:$4 sm:$0xff]  }
 0x5d1   :  { %7851 = vmatprep.subr.bf16.mxu1 %v12520_v40  ;;  %v12524_v35 = vld [vmem:[#allocation2 + $0xa24] ss:$16 sps:$4 sm:$0xff]   ;;  %v12528_v15 = vld [vmem:[#allocation2 + $0xa20] ss:$16 sps:$4 sm:$0xff]  }
 0x5d2   :  { %v12526_v4 = vld [vmem:[#allocation2 + $0xc24] ss:$16 sps:$4 sm:$0xff]   ;;  %v12529_v27 = vld [vmem:[#allocation2 + $0xc20] ss:$16 sps:$4 sm:$0xff]  }
 0x5d3   :  { %7811 = vmatpush1.bf16.msra.mxu0 %v12522_v53  ;;  %v12530_v41 = vld [vmem:[#allocation2 + $0xa04] ss:$16 sps:$4 sm:$0xff]   ;;  %v12534_v30 = vld [vmem:[#allocation2 + $0xa00] ss:$16 sps:$4 sm:$0xff]  }
 0x5d4   :  { %7852 = vmatpush1.bf16.msra.mxu1 %v12523_v47  ;;  %7812 = vmatprep.subr.bf16.mxu0 %v12524_v35  ;;  %v12532_v52 = vld [vmem:[#allocation2 + $0xc04] ss:$16 sps:$4 sm:$0xff]   ;;  %v12535_v42 = vld [vmem:[#allocation2 + $0xc00] ss:$16 sps:$4 sm:$0xff]  }
 0x5d5   :  { %7853 = vmatprep.subr.bf16.mxu1 %v12526_v4  ;;  %v12536_v33 = vld [vmem:[#allocation2 + $0x9e4] ss:$16 sps:$4 sm:$0xff]   ;;  %v12540_v1 = vld [vmem:[#allocation2 + $0x9e0] ss:$16 sps:$4 sm:$0xff]  }
 0x5d6   :  { %v12538_v20 = vld [vmem:[#allocation2 + $0xbe4] ss:$16 sps:$4 sm:$0xff]   ;;  %v12541_v40 = vld [vmem:[#allocation2 + $0xbe0] ss:$16 sps:$4 sm:$0xff]  }
 0x5d7   :  { %7813 = vmatpush1.bf16.msra.mxu0 %v12528_v15  ;;  %v12542_v55 = vld [vmem:[#allocation2 + $0x9c4] ss:$16 sps:$4 sm:$0xff]   ;;  %v12546_v53 = vld [vmem:[#allocation2 + $0x9c0] ss:$16 sps:$4 sm:$0xff]  }
 0x5d8   :  { %7854 = vmatpush1.bf16.msra.mxu1 %v12529_v27  ;;  %7814 = vmatprep.subr.bf16.mxu0 %v12530_v41  ;;  %v12544_v47 = vld [vmem:[#allocation2 + $0xbc4] ss:$16 sps:$4 sm:$0xff]   ;;  %v12547_v4 = vld [vmem:[#allocation2 + $0xbc0] ss:$16 sps:$4 sm:$0xff]  }
 0x5d9   :  { %7855 = vmatprep.subr.bf16.mxu1 %v12532_v52  ;;  %v12548_v35 = vld [vmem:[#allocation2 + $0x9a4] ss:$16 sps:$4 sm:$0xff]   ;;  %v12552_v15 = vld [vmem:[#allocation2 + $0x9a0] ss:$16 sps:$4 sm:$0xff]  }
 0x5da   :  { %v12550_v27 = vld [vmem:[#allocation2 + $0xba4] ss:$16 sps:$4 sm:$0xff]   ;;  %v12553_v41 = vld [vmem:[#allocation2 + $0xba0] ss:$16 sps:$4 sm:$0xff]  }
 0x5db   :  { %7815 = vmatpush1.bf16.msra.mxu0 %v12534_v30  ;;  %v12554_v52 = vld [vmem:[#allocation2 + $0x984] ss:$16 sps:$4 sm:$0xff]  }
 0x5dc   :  { %7856 = vmatpush1.bf16.msra.mxu1 %v12535_v42  ;;  %7816 = vmatprep.subr.bf16.mxu0 %v12536_v33  ;;  %v12556_v30 = vld [vmem:[#allocation2 + $0xb84] ss:$16 sps:$4 sm:$0xff]   ;;  %v12558_v42 = vld [vmem:[#allocation2 + $0x980] ss:$16 sps:$4 sm:$0xff]  }
 0x5dd   :  { %7857 = vmatprep.subr.bf16.mxu1 %v12538_v20  ;;  %v12559_v33 = vld [vmem:[#allocation2 + $0xb80] ss:$16 sps:$4 sm:$0xff]   ;;  %v12560_v20 = vld [vmem:[#allocation2 + $0xb64] ss:$16 sps:$4 sm:$0xff]  }
 0x5df   :  { %7817 = vmatpush1.bf16.msra.mxu0 %v12540_v1  ;;  %v12562_v1 = vld [vmem:[#allocation2 + $0xd64] ss:$16 sps:$4 sm:$0xff]  }
 0x5e0   :  { %7858 = vmatpush1.bf16.msra.mxu1 %v12541_v40  ;;  %7818 = vmatprep.subr.bf16.mxu0 %v12542_v55  ;;  %v12564_v40 = vld [vmem:[#allocation2 + $0xb60] ss:$16 sps:$4 sm:$0xff]  }
 0x5e1   :  { %7859 = vmatprep.subr.bf16.mxu1 %v12544_v47  ;;  %v12565_v55 = vld [vmem:[#allocation2 + $0xd60] ss:$16 sps:$4 sm:$0xff]   ;;  %v12566_v47 = vld [vmem:[#allocation2 + $0xb44] ss:$16 sps:$4 sm:$0xff]  }
 0x5e3   :  { %7819 = vmatpush1.bf16.msra.mxu0 %v12546_v53  ;;  %v12568_v53 = vld [vmem:[#allocation2 + $0xd44] ss:$16 sps:$4 sm:$0xff]  }
 0x5e4   :  { %7860 = vmatpush1.bf16.msra.mxu1 %v12547_v4  ;;  %7820 = vmatprep.subr.bf16.mxu0 %v12548_v35  ;;  %v12570_v4 = vld [vmem:[#allocation2 + $0xb40] ss:$16 sps:$4 sm:$0xff]  }
 0x5e5   :  { %7861 = vmatprep.subr.bf16.mxu1 %v12550_v27  ;;  %v12571_v35 = vld [vmem:[#allocation2 + $0xd40] ss:$16 sps:$4 sm:$0xff]   ;;  %v12572_v27 = vld [vmem:[#allocation2 + $0xb24] ss:$16 sps:$4 sm:$0xff]  }
 0x5e7   :  { %7821 = vmatpush1.bf16.msra.mxu0 %v12552_v15  ;;  %v12574_v15 = vld [vmem:[#allocation2 + $0xd24] ss:$16 sps:$4 sm:$0xff]  }
 0x5e8   :  { %7862 = vmatpush1.bf16.msra.mxu1 %v12553_v41  ;;  %7822 = vmatprep.subr.bf16.mxu0 %v12554_v52  ;;  %v12576_v41 = vld [vmem:[#allocation2 + $0xb20] ss:$16 sps:$4 sm:$0xff]  }
 0x5e9   :  { %7863 = vmatprep.subr.bf16.mxu1 %v12556_v30  ;;  %v12577_v52 = vld [vmem:[#allocation2 + $0xd20] ss:$16 sps:$4 sm:$0xff]   ;;  %v12578_v30 = vld [vmem:[#allocation2 + $0xb04] ss:$16 sps:$4 sm:$0xff]  }
 0x5eb   :  { %7823 = vmatpush1.bf16.msra.mxu0 %v12558_v42  ;;  %v12580_v42 = vld [vmem:[#allocation2 + $0xd04] ss:$16 sps:$4 sm:$0xff]  }
 0x5ec   :  { %7864 = vmatpush1.bf16.msra.mxu1 %v12559_v33  ;;  %7824 = vmatprep.subr.bf16.mxu0 %v12560_v20  ;;  %v12582_v33 = vld [vmem:[#allocation2 + $0xb00] ss:$16 sps:$4 sm:$0xff]  }
 0x5ed   :  { %7865 = vmatprep.subr.bf16.mxu1 %v12562_v1  ;;  %v12583_v20 = vld [vmem:[#allocation2 + $0xd00] ss:$16 sps:$4 sm:$0xff]   ;;  %v12584_v1 = vld [vmem:[#allocation2 + $0xae4] ss:$16 sps:$4 sm:$0xff]  }
 0x5ef   :  { %7825 = vmatpush2.bf16.msra.mxu0 %v12564_v40  ;;  %v12586_v40 = vld [vmem:[#allocation2 + $0xce4] ss:$16 sps:$4 sm:$0xff]  }
 0x5f0   :  { %7866 = vmatpush2.bf16.msra.mxu1 %v12565_v55  ;;  %7826 = vmatprep.subr.bf16.mxu0 %v12566_v47  ;;  %v12588_v55 = vld [vmem:[#allocation2 + $0xae0] ss:$16 sps:$4 sm:$0xff]  }
 0x5f1   :  { %7867 = vmatprep.subr.bf16.mxu1 %v12568_v53  ;;  %v12589_v47 = vld [vmem:[#allocation2 + $0xce0] ss:$16 sps:$4 sm:$0xff]   ;;  %v12590_v53 = vld [vmem:[#allocation2 + $0xac4] ss:$16 sps:$4 sm:$0xff]  }
 0x5f3   :  { %7827 = vmatpush2.bf16.msra.mxu0 %v12570_v4  ;;  %v12592_v4 = vld [vmem:[#allocation2 + $0xcc4] ss:$16 sps:$4 sm:$0xff]  }
 0x5f4   :  { %7868 = vmatpush2.bf16.msra.mxu1 %v12571_v35  ;;  %7828 = vmatprep.subr.bf16.mxu0 %v12572_v27  ;;  %v12594_v35 = vld [vmem:[#allocation2 + $0xac0] ss:$16 sps:$4 sm:$0xff]  }
 0x5f5   :  { %7869 = vmatprep.subr.bf16.mxu1 %v12574_v15  ;;  %v12595_v27 = vld [vmem:[#allocation2 + $0xcc0] ss:$16 sps:$4 sm:$0xff]   ;;  %v12596_v15 = vld [vmem:[#allocation2 + $0xaa4] ss:$16 sps:$4 sm:$0xff]  }
 0x5f7   :  { %7829 = vmatpush2.bf16.msra.mxu0 %v12576_v41  ;;  %v12598_v41 = vld [vmem:[#allocation2 + $0xca4] ss:$16 sps:$4 sm:$0xff]  }
 0x5f8   :  { %7870 = vmatpush2.bf16.msra.mxu1 %v12577_v52  ;;  %7830 = vmatprep.subr.bf16.mxu0 %v12578_v30  ;;  %v12600_v52 = vld [vmem:[#allocation2 + $0xaa0] ss:$16 sps:$4 sm:$0xff]  }
 0x5f9   :  { %7871 = vmatprep.subr.bf16.mxu1 %v12580_v42  ;;  %v12601_v30 = vld [vmem:[#allocation2 + $0xca0] ss:$16 sps:$4 sm:$0xff]   ;;  %v12602_v42 = vld [vmem:[#allocation2 + $0xa84] ss:$16 sps:$4 sm:$0xff]  }
 0x5fb   :  { %7831 = vmatpush2.bf16.msra.mxu0 %v12582_v33  ;;  %v12604_v33 = vld [vmem:[#allocation2 + $0xc84] ss:$16 sps:$4 sm:$0xff]  }
 0x5fc   :  { %7872 = vmatpush2.bf16.msra.mxu1 %v12583_v20  ;;  %7832 = vmatprep.subr.bf16.mxu0 %v12584_v1  ;;  %v12606_v20 = vld [vmem:[#allocation2 + $0xa80] ss:$16 sps:$4 sm:$0xff]  }
 0x5fd   :  { %7873 = vmatprep.subr.bf16.mxu1 %v12586_v40  ;;  %v12607_v1 = vld [vmem:[#allocation2 + $0xc80] ss:$16 sps:$4 sm:$0xff]   ;;  %v12610_v40 = vld [vmem:[#allocation2 + $0xe64] ss:$16 sps:$4 sm:$0xff]  }
 0x5ff   :  { %7833 = vmatpush2.bf16.msra.mxu0 %v12588_v55  ;;  %v12613_v55 = vld [vmem:[#allocation2 + $0x1064] ss:$16 sps:$4 sm:$0xff]  }
 0x600   :  { %7874 = vmatpush2.bf16.msra.mxu1 %v12589_v47  ;;  %7834 = vmatprep.subr.bf16.mxu0 %v12590_v53  ;;  %v12608_v47 = vld [vmem:[#allocation2 + $0xe60] ss:$16 sps:$4 sm:$0xff]  }
 0x601   :  { %7875 = vmatprep.subr.bf16.mxu1 %v12592_v4  ;;  %v12611_v53 = vld [vmem:[#allocation2 + $0x1060] ss:$16 sps:$4 sm:$0xff]   ;;  %v12616_v4 = vld [vmem:[#allocation2 + $0xe44] ss:$16 sps:$4 sm:$0xff]  }
 0x603   :  { %7835 = vmatpush2.bf16.msra.mxu0 %v12594_v35  ;;  %v12619_v35 = vld [vmem:[#allocation2 + $0x1044] ss:$16 sps:$4 sm:$0xff]  }
 0x604   :  { %7876 = vmatpush2.bf16.msra.mxu1 %v12595_v27  ;;  %7836 = vmatprep.subr.bf16.mxu0 %v12596_v15  ;;  %v12614_v27 = vld [vmem:[#allocation2 + $0xe40] ss:$16 sps:$4 sm:$0xff]  }
 0x605   :  { %7877 = vmatprep.subr.bf16.mxu1 %v12598_v41  ;;  %v12617_v15 = vld [vmem:[#allocation2 + $0x1040] ss:$16 sps:$4 sm:$0xff]   ;;  %v12622_v41 = vld [vmem:[#allocation2 + $0xe24] ss:$16 sps:$4 sm:$0xff]  }
 0x607   :  { %7837 = vmatpush2.bf16.msra.mxu0 %v12600_v52  ;;  %v12625_v52 = vld [vmem:[#allocation2 + $0x1024] ss:$16 sps:$4 sm:$0xff]  }
 0x608   :  { %7878 = vmatpush2.bf16.msra.mxu1 %v12601_v30  ;;  %7838 = vmatprep.subr.bf16.mxu0 %v12602_v42  ;;  %v12620_v30 = vld [vmem:[#allocation2 + $0xe20] ss:$16 sps:$4 sm:$0xff]  }
 0x609   :  { %7879 = vmatprep.subr.bf16.mxu1 %v12604_v33  ;;  %v12623_v42 = vld [vmem:[#allocation2 + $0x1020] ss:$16 sps:$4 sm:$0xff]   ;;  %v12628_v33 = vld [vmem:[#allocation2 + $0xe04] ss:$16 sps:$4 sm:$0xff]  }
 0x60b   :  { %7839 = vmatpush2.bf16.msra.mxu0 %v12606_v20  ;;  %v12631_v20 = vld [vmem:[#allocation2 + $0x1004] ss:$16 sps:$4 sm:$0xff]  }
 0x60c   :  { %7880 = vmatpush2.bf16.msra.mxu1 %v12607_v1  ;;  %7890 = vmatprep.subr.bf16.mxu0 %v12610_v40  ;;  %v12626_v1 = vld [vmem:[#allocation2 + $0xe00] ss:$16 sps:$4 sm:$0xff]  }
 0x60d   :  { %7931 = vmatprep.subr.bf16.mxu1 %v12613_v55  ;;  %v12629_v40 = vld [vmem:[#allocation2 + $0x1000] ss:$16 sps:$4 sm:$0xff]   ;;  %v12634_v55 = vld [vmem:[#allocation2 + $0xde4] ss:$16 sps:$4 sm:$0xff]  }
 0x60e   :  { %7841 = vmatmul.mubr.bf16.vlgmr.msra.gmra.mxu0 %v16132_v50 }
 0x60f   :  { %7882 = vmatmul.mubr.bf16.vlgmr.msra.gmra.mxu1 %v16136_v26  ;;  %7891 = vmatpush1.bf16.msra.mxu0 %v12608_v47  ;;  %v12637_v47 = vld [vmem:[#allocation2 + $0xfe4] ss:$16 sps:$4 sm:$0xff]  }
 0x610   :  { %7932 = vmatpush1.bf16.msra.mxu1 %v12611_v53  ;;  %7892 = vmatprep.subr.bf16.mxu0 %v12616_v4  ;;  %v12632_v53 = vld [vmem:[#allocation2 + $0xde0] ss:$16 sps:$4 sm:$0xff]  }
 0x611   :  { %7933 = vmatprep.subr.bf16.mxu1 %v12619_v35  ;;  %7922 = vmatprep.mubr.bf16.mxu0 %v16148_v25  ;;  %v12635_v4 = vld [vmem:[#allocation2 + $0xfe0] ss:$16 sps:$4 sm:$0xff]   ;;  %v12640_v35 = vld [vmem:[#allocation2 + $0xdc4] ss:$16 sps:$4 sm:$0xff]  }
 0x612   :  { %7963 = vmatprep.mubr.bf16.mxu1 %v16152_v31 }
 0x613   :  { %7893 = vmatpush1.bf16.msra.mxu0 %v12614_v27  ;;  %v12643_v27 = vld [vmem:[#allocation2 + $0xfc4] ss:$16 sps:$4 sm:$0xff]  }
 0x614   :  { %7934 = vmatpush1.bf16.msra.mxu1 %v12617_v15  ;;  %7894 = vmatprep.subr.bf16.mxu0 %v12622_v41  ;;  %v12638_v15 = vld [vmem:[#allocation2 + $0xdc0] ss:$16 sps:$4 sm:$0xff]  }
 0x615   :  { %7935 = vmatprep.subr.bf16.mxu1 %v12625_v52  ;;  %v12641_v41 = vld [vmem:[#allocation2 + $0xfc0] ss:$16 sps:$4 sm:$0xff]   ;;  %v12646_v52 = vld [vmem:[#allocation2 + $0xda4] ss:$16 sps:$4 sm:$0xff]  }
 0x617   :  { %7895 = vmatpush1.bf16.msra.mxu0 %v12620_v30  ;;  %v12649_v30 = vld [vmem:[#allocation2 + $0xfa4] ss:$16 sps:$4 sm:$0xff]  }
 0x618   :  { %7936 = vmatpush1.bf16.msra.mxu1 %v12623_v42  ;;  %7896 = vmatprep.subr.bf16.mxu0 %v12628_v33  ;;  %v12644_v42 = vld [vmem:[#allocation2 + $0xda0] ss:$16 sps:$4 sm:$0xff]  }
 0x619   :  { %7937 = vmatprep.subr.bf16.mxu1 %v12631_v20  ;;  %v12647_v33 = vld [vmem:[#allocation2 + $0xfa0] ss:$16 sps:$4 sm:$0xff]   ;;  %v12652_v20 = vld [vmem:[#allocation2 + $0xd84] ss:$16 sps:$4 sm:$0xff]  }
 0x61b   :  { %7897 = vmatpush1.bf16.msra.mxu0 %v12626_v1  ;;  %v12655_v1 = vld [vmem:[#allocation2 + $0xf84] ss:$16 sps:$4 sm:$0xff]  }
 0x61c   :  { %7938 = vmatpush1.bf16.msra.mxu1 %v12629_v40  ;;  %7898 = vmatprep.subr.bf16.mxu0 %v12634_v55  ;;  %v12650_v40 = vld [vmem:[#allocation2 + $0xd80] ss:$16 sps:$4 sm:$0xff]  }
 0x61d   :  { %7939 = vmatprep.subr.bf16.mxu1 %v12637_v47  ;;  %v12653_v55 = vld [vmem:[#allocation2 + $0xf80] ss:$16 sps:$4 sm:$0xff]   ;;  %v12658_v47 = vld [vmem:[#allocation2 + $0xf64] ss:$16 sps:$4 sm:$0xff]  }
 0x61f   :  { %7899 = vmatpush1.bf16.msra.mxu0 %v12632_v53  ;;  %v12661_v53 = vld [vmem:[#allocation2 + $0x1164] ss:$16 sps:$4 sm:$0xff]  }
 0x620   :  { %7940 = vmatpush1.bf16.msra.mxu1 %v12635_v4  ;;  %7900 = vmatprep.subr.bf16.mxu0 %v12640_v35  ;;  %v12656_v4 = vld [vmem:[#allocation2 + $0xf60] ss:$16 sps:$4 sm:$0xff]  }
 0x621   :  { %7941 = vmatprep.subr.bf16.mxu1 %v12643_v27  ;;  %v12659_v35 = vld [vmem:[#allocation2 + $0x1160] ss:$16 sps:$4 sm:$0xff]   ;;  %v12664_v27 = vld [vmem:[#allocation2 + $0xf44] ss:$16 sps:$4 sm:$0xff]  }
 0x623   :  { %7901 = vmatpush1.bf16.msra.mxu0 %v12638_v15  ;;  %v12667_v15 = vld [vmem:[#allocation2 + $0x1144] ss:$16 sps:$4 sm:$0xff]  }
 0x624   :  { %7942 = vmatpush1.bf16.msra.mxu1 %v12641_v41  ;;  %7902 = vmatprep.subr.bf16.mxu0 %v12646_v52  ;;  %v12662_v41 = vld [vmem:[#allocation2 + $0xf40] ss:$16 sps:$4 sm:$0xff]  }
 0x625   :  { %7943 = vmatprep.subr.bf16.mxu1 %v12649_v30  ;;  %v12665_v52 = vld [vmem:[#allocation2 + $0x1140] ss:$16 sps:$4 sm:$0xff]   ;;  %v12670_v30 = vld [vmem:[#allocation2 + $0xf24] ss:$16 sps:$4 sm:$0xff]  }
 0x627   :  { %7903 = vmatpush1.bf16.msra.mxu0 %v12644_v42  ;;  %v12673_v42 = vld [vmem:[#allocation2 + $0x1124] ss:$16 sps:$4 sm:$0xff]  }
 0x628   :  { %7944 = vmatpush1.bf16.msra.mxu1 %v12647_v33  ;;  %7904 = vmatprep.subr.bf16.mxu0 %v12652_v20  ;;  %v12668_v33 = vld [vmem:[#allocation2 + $0xf20] ss:$16 sps:$4 sm:$0xff]  }
 0x629   :  { %7945 = vmatprep.subr.bf16.mxu1 %v12655_v1  ;;  %v12671_v20 = vld [vmem:[#allocation2 + $0x1120] ss:$16 sps:$4 sm:$0xff]   ;;  %v12676_v1 = vld [vmem:[#allocation2 + $0xf04] ss:$16 sps:$4 sm:$0xff]  }
 0x62b   :  { %7905 = vmatpush1.bf16.msra.mxu0 %v12650_v40  ;;  %v12679_v40 = vld [vmem:[#allocation2 + $0x1104] ss:$16 sps:$4 sm:$0xff]  }
 0x62c   :  { %7946 = vmatpush1.bf16.msra.mxu1 %v12653_v55  ;;  %7906 = vmatprep.subr.bf16.mxu0 %v12658_v47  ;;  %v12674_v55 = vld [vmem:[#allocation2 + $0xf00] ss:$16 sps:$4 sm:$0xff]  }
 0x62d   :  { %7947 = vmatprep.subr.bf16.mxu1 %v12661_v53  ;;  %v12677_v47 = vld [vmem:[#allocation2 + $0x1100] ss:$16 sps:$4 sm:$0xff]   ;;  %v12682_v53 = vld [vmem:[#allocation2 + $0xee4] ss:$16 sps:$4 sm:$0xff]  }
 0x62f   :  { %7907 = vmatpush2.bf16.msra.mxu0 %v12656_v4  ;;  %v12685_v4 = vld [vmem:[#allocation2 + $0x10e4] ss:$16 sps:$4 sm:$0xff]  }
 0x630   :  { %7948 = vmatpush2.bf16.msra.mxu1 %v12659_v35  ;;  %7908 = vmatprep.subr.bf16.mxu0 %v12664_v27  ;;  %v12680_v35 = vld [vmem:[#allocation2 + $0xee0] ss:$16 sps:$4 sm:$0xff]  }
 0x631   :  { %7949 = vmatprep.subr.bf16.mxu1 %v12667_v15  ;;  %v12683_v27 = vld [vmem:[#allocation2 + $0x10e0] ss:$16 sps:$4 sm:$0xff]   ;;  %v12688_v15 = vld [vmem:[#allocation2 + $0xec4] ss:$16 sps:$4 sm:$0xff]  }
 0x633   :  { %7909 = vmatpush2.bf16.msra.mxu0 %v12662_v41  ;;  %v12691_v41 = vld [vmem:[#allocation2 + $0x10c4] ss:$16 sps:$4 sm:$0xff]  }
 0x634   :  { %7950 = vmatpush2.bf16.msra.mxu1 %v12665_v52  ;;  %7910 = vmatprep.subr.bf16.mxu0 %v12670_v30  ;;  %v12686_v52 = vld [vmem:[#allocation2 + $0xec0] ss:$16 sps:$4 sm:$0xff]  }
 0x635   :  { %7951 = vmatprep.subr.bf16.mxu1 %v12673_v42  ;;  %v12689_v30 = vld [vmem:[#allocation2 + $0x10c0] ss:$16 sps:$4 sm:$0xff]   ;;  %v12694_v42 = vld [vmem:[#allocation2 + $0xea4] ss:$16 sps:$4 sm:$0xff]  }
 0x637   :  { %7911 = vmatpush2.bf16.msra.mxu0 %v12668_v33  ;;  %v12697_v33 = vld [vmem:[#allocation2 + $0x10a4] ss:$16 sps:$4 sm:$0xff]  }
 0x638   :  { %7952 = vmatpush2.bf16.msra.mxu1 %v12671_v20  ;;  %7912 = vmatprep.subr.bf16.mxu0 %v12676_v1  ;;  %v12692_v20 = vld [vmem:[#allocation2 + $0xea0] ss:$16 sps:$4 sm:$0xff]  }
 0x639   :  { %7953 = vmatprep.subr.bf16.mxu1 %v12679_v40  ;;  %v12695_v1 = vld [vmem:[#allocation2 + $0x10a0] ss:$16 sps:$4 sm:$0xff]   ;;  %v12700_v40 = vld [vmem:[#allocation2 + $0xe84] ss:$16 sps:$4 sm:$0xff]  }
 0x63b   :  { %7913 = vmatpush2.bf16.msra.mxu0 %v12674_v55  ;;  %v12703_v55 = vld [vmem:[#allocation2 + $0x1084] ss:$16 sps:$4 sm:$0xff]  }
 0x63c   :  { %7954 = vmatpush2.bf16.msra.mxu1 %v12677_v47  ;;  %7914 = vmatprep.subr.bf16.mxu0 %v12682_v53  ;;  %v12698_v47 = vld [vmem:[#allocation2 + $0xe80] ss:$16 sps:$4 sm:$0xff]  }
 0x63d   :  { %7955 = vmatprep.subr.bf16.mxu1 %v12685_v4  ;;  %v12701_v53 = vld [vmem:[#allocation2 + $0x1080] ss:$16 sps:$4 sm:$0xff]   ;;  %v12706_v4 = vld [vmem:[#allocation2 + $0x1264] ss:$16 sps:$4 sm:$0xff]  }
 0x63f   :  { %7915 = vmatpush2.bf16.msra.mxu0 %v12680_v35  ;;  %v12709_v35 = vld [vmem:[#allocation2 + $0xa6c] ss:$16 sps:$4 sm:$0xff]  }
 0x640   :  { %7956 = vmatpush2.bf16.msra.mxu1 %v12683_v27  ;;  %7916 = vmatprep.subr.bf16.mxu0 %v12688_v15  ;;  %v12704_v27 = vld [vmem:[#allocation2 + $0x1260] ss:$16 sps:$4 sm:$0xff]   ;;  %v12707_v15 = vld [vmem:[#allocation2 + $0xa68] ss:$16 sps:$4 sm:$0xff]  }
 0x641   :  { %7957 = vmatprep.subr.bf16.mxu1 %v12691_v41  ;;  %v12712_v41 = vld [vmem:[#allocation2 + $0x1244] ss:$16 sps:$4 sm:$0xff]  }
 0x643   :  { %7917 = vmatpush2.bf16.msra.mxu0 %v12686_v52  ;;  %v12715_v52 = vld [vmem:[#allocation2 + $0xa4c] ss:$16 sps:$4 sm:$0xff]  }
 0x644   :  { %7958 = vmatpush2.bf16.msra.mxu1 %v12689_v30  ;;  %7918 = vmatprep.subr.bf16.mxu0 %v12694_v42  ;;  %v12710_v30 = vld [vmem:[#allocation2 + $0x1240] ss:$16 sps:$4 sm:$0xff]   ;;  %v12713_v42 = vld [vmem:[#allocation2 + $0xa48] ss:$16 sps:$4 sm:$0xff]  }
 0x645   :  { %7959 = vmatprep.subr.bf16.mxu1 %v12697_v33  ;;  %v12718_v33 = vld [vmem:[#allocation2 + $0x1224] ss:$16 sps:$4 sm:$0xff]  }
 0x647   :  { %7919 = vmatpush2.bf16.msra.mxu0 %v12692_v20  ;;  %v12721_v20 = vld [vmem:[#allocation2 + $0xa2c] ss:$16 sps:$4 sm:$0xff]  }
 0x648   :  { %7960 = vmatpush2.bf16.msra.mxu1 %v12695_v1  ;;  %7920 = vmatprep.subr.bf16.mxu0 %v12700_v40  ;;  %v12716_v1 = vld [vmem:[#allocation2 + $0x1220] ss:$16 sps:$4 sm:$0xff]   ;;  %v12719_v40 = vld [vmem:[#allocation2 + $0xa28] ss:$16 sps:$4 sm:$0xff]  }
 0x649   :  { %7961 = vmatprep.subr.bf16.mxu1 %v12703_v55  ;;  %v12724_v55 = vld [vmem:[#allocation2 + $0x1204] ss:$16 sps:$4 sm:$0xff]  }
 0x64b   :  { %7921 = vmatpush2.bf16.msra.mxu0 %v12698_v47  ;;  %v12727_v47 = vld [vmem:[#allocation2 + $0xa0c] ss:$16 sps:$4 sm:$0xff]  }
 0x64c   :  { %7962 = vmatpush2.bf16.msra.mxu1 %v12701_v53  ;;  %7972 = vmatprep.subr.bf16.mxu0 %v12706_v4  ;;  %v12722_v53 = vld [vmem:[#allocation2 + $0x1200] ss:$16 sps:$4 sm:$0xff]   ;;  %v12725_v4 = vld [vmem:[#allocation2 + $0xa08] ss:$16 sps:$4 sm:$0xff]  }
 0x64d   :  { %8013 = vmatprep.subr.bf16.mxu1 %v12709_v35  ;;  %v12730_v35 = vld [vmem:[#allocation2 + $0x11e4] ss:$16 sps:$4 sm:$0xff]  }
 0x64e   :  { %7923 = vmatmul.mubr.bf16.vlgmr.msra.gmra.mxu0 %v16144_v36 }
 0x64f   :  { %7964 = vmatmul.mubr.bf16.vlgmr.msra.gmra.mxu1 %v16150_v11  ;;  %7973 = vmatpush1.bf16.msra.mxu0 %v12704_v27  ;;  %v12733_v27 = vld [vmem:[#allocation2 + $0x9ec] ss:$16 sps:$4 sm:$0xff]  }
 0x650   :  { %8014 = vmatpush1.bf16.msra.mxu1 %v12707_v15  ;;  %7974 = vmatprep.subr.bf16.mxu0 %v12712_v41  ;;  %v12728_v15 = vld [vmem:[#allocation2 + $0x11e0] ss:$16 sps:$4 sm:$0xff]   ;;  %v12731_v41 = vld [vmem:[#allocation2 + $0x9e8] ss:$16 sps:$4 sm:$0xff]  }
 0x651   :  { %8015 = vmatprep.subr.bf16.mxu1 %v12715_v52  ;;  %11092 = vmatprep.mubr.msk.bf16.mxu0 %vm5406_vm7, %v16146_v28  ;;  %v12739_v52 = vld [vmem:[#allocation2 + $0x9cc] ss:$16 sps:$4 sm:$0xff]  }
 0x652   :  { %8045 = vmatprep.mubr.bf16.mxu1 %v16134_v0  ;;  %v12736_v0 = vld [vmem:[#allocation2 + $0x11c4] ss:$16 sps:$4 sm:$0xff]  }
 0x653   :  { %7975 = vmatpush1.bf16.msra.mxu0 %v12710_v30  ;;  %v12734_v30 = vld [vmem:[#allocation2 + $0x11c0] ss:$16 sps:$4 sm:$0xff]  }
 0x654   :  { %8016 = vmatpush1.bf16.msra.mxu1 %v12713_v42  ;;  %7976 = vmatprep.subr.bf16.mxu0 %v12718_v33  ;;  %v12737_v42 = vld [vmem:[#allocation2 + $0x9c8] ss:$16 sps:$4 sm:$0xff]   ;;  %v12742_v33 = vld [vmem:[#allocation2 + $0x11a4] ss:$16 sps:$4 sm:$0xff]  }
 0x655   :  { %8017 = vmatprep.subr.bf16.mxu1 %v12721_v20  ;;  %v12745_v20 = vld [vmem:[#allocation2 + $0x9ac] ss:$16 sps:$4 sm:$0xff]  }
 0x657   :  { %7977 = vmatpush1.bf16.msra.mxu0 %v12716_v1  ;;  %v12740_v1 = vld [vmem:[#allocation2 + $0x11a0] ss:$16 sps:$4 sm:$0xff]  }
 0x658   :  { %8018 = vmatpush1.bf16.msra.mxu1 %v12719_v40  ;;  %7978 = vmatprep.subr.bf16.mxu0 %v12724_v55  ;;  %v12743_v40 = vld [vmem:[#allocation2 + $0x9a8] ss:$16 sps:$4 sm:$0xff]   ;;  %v12748_v55 = vld [vmem:[#allocation2 + $0x1184] ss:$16 sps:$4 sm:$0xff]  }
 0x659   :  { %8019 = vmatprep.subr.bf16.mxu1 %v12727_v47  ;;  %v12751_v47 = vld [vmem:[#allocation2 + $0x98c] ss:$16 sps:$4 sm:$0xff]  }
 0x65b   :  { %7979 = vmatpush1.bf16.msra.mxu0 %v12722_v53  ;;  %v12746_v53 = vld [vmem:[#allocation2 + $0x1180] ss:$16 sps:$4 sm:$0xff]  }
 0x65c   :  { %8020 = vmatpush1.bf16.msra.mxu1 %v12725_v4  ;;  %7980 = vmatprep.subr.bf16.mxu0 %v12730_v35  ;;  %v12749_v4 = vld [vmem:[#allocation2 + $0x988] ss:$16 sps:$4 sm:$0xff]   ;;  %v12754_v35 = vld [vmem:[#allocation2 + $0x12e4] ss:$16 sps:$4 sm:$0xff]  }
 0x65d   :  { %8021 = vmatprep.subr.bf16.mxu1 %v12733_v27  ;;  %v12757_v27 = vld [vmem:[#allocation2 + $0xb6c] ss:$16 sps:$4 sm:$0xff]  }
 0x65f   :  { %7981 = vmatpush1.bf16.msra.mxu0 %v12728_v15  ;;  %v12752_v15 = vld [vmem:[#allocation2 + $0x12e0] ss:$16 sps:$4 sm:$0xff]  }
 0x660   :  { %8022 = vmatpush1.bf16.msra.mxu1 %v12731_v41  ;;  %7982 = vmatprep.subr.bf16.mxu0 %v12736_v0  ;;  %v12755_v41 = vld [vmem:[#allocation2 + $0xb68] ss:$16 sps:$4 sm:$0xff]   ;;  %v12760_v0 = vld [vmem:[#allocation2 + $0x12c4] ss:$16 sps:$4 sm:$0xff]  }
 0x661   :  { %8023 = vmatprep.subr.bf16.mxu1 %v12739_v52  ;;  %v12763_v52 = vld [vmem:[#allocation2 + $0xb4c] ss:$16 sps:$4 sm:$0xff]  }
 0x663   :  { %7983 = vmatpush1.bf16.msra.mxu0 %v12734_v30  ;;  %v12758_v30 = vld [vmem:[#allocation2 + $0x12c0] ss:$16 sps:$4 sm:$0xff]  }
 0x664   :  { %8024 = vmatpush1.bf16.msra.mxu1 %v12737_v42  ;;  %7984 = vmatprep.subr.bf16.mxu0 %v12742_v33  ;;  %v12761_v42 = vld [vmem:[#allocation2 + $0xb48] ss:$16 sps:$4 sm:$0xff]   ;;  %v12766_v33 = vld [vmem:[#allocation2 + $0x12a4] ss:$16 sps:$4 sm:$0xff]  }
 0x665   :  { %8025 = vmatprep.subr.bf16.mxu1 %v12745_v20  ;;  %v12769_v20 = vld [vmem:[#allocation2 + $0xb2c] ss:$16 sps:$4 sm:$0xff]  }
 0x667   :  { %7985 = vmatpush1.bf16.msra.mxu0 %v12740_v1  ;;  %v12764_v1 = vld [vmem:[#allocation2 + $0x12a0] ss:$16 sps:$4 sm:$0xff]  }
 0x668   :  { %8026 = vmatpush1.bf16.msra.mxu1 %v12743_v40  ;;  %7986 = vmatprep.subr.bf16.mxu0 %v12748_v55  ;;  %v12767_v40 = vld [vmem:[#allocation2 + $0xb28] ss:$16 sps:$4 sm:$0xff]   ;;  %v12772_v55 = vld [vmem:[#allocation2 + $0x1284] ss:$16 sps:$4 sm:$0xff]  }
 0x669   :  { %8027 = vmatprep.subr.bf16.mxu1 %v12751_v47  ;;  %v12775_v47 = vld [vmem:[#allocation2 + $0xb0c] ss:$16 sps:$4 sm:$0xff]  }
 0x66b   :  { %7987 = vmatpush1.bf16.msra.mxu0 %v12746_v53  ;;  %v12770_v53 = vld [vmem:[#allocation2 + $0x1280] ss:$16 sps:$4 sm:$0xff]  }
 0x66c   :  { %8028 = vmatpush1.bf16.msra.mxu1 %v12749_v4  ;;  %7996 = vmatprep.subr.bf16.mxu0 %v12754_v35  ;;  %v12773_v4 = vld [vmem:[#allocation2 + $0xb08] ss:$16 sps:$4 sm:$0xff]   ;;  %v12778_v35 = vld [vmem:[#allocation2 + $0xaec] ss:$16 sps:$4 sm:$0xff]  }
 0x66d   :  { %8029 = vmatprep.subr.bf16.mxu1 %v12757_v27  ;;  %v12781_v27 = vld [vmem:[#allocation2 + $0xc6c] ss:$16 sps:$4 sm:$0xff]  }
 0x66f   :  { %7997 = vmatpush2.bf16.msra.mxu0 %v12752_v15  ;;  %v12776_v15 = vld [vmem:[#allocation2 + $0xae8] ss:$16 sps:$4 sm:$0xff]  }
 0x670   :  { %8030 = vmatpush2.bf16.msra.mxu1 %v12755_v41  ;;  %7998 = vmatprep.subr.bf16.mxu0 %v12760_v0  ;;  %v12779_v41 = vld [vmem:[#allocation2 + $0xc68] ss:$16 sps:$4 sm:$0xff]   ;;  %v12784_v0 = vld [vmem:[#allocation2 + $0xacc] ss:$16 sps:$4 sm:$0xff]  }
 0x671   :  { %8031 = vmatprep.subr.bf16.mxu1 %v12763_v52  ;;  %v12787_v52 = vld [vmem:[#allocation2 + $0xc4c] ss:$16 sps:$4 sm:$0xff]  }
 0x673   :  { %7999 = vmatpush2.bf16.msra.mxu0 %v12758_v30  ;;  %v12782_v30 = vld [vmem:[#allocation2 + $0xac8] ss:$16 sps:$4 sm:$0xff]  }
 0x674   :  { %8032 = vmatpush2.bf16.msra.mxu1 %v12761_v42  ;;  %8000 = vmatprep.subr.bf16.mxu0 %v12766_v33  ;;  %v12785_v42 = vld [vmem:[#allocation2 + $0xc48] ss:$16 sps:$4 sm:$0xff]   ;;  %v12790_v33 = vld [vmem:[#allocation2 + $0xaac] ss:$16 sps:$4 sm:$0xff]  }
 0x675   :  { %8033 = vmatprep.subr.bf16.mxu1 %v12769_v20  ;;  %v12793_v20 = vld [vmem:[#allocation2 + $0xc2c] ss:$16 sps:$4 sm:$0xff]  }
 0x677   :  { %8001 = vmatpush2.bf16.msra.mxu0 %v12764_v1  ;;  %v12788_v1 = vld [vmem:[#allocation2 + $0xaa8] ss:$16 sps:$4 sm:$0xff]  }
 0x678   :  { %8034 = vmatpush2.bf16.msra.mxu1 %v12767_v40  ;;  %8002 = vmatprep.subr.bf16.mxu0 %v12772_v55  ;;  %v12791_v40 = vld [vmem:[#allocation2 + $0xc28] ss:$16 sps:$4 sm:$0xff]   ;;  %v12796_v55 = vld [vmem:[#allocation2 + $0xa8c] ss:$16 sps:$4 sm:$0xff]  }
 0x679   :  { %8035 = vmatprep.subr.bf16.mxu1 %v12775_v47  ;;  %v12799_v47 = vld [vmem:[#allocation2 + $0xc0c] ss:$16 sps:$4 sm:$0xff]  }
 0x67b   :  { %8003 = vmatpush2.bf16.msra.mxu0 %v12770_v53  ;;  %v12794_v53 = vld [vmem:[#allocation2 + $0xa88] ss:$16 sps:$4 sm:$0xff]  }
 0x67c   :  { %8036 = vmatpush2.bf16.msra.mxu1 %v12773_v4  ;;  %8054 = vmatprep.subr.bf16.mxu0 %v12781_v27  ;;  %v12797_v4 = vld [vmem:[#allocation2 + $0xc08] ss:$16 sps:$4 sm:$0xff]   ;;  %v12805_v27 = vld [vmem:[#allocation2 + $0xe6c] ss:$16 sps:$4 sm:$0xff]  }
 0x67d   :  { %8037 = vmatprep.subr.bf16.mxu1 %v12778_v35  ;;  %v12802_v35 = vld [vmem:[#allocation2 + $0xbec] ss:$16 sps:$4 sm:$0xff]  }
 0x67e   :  { %8005 = vmatmul.mubr.bf16.vlgmr.msra.gmra.mxu0 %v16141_v37 }
 0x67f   :  { %8055 = vmatpush1.bf16.msra.mxu0 %v12779_v41  ;;  %8086 = vmatprep.mubr.bf16.mxu0 %v16138_v54  ;;  %v12803_v54 = vld [vmem:[#allocation2 + $0xe68] ss:$16 sps:$4 sm:$0xff]   ;;  %v12808_v41 = vld [vmem:[#allocation2 + $0xbcc] ss:$16 sps:$4 sm:$0xff]  }
 0x680   :  { %8038 = vmatpush2.bf16.msra.mxu1 %v12776_v15  ;;  %8056 = vmatprep.subr.bf16.mxu0 %v12787_v52  ;;  %v12800_v15 = vld [vmem:[#allocation2 + $0xbe8] ss:$16 sps:$4 sm:$0xff]  }
 0x681   :  { %8039 = vmatprep.subr.bf16.mxu1 %v12784_v0  ;;  %v12811_v0 = vld [vmem:[#allocation2 + $0xe4c] ss:$16 sps:$4 sm:$0xff]   ;;  %v12806_v52 = vld [vmem:[#allocation2 + $0xbc8] ss:$16 sps:$4 sm:$0xff]  }
 0x683   :  { %8057 = vmatpush1.bf16.msra.mxu0 %v12785_v42  ;;  %v12814_v42 = vld [vmem:[#allocation2 + $0xbac] ss:$16 sps:$4 sm:$0xff]  }
 0x684   :  { %8040 = vmatpush2.bf16.msra.mxu1 %v12782_v30  ;;  %8058 = vmatprep.subr.bf16.mxu0 %v12793_v20  ;;  %v12809_v30 = vld [vmem:[#allocation2 + $0xe48] ss:$16 sps:$4 sm:$0xff]  }
 0x685   :  { %8041 = vmatprep.subr.bf16.mxu1 %v12790_v33  ;;  %v12817_v33 = vld [vmem:[#allocation2 + $0xe2c] ss:$16 sps:$4 sm:$0xff]   ;;  %v12812_v20 = vld [vmem:[#allocation2 + $0xba8] ss:$16 sps:$4 sm:$0xff]  }
 0x687   :  { %8059 = vmatpush1.bf16.msra.mxu0 %v12791_v40  ;;  %v12820_v40 = vld [vmem:[#allocation2 + $0xb8c] ss:$16 sps:$4 sm:$0xff]  }
 0x688   :  { %8042 = vmatpush2.bf16.msra.mxu1 %v12788_v1  ;;  %8060 = vmatprep.subr.bf16.mxu0 %v12799_v47  ;;  %v12815_v1 = vld [vmem:[#allocation2 + $0xe28] ss:$16 sps:$4 sm:$0xff]  }
 0x689   :  { %8043 = vmatprep.subr.bf16.mxu1 %v12796_v55  ;;  %v12823_v55 = vld [vmem:[#allocation2 + $0xe0c] ss:$16 sps:$4 sm:$0xff]   ;;  %v12821_v47 = vld [vmem:[#allocation2 + $0xe08] ss:$16 sps:$4 sm:$0xff]  }
 0x68b   :  { %8061 = vmatpush1.bf16.msra.mxu0 %v12797_v4  ;;  %v12829_v4 = vld [vmem:[#allocation2 + $0xdec] ss:$16 sps:$4 sm:$0xff]  }
 0x68c   :  { %8044 = vmatpush2.bf16.msra.mxu1 %v12794_v53  ;;  %8062 = vmatprep.subr.bf16.mxu0 %v12802_v35  ;;  %v12826_v53 = vld [vmem:[#allocation2 + $0xd6c] ss:$16 sps:$4 sm:$0xff]   ;;  %v12824_v35 = vld [vmem:[#allocation2 + $0xd68] ss:$16 sps:$4 sm:$0xff]  }
 0x68d   :  { %8095 = vmatprep.subr.bf16.mxu1 %v12805_v27  ;;  %v12832_v27 = vld [vmem:[#allocation2 + $0xd4c] ss:$16 sps:$4 sm:$0xff]  }
 0x68f   :  { %8046 = vmatmul.mubr.bf16.vlgmr.msra.gmra.mxu1 %v16132_v50  ;;  %8063 = vmatpush1.bf16.msra.mxu0 %v12800_v15  ;;  %v12818_v50 = vld [vmem:[#allocation2 + $0xb88] ss:$16 sps:$4 sm:$0xff]   ;;  %v12835_v15 = vld [vmem:[#allocation2 + $0xdcc] ss:$16 sps:$4 sm:$0xff]  }
 0x690   :  { %8096 = vmatpush1.bf16.msra.mxu1 %v12803_v54  ;;  %8064 = vmatprep.subr.bf16.mxu0 %v12808_v41  ;;  %v12830_v54 = vld [vmem:[#allocation2 + $0xd48] ss:$16 sps:$4 sm:$0xff]  }
 0x691   :  { %8097 = vmatprep.subr.bf16.mxu1 %v12811_v0  ;;  %8127 = vmatprep.mubr.bf16.mxu1 %v16148_v25  ;;  %v12827_v25 = vld [vmem:[#allocation2 + $0xde8] ss:$16 sps:$4 sm:$0xff]   ;;  %v12838_v0 = vld [vmem:[#allocation2 + $0xd2c] ss:$16 sps:$4 sm:$0xff]  }
 0x692   :  { %v12833_v41 = vld [vmem:[#allocation2 + $0xdc8] ss:$16 sps:$4 sm:$0xff]  }
 0x693   :  { %8065 = vmatpush1.bf16.msra.mxu0 %v12806_v52  ;;  %v12841_v52 = vld [vmem:[#allocation2 + $0xdac] ss:$16 sps:$4 sm:$0xff]  }
 0x694   :  { %8098 = vmatpush1.bf16.msra.mxu1 %v12809_v30  ;;  %8066 = vmatprep.subr.bf16.mxu0 %v12814_v42  ;;  %v12836_v30 = vld [vmem:[#allocation2 + $0xd28] ss:$16 sps:$4 sm:$0xff]  }
 0x695   :  { %8099 = vmatprep.subr.bf16.mxu1 %v12817_v33  ;;  %v12839_v42 = vld [vmem:[#allocation2 + $0xda8] ss:$16 sps:$4 sm:$0xff]   ;;  %v12844_v33 = vld [vmem:[#allocation2 + $0xd0c] ss:$16 sps:$4 sm:$0xff]  }
 0x697   :  { %8067 = vmatpush1.bf16.msra.mxu0 %v12812_v20  ;;  %v12847_v20 = vld [vmem:[#allocation2 + $0xd8c] ss:$16 sps:$4 sm:$0xff]  }
 0x698   :  { %8100 = vmatpush1.bf16.msra.mxu1 %v12815_v1  ;;  %8068 = vmatprep.subr.bf16.mxu0 %v12820_v40  ;;  %v12842_v1 = vld [vmem:[#allocation2 + $0xd08] ss:$16 sps:$4 sm:$0xff]  }
 0x699   :  { %8101 = vmatprep.subr.bf16.mxu1 %v12823_v55  ;;  %v12845_v40 = vld [vmem:[#allocation2 + $0xd88] ss:$16 sps:$4 sm:$0xff]   ;;  %v12850_v55 = vld [vmem:[#allocation2 + $0xcec] ss:$16 sps:$4 sm:$0xff]  }
 0x69b   :  { %8069 = vmatpush1.bf16.msra.mxu0 %v12818_v50  ;;  %v12853_v50 = vld [vmem:[#allocation2 + $0xf6c] ss:$16 sps:$4 sm:$0xff]  }
 0x69c   :  { %8102 = vmatpush1.bf16.msra.mxu1 %v12821_v47  ;;  %8070 = vmatprep.subr.bf16.mxu0 %v12826_v53  ;;  %v12848_v47 = vld [vmem:[#allocation2 + $0xce8] ss:$16 sps:$4 sm:$0xff]  }
 0x69d   :  { %8103 = vmatprep.subr.bf16.mxu1 %v12829_v4  ;;  %v12851_v53 = vld [vmem:[#allocation2 + $0xf68] ss:$16 sps:$4 sm:$0xff]   ;;  %v12856_v4 = vld [vmem:[#allocation2 + $0xccc] ss:$16 sps:$4 sm:$0xff]  }
 0x69f   :  { %8071 = vmatpush2.bf16.msra.mxu0 %v12824_v35  ;;  %v12859_v35 = vld [vmem:[#allocation2 + $0xf4c] ss:$16 sps:$4 sm:$0xff]  }
 0x6a0   :  { %8104 = vmatpush1.bf16.msra.mxu1 %v12827_v25  ;;  %8072 = vmatprep.subr.bf16.mxu0 %v12832_v27  ;;  %v12854_v25 = vld [vmem:[#allocation2 + $0xcc8] ss:$16 sps:$4 sm:$0xff]  }
 0x6a1   :  { %8105 = vmatprep.subr.bf16.mxu1 %v12835_v15  ;;  %v12857_v27 = vld [vmem:[#allocation2 + $0xf48] ss:$16 sps:$4 sm:$0xff]   ;;  %v12862_v15 = vld [vmem:[#allocation2 + $0xcac] ss:$16 sps:$4 sm:$0xff]  }
 0x6a3   :  { %8073 = vmatpush2.bf16.msra.mxu0 %v12830_v54  ;;  %v12865_v54 = vld [vmem:[#allocation2 + $0xf2c] ss:$16 sps:$4 sm:$0xff]  }
 0x6a4   :  { %8106 = vmatpush1.bf16.msra.mxu1 %v12833_v41  ;;  %8074 = vmatprep.subr.bf16.mxu0 %v12838_v0  ;;  %v12860_v41 = vld [vmem:[#allocation2 + $0xca8] ss:$16 sps:$4 sm:$0xff]  }
 0x6a5   :  { %8107 = vmatprep.subr.bf16.mxu1 %v12841_v52  ;;  %v12863_v0 = vld [vmem:[#allocation2 + $0xf28] ss:$16 sps:$4 sm:$0xff]   ;;  %v12868_v52 = vld [vmem:[#allocation2 + $0xc8c] ss:$16 sps:$4 sm:$0xff]  }
 0x6a7   :  { %8075 = vmatpush2.bf16.msra.mxu0 %v12836_v30  ;;  %v12871_v30 = vld [vmem:[#allocation2 + $0xf0c] ss:$16 sps:$4 sm:$0xff]  }
 0x6a8   :  { %8108 = vmatpush1.bf16.msra.mxu1 %v12839_v42  ;;  %8076 = vmatprep.subr.bf16.mxu0 %v12844_v33  ;;  %v12866_v42 = vld [vmem:[#allocation2 + $0xc88] ss:$16 sps:$4 sm:$0xff]  }
 0x6a9   :  { %8109 = vmatprep.subr.bf16.mxu1 %v12847_v20  ;;  %v12869_v33 = vld [vmem:[#allocation2 + $0xf08] ss:$16 sps:$4 sm:$0xff]   ;;  %v12874_v20 = vld [vmem:[#allocation2 + $0xeec] ss:$16 sps:$4 sm:$0xff]  }
 0x6ab   :  { %8077 = vmatpush2.bf16.msra.mxu0 %v12842_v1  ;;  %v12877_v1 = vld [vmem:[#allocation2 + $0x106c] ss:$16 sps:$4 sm:$0xff]  }
 0x6ac   :  { %8110 = vmatpush1.bf16.msra.mxu1 %v12845_v40  ;;  %8078 = vmatprep.subr.bf16.mxu0 %v12850_v55  ;;  %v12872_v40 = vld [vmem:[#allocation2 + $0xee8] ss:$16 sps:$4 sm:$0xff]  }
 0x6ad   :  { %8111 = vmatprep.subr.bf16.mxu1 %v12853_v50  ;;  %v12875_v55 = vld [vmem:[#allocation2 + $0x1068] ss:$16 sps:$4 sm:$0xff]   ;;  %v12880_v50 = vld [vmem:[#allocation2 + $0xecc] ss:$16 sps:$4 sm:$0xff]  }
 0x6af   :  { %8079 = vmatpush2.bf16.msra.mxu0 %v12848_v47  ;;  %v12883_v47 = vld [vmem:[#allocation2 + $0x104c] ss:$16 sps:$4 sm:$0xff]  }
 0x6b0   :  { %8112 = vmatpush2.bf16.msra.mxu1 %v12851_v53  ;;  %8080 = vmatprep.subr.bf16.mxu0 %v12856_v4  ;;  %v12878_v53 = vld [vmem:[#allocation2 + $0xec8] ss:$16 sps:$4 sm:$0xff]  }
 0x6b1   :  { %8113 = vmatprep.subr.bf16.mxu1 %v12859_v35  ;;  %v12881_v4 = vld [vmem:[#allocation2 + $0x1048] ss:$16 sps:$4 sm:$0xff]   ;;  %v12886_v35 = vld [vmem:[#allocation2 + $0xeac] ss:$16 sps:$4 sm:$0xff]  }
 0x6b3   :  { %8081 = vmatpush2.bf16.msra.mxu0 %v12854_v25  ;;  %v12889_v25 = vld [vmem:[#allocation2 + $0x102c] ss:$16 sps:$4 sm:$0xff]  }
 0x6b4   :  { %8114 = vmatpush2.bf16.msra.mxu1 %v12857_v27  ;;  %8082 = vmatprep.subr.bf16.mxu0 %v12862_v15  ;;  %v12884_v27 = vld [vmem:[#allocation2 + $0xea8] ss:$16 sps:$4 sm:$0xff]  }
 0x6b5   :  { %8115 = vmatprep.subr.bf16.mxu1 %v12865_v54  ;;  %v12887_v15 = vld [vmem:[#allocation2 + $0x1028] ss:$16 sps:$4 sm:$0xff]   ;;  %v12892_v54 = vld [vmem:[#allocation2 + $0xe8c] ss:$16 sps:$4 sm:$0xff]  }
 0x6b7   :  { %8083 = vmatpush2.bf16.msra.mxu0 %v12860_v41  ;;  %v12895_v41 = vld [vmem:[#allocation2 + $0x100c] ss:$16 sps:$4 sm:$0xff]  }
 0x6b8   :  { %8116 = vmatpush2.bf16.msra.mxu1 %v12863_v0  ;;  %8084 = vmatprep.subr.bf16.mxu0 %v12868_v52  ;;  %v12893_v0 = vld [vmem:[#allocation2 + $0x1008] ss:$16 sps:$4 sm:$0xff]   ;;  %v16473_v52 = vld [vmem:[#allocation12 + $0x4] sm:$0xf] }
 0x6b9   :  { %8117 = vmatprep.subr.bf16.mxu1 %v12871_v30  ;;  %v12898_v30 = vld [vmem:[#allocation2 + $0xfec] ss:$16 sps:$4 sm:$0xff]  }
 0x6bb   :  { %8085 = vmatpush2.bf16.msra.mxu0 %v12866_v42  ;;  %v12901_v42 = vld [vmem:[#allocation2 + $0x126c] ss:$16 sps:$4 sm:$0xff]  }
 0x6bc   :  { %8118 = vmatpush2.bf16.msra.mxu1 %v12869_v33  ;;  %8136 = vmatprep.subr.bf16.mxu0 %v12877_v1  ;;  %v12896_v33 = vld [vmem:[#allocation2 + $0xfe8] ss:$16 sps:$4 sm:$0xff]   ;;  %v12904_v1 = vld [vmem:[#allocation2 + $0xfcc] ss:$16 sps:$4 sm:$0xff]  }
 0x6bd   :  { %8119 = vmatprep.subr.bf16.mxu1 %v12874_v20  ;;  %v12899_v20 = vld [vmem:[#allocation2 + $0x1268] ss:$16 sps:$4 sm:$0xff]  }
 0x6be   :  { %8087 = vmatmul.mubr.bf16.vlgmr.msra.gmra.mxu0 %v16136_v26  ;;  %v12890_v26 = vld [vmem:[#allocation2 + $0xe88] ss:$16 sps:$4 sm:$0xff]  }
 0x6bf   :  { %8137 = vmatpush1.bf16.msra.mxu0 %v12875_v55  ;;  %8168 = vmatprep.mubr.bf16.mxu0 %v16152_v31  ;;  %v6271_v31 = vrot.slane %v16473_v52, %v17719_v17  ;;  %v6275_v55 = vrot.slane %v16473_v52, %v17720_v60 }
 0x6c0   :  { %8120 = vmatpush2.bf16.msra.mxu1 %v12872_v40  ;;  %8138 = vmatprep.subr.bf16.mxu0 %v12883_v47  ;;  %v12907_v40 = vld [vmem:[#allocation2 + $0x124c] ss:$16 sps:$4 sm:$0xff]  }
 0x6c1   :  { %8121 = vmatprep.subr.bf16.mxu1 %v12880_v50 }
 0x6c3   :  { %8139 = vmatpush1.bf16.msra.mxu0 %v12881_v4  ;;  %v12902_v4 = vld [vmem:[#allocation2 + $0xfc8] ss:$16 sps:$4 sm:$0xff]  }
 0x6c4   :  { %8122 = vmatpush2.bf16.msra.mxu1 %v12878_v53  ;;  %8140 = vmatprep.subr.bf16.mxu0 %v12889_v25 }
 0x6c5   :  { %8123 = vmatprep.subr.bf16.mxu1 %v12886_v35  ;;  %v12905_v35 = vld [vmem:[#allocation2 + $0x1248] ss:$16 sps:$4 sm:$0xff]  }
 0x6c7   :  { %8141 = vmatpush1.bf16.msra.mxu0 %v12887_v15  ;;  %v12910_v15 = vld [vmem:[#allocation2 + $0xfac] ss:$16 sps:$4 sm:$0xff]  }
 0x6c8   :  { %8124 = vmatpush2.bf16.msra.mxu1 %v12884_v27  ;;  %8142 = vmatprep.subr.bf16.mxu0 %v12895_v41 }
 0x6c9   :  { %8125 = vmatprep.subr.bf16.mxu1 %v12892_v54  ;;  %v12913_v54 = vld [vmem:[#allocation2 + $0x122c] ss:$16 sps:$4 sm:$0xff]  }
 0x6cb   :  { %8143 = vmatpush1.bf16.msra.mxu0 %v12893_v0 }
 0x6cc   :  { %8126 = vmatpush2.bf16.msra.mxu1 %v12890_v26  ;;  %8144 = vmatprep.subr.bf16.mxu0 %v12898_v30 }
 0x6cd   :  { %8177 = vmatprep.subr.bf16.mxu1 %v12901_v42  ;;  %v12908_v42 = vld [vmem:[#allocation2 + $0xfa8] ss:$16 sps:$4 sm:$0xff]  }
 0x6ce   :  { %v7842_v50 = vpop.f32.mrf.mxu0 }
 0x6cf   :  { %v7883_v47 = vpop.f32.mrf.mxu1  ;;  %8128 = vmatmul.mubr.bf16.vlgmr.msra.gmra.mxu1 %v16144_v36  ;;  %v7843_v53 = vadd.f32 %v7842_v50, %v6271_v31  ;;  %8145 = vmatpush1.bf16.msra.mxu0 %v12896_v33  ;;  %v12911_v31 = vld [vmem:[#allocation2 + $0x1228] ss:$16 sps:$4 sm:$0xff]  }
 0x6d0   :  { %8178 = vmatpush1.bf16.msra.mxu1 %v12899_v20  ;;  %v7844_v25 = vpop.f32.mrf.mxu0  ;;  %8146 = vmatprep.subr.bf16.mxu0 %v12904_v1  ;;  %v12916_v1 = vld [vmem:[#allocation2 + $0xf8c] ss:$16 sps:$4 sm:$0xff]   ;;  %v12917_v50 = vld [vmem:[#allocation2 + $0x1208] ss:$16 sps:$4 sm:$0xff]  }
 0x6d1   :  { %v7885_v27 = vpop.f32.mrf.mxu1  ;;  %8179 = vmatprep.subr.bf16.mxu1 %v12907_v40  ;;  %v16480_v41 = vadd.f32 %v7883_v47, %v7843_v53  ;;  %v7845_v26 = vadd.f32 %v7844_v25, %v6275_v55  ;;  %11093 = vmatprep.mubr.msk.bf16.mxu1 %vm5406_vm7, %v16146_v28  ;;  %v12919_v40 = vld [vmem:[#allocation2 + $0x120c] ss:$16 sps:$4 sm:$0xff]   ;;  %v12914_v55 = vld [vmem:[#allocation2 + $0xf88] ss:$16 sps:$4 sm:$0xff]  }
 0x6d2   :  { %v7846_v0 = vpop.f32.mrf.mxu0  ;;  %v12922_v28 = vld [vmem:[#allocation2 + $0x116c] ss:$16 sps:$4 sm:$0xff]   ;;  %v12920_v53 = vld [vmem:[#allocation2 + $0x1168] ss:$16 sps:$4 sm:$0xff]  }
 0x6d3   :  { %v7887_v30 = vpop.f32.mrf.mxu1  ;;  %v16484_v36 = vadd.f32 %v7885_v27, %v7845_v26  ;;  %8147 = vmatpush1.bf16.msra.mxu0 %v12902_v4  ;;  %v12925_v47 = vld [vmem:[#allocation2 + $0x11ec] ss:$16 sps:$4 sm:$0xff]   ;;  %v12923_v4 = vld [vmem:[#allocation2 + $0x11e8] ss:$16 sps:$4 sm:$0xff]  }
 0x6d4   :  { %8180 = vmatpush1.bf16.msra.mxu1 %v12905_v35  ;;  %v7847_v33 = vpop.f32.mrf.mxu0  ;;  %8148 = vmatprep.subr.bf16.mxu0 %v12910_v15  ;;  %v12928_v35 = vld [vmem:[#allocation2 + $0x114c] ss:$16 sps:$4 sm:$0xff]   ;;  %v12926_v27 = vld [vmem:[#allocation2 + $0x1148] ss:$16 sps:$4 sm:$0xff]  }
 0x6d5   :  { %v7888_v20 = vpop.f32.mrf.mxu1  ;;  %8181 = vmatprep.subr.bf16.mxu1 %v12913_v54  ;;  %v12931_v25 = vld [vmem:[#allocation2 + $0x11cc] ss:$16 sps:$4 sm:$0xff]   ;;  %v12929_v15 = vld [vmem:[#allocation2 + $0x11c8] ss:$16 sps:$4 sm:$0xff]  }
 0x6d6   :  { %v12934_v54 = vld [vmem:[#allocation2 + $0x112c] ss:$16 sps:$4 sm:$0xff]   ;;  %v12932_v0 = vld [vmem:[#allocation2 + $0x1128] ss:$16 sps:$4 sm:$0xff]  }
 0x6d7   :  { %8149 = vmatpush1.bf16.msra.mxu0 %v12908_v42  ;;  %v12937_v26 = vld [vmem:[#allocation2 + $0x11ac] ss:$16 sps:$4 sm:$0xff]   ;;  %v12935_v30 = vld [vmem:[#allocation2 + $0x11a8] ss:$16 sps:$4 sm:$0xff]  }
 0x6d8   :  { %8182 = vmatpush1.bf16.msra.mxu1 %v12911_v31  ;;  %8150 = vmatprep.subr.bf16.mxu0 %v12916_v1  ;;  %v12940_v42 = vld [vmem:[#allocation2 + $0x110c] ss:$16 sps:$4 sm:$0xff]   ;;  %v12938_v33 = vld [vmem:[#allocation2 + $0x1108] ss:$16 sps:$4 sm:$0xff]  }
 0x6d9   :  { %8183 = vmatprep.subr.bf16.mxu1 %v12919_v40  ;;  %v12943_v31 = vld [vmem:[#allocation2 + $0x118c] ss:$16 sps:$4 sm:$0xff]   ;;  %v12941_v20 = vld [vmem:[#allocation2 + $0x1188] ss:$16 sps:$4 sm:$0xff]  }
 0x6da   :  { %v12946_v1 = vld [vmem:[#allocation2 + $0x10ec] ss:$16 sps:$4 sm:$0xff]  }
 0x6db   :  { %8151 = vmatpush1.bf16.msra.mxu0 %v12914_v55  ;;  %v12949_v40 = vld [vmem:[#allocation2 + $0x12ec] ss:$16 sps:$4 sm:$0xff]   ;;  %v12944_v55 = vld [vmem:[#allocation2 + $0x10e8] ss:$16 sps:$4 sm:$0xff]  }
 0x6dc   :  { %8184 = vmatpush1.bf16.msra.mxu1 %v12917_v50  ;;  %8152 = vmatprep.subr.bf16.mxu0 %v12922_v28  ;;  %v12947_v50 = vld [vmem:[#allocation2 + $0x12e8] ss:$16 sps:$4 sm:$0xff]   ;;  %v12952_v28 = vld [vmem:[#allocation2 + $0x10cc] ss:$16 sps:$4 sm:$0xff]  }
 0x6dd   :  { %8185 = vmatprep.subr.bf16.mxu1 %v12925_v47  ;;  %v12955_v47 = vld [vmem:[#allocation2 + $0x12cc] ss:$16 sps:$4 sm:$0xff]  }
 0x6df   :  { %8153 = vmatpush2.bf16.msra.mxu0 %v12920_v53  ;;  %v12950_v53 = vld [vmem:[#allocation2 + $0x10c8] ss:$16 sps:$4 sm:$0xff]  }
 0x6e0   :  { %8186 = vmatpush1.bf16.msra.mxu1 %v12923_v4  ;;  %8154 = vmatprep.subr.bf16.mxu0 %v12928_v35  ;;  %v12953_v4 = vld [vmem:[#allocation2 + $0x12c8] ss:$16 sps:$4 sm:$0xff]   ;;  %v12958_v35 = vld [vmem:[#allocation2 + $0x10ac] ss:$16 sps:$4 sm:$0xff]  }
 0x6e1   :  { %8187 = vmatprep.subr.bf16.mxu1 %v12931_v25  ;;  %v12961_v25 = vld [vmem:[#allocation2 + $0x12ac] ss:$16 sps:$4 sm:$0xff]  }
 0x6e3   :  { %8155 = vmatpush2.bf16.msra.mxu0 %v12926_v27  ;;  %v12956_v27 = vld [vmem:[#allocation2 + $0x10a8] ss:$16 sps:$4 sm:$0xff]  }
 0x6e4   :  { %8188 = vmatpush1.bf16.msra.mxu1 %v12929_v15  ;;  %8156 = vmatprep.subr.bf16.mxu0 %v12934_v54  ;;  %v12959_v15 = vld [vmem:[#allocation2 + $0x12a8] ss:$16 sps:$4 sm:$0xff]   ;;  %v12964_v54 = vld [vmem:[#allocation2 + $0x108c] ss:$16 sps:$4 sm:$0xff]  }
 0x6e5   :  { %8189 = vmatprep.subr.bf16.mxu1 %v12937_v26  ;;  %v12967_v26 = vld [vmem:[#allocation2 + $0x128c] ss:$16 sps:$4 sm:$0xff]  }
 0x6e7   :  { %8157 = vmatpush2.bf16.msra.mxu0 %v12932_v0  ;;  %v12962_v0 = vld [vmem:[#allocation2 + $0x1088] ss:$16 sps:$4 sm:$0xff]  }
 0x6e8   :  { %8190 = vmatpush1.bf16.msra.mxu1 %v12935_v30  ;;  %8158 = vmatprep.subr.bf16.mxu0 %v12940_v42  ;;  %v12965_v30 = vld [vmem:[#allocation2 + $0x1288] ss:$16 sps:$4 sm:$0xff]  }
 0x6e9   :  { %8191 = vmatprep.subr.bf16.mxu1 %v12943_v31 }
 0x6eb   :  { %8159 = vmatpush2.bf16.msra.mxu0 %v12938_v33 }
 0x6ec   :  { %8192 = vmatpush1.bf16.msra.mxu1 %v12941_v20  ;;  %8160 = vmatprep.subr.bf16.mxu0 %v12946_v1 }
 0x6ed   :  { %8201 = vmatprep.subr.bf16.mxu1 %v12949_v40 }
 0x6ef   :  { %8161 = vmatpush2.bf16.msra.mxu0 %v12944_v55 }
 0x6f0   :  { %8202 = vmatpush2.bf16.msra.mxu1 %v12947_v50  ;;  %8162 = vmatprep.subr.bf16.mxu0 %v12952_v28 }
 0x6f1   :  { %8203 = vmatprep.subr.bf16.mxu1 %v12955_v47 }
 0x6f3   :  { %8163 = vmatpush2.bf16.msra.mxu0 %v12950_v53 }
 0x6f4   :  { %8204 = vmatpush2.bf16.msra.mxu1 %v12953_v4  ;;  %8164 = vmatprep.subr.bf16.mxu0 %v12958_v35 }
 0x6f5   :  { %8205 = vmatprep.subr.bf16.mxu1 %v12961_v25 }
 0x6f7   :  { %8165 = vmatpush2.bf16.msra.mxu0 %v12956_v27 }
 0x6f8   :  { %8206 = vmatpush2.bf16.msra.mxu1 %v12959_v15  ;;  %8166 = vmatprep.subr.bf16.mxu0 %v12964_v54 }
 0x6f9   :  { %8207 = vmatprep.subr.bf16.mxu1 %v12967_v26 }
 0x6fb   :  { %8167 = vmatpush2.bf16.msra.mxu0 %v12962_v0 }
 0x6fc   :  { %8208 = vmatpush2.bf16.msra.mxu1 %v12965_v30 }
 0x6fe   :  { %8169 = vmatmul.mubr.bf16.vlgmr.msra.gmra.mxu0 %v16150_v11 }
 0x6ff   :  { %8210 = vmatmul.mubr.bf16.vlgmr.msra.gmra.mxu1 %v16141_v37 }
 0x70e   :  { %v7924_v42 = vpop.f32.mrf.mxu0 }
 0x70f   :  { %v7965_v31 = vpop.f32.mrf.mxu1  ;;  %v7925_v33 = vadd.f32 %v7924_v42, %v16480_v41 }
 0x710   :  { %v7926_v20 = vpop.f32.mrf.mxu0 }
 0x711   :  { %v7967_v1 = vpop.f32.mrf.mxu1  ;;  %v7966_v40 = vadd.f32 %v7965_v31, %v7925_v33  ;;  %v7927_v55 = vadd.f32 %v7926_v20, %v16484_v36 }
 0x712   :  { %v7928_v50 = vpop.f32.mrf.mxu0 }
 0x713   :  { %v7969_v28 = vpop.f32.mrf.mxu1  ;;  %v7968_v47 = vadd.f32 %v7967_v1, %v7927_v55 }
 0x714   :  { %v7929_v53 = vpop.f32.mrf.mxu0  ;;  %v6279_v28 = vrot.slane %v16473_v52, %v17721_v12 }
 0x715   :  { %v7970_v4 = vpop.f32.mrf.mxu1 }
 0x73e   :  { %v8006_v35 = vpop.f32.mrf.mxu0 }
 0x73f   :  { %v16490_v25 = vadd.f32 %v8006_v35, %v7966_v40 }
 0x740   :  { %v8008_v11 = vpop.f32.mrf.mxu0 }
 0x741   :  { %v8009_v27 = vadd.f32 %v8008_v11, %v7968_v47  ;;  %v6283_v47 = vrot.slane %v16473_v52, %v17722_v16 }
 0x742   :  { %v8010_v15 = vpop.f32.mrf.mxu0 }
 0x743   :  { %v8219_v54 = vmax.f32 %v8009_v27, 0.0 }
 0x744   :  { %v8011_v41 = vpop.f32.mrf.mxu0 }
 0x74f   :  { %v8047_v26 = vpop.f32.mrf.mxu1 }
 0x750   :  { %v8048_v53 = vadd.f32 %v8047_v26, %v6279_v28 }
 0x751   :  { %v8049_v0 = vpop.f32.mrf.mxu1 }
 0x752   :  { %v8050_v4 = vadd.f32 %v8049_v0, %v6283_v47 }
 0x753   :  { %v8051_v30 = vpop.f32.mrf.mxu1 }
 0x755   :  { %v8052_v42 = vpop.f32.mrf.mxu1 }
 0x77e   :  { %v8088_v36 = vpop.f32.mrf.mxu0 }
 0x77f   :  { %v8089_v35 = vadd.f32 %v8088_v36, %v8048_v53 }
 0x780   :  { %v8090_v31 = vpop.f32.mrf.mxu0 }
 0x781   :  { %v8091_v11 = vadd.f32 %v8090_v31, %v8050_v4 }
 0x782   :  { %v8092_v33 = vpop.f32.mrf.mxu0 }
 0x784   :  { %v8093_v20 = vpop.f32.mrf.mxu0 }
 0x78f   :  { %v8129_v1 = vpop.f32.mrf.mxu1 }
 0x790   :  { %v8130_v27 = vadd.f32 %v8129_v1, %v8089_v35 }
 0x791   :  { %v8131_v55 = vpop.f32.mrf.mxu1 }
 0x792   :  { %v8132_v30 = vadd.f32 %v8131_v55, %v8091_v11 }
 0x793   :  { %v8133_v50 = vpop.f32.mrf.mxu1 }
 0x795   :  { %v8134_v40 = vpop.f32.mrf.mxu1 }
 0x7be   :  { %v8170_v15 = vpop.f32.mrf.mxu0 }
 0x7bf   :  { %v8211_v41 = vpop.f32.mrf.mxu1  ;;  %v8171_v42 = vadd.f32 %v8170_v15, %v8130_v27 }
 0x7c0   :  { %v8172_v33 = vpop.f32.mrf.mxu0 }
 0x7c1   :  { %v8213_v20 = vpop.f32.mrf.mxu1  ;;  %v16497_v37 = vadd.f32 %v8211_v41, %v8171_v42  ;;  %v8173_v50 = vadd.f32 %v8172_v33, %v8132_v30 }
 0x7c2   :  { %v8174_v40 = vpop.f32.mrf.mxu0 }
 0x7c3   :  { %v8215_v60 = vpop.f32.mrf.mxu1  ;;  %v8220_v12 = vmax.f32 %v16497_v37, 0.0  ;;  %v8214_v17 = vadd.f32 %v8213_v20, %v8173_v50 }
 0x7c4   :  { %v8175_v52 = vpop.f32.mrf.mxu0 }
 0x7c5   :  { %v8216_v26 = vpop.f32.mrf.mxu1  ;;  %v8221_v0 = vmax.f32 %v8214_v17, 0.0 }
 0x7c6   :  { %13432 = dma.done.wait [#allocation5 + $0x3], 16384 }
 0x7c7   :  { %13433 = vsyncadd [#allocation5 + $0x3], 4294950912  ;;  %v16500_v36 = vpack.c.bf16 %v8219_v54, %v8219_v54  ;;  %v16502_v31 = vpack.c.bf16 %v8221_v0, %v8221_v0  ;;  %v12968_v1 = vld [vmem:[#allocation3 + $0x4e4] ss:$16 sps:$4 sm:$0xff]   ;;  %v12972_v60 = vld [vmem:[#allocation3 + $0x4e0] ss:$16 sps:$4 sm:$0xff]  }
 0x7c8   :  { %v12970_v55 = vld [vmem:[#allocation3 + $0x6e4] ss:$16 sps:$4 sm:$0xff]   ;;  %8996 = vmatprep.subr.bf16.mxu0 %v12968_v1  ;;  %v12973_v28 = vld [vmem:[#allocation3 + $0x6e0] ss:$16 sps:$4 sm:$0xff]   ;;  %v13078_v37 = vld [vmem:[#allocation3 + $0x4ac] ss:$16 sps:$4 sm:$0xff]  }
 0x7c9   :  { %9028 = vmatprep.mubr.bf16.mxu0 %v16500_v36  ;;  %9069 = vmatprep.mubr.bf16.mxu1 %v16502_v31  ;;  %v12974_v47 = vld [vmem:[#allocation3 + $0x4c4] ss:$16 sps:$4 sm:$0xff]   ;;  %v12978_v53 = vld [vmem:[#allocation3 + $0x4c0] ss:$16 sps:$4 sm:$0xff]   ;;  %vm10341_vm8 = vcmask 91136  }
 0x7ca   :  { %9037 = vmatprep.subr.bf16.mxu1 %v12970_v55  ;;  %8997 = vmatpush1.bf16.msra.mxu0 %v12972_v60  ;;  %v12976_v17 = vld [vmem:[#allocation3 + $0x6c4] ss:$16 sps:$4 sm:$0xff]   ;;  %v12979_v54 = vld [vmem:[#allocation3 + $0x6c0] ss:$16 sps:$4 sm:$0xff]  }
 0x7cb   :  { %9038 = vmatpush1.bf16.msra.mxu1 %v12973_v28  ;;  %8998 = vmatprep.subr.bf16.mxu0 %v12974_v47  ;;  %v12980_v4 = vld [vmem:[#allocation3 + $0x4a4] ss:$16 sps:$4 sm:$0xff]   ;;  %v12984_v11 = vld [vmem:[#allocation3 + $0x4a0] ss:$16 sps:$4 sm:$0xff]  }
 0x7cc   :  { %9039 = vmatprep.subr.bf16.mxu1 %v12976_v17  ;;  %v12982_v35 = vld [vmem:[#allocation3 + $0x6a4] ss:$16 sps:$4 sm:$0xff]   ;;  %v12985_v27 = vld [vmem:[#allocation3 + $0x6a0] ss:$16 sps:$4 sm:$0xff]  }
 0x7cd   :  { %v12986_v15 = vld [vmem:[#allocation3 + $0x484] ss:$16 sps:$4 sm:$0xff]   ;;  %v12990_v30 = vld [vmem:[#allocation3 + $0x480] ss:$16 sps:$4 sm:$0xff]  }
 0x7ce   :  { %8999 = vmatpush1.bf16.msra.mxu0 %v12978_v53  ;;  %v12988_v41 = vld [vmem:[#allocation3 + $0x684] ss:$16 sps:$4 sm:$0xff]   ;;  %v12991_v42 = vld [vmem:[#allocation3 + $0x680] ss:$16 sps:$4 sm:$0xff]  }
 0x7cf   :  { %9040 = vmatpush1.bf16.msra.mxu1 %v12979_v54  ;;  %9000 = vmatprep.subr.bf16.mxu0 %v12980_v4  ;;  %v12992_v33 = vld [vmem:[#allocation3 + $0x464] ss:$16 sps:$4 sm:$0xff]   ;;  %v12996_v50 = vld [vmem:[#allocation3 + $0x460] ss:$16 sps:$4 sm:$0xff]  }
 0x7d0   :  { %9041 = vmatprep.subr.bf16.mxu1 %v12982_v35  ;;  %v12994_v20 = vld [vmem:[#allocation3 + $0x664] ss:$16 sps:$4 sm:$0xff]   ;;  %v12997_v40 = vld [vmem:[#allocation3 + $0x660] ss:$16 sps:$4 sm:$0xff]  }
 0x7d1   :  { %v12998_v52 = vld [vmem:[#allocation3 + $0x444] ss:$16 sps:$4 sm:$0xff]   ;;  %v13002_v0 = vld [vmem:[#allocation3 + $0x440] ss:$16 sps:$4 sm:$0xff]  }
 0x7d2   :  { %9001 = vmatpush1.bf16.msra.mxu0 %v12984_v11  ;;  %v13000_v26 = vld [vmem:[#allocation3 + $0x644] ss:$16 sps:$4 sm:$0xff]   ;;  %v13003_v1 = vld [vmem:[#allocation3 + $0x640] ss:$16 sps:$4 sm:$0xff]  }
 0x7d3   :  { %9042 = vmatpush1.bf16.msra.mxu1 %v12985_v27  ;;  %9002 = vmatprep.subr.bf16.mxu0 %v12986_v15  ;;  %v13004_v55 = vld [vmem:[#allocation3 + $0x424] ss:$16 sps:$4 sm:$0xff]   ;;  %v13008_v28 = vld [vmem:[#allocation3 + $0x420] ss:$16 sps:$4 sm:$0xff]  }
 0x7d4   :  { %9043 = vmatprep.subr.bf16.mxu1 %v12988_v41  ;;  %v13006_v60 = vld [vmem:[#allocation3 + $0x624] ss:$16 sps:$4 sm:$0xff]   ;;  %v13009_v47 = vld [vmem:[#allocation3 + $0x620] ss:$16 sps:$4 sm:$0xff]  }
 0x7d5   :  { %v13010_v17 = vld [vmem:[#allocation3 + $0x404] ss:$16 sps:$4 sm:$0xff]   ;;  %v13014_v54 = vld [vmem:[#allocation3 + $0x400] ss:$16 sps:$4 sm:$0xff]  }
 0x7d6   :  { %9003 = vmatpush1.bf16.msra.mxu0 %v12990_v30  ;;  %v13012_v53 = vld [vmem:[#allocation3 + $0x604] ss:$16 sps:$4 sm:$0xff]   ;;  %v13015_v4 = vld [vmem:[#allocation3 + $0x600] ss:$16 sps:$4 sm:$0xff]  }
 0x7d7   :  { %9044 = vmatpush1.bf16.msra.mxu1 %v12991_v42  ;;  %9004 = vmatprep.subr.bf16.mxu0 %v12992_v33  ;;  %v13016_v35 = vld [vmem:[#allocation3 + $0x5e4] ss:$16 sps:$4 sm:$0xff]   ;;  %v13020_v27 = vld [vmem:[#allocation3 + $0x5e0] ss:$16 sps:$4 sm:$0xff]  }
 0x7d8   :  { %9045 = vmatprep.subr.bf16.mxu1 %v12994_v20  ;;  %v13018_v11 = vld [vmem:[#allocation3 + $0x7e4] ss:$16 sps:$4 sm:$0xff]   ;;  %v13021_v15 = vld [vmem:[#allocation3 + $0x7e0] ss:$16 sps:$4 sm:$0xff]  }
 0x7d9   :  { %v13022_v41 = vld [vmem:[#allocation3 + $0x5c4] ss:$16 sps:$4 sm:$0xff]   ;;  %v13026_v42 = vld [vmem:[#allocation3 + $0x5c0] ss:$16 sps:$4 sm:$0xff]  }
 0x7da   :  { %9005 = vmatpush1.bf16.msra.mxu0 %v12996_v50  ;;  %v13024_v30 = vld [vmem:[#allocation3 + $0x7c4] ss:$16 sps:$4 sm:$0xff]   ;;  %v13027_v33 = vld [vmem:[#allocation3 + $0x7c0] ss:$16 sps:$4 sm:$0xff]  }
 0x7db   :  { %9046 = vmatpush1.bf16.msra.mxu1 %v12997_v40  ;;  %9006 = vmatprep.subr.bf16.mxu0 %v12998_v52  ;;  %v13028_v20 = vld [vmem:[#allocation3 + $0x5a4] ss:$16 sps:$4 sm:$0xff]   ;;  %v13032_v40 = vld [vmem:[#allocation3 + $0x5a0] ss:$16 sps:$4 sm:$0xff]  }
 0x7dc   :  { %9047 = vmatprep.subr.bf16.mxu1 %v13000_v26  ;;  %v13030_v50 = vld [vmem:[#allocation3 + $0x7a4] ss:$16 sps:$4 sm:$0xff]   ;;  %v13033_v52 = vld [vmem:[#allocation3 + $0x7a0] ss:$16 sps:$4 sm:$0xff]  }
 0x7dd   :  { %v13034_v26 = vld [vmem:[#allocation3 + $0x584] ss:$16 sps:$4 sm:$0xff]  }
 0x7de   :  { %9007 = vmatpush1.bf16.msra.mxu0 %v13002_v0  ;;  %v13036_v0 = vld [vmem:[#allocation3 + $0x784] ss:$16 sps:$4 sm:$0xff]  }
 0x7df   :  { %9048 = vmatpush1.bf16.msra.mxu1 %v13003_v1  ;;  %9008 = vmatprep.subr.bf16.mxu0 %v13004_v55  ;;  %v13038_v1 = vld [vmem:[#allocation3 + $0x580] ss:$16 sps:$4 sm:$0xff]  }
 0x7e0   :  { %9049 = vmatprep.subr.bf16.mxu1 %v13006_v60  ;;  %v13039_v55 = vld [vmem:[#allocation3 + $0x780] ss:$16 sps:$4 sm:$0xff]   ;;  %v13040_v60 = vld [vmem:[#allocation3 + $0x564] ss:$16 sps:$4 sm:$0xff]  }
 0x7e2   :  { %9009 = vmatpush1.bf16.msra.mxu0 %v13008_v28  ;;  %v13042_v28 = vld [vmem:[#allocation3 + $0x764] ss:$16 sps:$4 sm:$0xff]  }
 0x7e3   :  { %9050 = vmatpush1.bf16.msra.mxu1 %v13009_v47  ;;  %9010 = vmatprep.subr.bf16.mxu0 %v13010_v17  ;;  %v13044_v47 = vld [vmem:[#allocation3 + $0x560] ss:$16 sps:$4 sm:$0xff]  }
 0x7e4   :  { %9051 = vmatprep.subr.bf16.mxu1 %v13012_v53  ;;  %v13045_v17 = vld [vmem:[#allocation3 + $0x760] ss:$16 sps:$4 sm:$0xff]   ;;  %v13046_v53 = vld [vmem:[#allocation3 + $0x544] ss:$16 sps:$4 sm:$0xff]  }
 0x7e6   :  { %9011 = vmatpush1.bf16.msra.mxu0 %v13014_v54  ;;  %v13048_v54 = vld [vmem:[#allocation3 + $0x744] ss:$16 sps:$4 sm:$0xff]  }
 0x7e7   :  { %9052 = vmatpush1.bf16.msra.mxu1 %v13015_v4  ;;  %9012 = vmatprep.subr.bf16.mxu0 %v13016_v35  ;;  %v13050_v4 = vld [vmem:[#allocation3 + $0x540] ss:$16 sps:$4 sm:$0xff]  }
 0x7e8   :  { %9053 = vmatprep.subr.bf16.mxu1 %v13018_v11  ;;  %v13051_v35 = vld [vmem:[#allocation3 + $0x740] ss:$16 sps:$4 sm:$0xff]   ;;  %v13052_v11 = vld [vmem:[#allocation3 + $0x524] ss:$16 sps:$4 sm:$0xff]  }
 0x7ea   :  { %9013 = vmatpush2.bf16.msra.mxu0 %v13020_v27  ;;  %v13054_v27 = vld [vmem:[#allocation3 + $0x724] ss:$16 sps:$4 sm:$0xff]  }
 0x7eb   :  { %9054 = vmatpush2.bf16.msra.mxu1 %v13021_v15  ;;  %9014 = vmatprep.subr.bf16.mxu0 %v13022_v41  ;;  %v13056_v15 = vld [vmem:[#allocation3 + $0x520] ss:$16 sps:$4 sm:$0xff]  }
 0x7ec   :  { %9055 = vmatprep.subr.bf16.mxu1 %v13024_v30  ;;  %v13057_v41 = vld [vmem:[#allocation3 + $0x720] ss:$16 sps:$4 sm:$0xff]   ;;  %v13058_v30 = vld [vmem:[#allocation3 + $0x504] ss:$16 sps:$4 sm:$0xff]  }
 0x7ee   :  { %9015 = vmatpush2.bf16.msra.mxu0 %v13026_v42  ;;  %v13060_v42 = vld [vmem:[#allocation3 + $0x704] ss:$16 sps:$4 sm:$0xff]  }
 0x7ef   :  { %9056 = vmatpush2.bf16.msra.mxu1 %v13027_v33  ;;  %9016 = vmatprep.subr.bf16.mxu0 %v13028_v20  ;;  %v13062_v33 = vld [vmem:[#allocation3 + $0x500] ss:$16 sps:$4 sm:$0xff]  }
 0x7f0   :  { %9057 = vmatprep.subr.bf16.mxu1 %v13030_v50  ;;  %v13063_v20 = vld [vmem:[#allocation3 + $0x700] ss:$16 sps:$4 sm:$0xff]   ;;  %v13066_v50 = vld [vmem:[#allocation3 + $0x4ec] ss:$16 sps:$4 sm:$0xff]  }
 0x7f2   :  { %9017 = vmatpush2.bf16.msra.mxu0 %v13032_v40  ;;  %v13069_v40 = vld [vmem:[#allocation3 + $0x6ec] ss:$16 sps:$4 sm:$0xff]  }
 0x7f3   :  { %9058 = vmatpush2.bf16.msra.mxu1 %v13033_v52  ;;  %9018 = vmatprep.subr.bf16.mxu0 %v13034_v26  ;;  %v17820_v52 = vmax.f32 %v16490_v25, 0.0  ;;  %v13070_v25 = vld [vmem:[#allocation3 + $0x4c8] ss:$16 sps:$4 sm:$0xff]  }
 0x7f4   :  { %9059 = vmatprep.subr.bf16.mxu1 %v13036_v0  ;;  %v16514_v0 = vpack.c.bf16 %v8220_v12, %v8220_v12  ;;  %v13081_v12 = vld [vmem:[#allocation3 + $0x6ac] ss:$16 sps:$4 sm:$0xff]  }
 0x7f5   :  { %v16509_v26 = vpack.c.bf16 %v17820_v52, %v17820_v52  ;;  %v13103_v52 = vld [vmem:[#allocation3 + $0x628] ss:$16 sps:$4 sm:$0xff]  }
 0x7f6   :  { %9019 = vmatpush2.bf16.msra.mxu0 %v13038_v1  ;;  %v13064_v1 = vld [vmem:[#allocation3 + $0x4e8] ss:$16 sps:$4 sm:$0xff]  }
 0x7f7   :  { %9060 = vmatpush2.bf16.msra.mxu1 %v13039_v55  ;;  %9020 = vmatprep.subr.bf16.mxu0 %v13040_v60  ;;  %v13067_v55 = vld [vmem:[#allocation3 + $0x6e8] ss:$16 sps:$4 sm:$0xff]   ;;  %v13072_v60 = vld [vmem:[#allocation3 + $0x4cc] ss:$16 sps:$4 sm:$0xff]  }
 0x7f8   :  { %9061 = vmatprep.subr.bf16.mxu1 %v13042_v28  ;;  %v13075_v28 = vld [vmem:[#allocation3 + $0x6cc] ss:$16 sps:$4 sm:$0xff]  }
 0x7fa   :  { %9021 = vmatpush2.bf16.msra.mxu0 %v13044_v47  ;;  %v13073_v47 = vld [vmem:[#allocation3 + $0x6c8] ss:$16 sps:$4 sm:$0xff]  }
 0x7fb   :  { %9062 = vmatpush2.bf16.msra.mxu1 %v13045_v17  ;;  %9022 = vmatprep.subr.bf16.mxu0 %v13046_v53  ;;  %v13076_v17 = vld [vmem:[#allocation3 + $0x4a8] ss:$16 sps:$4 sm:$0xff]  }
 0x7fc   :  { %9063 = vmatprep.subr.bf16.mxu1 %v13048_v54  ;;  %v13079_v53 = vld [vmem:[#allocation3 + $0x6a8] ss:$16 sps:$4 sm:$0xff]   ;;  %v13084_v54 = vld [vmem:[#allocation3 + $0x48c] ss:$16 sps:$4 sm:$0xff]  }
 0x7fe   :  { %9023 = vmatpush2.bf16.msra.mxu0 %v13050_v4  ;;  %v13087_v4 = vld [vmem:[#allocation3 + $0x68c] ss:$16 sps:$4 sm:$0xff]  }
 0x7ff   :  { %9064 = vmatpush2.bf16.msra.mxu1 %v13051_v35  ;;  %9024 = vmatprep.subr.bf16.mxu0 %v13052_v11  ;;  %v13082_v35 = vld [vmem:[#allocation3 + $0x488] ss:$16 sps:$4 sm:$0xff]  }
 0x800   :  { %9065 = vmatprep.subr.bf16.mxu1 %v13054_v27  ;;  %v13085_v11 = vld [vmem:[#allocation3 + $0x688] ss:$16 sps:$4 sm:$0xff]   ;;  %v13090_v27 = vld [vmem:[#allocation3 + $0x46c] ss:$16 sps:$4 sm:$0xff]  }
 0x802   :  { %9025 = vmatpush2.bf16.msra.mxu0 %v13056_v15  ;;  %v13093_v15 = vld [vmem:[#allocation3 + $0x66c] ss:$16 sps:$4 sm:$0xff]  }
 0x803   :  { %9066 = vmatpush2.bf16.msra.mxu1 %v13057_v41  ;;  %9026 = vmatprep.subr.bf16.mxu0 %v13058_v30  ;;  %v13088_v41 = vld [vmem:[#allocation3 + $0x468] ss:$16 sps:$4 sm:$0xff]   ;;  %v13099_v30 = vld [vmem:[#allocation3 + $0x64c] ss:$16 sps:$4 sm:$0xff]  }
 0x804   :  { %9067 = vmatprep.subr.bf16.mxu1 %v13060_v42  ;;  %v13094_v42 = vld [vmem:[#allocation3 + $0x448] ss:$16 sps:$4 sm:$0xff]  }
 0x806   :  { %9027 = vmatpush2.bf16.msra.mxu0 %v13062_v33  ;;  %v13097_v33 = vld [vmem:[#allocation3 + $0x648] ss:$16 sps:$4 sm:$0xff]  }
 0x807   :  { %9068 = vmatpush2.bf16.msra.mxu1 %v13063_v20  ;;  %9078 = vmatprep.subr.bf16.mxu0 %v13066_v50  ;;  %v13102_v20 = vld [vmem:[#allocation3 + $0x42c] ss:$16 sps:$4 sm:$0xff]  }
 0x808   :  { %9119 = vmatprep.subr.bf16.mxu1 %v13069_v40  ;;  %v13105_v50 = vld [vmem:[#allocation3 + $0x62c] ss:$16 sps:$4 sm:$0xff]   ;;  %v13100_v40 = vld [vmem:[#allocation3 + $0x428] ss:$16 sps:$4 sm:$0xff]  }
 0x809   :  { %9029 = vmatmul.mubr.bf16.vlgmr.msra.gmra.mxu0 %v16509_v26 }
 0x80a   :  { %9070 = vmatmul.mubr.bf16.vlgmr.msra.gmra.mxu1 %v16514_v0  ;;  %9079 = vmatpush1.bf16.msra.mxu0 %v13064_v1  ;;  %v13108_v1 = vld [vmem:[#allocation3 + $0x40c] ss:$16 sps:$4 sm:$0xff]  }
 0x80b   :  { %9120 = vmatpush1.bf16.msra.mxu1 %v13067_v55  ;;  %9080 = vmatprep.subr.bf16.mxu0 %v13072_v60  ;;  %v13111_v55 = vld [vmem:[#allocation3 + $0x60c] ss:$16 sps:$4 sm:$0xff]   ;;  %v13106_v60 = vld [vmem:[#allocation3 + $0x408] ss:$16 sps:$4 sm:$0xff]  }
 0x80c   :  { %9121 = vmatprep.subr.bf16.mxu1 %v13075_v28  ;;  %9110 = vmatprep.mubr.bf16.mxu0 %v16500_v36  ;;  %v13091_v36 = vld [vmem:[#allocation3 + $0x668] ss:$16 sps:$4 sm:$0xff]  }
 0x80d   :  { %9151 = vmatprep.mubr.bf16.mxu1 %v16502_v31  ;;  %v13096_v31 = vld [vmem:[#allocation3 + $0x44c] ss:$16 sps:$4 sm:$0xff]   ;;  %v13109_v28 = vld [vmem:[#allocation3 + $0x608] ss:$16 sps:$4 sm:$0xff]  }
 0x80e   :  { %9081 = vmatpush1.bf16.msra.mxu0 %v13070_v25  ;;  %v13114_v25 = vld [vmem:[#allocation3 + $0x5ec] ss:$16 sps:$4 sm:$0xff]  }
 0x80f   :  { %9122 = vmatpush1.bf16.msra.mxu1 %v13073_v47  ;;  %9082 = vmatprep.subr.bf16.mxu0 %v13078_v37  ;;  %v13117_v47 = vld [vmem:[#allocation3 + $0x7ec] ss:$16 sps:$4 sm:$0xff]   ;;  %v13112_v37 = vld [vmem:[#allocation3 + $0x5e8] ss:$16 sps:$4 sm:$0xff]  }
 0x810   :  { %9123 = vmatprep.subr.bf16.mxu1 %v13081_v12  ;;  %v13115_v12 = vld [vmem:[#allocation3 + $0x7e8] ss:$16 sps:$4 sm:$0xff]  }
 0x812   :  { %9083 = vmatpush1.bf16.msra.mxu0 %v13076_v17  ;;  %v13120_v17 = vld [vmem:[#allocation3 + $0x5cc] ss:$16 sps:$4 sm:$0xff]  }
 0x813   :  { %9124 = vmatpush1.bf16.msra.mxu1 %v13079_v53  ;;  %9084 = vmatprep.subr.bf16.mxu0 %v13084_v54  ;;  %v13123_v53 = vld [vmem:[#allocation3 + $0x7cc] ss:$16 sps:$4 sm:$0xff]   ;;  %v13118_v54 = vld [vmem:[#allocation3 + $0x5c8] ss:$16 sps:$4 sm:$0xff]  }
 0x814   :  { %9125 = vmatprep.subr.bf16.mxu1 %v13087_v4  ;;  %v13121_v4 = vld [vmem:[#allocation3 + $0x7c8] ss:$16 sps:$4 sm:$0xff]  }
 0x816   :  { %9085 = vmatpush1.bf16.msra.mxu0 %v13082_v35  ;;  %v13126_v35 = vld [vmem:[#allocation3 + $0x5ac] ss:$16 sps:$4 sm:$0xff]  }
 0x817   :  { %9126 = vmatpush1.bf16.msra.mxu1 %v13085_v11  ;;  %9086 = vmatprep.subr.bf16.mxu0 %v13090_v27  ;;  %v13129_v11 = vld [vmem:[#allocation3 + $0x7ac] ss:$16 sps:$4 sm:$0xff]   ;;  %v13124_v27 = vld [vmem:[#allocation3 + $0x5a8] ss:$16 sps:$4 sm:$0xff]  }
 0x818   :  { %9127 = vmatprep.subr.bf16.mxu1 %v13093_v15  ;;  %v13127_v15 = vld [vmem:[#allocation3 + $0x7a8] ss:$16 sps:$4 sm:$0xff]  }
 0x81a   :  { %9087 = vmatpush1.bf16.msra.mxu0 %v13088_v41  ;;  %v13132_v41 = vld [vmem:[#allocation3 + $0x58c] ss:$16 sps:$4 sm:$0xff]  }
 0x81b   :  { %9128 = vmatpush1.bf16.msra.mxu1 %v13091_v36  ;;  %9088 = vmatprep.subr.bf16.mxu0 %v13096_v31  ;;  %v13135_v36 = vld [vmem:[#allocation3 + $0x78c] ss:$16 sps:$4 sm:$0xff]   ;;  %v13130_v31 = vld [vmem:[#allocation3 + $0x588] ss:$16 sps:$4 sm:$0xff]  }
 0x81c   :  { %9129 = vmatprep.subr.bf16.mxu1 %v13099_v30  ;;  %v13133_v30 = vld [vmem:[#allocation3 + $0x788] ss:$16 sps:$4 sm:$0xff]  }
 0x81e   :  { %9089 = vmatpush1.bf16.msra.mxu0 %v13094_v42  ;;  %v13138_v42 = vld [vmem:[#allocation3 + $0x56c] ss:$16 sps:$4 sm:$0xff]  }
 0x81f   :  { %9130 = vmatpush1.bf16.msra.mxu1 %v13097_v33  ;;  %9090 = vmatprep.subr.bf16.mxu0 %v13102_v20  ;;  %v13141_v33 = vld [vmem:[#allocation3 + $0x76c] ss:$16 sps:$4 sm:$0xff]   ;;  %v13136_v20 = vld [vmem:[#allocation3 + $0x568] ss:$16 sps:$4 sm:$0xff]  }
 0x820   :  { %9131 = vmatprep.subr.bf16.mxu1 %v13105_v50  ;;  %v13139_v50 = vld [vmem:[#allocation3 + $0x768] ss:$16 sps:$4 sm:$0xff]  }
 0x822   :  { %9091 = vmatpush1.bf16.msra.mxu0 %v13100_v40  ;;  %v13144_v40 = vld [vmem:[#allocation3 + $0x54c] ss:$16 sps:$4 sm:$0xff]  }
 0x823   :  { %9132 = vmatpush1.bf16.msra.mxu1 %v13103_v52  ;;  %9092 = vmatprep.subr.bf16.mxu0 %v13108_v1  ;;  %v13147_v52 = vld [vmem:[#allocation3 + $0x74c] ss:$16 sps:$4 sm:$0xff]   ;;  %v13142_v1 = vld [vmem:[#allocation3 + $0x548] ss:$16 sps:$4 sm:$0xff]  }
 0x824   :  { %9133 = vmatprep.subr.bf16.mxu1 %v13111_v55  ;;  %v13145_v55 = vld [vmem:[#allocation3 + $0x748] ss:$16 sps:$4 sm:$0xff]  }
 0x826   :  { %9093 = vmatpush1.bf16.msra.mxu0 %v13106_v60  ;;  %v13150_v60 = vld [vmem:[#allocation3 + $0x52c] ss:$16 sps:$4 sm:$0xff]  }
 0x827   :  { %9134 = vmatpush1.bf16.msra.mxu1 %v13109_v28  ;;  %9094 = vmatprep.subr.bf16.mxu0 %v13114_v25  ;;  %v13153_v28 = vld [vmem:[#allocation3 + $0x72c] ss:$16 sps:$4 sm:$0xff]   ;;  %v13148_v25 = vld [vmem:[#allocation3 + $0x528] ss:$16 sps:$4 sm:$0xff]  }
 0x828   :  { %9135 = vmatprep.subr.bf16.mxu1 %v13117_v47  ;;  %v13151_v47 = vld [vmem:[#allocation3 + $0x728] ss:$16 sps:$4 sm:$0xff]  }
 0x82a   :  { %9095 = vmatpush2.bf16.msra.mxu0 %v13112_v37  ;;  %v13156_v37 = vld [vmem:[#allocation3 + $0x50c] ss:$16 sps:$4 sm:$0xff]  }
 0x82b   :  { %9136 = vmatpush2.bf16.msra.mxu1 %v13115_v12  ;;  %9096 = vmatprep.subr.bf16.mxu0 %v13120_v17  ;;  %v13159_v12 = vld [vmem:[#allocation3 + $0x70c] ss:$16 sps:$4 sm:$0xff]   ;;  %v13154_v17 = vld [vmem:[#allocation3 + $0x508] ss:$16 sps:$4 sm:$0xff]  }
 0x82c   :  { %9137 = vmatprep.subr.bf16.mxu1 %v13123_v53  ;;  %v13157_v53 = vld [vmem:[#allocation3 + $0x708] ss:$16 sps:$4 sm:$0xff]  }
 0x82e   :  { %9097 = vmatpush2.bf16.msra.mxu0 %v13118_v54  ;;  %v11251_v54 = vcombine.high %v16256_v63, %v16260_v21 }
 0x82f   :  { %9138 = vmatpush2.bf16.msra.mxu1 %v13121_v4  ;;  %9098 = vmatprep.subr.bf16.mxu0 %v13126_v35  ;;  %v11315_v4 = vcombine.high %v16384_v14, %v16388_v62  ;;  %v11250_v35 = vcombine.low %v16256_v63, %v16260_v21  ;;  %v11246_v63 = vcombine.low %v16248_v56, %v16252_v29 }
 0x830   :  { %9139 = vmatprep.subr.bf16.mxu1 %v13129_v11  ;;  %v11314_v11 = vcombine.low %v16384_v14, %v16388_v62  ;;  %v11310_v14 = vcombine.low %v16376_v5, %v16380_v57  ;;  %v11243_v21 = vcombine.high %v16240_v38, %v16244_v34  ;;  %v11307_v62 = vcombine.high %v16368_v23, %v16372_v2 }
 0x832   :  { %9099 = vmatpush2.bf16.msra.mxu0 %v13124_v27  ;;  %v11247_v27 = vcombine.high %v16248_v56, %v16252_v29  ;;  %v11242_v56 = vcombine.low %v16240_v38, %v16244_v34  ;;  %v11239_v29 = vcombine.high %v16232_v8, %v16236_v59  ;;  %v11234_v38 = vcombine.low %v16224_v6, %v16228_v46 }
 0x833   :  { %9140 = vmatpush2.bf16.msra.mxu1 %v13127_v15  ;;  %9100 = vmatprep.subr.bf16.mxu0 %v13132_v41  ;;  %v11311_v15 = vcombine.high %v16376_v5, %v16380_v57  ;;  %v11306_v5 = vcombine.low %v16368_v23, %v16372_v2  ;;  %v11303_v57 = vcombine.high %v16360_v18, %v16364_v61 }
 0x834   :  { %9141 = vmatprep.subr.bf16.mxu1 %v13135_v36  ;;  %v11235_v2 = vcombine.high %v16224_v6, %v16228_v46  ;;  %v11299_v23 = vcombine.high %v16352_v58, %v16356_v3  ;;  %v11298_v34 = vcombine.low %v16352_v58, %v16356_v3  ;;  %v11227_v6 = vcombine.high %v16208_v48, %v16212_v13 }
 0x835   :  { %v11291_v46 = vcombine.high %v16336_v32, %v16340_v49  ;;  %v11226_v58 = vcombine.low %v16208_v48, %v16212_v13  ;;  %v11290_v3 = vcombine.low %v16336_v32, %v16340_v49  ;;  %v17821_v48 = vld [vmem:[#allocation129_spill] sm:$0xff]  ;;  %v17822_v32 = vld [vmem:[#allocation135_spill] sm:$0xff] }
 0x836   :  { %9101 = vmatpush2.bf16.msra.mxu0 %v13130_v31  ;;  %v11283_v13 = vcombine.high %v17821_v48, %v16324_v45  ;;  %v17823_v49 = vld [vmem:[#allocation133_spill] sm:$0xff]  ;;  %v11282_v36 = vcombine.low %v17821_v48, %v16324_v45  ;;  %v17828_v45 = vld [vmem:[#allocation72_spill] sm:$0xff] }
 0x837   :  { %9142 = vmatpush2.bf16.msra.mxu1 %v13133_v30  ;;  %9102 = vmatprep.subr.bf16.mxu0 %v13138_v42  ;;  %v11347_v41 = vcombine.high %v17823_v49, %v17822_v32  ;;  %v11346_v31 = vcombine.low %v17823_v49, %v17822_v32  ;;  %v17827_v30 = vld [vmem:[#allocation47_spill] sm:$0xff]  ;;  %v17852_v32 = vld [vmem:[#allocation126_spill] sm:$0xff] }
 0x838   :  { %9143 = vmatprep.subr.bf16.mxu1 %v13141_v33  ;;  %v17853_v49 = vld [vmem:[#allocation118_spill] sm:$0xff] }
 0x83a   :  { %9103 = vmatpush2.bf16.msra.mxu0 %v13136_v20 }
 0x83b   :  { %9144 = vmatpush2.bf16.msra.mxu1 %v13139_v50  ;;  %9104 = vmatprep.subr.bf16.mxu0 %v13144_v40  ;;  %v17829_v50 = vld [vmem:[#allocation61_spill] sm:$0xff] }
 0x83c   :  { %9145 = vmatprep.subr.bf16.mxu1 %v13147_v52  ;;  %v11275_v40 = vcombine.high %v17829_v50, %v17828_v45  ;;  %v17830_v52 = vld [vmem:[#allocation102_spill] sm:$0xff] }
 0x83e   :  { %9105 = vmatpush2.bf16.msra.mxu0 %v13142_v1  ;;  %v17831_v1 = vld [vmem:[#allocation42_spill] sm:$0xff] }
 0x83f   :  { %9146 = vmatpush2.bf16.msra.mxu1 %v13145_v55  ;;  %9106 = vmatprep.subr.bf16.mxu0 %v13150_v60  ;;  %v11339_v55 = vcombine.high %v17831_v1, %v17830_v52  ;;  %v11274_v60 = vcombine.low %v17829_v50, %v17828_v45  ;;  %v17860_v50 = vld [vmem:[#allocation120_spill] sm:$0xff] }
 0x840   :  { %9147 = vmatprep.subr.bf16.mxu1 %v13153_v28  ;;  %v11338_v28 = vcombine.low %v17831_v1, %v17830_v52 }
 0x842   :  { %9107 = vmatpush2.bf16.msra.mxu0 %v13148_v25  ;;  %v17832_v25 = vld [vmem:[#allocation65_spill] sm:$0xff] }
 0x843   :  { %9148 = vmatpush2.bf16.msra.mxu1 %v13151_v47  ;;  %9108 = vmatprep.subr.bf16.mxu0 %v13156_v37  ;;  %v17833_v47 = vld [vmem:[#allocation56_spill] sm:$0xff] }
 0x844   :  { %9149 = vmatprep.subr.bf16.mxu1 %v13159_v12  ;;  %v11271_v37 = vcombine.high %v17833_v47, %v17832_v25  ;;  %v17834_v12 = vld [vmem:[#allocation44_spill] sm:$0xff] }
 0x846   :  { %9109 = vmatpush2.bf16.msra.mxu0 %v13154_v17  ;;  %v17835_v17 = vld [vmem:[#allocation43_spill] sm:$0xff] }
 0x847   :  { %9150 = vmatpush2.bf16.msra.mxu1 %v13157_v53  ;;  %9800 = vmatprep.subr.bf16.mxu0 %v11251_v54  ;;  %v11335_v53 = vcombine.high %v17835_v17, %v17834_v12  ;;  %v11270_v54 = vcombine.low %v17833_v47, %v17832_v25  ;;  %v17864_v25 = vld [vmem:[#allocation38_spill] sm:$0xff]  ;;  %v17865_v47 = vld [vmem:[#allocation39_spill] sm:$0xff] }
 0x848   :  { %9841 = vmatprep.subr.bf16.mxu1 %v11315_v4  ;;  %v11334_v4 = vcombine.low %v17835_v17, %v17834_v12  ;;  %v11308_v17 = vcombine.low %v17865_v47, %v17864_v25 }
 0x849   :  { %9111 = vmatmul.mubr.bf16.vlgmr.msra.gmra.mxu0 %v16509_v26  ;;  %v11238_v26 = vcombine.low %v16232_v8, %v16236_v59  ;;  %v11231_v8 = vcombine.high %v16216_v43, %v16220_v24  ;;  %v11295_v59 = vcombine.high %v16344_v7, %v16348_v22 }
 0x84a   :  { %9152 = vmatmul.mubr.bf16.vlgmr.msra.gmra.mxu1 %v16514_v0  ;;  %9801 = vmatpush1.bf16.msra.mxu0 %v11250_v35  ;;  %v11302_v0 = vcombine.low %v16360_v18, %v16364_v61  ;;  %v11230_v18 = vcombine.low %v16216_v43, %v16220_v24  ;;  %v11294_v61 = vcombine.low %v16344_v7, %v16348_v22  ;;  %v17836_v35 = vld [vmem:[#allocation66_spill] sm:$0xff] }
 0x84b   :  { %9842 = vmatpush1.bf16.msra.mxu1 %v11314_v11  ;;  %9802 = vmatprep.subr.bf16.mxu0 %v11247_v27  ;;  %v11223_v43 = vcombine.high %v16200_v51, %v16204_v9  ;;  %v11287_v24 = vcombine.high %v16328_v39, %v16332_v19  ;;  %v11222_v7 = vcombine.low %v16200_v51, %v16204_v9  ;;  %v17824_v51 = vld [vmem:[#allocation113_spill] sm:$0xff]  ;;  %v17825_v9 = vld [vmem:[#allocation99_spill] sm:$0xff]  ;;  %v17837_v11 = vld [vmem:[#allocation68_spill] sm:$0xff] }
 0x84c   :  { %9843 = vmatprep.subr.bf16.mxu1 %v11311_v15  ;;  %9832 = vmatprep.mubr.bf16.mxu0 %v16194_v10  ;;  %v11286_v22 = vcombine.low %v16328_v39, %v16332_v19  ;;  %v11279_v39 = vcombine.high %v17825_v9, %v17824_v51  ;;  %v17826_v19 = vld [vmem:[#allocation131_spill] sm:$0xff]  ;;  %v11278_v33 = vcombine.low %v17825_v9, %v17824_v51  ;;  %v17838_v15 = vld [vmem:[#allocation116_spill] sm:$0xff] }
 0x84d   :  { %9873 = vmatprep.mubr.bf16.mxu1 %v16198_v44  ;;  %v11343_v42 = vcombine.high %v17827_v30, %v17826_v19  ;;  %v11342_v20 = vcombine.low %v17827_v30, %v17826_v19  ;;  %v11267_v27 = vcombine.high %v17837_v11, %v17836_v35  ;;  %v11252_v9 = vcombine.low %v17853_v49, %v17852_v32  ;;  %v17856_v19 = vld [vmem:[#allocation124_spill] sm:$0xff]  ;;  %v17857_v30 = vld [vmem:[#allocation127_spill] sm:$0xff] }
 0x84e   :  { %9803 = vmatpush1.bf16.msra.mxu0 %v11246_v63  ;;  %v17839_v63 = vld [vmem:[#allocation115_spill] sm:$0xff]  ;;  %v11248_v52 = vcombine.low %v17857_v30, %v17856_v19 }
 0x84f   :  { %9844 = vmatpush1.bf16.msra.mxu1 %v11310_v14  ;;  %9804 = vmatprep.subr.bf16.mxu0 %v11243_v21  ;;  %v11331_v14 = vcombine.high %v17839_v63, %v17838_v15  ;;  %v11266_v21 = vcombine.low %v17837_v11, %v17836_v35  ;;  %v17868_v35 = vld [vmem:[#allocation109_spill] sm:$0xff]  ;;  %v17869_v11 = vld [vmem:[#allocation40_spill] sm:$0xff] }
 0x850   :  { %9845 = vmatprep.subr.bf16.mxu1 %v11307_v62  ;;  %v11330_v62 = vcombine.low %v17839_v63, %v17838_v15  ;;  %v17870_v15 = vld [vmem:[#allocation119_spill] sm:$0xff]  ;;  %v17871_v63 = vld [vmem:[#allocation108_spill] sm:$0xff] }
 0x852   :  { %9805 = vmatpush1.bf16.msra.mxu0 %v11242_v56  ;;  %v17840_v56 = vld [vmem:[#allocation55_spill] sm:$0xff] }
 0x853   :  { %9846 = vmatpush1.bf16.msra.mxu1 %v11306_v5  ;;  %9806 = vmatprep.subr.bf16.mxu0 %v11239_v29  ;;  %v17841_v5 = vld [vmem:[#allocation128_spill] sm:$0xff] }
 0x854   :  { %9847 = vmatprep.subr.bf16.mxu1 %v11303_v57  ;;  %v11263_v29 = vcombine.high %v17841_v5, %v17840_v56  ;;  %v17842_v57 = vld [vmem:[#allocation52_spill] sm:$0xff] }
 0x856   :  { %9807 = vmatpush1.bf16.msra.mxu0 %v11238_v26  ;;  %v17843_v26 = vld [vmem:[#allocation88_spill] sm:$0xff] }
 0x857   :  { %9848 = vmatpush1.bf16.msra.mxu1 %v11302_v0  ;;  %9808 = vmatprep.subr.bf16.mxu0 %v11235_v2  ;;  %v11327_v0 = vcombine.high %v17843_v26, %v17842_v57  ;;  %v11262_v2 = vcombine.low %v17841_v5, %v17840_v56  ;;  %v11236_v5 = vcombine.low %v17871_v63, %v17870_v15 }
 0x858   :  { %9849 = vmatprep.subr.bf16.mxu1 %v11299_v23  ;;  %v11326_v23 = vcombine.low %v17843_v26, %v17842_v57  ;;  %v17874_v57 = vld [vmem:[#allocation106_spill] sm:$0xff]  ;;  %v17875_v26 = vld [vmem:[#allocation80_spill] sm:$0xff] }
 0x85a   :  { %9809 = vmatpush1.bf16.msra.mxu0 %v11234_v38  ;;  %v17844_v38 = vld [vmem:[#allocation63_spill] sm:$0xff] }
 0x85b   :  { %9850 = vmatpush1.bf16.msra.mxu1 %v11298_v34  ;;  %9810 = vmatprep.subr.bf16.mxu0 %v11231_v8  ;;  %v17845_v34 = vld [vmem:[#allocation86_spill] sm:$0xff] }
 0x85c   :  { %9851 = vmatprep.subr.bf16.mxu1 %v11295_v59  ;;  %v11259_v8 = vcombine.high %v17845_v34, %v17844_v38  ;;  %v17846_v59 = vld [vmem:[#allocation87_spill] sm:$0xff] }
 0x85e   :  { %9811 = vmatpush1.bf16.msra.mxu0 %v11230_v18  ;;  %v17847_v18 = vld [vmem:[#allocation112_spill] sm:$0xff] }
 0x85f   :  { %9852 = vmatpush1.bf16.msra.mxu1 %v11294_v61  ;;  %9812 = vmatprep.subr.bf16.mxu0 %v11227_v6  ;;  %v11323_v61 = vcombine.high %v17847_v18, %v17846_v59  ;;  %v11258_v6 = vcombine.low %v17845_v34, %v17844_v38  ;;  %v11232_v34 = vcombine.low %v17875_v26, %v17874_v57 }
 0x860   :  { %9853 = vmatprep.subr.bf16.mxu1 %v11291_v46  ;;  %v11322_v46 = vcombine.low %v17847_v18, %v17846_v59  ;;  %v17878_v59 = vld [vmem:[#allocation96_spill] sm:$0xff]  ;;  %v17879_v18 = vld [vmem:[#allocation93_spill] sm:$0xff] }
 0x862   :  { %9813 = vmatpush1.bf16.msra.mxu0 %v11226_v58  ;;  %v17848_v58 = vld [vmem:[#allocation101_spill] sm:$0xff] }
 0x863   :  { %9854 = vmatpush1.bf16.msra.mxu1 %v11290_v3  ;;  %9814 = vmatprep.subr.bf16.mxu0 %v11223_v43  ;;  %v17849_v3 = vld [vmem:[#allocation95_spill] sm:$0xff] }
 0x864   :  { %9855 = vmatprep.subr.bf16.mxu1 %v11287_v24  ;;  %v11255_v43 = vcombine.high %v17849_v3, %v17848_v58  ;;  %v17850_v24 = vld [vmem:[#allocation59_spill] sm:$0xff]  ;;  %v11254_v48 = vcombine.low %v17849_v3, %v17848_v58  ;;  %v11228_v3 = vcombine.low %v17879_v18, %v17878_v59 }
 0x866   :  { %9815 = vmatpush1.bf16.msra.mxu0 %v11222_v7  ;;  %v17851_v7 = vld [vmem:[#allocation77_spill] sm:$0xff] }
 0x867   :  { %9856 = vmatpush1.bf16.msra.mxu1 %v11286_v22  ;;  %9816 = vmatprep.subr.bf16.mxu0 %v11283_v13  ;;  %v11319_v22 = vcombine.high %v17851_v7, %v17850_v24  ;;  %v11318_v13 = vcombine.low %v17851_v7, %v17850_v24  ;;  %v17882_v24 = vld [vmem:[#allocation71_spill] sm:$0xff]  ;;  %v17883_v7 = vld [vmem:[#allocation117_spill] sm:$0xff] }
 0x868   :  { %9857 = vmatprep.subr.bf16.mxu1 %v11347_v41  ;;  %v11253_v41 = vcombine.high %v17853_v49, %v17852_v32  ;;  %v11224_v49 = vcombine.low %v17883_v7, %v17882_v24 }
 0x86a   :  { %9817 = vmatpush2.bf16.msra.mxu0 %v11282_v36  ;;  %v17854_v36 = vld [vmem:[#allocation85_spill] sm:$0xff] }
 0x86b   :  { %9858 = vmatpush2.bf16.msra.mxu1 %v11346_v31  ;;  %9818 = vmatprep.subr.bf16.mxu0 %v11279_v39  ;;  %v17855_v31 = vld [vmem:[#allocation110_spill] sm:$0xff] }
 0x86c   :  { %9859 = vmatprep.subr.bf16.mxu1 %v11343_v42  ;;  %v11317_v51 = vcombine.high %v17855_v31, %v17854_v36  ;;  %v11316_v39 = vcombine.low %v17855_v31, %v17854_v36  ;;  %v11249_v42 = vcombine.high %v17857_v30, %v17856_v19  ;;  %v17886_v36 = vld [vmem:[#allocation90_spill] sm:$0xff]  ;;  %v17887_v31 = vld [vmem:[#allocation100_spill] sm:$0xff] }
 0x86d   :  { %v11284_v30 = vcombine.low %v17887_v31, %v17886_v36 }
 0x86e   :  { %9819 = vmatpush2.bf16.msra.mxu0 %v11278_v33  ;;  %v17858_v33 = vld [vmem:[#allocation76_spill] sm:$0xff] }
 0x86f   :  { %9860 = vmatpush2.bf16.msra.mxu1 %v11342_v20  ;;  %9820 = vmatprep.subr.bf16.mxu0 %v11275_v40  ;;  %v17859_v20 = vld [vmem:[#allocation54_spill] sm:$0xff] }
 0x870   :  { %9861 = vmatprep.subr.bf16.mxu1 %v11339_v55  ;;  %v11313_v45 = vcombine.high %v17859_v20, %v17858_v33  ;;  %v17861_v40 = vld [vmem:[#allocation94_spill] sm:$0xff]  ;;  %v11312_v1 = vcombine.low %v17859_v20, %v17858_v33  ;;  %v17862_v55 = vld [vmem:[#allocation123_spill] sm:$0xff] }
 0x871   :  { %v17890_v33 = vld [vmem:[#allocation62_spill] sm:$0xff]  ;;  %v17891_v20 = vld [vmem:[#allocation79_spill] sm:$0xff] }
 0x872   :  { %9821 = vmatpush2.bf16.msra.mxu0 %v11274_v60  ;;  %v17863_v60 = vld [vmem:[#allocation114_spill] sm:$0xff] }
 0x873   :  { %9862 = vmatpush2.bf16.msra.mxu1 %v11338_v28  ;;  %9822 = vmatprep.subr.bf16.mxu0 %v11271_v37  ;;  %v11245_v28 = vcombine.high %v17863_v60, %v17862_v55  ;;  %v11309_v37 = vcombine.high %v17865_v47, %v17864_v25  ;;  %v11244_v12 = vcombine.low %v17863_v60, %v17862_v55  ;;  %v17894_v25 = vld [vmem:[#allocation69_spill] sm:$0xff] }
 0x874   :  { %9863 = vmatprep.subr.bf16.mxu1 %v11335_v53  ;;  %v17866_v53 = vld [vmem:[#allocation92_spill] sm:$0xff]  ;;  %v11280_v60 = vcombine.low %v17891_v20, %v17890_v33  ;;  %v17895_v47 = vld [vmem:[#allocation105_spill] sm:$0xff] }
 0x876   :  { %9823 = vmatpush2.bf16.msra.mxu0 %v11270_v54  ;;  %v17867_v54 = vld [vmem:[#allocation121_spill] sm:$0xff] }
 0x877   :  { %9864 = vmatpush2.bf16.msra.mxu1 %v11334_v4  ;;  %9824 = vmatprep.subr.bf16.mxu0 %v11267_v27  ;;  %v11241_v4 = vcombine.high %v17867_v54, %v17866_v53  ;;  %v11305_v27 = vcombine.high %v17869_v11, %v17868_v35 }
 0x878   :  { %9865 = vmatprep.subr.bf16.mxu1 %v11331_v14  ;;  %v11237_v14 = vcombine.high %v17871_v63, %v17870_v15 }
 0x87a   :  { %9825 = vmatpush2.bf16.msra.mxu0 %v11266_v21  ;;  %v17872_v21 = vld [vmem:[#allocation75_spill] sm:$0xff] }
 0x87b   :  { %9866 = vmatpush2.bf16.msra.mxu1 %v11330_v62  ;;  %9826 = vmatprep.subr.bf16.mxu0 %v11263_v29  ;;  %v17873_v62 = vld [vmem:[#allocation111_spill] sm:$0xff] }
 0x87c   :  { %9867 = vmatprep.subr.bf16.mxu1 %v11327_v0  ;;  %v11301_v56 = vcombine.high %v17873_v62, %v17872_v21  ;;  %v11300_v29 = vcombine.low %v17873_v62, %v17872_v21  ;;  %v11233_v0 = vcombine.high %v17875_v26, %v17874_v57  ;;  %v17902_v21 = vld [vmem:[#allocation64_spill] sm:$0xff]  ;;  %v17903_v62 = vld [vmem:[#allocation67_spill] sm:$0xff] }
 0x87d   :  { %v11268_v26 = vcombine.low %v17903_v62, %v17902_v21 }
 0x87e   :  { %9827 = vmatpush2.bf16.msra.mxu0 %v11262_v2  ;;  %v17876_v2 = vld [vmem:[#allocation97_spill] sm:$0xff] }
 0x87f   :  { %9868 = vmatpush2.bf16.msra.mxu1 %v11326_v23  ;;  %9828 = vmatprep.subr.bf16.mxu0 %v11259_v8  ;;  %v17877_v23 = vld [vmem:[#allocation74_spill] sm:$0xff] }
 0x880   :  { %9869 = vmatprep.subr.bf16.mxu1 %v11323_v61  ;;  %v11297_v38 = vcombine.high %v17877_v23, %v17876_v2  ;;  %v11296_v8 = vcombine.low %v17877_v23, %v17876_v2  ;;  %v11229_v61 = vcombine.high %v17879_v18, %v17878_v59  ;;  %v17906_v2 = vld [vmem:[#allocation70_spill] sm:$0xff] }
 0x881   :  { %v17907_v23 = vld [vmem:[#allocation122_spill] sm:$0xff] }
 0x882   :  { %9829 = vmatpush2.bf16.msra.mxu0 %v11258_v6  ;;  %v17880_v6 = vld [vmem:[#allocation81_spill] sm:$0xff]  ;;  %v11264_v18 = vcombine.low %v17907_v23, %v17906_v2 }
 0x883   :  { %9870 = vmatpush2.bf16.msra.mxu1 %v11322_v46  ;;  %9830 = vmatprep.subr.bf16.mxu0 %v11255_v43  ;;  %v17881_v46 = vld [vmem:[#allocation107_spill] sm:$0xff] }
 0x884   :  { %9871 = vmatprep.subr.bf16.mxu1 %v11319_v22  ;;  %v11293_v58 = vcombine.high %v17881_v46, %v17880_v6  ;;  %v11292_v43 = vcombine.low %v17881_v46, %v17880_v6  ;;  %v11225_v22 = vcombine.high %v17883_v7, %v17882_v24  ;;  %v17910_v6 = vld [vmem:[#allocation73_spill] sm:$0xff]  ;;  %v17911_v46 = vld [vmem:[#allocation60_spill] sm:$0xff] }
 0x885   :  { %v11260_v7 = vcombine.low %v17911_v46, %v17910_v6 }
 0x886   :  { %9831 = vmatpush2.bf16.msra.mxu0 %v11254_v48  ;;  %v17884_v48 = vld [vmem:[#allocation98_spill] sm:$0xff] }
 0x887   :  { %9872 = vmatpush2.bf16.msra.mxu1 %v11318_v13  ;;  %9882 = vmatprep.subr.bf16.mxu0 %v11253_v41  ;;  %v17885_v13 = vld [vmem:[#allocation84_spill] sm:$0xff] }
 0x888   :  { %9923 = vmatprep.subr.bf16.mxu1 %v11317_v51  ;;  %v11289_v32 = vcombine.high %v17885_v13, %v17884_v48  ;;  %v11288_v41 = vcombine.low %v17885_v13, %v17884_v48  ;;  %v11285_v51 = vcombine.high %v17887_v31, %v17886_v36  ;;  %v17914_v48 = vld [vmem:[#allocation58_spill] sm:$0xff] }
 0x889   :  { %9833 = vmatmul.mubr.bf16.vlgmr.msra.gmra.mxu0 %v17860_v50  ;;  %v17915_v13 = vld [vmem:[#allocation82_spill] sm:$0xff] }
 0x88a   :  { %9874 = vmatmul.mubr.bf16.vlgmr.msra.gmra.mxu1 %v17861_v40  ;;  %9883 = vmatpush1.bf16.msra.mxu0 %v11252_v9  ;;  %v17888_v9 = vld [vmem:[#allocation136_spill] sm:$0xff]  ;;  %v11256_v31 = vcombine.low %v17915_v13, %v17914_v48 }
 0x88b   :  { %9924 = vmatpush1.bf16.msra.mxu1 %v11316_v39  ;;  %9884 = vmatprep.subr.bf16.mxu0 %v11249_v42  ;;  %v17889_v39 = vld [vmem:[#allocation134_spill] sm:$0xff] }
 0x88c   :  { %9925 = vmatprep.subr.bf16.mxu1 %v11313_v45  ;;  %9914 = vmatprep.mubr.bf16.mxu0 %v16194_v10  ;;  %v11240_v10 = vcombine.low %v17867_v54, %v17866_v53  ;;  %v11349_v19 = vcombine.high %v17889_v39, %v17888_v9  ;;  %v11348_v42 = vcombine.low %v17889_v39, %v17888_v9  ;;  %v13160_v9 = vld [vmem:[%s16902_s7 + $0x78] sm:$0xff]  }
 0x88d   :  { %9955 = vmatprep.mubr.bf16.mxu1 %v16198_v44  ;;  %v11304_v44 = vcombine.low %v17869_v11, %v17868_v35  ;;  %v11281_v45 = vcombine.high %v17891_v20, %v17890_v33  ;;  %v11276_v54 = vcombine.low %v17895_v47, %v17894_v25  ;;  %v17898_v35 = vld [vmem:[#allocation57_spill] sm:$0xff]  ;;  %v17899_v11 = vld [vmem:[#allocation104_spill] sm:$0xff] }
 0x88e   :  { %9885 = vmatpush1.bf16.msra.mxu0 %v11248_v52  ;;  %v17892_v52 = vld [vmem:[#allocation132_spill] sm:$0xff]  ;;  %v11272_v63 = vcombine.low %v17899_v11, %v17898_v35  ;;  %v13161_v39 = vld [vmem:[%s16902_s7 + $0x38] sm:$0xff]  }
 0x88f   :  { %9926 = vmatpush1.bf16.msra.mxu1 %v11312_v1  ;;  %9886 = vmatprep.subr.bf16.mxu0 %v11245_v28  ;;  %v17893_v1 = vld [vmem:[#allocation130_spill] sm:$0xff]  ;;  %v13163_v20 = vld [vmem:[%s16902_s7 + $0x30] sm:$0xff]  }
 0x890   :  { %9927 = vmatprep.subr.bf16.mxu1 %v11309_v37  ;;  %v11345_v55 = vcombine.high %v17893_v1, %v17892_v52  ;;  %v11344_v28 = vcombine.low %v17893_v1, %v17892_v52  ;;  %v11277_v37 = vcombine.high %v17895_v47, %v17894_v25  ;;  %v13164_v1 = vld [vmem:[%s16902_s7 + $0x68] sm:$0xff]   ;;  %v13166_v47 = vld [vmem:[%s16902_s7 + $0x60] sm:$0xff]  }
 0x892   :  { %9887 = vmatpush1.bf16.msra.mxu0 %v11244_v12  ;;  %v17896_v12 = vld [vmem:[#allocation45_spill] sm:$0xff] }
 0x893   :  { %9928 = vmatpush1.bf16.msra.mxu1 %v11308_v17  ;;  %9888 = vmatprep.subr.bf16.mxu0 %v11241_v4  ;;  %v17897_v17 = vld [vmem:[#allocation78_spill] sm:$0xff] }
 0x894   :  { %9929 = vmatprep.subr.bf16.mxu1 %v11305_v27  ;;  %v11341_v53 = vcombine.high %v17897_v17, %v17896_v12  ;;  %v11340_v4 = vcombine.low %v17897_v17, %v17896_v12  ;;  %v11273_v27 = vcombine.high %v17899_v11, %v17898_v35  ;;  %v13168_v12 = vld [vmem:[%s16902_s7 + $0x58] sm:$0xff]   ;;  %v13178_v35 = vld [vmem:[%s16902_s7 + $0xf0] sm:$0xff]  }
 0x895   :  { %v13169_v17 = vld [vmem:[%s16902_s7 + $0x18] sm:$0xff]   ;;  %v13171_v11 = vld [vmem:[%s16902_s7 + $0x10] sm:$0xff]  }
 0x896   :  { %9889 = vmatpush1.bf16.msra.mxu0 %v11240_v10  ;;  %v17900_v10 = vld [vmem:[#allocation41_spill] sm:$0xff] }
 0x897   :  { %9930 = vmatpush1.bf16.msra.mxu1 %v11304_v44  ;;  %9890 = vmatprep.subr.bf16.mxu0 %v11237_v14  ;;  %v17901_v44 = vld [vmem:[#allocation103_spill] sm:$0xff] }
 0x898   :  { %9931 = vmatprep.subr.bf16.mxu1 %v11301_v56  ;;  %v11337_v15 = vcombine.high %v17901_v44, %v17900_v10  ;;  %v11336_v14 = vcombine.low %v17901_v44, %v17900_v10  ;;  %v11269_v56 = vcombine.high %v17903_v62, %v17902_v21  ;;  %v13172_v10 = vld [vmem:[%s16902_s7 + $0x48] sm:$0xff]   ;;  %v13182_v21 = vld [vmem:[%s16902_s7 + $0xe0] sm:$0xff]  }
 0x899   :  { %v13180_v44 = vld [vmem:[%s16902_s7 + $0xe8] sm:$0xff]   ;;  %v13175_v62 = vld [vmem:[%s16902_s7] sm:$0xff]  }
 0x89a   :  { %9891 = vmatpush1.bf16.msra.mxu0 %v11236_v5  ;;  %v17904_v5 = vld [vmem:[#allocation83_spill] sm:$0xff] }
 0x89b   :  { %9932 = vmatpush1.bf16.msra.mxu1 %v11300_v29  ;;  %9892 = vmatprep.subr.bf16.mxu0 %v11233_v0  ;;  %v17905_v29 = vld [vmem:[#allocation125_spill] sm:$0xff] }
 0x89c   :  { %9933 = vmatprep.subr.bf16.mxu1 %v11297_v38  ;;  %v11333_v57 = vcombine.high %v17905_v29, %v17904_v5  ;;  %v11332_v0 = vcombine.low %v17905_v29, %v17904_v5  ;;  %v11265_v38 = vcombine.high %v17907_v23, %v17906_v2  ;;  %v13184_v5 = vld [vmem:[%s16902_s7 + $0xd8] sm:$0xff]   ;;  %v13187_v23 = vld [vmem:[%s16902_s7 + $0x90] sm:$0xff]  }
 0x89d   :  { %v13185_v29 = vld [vmem:[%s16902_s7 + $0x98] sm:$0xff]  }
 0x89e   :  { %9893 = vmatpush1.bf16.msra.mxu0 %v11232_v34  ;;  %v17908_v34 = vld [vmem:[#allocation51_spill] sm:$0xff] }
 0x89f   :  { %9934 = vmatpush1.bf16.msra.mxu1 %v11296_v8  ;;  %9894 = vmatprep.subr.bf16.mxu0 %v11229_v61  ;;  %v17909_v8 = vld [vmem:[#allocation89_spill] sm:$0xff] }
 0x8a0   :  { %9935 = vmatprep.subr.bf16.mxu1 %v11293_v58  ;;  %v11329_v59 = vcombine.high %v17909_v8, %v17908_v34  ;;  %v11328_v61 = vcombine.low %v17909_v8, %v17908_v34  ;;  %v11261_v58 = vcombine.high %v17911_v46, %v17910_v6  ;;  %v13189_v6 = vld [vmem:[%s16902_s7 + $0x88] sm:$0xff]  }
 0x8a2   :  { %9895 = vmatpush1.bf16.msra.mxu0 %v11228_v3  ;;  %v17912_v3 = vld [vmem:[#allocation50_spill] sm:$0xff] }
 0x8a3   :  { %9936 = vmatpush1.bf16.msra.mxu1 %v11292_v43  ;;  %9896 = vmatprep.subr.bf16.mxu0 %v11225_v22  ;;  %v17913_v43 = vld [vmem:[#allocation53_spill] sm:$0xff] }
 0x8a4   :  { %9937 = vmatprep.subr.bf16.mxu1 %v11289_v32  ;;  %v11325_v24 = vcombine.high %v17913_v43, %v17912_v3  ;;  %v11324_v22 = vcombine.low %v17913_v43, %v17912_v3  ;;  %v11257_v32 = vcombine.high %v17915_v13, %v17914_v48  ;;  %v13190_v3 = vld [vmem:[%s16902_s7 + $0xc0] sm:$0xff]   ;;  %v17918_v13 = vld [vmem:[#allocation48_spill] sm:$0xff] }
 0x8a5   :  { %v13191_v43 = vld [vmem:[%s16902_s7 + $0x80] sm:$0xff]  }
 0x8a6   :  { %9897 = vmatpush1.bf16.msra.mxu0 %v11224_v49  ;;  %v17916_v49 = vld [vmem:[#allocation91_spill] sm:$0xff] }
 0x8a7   :  { %9938 = vmatpush1.bf16.msra.mxu1 %v11288_v41  ;;  %9898 = vmatprep.subr.bf16.mxu0 %v11285_v51  ;;  %v17917_v41 = vld [vmem:[#allocation37_spill] sm:$0xff] }
 0x8a8   :  { %9939 = vmatprep.subr.bf16.mxu1 %v11349_v19  ;;  %v11321_v36 = vcombine.high %v17917_v41, %v17916_v49  ;;  %v11320_v51 = vcombine.low %v17917_v41, %v17916_v49  ;;  %v13162_v19 = vld [vmem:[%s16902_s7 + $0x70] sm:$0xff]  }
 0x8aa   :  { %9899 = vmatpush2.bf16.msra.mxu0 %v11284_v30 }
 0x8ab   :  { %9940 = vmatpush2.bf16.msra.mxu1 %v11348_v42  ;;  %9900 = vmatprep.subr.bf16.mxu0 %v11281_v45 }
 0x8ac   :  { %9941 = vmatprep.subr.bf16.mxu1 %v11345_v55 }
 0x8ae   :  { %9901 = vmatpush2.bf16.msra.mxu0 %v11280_v60 }
 0x8af   :  { %9942 = vmatpush2.bf16.msra.mxu1 %v11344_v28  ;;  %9902 = vmatprep.subr.bf16.mxu0 %v11277_v37  ;;  %v13167_v37 = vld [vmem:[%s16902_s7 + $0x20] sm:$0xff]  }
 0x8b0   :  { %9943 = vmatprep.subr.bf16.mxu1 %v11341_v53  ;;  %v13170_v53 = vld [vmem:[%s16902_s7 + $0x50] sm:$0xff]  }
 0x8b2   :  { %9903 = vmatpush2.bf16.msra.mxu0 %v11276_v54  ;;  %v13176_v54 = vld [vmem:[%s16902_s7 + $0xf8] sm:$0xff]  }
 0x8b3   :  { %9944 = vmatpush2.bf16.msra.mxu1 %v11340_v4  ;;  %9904 = vmatprep.subr.bf16.mxu0 %v11273_v27  ;;  %v13177_v4 = vld [vmem:[%s16902_s7 + $0xb8] sm:$0xff]   ;;  %v13179_v27 = vld [vmem:[%s16902_s7 + $0xb0] sm:$0xff]  }
 0x8b4   :  { %9945 = vmatprep.subr.bf16.mxu1 %v11337_v15  ;;  %v13173_v15 = vld [vmem:[%s16902_s7 + $0x8] sm:$0xff]  }
 0x8b6   :  { %9905 = vmatpush2.bf16.msra.mxu0 %v11272_v63  ;;  %v13181_v63 = vld [vmem:[%s16902_s7 + $0xa8] sm:$0xff]  }
 0x8b7   :  { %9946 = vmatpush2.bf16.msra.mxu1 %v11336_v14  ;;  %9906 = vmatprep.subr.bf16.mxu0 %v11269_v56  ;;  %v13174_v14 = vld [vmem:[%s16902_s7 + $0x40] sm:$0xff]  }
 0x8b8   :  { %9947 = vmatprep.subr.bf16.mxu1 %v11333_v57  ;;  %v13183_v56 = vld [vmem:[%s16902_s7 + $0xa0] sm:$0xff]  }
 0x8ba   :  { %9907 = vmatpush2.bf16.msra.mxu0 %v11268_v26 }
 0x8bb   :  { %9948 = vmatpush2.bf16.msra.mxu1 %v11332_v0  ;;  %9908 = vmatprep.subr.bf16.mxu0 %v11265_v38  ;;  %v13186_v0 = vld [vmem:[%s16902_s7 + $0xd0] sm:$0xff]  }
 0x8bc   :  { %9949 = vmatprep.subr.bf16.mxu1 %v11329_v59 }
 0x8be   :  { %9909 = vmatpush2.bf16.msra.mxu0 %v11264_v18 }
 0x8bf   :  { %9950 = vmatpush2.bf16.msra.mxu1 %v11328_v61  ;;  %9910 = vmatprep.subr.bf16.mxu0 %v11261_v58  ;;  %v13188_v61 = vld [vmem:[%s16902_s7 + $0xc8] sm:$0xff]  }
 0x8c0   :  { %9951 = vmatprep.subr.bf16.mxu1 %v11325_v24  ;;  %v9964_v24 = vld [vmem:[#allocation14] sm:$0xf] }
 0x8c2   :  { %9911 = vmatpush2.bf16.msra.mxu0 %v11260_v7 }
 0x8c3   :  { %9952 = vmatpush2.bf16.msra.mxu1 %v11324_v22  ;;  %9912 = vmatprep.subr.bf16.mxu0 %v11257_v32  ;;  %v9969_v32 = vrot.slane %v9964_v24, %v17918_v13 }
 0x8c4   :  { %9953 = vmatprep.subr.bf16.mxu1 %v11321_v36 }
 0x8c6   :  { %9913 = vmatpush2.bf16.msra.mxu0 %v11256_v31 }
 0x8c7   :  { %9954 = vmatpush2.bf16.msra.mxu1 %v11320_v51  ;;  %11549 = vmatprep.subr.bf16.mxu0 %v13160_v9  ;;  %v17919_v51 = vld [vmem:[#allocation49_spill] sm:$0xff] }
 0x8c8   :  { %11571 = vmatprep.subr.bf16.mxu1 %v13176_v54  ;;  %v9973_v9 = vrot.slane %v9964_v24, %v17919_v51  ;;  %v9981_v54 = vrot.slane %v9964_v24, %v17722_v16 }
 0x8c9   :  { %v9030_v30 = vpop.f32.mrf.mxu0  ;;  %9915 = vmatmul.mubr.bf16.vlgmr.msra.gmra.mxu0 %v17860_v50 }
 0x8ca   :  { %v9071_v42 = vpop.f32.mrf.mxu1  ;;  %9956 = vmatmul.mubr.bf16.vlgmr.msra.gmra.mxu1 %v17861_v40  ;;  %11550 = vmatpush3.bf16.msra.mxu0 %v13161_v39  ;;  %v13165_v40 = vld [vmem:[%s16902_s7 + $0x28] sm:$0xff]   ;;  %s13456_s7 = smov [#allocation17]  }
 0x8cb   :  { %v16795_v33 = vadd.f32 %v9071_v42, %v9030_v30  ;;  %v9032_v45 = vpop.f32.mrf.mxu0  ;;  %11551 = vmatprep.subr.bf16.mxu0 %v13162_v19  ;;  %11572 = vmatpush3.bf16.msra.mxu1 %v13177_v4  ;;  %s10349_s16 = sshll.u32 %s13456_s7, 4  ;;  %s10350_s16 = int_to_ptr.vmem [resolvable:$true] %s10349_s16 }
 0x8cc   :  { %v9073_v52 = vpop.f32.mrf.mxu1  ;;  %11573 = vmatprep.subr.bf16.mxu1 %v13178_v35  ;;  %s13398_s5 = scalar_lea.vmem %s10350_s16, 32  ;;  %p13403_p9 = scmp.lt.s32.totalorder %s10350_s16, %s10350_s16 }
 0x8cd   :  { %v16803_v55 = vadd.f32 %v9073_v52, %v9032_v45  ;;  %v9034_v60 = vpop.f32.mrf.mxu0  ;;  %p13399_p8 = scmp.ne.s32.totalorder %s10350_s16, %s13398_s5  ;;  %p13404_p10 = scmp.lt.s32.totalorder %s13398_s5, %s13398_s5 }
 0x8ce   :  { %v9075_v50 = vpop.f32.mrf.mxu1  ;;  %11552 = vmatpush3.bf16.msra.mxu0 %v13163_v20 }
 0x8cf   :  { %v9035_v28 = vpop.f32.mrf.mxu0  ;;  %11553 = vmatprep.subr.bf16.mxu0 %v13164_v1  ;;  %11574 = vmatpush3.bf16.msra.mxu1 %v13179_v27  ;;  %p13405_p11 = por %p13404_p10, %p13403_p9 }
 0x8d0   :  { %v9076_v25 = vpop.f32.mrf.mxu1  ;;  %11575 = vmatprep.subr.bf16.mxu1 %v13180_v44 }
 0x8d1   :  { %p13406_p12 = pnand %p13405_p11, %p13399_p8 }
 0x8d2   :  { %11554 = vmatpush3.bf16.msra.mxu0 %v13165_v40 }
 0x8d3   :  { %11555 = vmatprep.subr.bf16.mxu0 %v13166_v47  ;;  %11576 = vmatpush3.bf16.msra.mxu1 %v13181_v63  ;;  %v17920_v47 = vld [vmem:[#allocation46_spill] sm:$0xff] }
 0x8d4   :  { %11577 = vmatprep.subr.bf16.mxu1 %v13182_v21 }
 0x8d6   :  { %11556 = vmatpush3.bf16.msra.mxu0 %v13167_v37 }
 0x8d7   :  { %11557 = vmatprep.subr.bf16.mxu0 %v13168_v12  ;;  %11578 = vmatpush3.bf16.msra.mxu1 %v13183_v56 }
 0x8d8   :  { %11579 = vmatprep.subr.bf16.mxu1 %v13184_v5 }
 0x8da   :  { %11558 = vmatpush3.bf16.msra.mxu0 %v13169_v17 }
 0x8db   :  { %11559 = vmatprep.subr.bf16.mxu0 %v13170_v53  ;;  %11580 = vmatpush3.bf16.msra.mxu1 %v13185_v29 }
 0x8dc   :  { %11581 = vmatprep.subr.bf16.mxu1 %v13186_v0  ;;  %v11350_v0 = vld [vmem:[#allocation15] ss:$0 sm:$0xff] }
 0x8de   :  { %11560 = vmatpush3.bf16.msra.mxu0 %v13171_v11 }
 0x8df   :  { %11561 = vmatprep.subr.bf16.mxu0 %v13172_v10  ;;  %11582 = vmatpush3.bf16.msra.mxu1 %v13187_v23 }
 0x8e0   :  { %11583 = vmatprep.subr.bf16.mxu1 %v13188_v61 }
 0x8e2   :  { %11562 = vmatpush3.bf16.msra.mxu0 %v13173_v15 }
 0x8e3   :  { %11563 = vmatprep.subr.bf16.mxu0 %v13174_v14  ;;  %11584 = vmatpush3.bf16.msra.mxu1 %v13189_v6 }
 0x8e4   :  { %11585 = vmatprep.subr.bf16.mxu1 %v13190_v3 }
 0x8e6   :  { %11564 = vmatpush3.bf16.msra.mxu0 %v13175_v62 }
 0x8e7   :  { %11586 = vmatpush3.bf16.msra.mxu1 %v13191_v43 }
 0x909   :  { %v9112_v57 = vpop.f32.mrf.mxu0 }
 0x90a   :  { %v9153_v26 = vpop.f32.mrf.mxu1 }
 0x90b   :  { %v9154_v2 = vadd.f32 %v9153_v26, %v9112_v57  ;;  %v9114_v38 = vpop.f32.mrf.mxu0 }
 0x90c   :  { %v9155_v34 = vpop.f32.mrf.mxu1 }
 0x90d   :  { %v9156_v8 = vadd.f32 %v9155_v34, %v9114_v38  ;;  %v9116_v59 = vpop.f32.mrf.mxu0 }
 0x90e   :  { %v9157_v18 = vpop.f32.mrf.mxu1 }
 0x90f   :  { %v9117_v46 = vpop.f32.mrf.mxu0 }
 0x910   :  { %v9158_v58 = vpop.f32.mrf.mxu1 }
 0x949   :  { %v9834_v7 = vpop.f32.mrf.mxu0 }
 0x94a   :  { %v9875_v22 = vpop.f32.mrf.mxu1  ;;  %v9835_v48 = vadd.f32 %v9834_v7, %v16795_v33 }
 0x94b   :  { %v9836_v49 = vpop.f32.mrf.mxu0 }
 0x94c   :  { %v9877_v41 = vpop.f32.mrf.mxu1  ;;  %v9876_v36 = vadd.f32 %v9875_v22, %v9835_v48  ;;  %v9837_v31 = vadd.f32 %v9836_v49, %v16803_v55  ;;  %v9977_v55 = vrot.slane %v9964_v24, %v17920_v47 }
 0x94d   :  { %v9838_v39 = vpop.f32.mrf.mxu0 }
 0x94e   :  { %v9879_v19 = vpop.f32.mrf.mxu1  ;;  %v9986_v30 = vadd.f32 %v9969_v32, %v9876_v36  ;;  %v9878_v42 = vadd.f32 %v9877_v41, %v9837_v31 }
 0x94f   :  { %v9839_v20 = vpop.f32.mrf.mxu0 }
 0x950   :  { %v9880_v45 = vpop.f32.mrf.mxu1  ;;  %v9987_v52 = vadd.f32 %v9973_v9, %v9878_v42  ;;  %v9990_v1 = vmax.f32 %v9986_v30, 0.0 }
 0x952   :  { %v9991_v60 = vmax.f32 %v9987_v52, 0.0  ;;  %v9994_v33 = vpack.c.bf16 %v9990_v1, %v9990_v1 }
 0x954   :  { %v9995_v50 = vpack.c.bf16 %v9991_v60, %v9991_v60 }
 0x956   :  { %10293 = vmatprep.mubr.bf16.mxu0 %v9995_v50 }
 0x957   :  { %10294 = vmatmul.mubr.bf16.vlgmr.msra.gmra.mxu0 %v9994_v33 }
 0x989   :  { %v9916_v40 = vpop.f32.mrf.mxu0 }
 0x98a   :  { %v9957_v28 = vpop.f32.mrf.mxu1  ;;  %v9917_v25 = vadd.f32 %v9916_v40, %v9154_v2 }
 0x98b   :  { %v9918_v37 = vpop.f32.mrf.mxu0 }
 0x98c   :  { %v9959_v12 = vpop.f32.mrf.mxu1  ;;  %v9958_v17 = vadd.f32 %v9957_v28, %v9917_v25  ;;  %v9919_v53 = vadd.f32 %v9918_v37, %v9156_v8 }
 0x98d   :  { %v9920_v4 = vpop.f32.mrf.mxu0 }
 0x98e   :  { %v9961_v35 = vpop.f32.mrf.mxu1  ;;  %v9988_v11 = vadd.f32 %v9977_v55, %v9958_v17  ;;  %v9960_v27 = vadd.f32 %v9959_v12, %v9919_v53 }
 0x98f   :  { %v9921_v10 = vpop.f32.mrf.mxu0 }
 0x990   :  { %v9962_v44 = vpop.f32.mrf.mxu1  ;;  %v9989_v15 = vadd.f32 %v9981_v54, %v9960_v27  ;;  %v9992_v63 = vmax.f32 %v9988_v11, 0.0 }
 0x992   :  { %v9993_v14 = vmax.f32 %v9989_v15, 0.0  ;;  %v9996_v62 = vpack.c.bf16 %v9992_v63, %v9992_v63 }
 0x994   :  { %v9997_v21 = vpack.c.bf16 %v9993_v14, %v9993_v14 }
 0x996   :  { %10333 = vmatprep.mubr.bf16.mxu1 %v9997_v21 }
 0x997   :  { %10334 = vmatmul.mubr.bf16.vlgmr.msra.gmra.mxu1 %v9996_v62 }
 0xa17   :  { %v11565_v56 = vpop.f32.mrf.mxu0 }
 0xa19   :  { %v11566_v5 = vpop.f32.mrf.mxu0 }
 0xa1a   :  { %v11567_v26 = vadd.f32 %v11566_v5, %v11565_v56 }
 0xa1b   :  { %v11568_v29 = vpop.f32.mrf.mxu0 }
 0xa1c   :  { %v10296_v23 = vadd.f32 %v11567_v26, %v11350_v0 }
 0xa1d   :  { %v11569_v57 = vpop.f32.mrf.mxu0 }
 0xa57   :  { %v11587_v16 = vpop.f32.mrf.mxu1 }
 0xa59   :  { %v11588_v2 = vpop.f32.mrf.mxu1 }
 0xa5a   :  { %v11589_v38 = vadd.f32 %v11588_v2, %v11587_v16 }
 0xa5b   :  { %v11590_v34 = vpop.f32.mrf.mxu1 }
 0xa5c   :  { %v10336_v8 = vadd.f32 %v11589_v38, %v10296_v23 }
 0xa5d   :  { %v11591_v59 = vpop.f32.mrf.mxu1 }
 0xa5e   :  { %10342 = vst.msk [vmem:[#allocation17] sm:$0x3] %vm10341_vm8, %v10336_v8 }
 0xa5f   :  { %13409 = shalt.err (!%p13406_p12)
}
 0xa60   :  { %10352 = dma.vmem_to_hbm [thread:$0]  %s10350_s16, 32, %s16906_s11, [#allocation8]  }
 0xa61   :  { %13434 = dma.done.wait [#allocation8], 32  }
 0xa62   :  { %13435 = vsyncadd [#allocation8], 4294967264 }
 0xa63   :  { %10356 = vsyncpa [#allocation7], 1 }
 0xa64   :  { %10357 = vsyncpa [#allocation10], 1 }
 0xa65   :  { %10358 = vsyncpa [#allocation13], 1 }
 0xa66   :  { %10359 = vsyncpa [#allocation16], 1 }
 0xa67   :  { %10360 = vsyncpa [#allocation8], 1 }
 0xa68   :  { %10361 = vsyncmov [#allocation5] }
 0xa6b   :  { %s10362_s19 = vpop.sfrf %10361 }
 0xa6c   :  { %p11383_p13 = scmp.ne.s32.totalorder %s10362_s19, 0 }
 0xa6e   :  { %10366 = shalt.err (%p11383_p13)  }
 0xa6f   :  { %10368 = vsyncmov [#allocation5 + $0x1] }
 0xa72   :  { %s10369_s20 = vpop.sfrf %10368 }
 0xa73   :  { %p11384_p0 = scmp.ne.s32.totalorder %s10369_s20, 0 }
 0xa75   :  { %10373 = shalt.err (%p11384_p0)  }
 0xa76   :  { %10375 = vsyncmov [#allocation5 + $0x2] }
 0xa79   :  { %s10376_s21 = vpop.sfrf %10375 }
 0xa7a   :  { %p11385_p1 = scmp.ne.s32.totalorder %s10376_s21, 0 }
 0xa7c   :  { %10380 = shalt.err (%p11385_p1)  }
 0xa7d   :  { %10382 = vsyncmov [#allocation5 + $0x3] }
 0xa80   :  { %s10383_s11 = vpop.sfrf %10382 }
 0xa81   :  { %p11386_p2 = scmp.ne.s32.totalorder %s10383_s11, 0 }
 0xa83   :  { %10387 = shalt.err (%p11386_p2)  }

</bundles_post_ra>
